<compile_context>
chip_gen: v5e
topology: v5e:2x2
jax: 0.10.0
libtpu: 0.0.40
codegen_flags: <defaults>
</compile_context>

<pallas_src>
import functools

import jax
import jax.numpy as jnp
from jax.experimental import pallas as pl
from jax.experimental.pallas import tpu as pltpu


# --------------------------- in-kernel helpers ------------------------------

def _add_ln(x, resid, gamma, beta, eps=1e-5):
    """LayerNorm(x + resid) over last axis. x/resid: [M, D]; gamma/beta: [1, D]."""
    y = x + resid
    mean = jnp.mean(y, axis=-1, keepdims=True)
    var = jnp.mean(jnp.square(y - mean), axis=-1, keepdims=True)
    return (y - mean) * jax.lax.rsqrt(var + eps) * gamma + beta


def _attn_core(q, k, v, n_heads, scale):
    """Multi-head softmax attention (no mask). q:[Bk,Lq,D], k/v:[Bk,Lk,D] -> [Bk,Lq,D]."""
    _, _, D = q.shape
    Dh = D // n_heads
    outs = []
    for h in range(n_heads):               # static unroll, heads stay lane-packed in D
        sl = slice(h * Dh, (h + 1) * Dh)
        qh = q[:, :, sl] * scale
        kh = k[:, :, sl]
        vh = v[:, :, sl]
        s = jnp.einsum("bqd,bkd->bqk", qh, kh, preferred_element_type=jnp.float32)
        m = jnp.max(s, axis=-1, keepdims=True)
        p = jnp.exp(s - m)
        inv = pl.reciprocal(jnp.sum(p, axis=-1, keepdims=True), approx=True)
        outs.append(jnp.einsum("bqk,bkd->bqd", p * inv, vh,
                               preferred_element_type=jnp.float32))
    return jnp.concatenate(outs, axis=-1)


# ----------------------------- fused kernels --------------------------------

def _backbone_kernel(patch_ref, w_bb_ref, b_bb_ref, w_1x1_ref, b_1x1_ref, pe_ref,
                     o_ref):
    """patch-conv (ReLU) -> 1x1 conv -> + positional encoding, fully in VMEM."""
    Bk, T, PD = patch_ref.shape
    D = w_1x1_ref.shape[1]
    p = patch_ref[...].reshape(Bk * T, PD)
    feats = jnp.dot(p, w_bb_ref[...], preferred_element_type=jnp.float32) + b_bb_ref[...]
    feats = jnp.maximum(feats, 0.0)
    tok = jnp.dot(feats, w_1x1_ref[...], preferred_element_type=jnp.float32) + b_1x1_ref[...]
    o_ref[...] = (tok.reshape(Bk, T, D) + pe_ref[...]).astype(o_ref.dtype)


def _encoder_layer_kernel(x_ref,
                          w_qkv_ref, b_qkv_ref, w_o_ref, b_o_ref,
                          ln1_g_ref, ln1_b_ref,
                          w1_ref, b1_ref, w2_ref, b2_ref,
                          ln2_g_ref, ln2_b_ref,
                          o_ref, *, n_heads):
    """One nn.TransformerEncoderLayer (post-norm, ReLU, dropout=identity)."""
    Bk, L, D = x_ref.shape
    scale = 1.0 / float(D // n_heads) ** 0.5

    x = x_ref[...].reshape(Bk * L, D)

    # fused QKV projection
    qkv = jnp.dot(x, w_qkv_ref[...], preferred_element_type=jnp.float32) + b_qkv_ref[...]
    q = qkv[:, :D].reshape(Bk, L, D)
    k = qkv[:, D:2 * D].reshape(Bk, L, D)
    v = qkv[:, 2 * D:].reshape(Bk, L, D)

    sa = _attn_core(q, k, v, n_heads, scale).reshape(Bk * L, D)
    sa = jnp.dot(sa, w_o_ref[...], preferred_element_type=jnp.float32) + b_o_ref[...]
    x = _add_ln(sa, x, ln1_g_ref[...], ln1_b_ref[...])

    h = jnp.dot(x, w1_ref[...], preferred_element_type=jnp.float32) + b1_ref[...]
    h = jnp.maximum(h, 0.0)
    y = jnp.dot(h, w2_ref[...], preferred_element_type=jnp.float32) + b2_ref[...]
    x = _add_ln(y, x, ln2_g_ref[...], ln2_b_ref[...])

    o_ref[...] = x.reshape(Bk, L, D).astype(o_ref.dtype)


def _decoder_layer_kernel(x_ref, mem_ref,
                          sa_w_qkv_ref, sa_b_qkv_ref, sa_w_o_ref, sa_b_o_ref,
                          ln1_g_ref, ln1_b_ref,
                          ca_w_q_ref, ca_b_q_ref, ca_w_kv_ref, ca_b_kv_ref,
                          ca_w_o_ref, ca_b_o_ref,
                          ln2_g_ref, ln2_b_ref,
                          w1_ref, b1_ref, w2_ref, b2_ref,
                          ln3_g_ref, ln3_b_ref,
                          o_ref, *, n_heads):
    """One nn.TransformerDecoderLayer (batch_first, post-norm, dropout=identity)."""
    Bk, Lq, D = x_ref.shape
    Lk = mem_ref.shape[1]
    scale = 1.0 / float(D // n_heads) ** 0.5

    x = x_ref[...].reshape(Bk * Lq, D)
    mem = mem_ref[...].reshape(Bk * Lk, D)

    # --- self-attention ---
    qkv = jnp.dot(x, sa_w_qkv_ref[...], preferred_element_type=jnp.float32) + sa_b_qkv_ref[...]
    q = qkv[:, :D].reshape(Bk, Lq, D)
    k = qkv[:, D:2 * D].reshape(Bk, Lq, D)
    v = qkv[:, 2 * D:].reshape(Bk, Lq, D)
    sa = _attn_core(q, k, v, n_heads, scale).reshape(Bk * Lq, D)
    sa = jnp.dot(sa, sa_w_o_ref[...], preferred_element_type=jnp.float32) + sa_b_o_ref[...]
    x = _add_ln(sa, x, ln1_g_ref[...], ln1_b_ref[...])

    # --- cross-attention ---
    q = (jnp.dot(x, ca_w_q_ref[...], preferred_element_type=jnp.float32)
         + ca_b_q_ref[...]).reshape(Bk, Lq, D)
    kv = jnp.dot(mem, ca_w_kv_ref[...], preferred_element_type=jnp.float32) + ca_b_kv_ref[...]
    k = kv[:, :D].reshape(Bk, Lk, D)
    v = kv[:, D:].reshape(Bk, Lk, D)
    ca = _attn_core(q, k, v, n_heads, scale).reshape(Bk * Lq, D)
    ca = jnp.dot(ca, ca_w_o_ref[...], preferred_element_type=jnp.float32) + ca_b_o_ref[...]
    x = _add_ln(ca, x, ln2_g_ref[...], ln2_b_ref[...])

    # --- feed-forward ---
    h = jnp.dot(x, w1_ref[...], preferred_element_type=jnp.float32) + b1_ref[...]
    h = jnp.maximum(h, 0.0)
    y = jnp.dot(h, w2_ref[...], preferred_element_type=jnp.float32) + b2_ref[...]
    x = _add_ln(y, x, ln3_g_ref[...], ln3_b_ref[...])

    o_ref[...] = x.reshape(Bk, Lq, D).astype(o_ref.dtype)


def _heads_kernel(q_ref, w_ref, b_ref, o_ref):
    """Fused class+bbox heads for all decoder layers in one matmul."""
    o_ref[...] = (jnp.dot(q_ref[...], w_ref[...], preferred_element_type=jnp.float32)
                  + b_ref[...]).astype(o_ref.dtype)


# ------------------------------ wrappers -------------------------------------

def _full_spec(shape):
    nd = len(shape)
    return pl.BlockSpec(shape, lambda i: (0,) * nd)


def backbone_tokens(patches, params):
    """patches: [B, T, C*P*P] -> tokens + PE: [B, T, d]."""
    B, T, PD = patches.shape
    D = params["w_1x1"].shape[1]
    return pl.pallas_call(
        _backbone_kernel,
        grid=(B,),
        in_specs=[pl.BlockSpec((1, T, PD), lambda i: (i, 0, 0)),
                  _full_spec(params["w_bb"].shape),
                  _full_spec(params["b_bb"].shape),
                  _full_spec(params["w_1x1"].shape),
                  _full_spec(params["b_1x1"].shape),
                  pl.BlockSpec((1, T, D), lambda i: (0, 0, 0))],
        out_specs=pl.BlockSpec((1, T, D), lambda i: (i, 0, 0)),
        out_shape=jax.ShapeDtypeStruct((B, T, D), jnp.float32),
        compiler_params=pltpu.CompilerParams(dimension_semantics=("parallel",)),
    )(patches, params["w_bb"], params["b_bb"], params["w_1x1"], params["b_1x1"],
      params["pe"])


def encoder_layer(x, p, n_heads):
    """x: [Bk, L, D] (batch-first for the kernel). One fused pallas_call."""
    Bk, L, D = x.shape
    nb = 2 if (Bk % 2 == 0 and Bk >= 2) else 1     # parallel batch split (megacore)
    block_b = Bk // nb
    weights = [p["w_qkv"], p["b_qkv"], p["w_o"], p["b_o"],
               p["ln1_g"], p["ln1_b"],
               p["w1"], p["b1"], p["w2"], p["b2"],
               p["ln2_g"], p["ln2_b"]]
    in_specs = [pl.BlockSpec((block_b, L, D), lambda i: (i, 0, 0))]
    in_specs += [_full_spec(w.shape) for w in weights]
    return pl.pallas_call(
        functools.partial(_encoder_layer_kernel, n_heads=n_heads),
        grid=(nb,),
        in_specs=in_specs,
        out_specs=pl.BlockSpec((block_b, L, D), lambda i: (i, 0, 0)),
        out_shape=jax.ShapeDtypeStruct((Bk, L, D), jnp.float32),
        compiler_params=pltpu.CompilerParams(dimension_semantics=("parallel",)),
    )(x, *weights)


def decoder_layer(x, mem, p, n_heads):
    """x: [B, Lq, D], mem: [B, Lk, D]. One fused pallas_call, parallel over batch."""
    B, Lq, D = x.shape
    Lk = mem.shape[1]
    weights = [p["sa_w_qkv"], p["sa_b_qkv"], p["sa_w_o"], p["sa_b_o"],
               p["ln1_g"], p["ln1_b"],
               p["ca_w_q"], p["ca_b_q"], p["ca_w_kv"], p["ca_b_kv"],
               p["ca_w_o"], p["ca_b_o"],
               p["ln2_g"], p["ln2_b"],
               p["w1"], p["b1"], p["w2"], p["b2"],
               p["ln3_g"], p["ln3_b"]]
    in_specs = [pl.BlockSpec((1, Lq, D), lambda i: (i, 0, 0)),
                pl.BlockSpec((1, Lk, D), lambda i: (i, 0, 0))]
    in_specs += [_full_spec(w.shape) for w in weights]
    return pl.pallas_call(
        functools.partial(_decoder_layer_kernel, n_heads=n_heads),
        grid=(B,),
        in_specs=in_specs,
        out_specs=pl.BlockSpec((1, Lq, D), lambda i: (i, 0, 0)),
        out_shape=jax.ShapeDtypeStruct((B, Lq, D), jnp.float32),
        compiler_params=pltpu.CompilerParams(dimension_semantics=("parallel",)),
    )(x, mem, *weights)


def fused_heads(q2d, w, b):
    """q2d: [M, d]; w: [d, n_classes+4]; b: [1, n_classes+4]."""
    M, D = q2d.shape
    N = w.shape[1]
    return pl.pallas_call(
        _heads_kernel,
        grid=(1,),
        in_specs=[_full_spec((M, D)), _full_spec((D, N)), _full_spec((1, N))],
        out_specs=pl.BlockSpec((M, N), lambda i: (0, 0)),
        out_shape=jax.ShapeDtypeStruct((M, N), jnp.float32),
    )(q2d, w, b)


# --------------------------------- params -----------------------------------

def _w(key, shape, scale=0.05):
    return scale * jax.random.normal(key, shape, jnp.float32)


def _init_enc_layer(key, d):
    k = jax.random.split(key, 8)
    return dict(
        w_qkv=_w(k[0], (d, 3 * d)), b_qkv=_w(k[1], (1, 3 * d)),
        w_o=_w(k[2], (d, d)), b_o=_w(k[3], (1, d)),
        ln1_g=jnp.ones((1, d), jnp.float32), ln1_b=jnp.zeros((1, d), jnp.float32),
        w1=_w(k[4], (d, 4 * d)), b1=_w(k[5], (1, 4 * d)),
        w2=_w(k[6], (4 * d, d)), b2=_w(k[7], (1, d)),
        ln2_g=jnp.ones((1, d), jnp.float32), ln2_b=jnp.zeros((1, d), jnp.float32),
    )


def _init_dec_layer(key, d):
    k = jax.random.split(key, 14)
    return dict(
        sa_w_qkv=_w(k[0], (d, 3 * d)), sa_b_qkv=_w(k[1], (1, 3 * d)),
        sa_w_o=_w(k[2], (d, d)), sa_b_o=_w(k[3], (1, d)),
        ln1_g=jnp.ones((1, d), jnp.float32), ln1_b=jnp.zeros((1, d), jnp.float32),
        ca_w_q=_w(k[4], (d, d)), ca_b_q=_w(k[5], (1, d)),
        ca_w_kv=_w(k[6], (d, 2 * d)), ca_b_kv=_w(k[7], (1, 2 * d)),
        ca_w_o=_w(k[8], (d, d)), ca_b_o=_w(k[9], (1, d)),
        ln2_g=jnp.ones((1, d), jnp.float32), ln2_b=jnp.zeros((1, d), jnp.float32),
        w1=_w(k[10], (d, 4 * d)), b1=_w(k[11], (1, 4 * d)),
        w2=_w(k[12], (4 * d, d)), b2=_w(k[13], (1, d)),
        ln3_g=jnp.ones((1, d), jnp.float32), ln3_b=jnp.zeros((1, d), jnp.float32),
    )


def init_params(key, cfg):
    d = cfg["d_model"]
    patch_dim = cfg["c_in"] * cfg["patch"] * cfg["patch"]
    keys = jax.random.split(key, 10 + 2 * cfg["n_layers"])
    return dict(
        # TODO(synk): pretrained ResNet50 backbone cannot be reproduced without
        # its checkpoint; replaced by one synthetic strided patch-conv (+ReLU).
        w_bb=_w(keys[0], (patch_dim, cfg["c_backbone"])),
        b_bb=_w(keys[1], (1, cfg["c_backbone"])),
        w_1x1=_w(keys[2], (cfg["c_backbone"], d)),
        b_1x1=_w(keys[3], (1, d)),
        pe=jax.random.uniform(keys[4], (1, cfg["n_tokens"], d), jnp.float32),       # torch.rand
        queries=jax.random.uniform(keys[5], (1, cfg["n_queries"], d), jnp.float32),  # torch.rand
        # class and bbox heads fused into one [d, n_classes+4] matmul
        w_heads=_w(keys[6], (d, cfg["n_classes"] + 4)),
        b_heads=_w(keys[7], (1, cfg["n_classes"] + 4)),
        enc_layers=[_init_enc_layer(keys[10 + i], d) for i in range(cfg["n_layers"])],
        dec_layers=[_init_dec_layer(keys[10 + cfg["n_layers"] + i], d)
                    for i in range(cfg["n_layers"])],
    )


# --------------------------------- forward ----------------------------------

def detr_forward(x_nchw, params, cfg):
    B, C, H, W = x_nchw.shape
    P = cfg["patch"]
    Hp, Wp = H // P, W // P
    T = Hp * Wp
    d = cfg["d_model"]

    # layout plumbing only (XLA glue): NCHW -> [B, tokens, patch_pixels]
    patches = (x_nchw.reshape(B, C, Hp, P, Wp, P)
               .transpose(0, 2, 4, 1, 3, 5)
               .reshape(B, T, C * P * P))

    # backbone patch-conv + 1x1 conv + positional encoding (one fused kernel)
    tokens = backbone_tokens(patches, params)                      # [B, T, d]

    # Encoder quirk: module omits batch_first, so PyTorch attends over the
    # batch axis.  Transpose so kernel-batch = tokens, sequence = B.
    enc = jnp.transpose(tokens, (1, 0, 2))                         # [T, B, d]
    for lp in params["enc_layers"]:
        enc = encoder_layer(enc, lp, cfg["n_heads"])
    memory = jnp.transpose(enc, (1, 0, 2))                         # [B, T, d]

    queries = jnp.broadcast_to(params["queries"], (B, cfg["n_queries"], d))
    per_layer_queries = []
    for lp in params["dec_layers"]:
        queries = decoder_layer(queries, memory, lp, cfg["n_heads"])
        per_layer_queries.append(queries)

    # fused class+bbox heads over ALL decoder layers in one call
    nl, Q, nc = cfg["n_layers"], cfg["n_queries"], cfg["n_classes"]
    qs = jnp.stack(per_layer_queries, axis=1)                      # [B, nl, Q, d]
    out = fused_heads(qs.reshape(B * nl * Q, d), params["w_heads"], params["b_heads"])
    out = out.reshape(B, nl, Q, nc + 4)
    class_preds = out[..., :nc]          # ≡ torch.stack(class_preds, dim=1)
    bbox_preds = out[..., nc:]           # ≡ torch.stack(bbox_preds, dim=1)
    return class_preds, bbox_preds


# ----------------------------------- main ------------------------------------

if __name__ == "__main__":
    CFG = dict(d_model=32, n_classes=12, n_tokens=16, n_layers=2, n_heads=4,
               n_queries=8, c_in=3, img=32, patch=8, c_backbone=64)

    key = jax.random.PRNGKey(0)
    k_param, k_x = jax.random.split(key)
    params = init_params(k_param, CFG)
    x = jax.random.normal(k_x, (2, CFG["c_in"], CFG["img"], CFG["img"]), jnp.float32)

    fwd = jax.jit(functools.partial(detr_forward, cfg=CFG))
    class_preds, bbox_preds = fwd(x, params)
    jax.block_until_ready((class_preds, bbox_preds))

    assert class_preds.shape == (2, CFG["n_layers"], CFG["n_queries"], CFG["n_classes"])
    assert bbox_preds.shape == (2, CFG["n_layers"], CFG["n_queries"], 4)
    assert jnp.all(jnp.isfinite(class_preds)) and jnp.all(jnp.isfinite(bbox_preds))
    print("KERNEL_OK")
</pallas_src>

<mosaic_0001>
module attributes {stable_mosaic.version = 11 : i64} {
  func.func @_backbone_kernel(%arg0: i32, %arg1: memref<1x16x192xf32, #tpu.memory_space<vmem>>, %arg2: memref<192x64xf32, #tpu.memory_space<vmem>>, %arg3: memref<1x64xf32, #tpu.memory_space<vmem>>, %arg4: memref<64x32xf32, #tpu.memory_space<vmem>>, %arg5: memref<1x32xf32, #tpu.memory_space<vmem>>, %arg6: memref<1x16x32xf32, #tpu.memory_space<vmem>>, %arg7: memref<1x16x32xf32, #tpu.memory_space<vmem>>) attributes {dimension_semantics = [#tpu.dimension_semantics<parallel>], iteration_bounds = array<i64: 2>, scalar_prefetch = 0 : i64, scratch_operands = 0 : i64, tpu.core_type = #tpu.core_type<tc>, window_params = [{transform_indices = @transform_0, window_bounds = array<i64: 1, 16, 192>}, {pipeline_mode = #tpu.pipeline_mode<synchronous>, transform_indices = @transform_1, window_bounds = array<i64: 192, 64>}, {pipeline_mode = #tpu.pipeline_mode<synchronous>, transform_indices = @transform_2, window_bounds = array<i64: 1, 64>}, {pipeline_mode = #tpu.pipeline_mode<synchronous>, transform_indices = @transform_3, window_bounds = array<i64: 64, 32>}, {pipeline_mode = #tpu.pipeline_mode<synchronous>, transform_indices = @transform_4, window_bounds = array<i64: 1, 32>}, {pipeline_mode = #tpu.pipeline_mode<synchronous>, transform_indices = @transform_5, window_bounds = array<i64: 1, 16, 32>}, {transform_indices = @transform_6, window_bounds = array<i64: 1, 16, 32>}]} {
    %c0 = arith.constant 0 : index
    %c0_0 = arith.constant 0 : index
    %c0_1 = arith.constant 0 : index
    %0 = vector.load %arg1[%c0, %c0_0, %c0_1] : memref<1x16x192xf32, #tpu.memory_space<vmem>>, vector<1x16x192xf32>
    %1 = vector.shape_cast %0 : vector<1x16x192xf32> to vector<16x192xf32>
    %c0_2 = arith.constant 0 : index
    %c0_3 = arith.constant 0 : index
    %2 = vector.load %arg2[%c0_2, %c0_3] : memref<192x64xf32, #tpu.memory_space<vmem>>, vector<192x64xf32>
    %cst = arith.constant dense<0.000000e+00> : vector<16x64xf32>
    %3 = tpu.matmul %1, %2, %cst {dimension_numbers = #tpu.dot_dimension_numbers<[1], [0], [0], [1], [0, 0, 1, 1], [], []>} : vector<16x192xf32>, vector<192x64xf32>, vector<16x64xf32> -> vector<16x64xf32>
    %c0_4 = arith.constant 0 : index
    %c0_5 = arith.constant 0 : index
    %4 = vector.load %arg3[%c0_4, %c0_5] : memref<1x64xf32, #tpu.memory_space<vmem>>, vector<1x64xf32>
    %5 = vector.broadcast %4 : vector<1x64xf32> to vector<16x64xf32>
    %6 = arith.addf %3, %5 : vector<16x64xf32>
    %cst_6 = arith.constant 0.000000e+00 : f32
    %7 = vector.broadcast %cst_6 : f32 to vector<16x64xf32>
    %8 = arith.maximumf %6, %7 : vector<16x64xf32>
    %c0_7 = arith.constant 0 : index
    %c0_8 = arith.constant 0 : index
    %9 = vector.load %arg4[%c0_7, %c0_8] : memref<64x32xf32, #tpu.memory_space<vmem>>, vector<64x32xf32>
    %cst_9 = arith.constant dense<0.000000e+00> : vector<16x32xf32>
    %10 = tpu.matmul %8, %9, %cst_9 {dimension_numbers = #tpu.dot_dimension_numbers<[1], [0], [0], [1], [0, 0, 1, 1], [], []>} : vector<16x64xf32>, vector<64x32xf32>, vector<16x32xf32> -> vector<16x32xf32>
    %c0_10 = arith.constant 0 : index
    %c0_11 = arith.constant 0 : index
    %11 = vector.load %arg5[%c0_10, %c0_11] : memref<1x32xf32, #tpu.memory_space<vmem>>, vector<1x32xf32>
    %12 = vector.broadcast %11 : vector<1x32xf32> to vector<16x32xf32>
    %13 = arith.addf %10, %12 : vector<16x32xf32>
    %14 = vector.shape_cast %13 : vector<16x32xf32> to vector<1x16x32xf32>
    %c0_12 = arith.constant 0 : index
    %c0_13 = arith.constant 0 : index
    %c0_14 = arith.constant 0 : index
    %15 = vector.load %arg6[%c0_12, %c0_13, %c0_14] : memref<1x16x32xf32, #tpu.memory_space<vmem>>, vector<1x16x32xf32>
    %16 = arith.addf %14, %15 : vector<1x16x32xf32>
    %c0_15 = arith.constant 0 : index
    %c0_16 = arith.constant 0 : index
    %c0_17 = arith.constant 0 : index
    %17 = vector.load %arg7[%c0_15, %c0_16, %c0_17] : memref<1x16x32xf32, #tpu.memory_space<vmem>>, vector<1x16x32xf32>
    tpu.vector_store %arg7[%c0_15, %c0_16, %c0_17], %16 {strides = array<i32>} : memref<1x16x32xf32, #tpu.memory_space<vmem>>, vector<1x16x32xf32>,
    return
  }
  func.func @transform_0(%arg0: i32) -> (i32, i32, i32) {
    %c0_i32 = arith.constant 0 : i32
    %c0_i32_0 = arith.constant 0 : i32
    %c0_i32_1 = arith.constant 0 : i32
    return %arg0, %c0_i32, %c0_i32_0 : i32, i32, i32
  }
  func.func @transform_1(%arg0: i32) -> (i32, i32) {
    %c0_i32 = arith.constant 0 : i32
    %c0_i32_0 = arith.constant 0 : i32
    %c0_i32_1 = arith.constant 0 : i32
    return %c0_i32, %c0_i32_0 : i32, i32
  }
  func.func @transform_2(%arg0: i32) -> (i32, i32) {
    %c0_i32 = arith.constant 0 : i32
    %c0_i32_0 = arith.constant 0 : i32
    %c0_i32_1 = arith.constant 0 : i32
    return %c0_i32, %c0_i32_0 : i32, i32
  }
  func.func @transform_3(%arg0: i32) -> (i32, i32) {
    %c0_i32 = arith.constant 0 : i32
    %c0_i32_0 = arith.constant 0 : i32
    %c0_i32_1 = arith.constant 0 : i32
    return %c0_i32, %c0_i32_0 : i32, i32
  }
  func.func @transform_4(%arg0: i32) -> (i32, i32) {
    %c0_i32 = arith.constant 0 : i32
    %c0_i32_0 = arith.constant 0 : i32
    %c0_i32_1 = arith.constant 0 : i32
    return %c0_i32, %c0_i32_0 : i32, i32
  }
  func.func @transform_5(%arg0: i32) -> (i32, i32, i32) {
    %c0_i32 = arith.constant 0 : i32
    %c0_i32_0 = arith.constant 0 : i32
    %c0_i32_1 = arith.constant 0 : i32
    %c0_i32_2 = arith.constant 0 : i32
    return %c0_i32, %c0_i32_0, %c0_i32_1 : i32, i32, i32
  }
  func.func @transform_6(%arg0: i32) -> (i32, i32, i32) {
    %c0_i32 = arith.constant 0 : i32
    %c0_i32_0 = arith.constant 0 : i32
    %c0_i32_1 = arith.constant 0 : i32
    return %arg0, %c0_i32, %c0_i32_0 : i32, i32, i32
  }
}

module attributes {stable_mosaic.version = 11 : i64} {
  func.func @_encoder_layer_kernel(%arg0: i32, %arg1: memref<8x2x32xf32, #tpu.memory_space<vmem>>, %arg2: memref<32x96xf32, #tpu.memory_space<vmem>>, %arg3: memref<1x96xf32, #tpu.memory_space<vmem>>, %arg4: memref<32x32xf32, #tpu.memory_space<vmem>>, %arg5: memref<1x32xf32, #tpu.memory_space<vmem>>, %arg6: memref<1x32xf32, #tpu.memory_space<vmem>>, %arg7: memref<1x32xf32, #tpu.memory_space<vmem>>, %arg8: memref<32x128xf32, #tpu.memory_space<vmem>>, %arg9: memref<1x128xf32, #tpu.memory_space<vmem>>, %arg10: memref<128x32xf32, #tpu.memory_space<vmem>>, %arg11: memref<1x32xf32, #tpu.memory_space<vmem>>, %arg12: memref<1x32xf32, #tpu.memory_space<vmem>>, %arg13: memref<1x32xf32, #tpu.memory_space<vmem>>, %arg14: memref<8x2x32xf32, #tpu.memory_space<vmem>>) attributes {dimension_semantics = [#tpu.dimension_semantics<parallel>], iteration_bounds = array<i64: 2>, scalar_prefetch = 0 : i64, scratch_operands = 0 : i64, tpu.core_type = #tpu.core_type<tc>, window_params = [{transform_indices = @transform_0, window_bounds = array<i64: 8, 2, 32>}, {pipeline_mode = #tpu.pipeline_mode<synchronous>, transform_indices = @transform_1, window_bounds = array<i64: 32, 96>}, {pipeline_mode = #tpu.pipeline_mode<synchronous>, transform_indices = @transform_2, window_bounds = array<i64: 1, 96>}, {pipeline_mode = #tpu.pipeline_mode<synchronous>, transform_indices = @transform_3, window_bounds = array<i64: 32, 32>}, {pipeline_mode = #tpu.pipeline_mode<synchronous>, transform_indices = @transform_4, window_bounds = array<i64: 1, 32>}, {pipeline_mode = #tpu.pipeline_mode<synchronous>, transform_indices = @transform_5, window_bounds = array<i64: 1, 32>}, {pipeline_mode = #tpu.pipeline_mode<synchronous>, transform_indices = @transform_6, window_bounds = array<i64: 1, 32>}, {pipeline_mode = #tpu.pipeline_mode<synchronous>, transform_indices = @transform_7, window_bounds = array<i64: 32, 128>}, {pipeline_mode = #tpu.pipeline_mode<synchronous>, transform_indices = @transform_8, window_bounds = array<i64: 1, 128>}, {pipeline_mode = #tpu.pipeline_mode<synchronous>, transform_indices = @transform_9, window_bounds = array<i64: 128, 32>}, {pipeline_mode = #tpu.pipeline_mode<synchronous>, transform_indices = @transform_10, window_bounds = array<i64: 1, 32>}, {pipeline_mode = #tpu.pipeline_mode<synchronous>, transform_indices = @transform_11, window_bounds = array<i64: 1, 32>}, {pipeline_mode = #tpu.pipeline_mode<synchronous>, transform_indices = @transform_12, window_bounds = array<i64: 1, 32>}, {transform_indices = @transform_13, window_bounds = array<i64: 8, 2, 32>}]} {
    %c0 = arith.constant 0 : index
    %c0_0 = arith.constant 0 : index
    %c0_1 = arith.constant 0 : index
    %0 = vector.load %arg1[%c0, %c0_0, %c0_1] : memref<8x2x32xf32, #tpu.memory_space<vmem>>, vector<8x2x32xf32>
    %1 = vector.shape_cast %0 : vector<8x2x32xf32> to vector<16x32xf32>
    %c0_2 = arith.constant 0 : index
    %c0_3 = arith.constant 0 : index
    %2 = vector.load %arg2[%c0_2, %c0_3] : memref<32x96xf32, #tpu.memory_space<vmem>>, vector<32x96xf32>
    %cst = arith.constant dense<0.000000e+00> : vector<16x96xf32>
    %3 = tpu.matmul %1, %2, %cst {dimension_numbers = #tpu.dot_dimension_numbers<[1], [0], [0], [1], [0, 0, 1, 1], [], []>} : vector<16x32xf32>, vector<32x96xf32>, vector<16x96xf32> -> vector<16x96xf32>
    %c0_4 = arith.constant 0 : index
    %c0_5 = arith.constant 0 : index
    %4 = vector.load %arg3[%c0_4, %c0_5] : memref<1x96xf32, #tpu.memory_space<vmem>>, vector<1x96xf32>
    %5 = vector.broadcast %4 : vector<1x96xf32> to vector<16x96xf32>
    %6 = arith.addf %3, %5 : vector<16x96xf32>
    %7 = vector.extract_strided_slice %6 {offsets = [0, 0], sizes = [16, 32], strides = [1, 1]} : vector<16x96xf32> to vector<16x32xf32>
    %8 = vector.shape_cast %7 : vector<16x32xf32> to vector<8x2x32xf32>
    %9 = vector.extract_strided_slice %6 {offsets = [0, 32], sizes = [16, 32], strides = [1, 1]} : vector<16x96xf32> to vector<16x32xf32>
    %10 = vector.shape_cast %9 : vector<16x32xf32> to vector<8x2x32xf32>
    %11 = vector.extract_strided_slice %6 {offsets = [0, 64], sizes = [16, 32], strides = [1, 1]} : vector<16x96xf32> to vector<16x32xf32>
    %12 = vector.shape_cast %11 : vector<16x32xf32> to vector<8x2x32xf32>
    %13 = vector.extract_strided_slice %8 {offsets = [0, 0, 0], sizes = [8, 2, 8], strides = [1, 1, 1]} : vector<8x2x32xf32> to vector<8x2x8xf32>
    %cst_6 = arith.constant 0.353553385 : f32
    %14 = vector.broadcast %cst_6 : f32 to vector<8x2x8xf32>
    %15 = arith.mulf %13, %14 : vector<8x2x8xf32>
    %16 = vector.extract_strided_slice %10 {offsets = [0, 0, 0], sizes = [8, 2, 8], strides = [1, 1, 1]} : vector<8x2x32xf32> to vector<8x2x8xf32>
    %17 = vector.extract_strided_slice %12 {offsets = [0, 0, 0], sizes = [8, 2, 8], strides = [1, 1, 1]} : vector<8x2x32xf32> to vector<8x2x8xf32>
    "tpu.trace_start"() <{level = 10 : i32, message = "bqd,bkd->bqk"}> : () -> ()
    %cst_7 = arith.constant dense<0.000000e+00> : vector<8x2x2xf32>
    %18 = tpu.matmul %15, %16, %cst_7 {dimension_numbers = #tpu.dot_dimension_numbers<[2], [2], [1], [1], [0, 0, 0, 1, 1, 1], [0], [0]>} : vector<8x2x8xf32>, vector<8x2x8xf32>, vector<8x2x2xf32> -> vector<8x2x2xf32>
    "tpu.trace_stop"() : () -> ()
    %cst_8 = arith.constant dense<0xFF800000> : vector<8x2xf32>
    %19 = vector.multi_reduction <maximumf>, %18, %cst_8 [2] : vector<8x2x2xf32> to vector<8x2xf32>
    %20 = vector.shape_cast %19 : vector<8x2xf32> to vector<8x2x1xf32>
    %21 = vector.broadcast %20 : vector<8x2x1xf32> to vector<8x2x2xf32>
    %22 = arith.subf %18, %21 : vector<8x2x2xf32>
    %23 = math.exp %22 : vector<8x2x2xf32>
    %cst_9 = arith.constant dense<0.000000e+00> : vector<8x2xf32>
    %24 = vector.multi_reduction <add>, %23, %cst_9 [2] : vector<8x2x2xf32> to vector<8x2xf32>
    %25 = vector.shape_cast %24 : vector<8x2xf32> to vector<8x2x1xf32>
    %26 = tpu.reciprocal %25 {approx = true} : vector<8x2x1xf32> -> vector<8x2x1xf32>
    %27 = vector.broadcast %26 : vector<8x2x1xf32> to vector<8x2x2xf32>
    %28 = arith.mulf %23, %27 : vector<8x2x2xf32>
    "tpu.trace_start"() <{level = 10 : i32, message = "bqk,bkd->bqd"}> : () -> ()
    %cst_10 = arith.constant dense<0.000000e+00> : vector<8x2x8xf32>
    %29 = tpu.matmul %28, %17, %cst_10 {dimension_numbers = #tpu.dot_dimension_numbers<[2], [1], [1], [2], [0, 0, 0, 1, 1, 2], [0], [0]>} : vector<8x2x2xf32>, vector<8x2x8xf32>, vector<8x2x8xf32> -> vector<8x2x8xf32>
    "tpu.trace_stop"() : () -> ()
    %30 = vector.extract_strided_slice %8 {offsets = [0, 0, 8], sizes = [8, 2, 8], strides = [1, 1, 1]} : vector<8x2x32xf32> to vector<8x2x8xf32>
    %cst_11 = arith.constant 0.353553385 : f32
    %31 = vector.broadcast %cst_11 : f32 to vector<8x2x8xf32>
    %32 = arith.mulf %30, %31 : vector<8x2x8xf32>
    %33 = vector.extract_strided_slice %10 {offsets = [0, 0, 8], sizes = [8, 2, 8], strides = [1, 1, 1]} : vector<8x2x32xf32> to vector<8x2x8xf32>
    %34 = vector.extract_strided_slice %12 {offsets = [0, 0, 8], sizes = [8, 2, 8], strides = [1, 1, 1]} : vector<8x2x32xf32> to vector<8x2x8xf32>
    "tpu.trace_start"() <{level = 10 : i32, message = "bqd,bkd->bqk"}> : () -> ()
    %cst_12 = arith.constant dense<0.000000e+00> : vector<8x2x2xf32>
    %35 = tpu.matmul %32, %33, %cst_12 {dimension_numbers = #tpu.dot_dimension_numbers<[2], [2], [1], [1], [0, 0, 0, 1, 1, 1], [0], [0]>} : vector<8x2x8xf32>, vector<8x2x8xf32>, vector<8x2x2xf32> -> vector<8x2x2xf32>
    "tpu.trace_stop"() : () -> ()
    %cst_13 = arith.constant dense<0xFF800000> : vector<8x2xf32>
    %36 = vector.multi_reduction <maximumf>, %35, %cst_13 [2] : vector<8x2x2xf32> to vector<8x2xf32>
    %37 = vector.shape_cast %36 : vector<8x2xf32> to vector<8x2x1xf32>
    %38 = vector.broadcast %37 : vector<8x2x1xf32> to vector<8x2x2xf32>
    %39 = arith.subf %35, %38 : vector<8x2x2xf32>
    %40 = math.exp %39 : vector<8x2x2xf32>
    %cst_14 = arith.constant dense<0.000000e+00> : vector<8x2xf32>
    %41 = vector.multi_reduction <add>, %40, %cst_14 [2] : vector<8x2x2xf32> to vector<8x2xf32>
    %42 = vector.shape_cast %41 : vector<8x2xf32> to vector<8x2x1xf32>
    %43 = tpu.reciprocal %42 {approx = true} : vector<8x2x1xf32> -> vector<8x2x1xf32>
    %44 = vector.broadcast %43 : vector<8x2x1xf32> to vector<8x2x2xf32>
    %45 = arith.mulf %40, %44 : vector<8x2x2xf32>
    "tpu.trace_start"() <{level = 10 : i32, message = "bqk,bkd->bqd"}> : () -> ()
    %cst_15 = arith.constant dense<0.000000e+00> : vector<8x2x8xf32>
    %46 = tpu.matmul %45, %34, %cst_15 {dimension_numbers = #tpu.dot_dimension_numbers<[2], [1], [1], [2], [0, 0, 0, 1, 1, 2], [0], [0]>} : vector<8x2x2xf32>, vector<8x2x8xf32>, vector<8x2x8xf32> -> vector<8x2x8xf32>
    "tpu.trace_stop"() : () -> ()
    %47 = vector.extract_strided_slice %8 {offsets = [0, 0, 16], sizes = [8, 2, 8], strides = [1, 1, 1]} : vector<8x2x32xf32> to vector<8x2x8xf32>
    %cst_16 = arith.constant 0.353553385 : f32
    %48 = vector.broadcast %cst_16 : f32 to vector<8x2x8xf32>
    %49 = arith.mulf %47, %48 : vector<8x2x8xf32>
    %50 = vector.extract_strided_slice %10 {offsets = [0, 0, 16], sizes = [8, 2, 8], strides = [1, 1, 1]} : vector<8x2x32xf32> to vector<8x2x8xf32>
    %51 = vector.extract_strided_slice %12 {offsets = [0, 0, 16], sizes = [8, 2, 8], strides = [1, 1, 1]} : vector<8x2x32xf32> to vector<8x2x8xf32>
    "tpu.trace_start"() <{level = 10 : i32, message = "bqd,bkd->bqk"}> : () -> ()
    %cst_17 = arith.constant dense<0.000000e+00> : vector<8x2x2xf32>
    %52 = tpu.matmul %49, %50, %cst_17 {dimension_numbers = #tpu.dot_dimension_numbers<[2], [2], [1], [1], [0, 0, 0, 1, 1, 1], [0], [0]>} : vector<8x2x8xf32>, vector<8x2x8xf32>, vector<8x2x2xf32> -> vector<8x2x2xf32>
    "tpu.trace_stop"() : () -> ()
    %cst_18 = arith.constant dense<0xFF800000> : vector<8x2xf32>
    %53 = vector.multi_reduction <maximumf>, %52, %cst_18 [2] : vector<8x2x2xf32> to vector<8x2xf32>
    %54 = vector.shape_cast %53 : vector<8x2xf32> to vector<8x2x1xf32>
    %55 = vector.broadcast %54 : vector<8x2x1xf32> to vector<8x2x2xf32>
    %56 = arith.subf %52, %55 : vector<8x2x2xf32>
    %57 = math.exp %56 : vector<8x2x2xf32>
    %cst_19 = arith.constant dense<0.000000e+00> : vector<8x2xf32>
    %58 = vector.multi_reduction <add>, %57, %cst_19 [2] : vector<8x2x2xf32> to vector<8x2xf32>
    %59 = vector.shape_cast %58 : vector<8x2xf32> to vector<8x2x1xf32>
    %60 = tpu.reciprocal %59 {approx = true} : vector<8x2x1xf32> -> vector<8x2x1xf32>
    %61 = vector.broadcast %60 : vector<8x2x1xf32> to vector<8x2x2xf32>
    %62 = arith.mulf %57, %61 : vector<8x2x2xf32>
    "tpu.trace_start"() <{level = 10 : i32, message = "bqk,bkd->bqd"}> : () -> ()
    %cst_20 = arith.constant dense<0.000000e+00> : vector<8x2x8xf32>
    %63 = tpu.matmul %62, %51, %cst_20 {dimension_numbers = #tpu.dot_dimension_numbers<[2], [1], [1], [2], [0, 0, 0, 1, 1, 2], [0], [0]>} : vector<8x2x2xf32>, vector<8x2x8xf32>, vector<8x2x8xf32> -> vector<8x2x8xf32>
    "tpu.trace_stop"() : () -> ()
    %64 = vector.extract_strided_slice %8 {offsets = [0, 0, 24], sizes = [8, 2, 8], strides = [1, 1, 1]} : vector<8x2x32xf32> to vector<8x2x8xf32>
    %cst_21 = arith.constant 0.353553385 : f32
    %65 = vector.broadcast %cst_21 : f32 to vector<8x2x8xf32>
    %66 = arith.mulf %64, %65 : vector<8x2x8xf32>
    %67 = vector.extract_strided_slice %10 {offsets = [0, 0, 24], sizes = [8, 2, 8], strides = [1, 1, 1]} : vector<8x2x32xf32> to vector<8x2x8xf32>
    %68 = vector.extract_strided_slice %12 {offsets = [0, 0, 24], sizes = [8, 2, 8], strides = [1, 1, 1]} : vector<8x2x32xf32> to vector<8x2x8xf32>
    "tpu.trace_start"() <{level = 10 : i32, message = "bqd,bkd->bqk"}> : () -> ()
    %cst_22 = arith.constant dense<0.000000e+00> : vector<8x2x2xf32>
    %69 = tpu.matmul %66, %67, %cst_22 {dimension_numbers = #tpu.dot_dimension_numbers<[2], [2], [1], [1], [0, 0, 0, 1, 1, 1], [0], [0]>} : vector<8x2x8xf32>, vector<8x2x8xf32>, vector<8x2x2xf32> -> vector<8x2x2xf32>
    "tpu.trace_stop"() : () -> ()
    %cst_23 = arith.constant dense<0xFF800000> : vector<8x2xf32>
    %70 = vector.multi_reduction <maximumf>, %69, %cst_23 [2] : vector<8x2x2xf32> to vector<8x2xf32>
    %71 = vector.shape_cast %70 : vector<8x2xf32> to vector<8x2x1xf32>
    %72 = vector.broadcast %71 : vector<8x2x1xf32> to vector<8x2x2xf32>
    %73 = arith.subf %69, %72 : vector<8x2x2xf32>
    %74 = math.exp %73 : vector<8x2x2xf32>
    %cst_24 = arith.constant dense<0.000000e+00> : vector<8x2xf32>
    %75 = vector.multi_reduction <add>, %74, %cst_24 [2] : vector<8x2x2xf32> to vector<8x2xf32>
    %76 = vector.shape_cast %75 : vector<8x2xf32> to vector<8x2x1xf32>
    %77 = tpu.reciprocal %76 {approx = true} : vector<8x2x1xf32> -> vector<8x2x1xf32>
    %78 = vector.broadcast %77 : vector<8x2x1xf32> to vector<8x2x2xf32>
    %79 = arith.mulf %74, %78 : vector<8x2x2xf32>
    "tpu.trace_start"() <{level = 10 : i32, message = "bqk,bkd->bqd"}> : () -> ()
    %cst_25 = arith.constant dense<0.000000e+00> : vector<8x2x8xf32>
    %80 = tpu.matmul %79, %68, %cst_25 {dimension_numbers = #tpu.dot_dimension_numbers<[2], [1], [1], [2], [0, 0, 0, 1, 1, 2], [0], [0]>} : vector<8x2x2xf32>, vector<8x2x8xf32>, vector<8x2x8xf32> -> vector<8x2x8xf32>
    "tpu.trace_stop"() : () -> ()
    %81 = tpu.concatenate %29, %46, %63, %80 in 2 : vector<8x2x8xf32>, vector<8x2x8xf32>, vector<8x2x8xf32>, vector<8x2x8xf32> -> vector<8x2x32xf32>
    %82 = vector.shape_cast %81 : vector<8x2x32xf32> to vector<16x32xf32>
    %c0_26 = arith.constant 0 : index
    %c0_27 = arith.constant 0 : index
    %83 = vector.load %arg4[%c0_26, %c0_27] : memref<32x32xf32, #tpu.memory_space<vmem>>, vector<32x32xf32>
    %cst_28 = arith.constant dense<0.000000e+00> : vector<16x32xf32>
    %84 = tpu.matmul %82, %83, %cst_28 {dimension_numbers = #tpu.dot_dimension_numbers<[1], [0], [0], [1], [0, 0, 1, 1], [], []>} : vector<16x32xf32>, vector<32x32xf32>, vector<16x32xf32> -> vector<16x32xf32>
    %c0_29 = arith.constant 0 : index
    %c0_30 = arith.constant 0 : index
    %85 = vector.load %arg5[%c0_29, %c0_30] : memref<1x32xf32, #tpu.memory_space<vmem>>, vector<1x32xf32>
    %86 = vector.broadcast %85 : vector<1x32xf32> to vector<16x32xf32>
    %87 = arith.addf %84, %86 : vector<16x32xf32>
    %c0_31 = arith.constant 0 : index
    %c0_32 = arith.constant 0 : index
    %88 = vector.load %arg6[%c0_31, %c0_32] : memref<1x32xf32, #tpu.memory_space<vmem>>, vector<1x32xf32>
    %c0_33 = arith.constant 0 : index
    %c0_34 = arith.constant 0 : index
    %89 = vector.load %arg7[%c0_33, %c0_34] : memref<1x32xf32, #tpu.memory_space<vmem>>, vector<1x32xf32>
    %90 = arith.addf %87, %1 : vector<16x32xf32>
    %cst_35 = arith.constant dense<0.000000e+00> : vector<16xf32>
    %91 = vector.multi_reduction <add>, %90, %cst_35 [1] : vector<16x32xf32> to vector<16xf32>
    %92 = vector.shape_cast %91 : vector<16xf32> to vector<16x1xf32>
    %cst_36 = arith.constant 3.200000e+01 : f32
    %93 = vector.broadcast %cst_36 : f32 to vector<16x1xf32>
    %94 = arith.divf %92, %93 : vector<16x1xf32>
    %95 = vector.broadcast %94 : vector<16x1xf32> to vector<16x32xf32>
    %96 = arith.subf %90, %95 : vector<16x32xf32>
    %97 = arith.mulf %96, %96 : vector<16x32xf32>
    %cst_37 = arith.constant dense<0.000000e+00> : vector<16xf32>
    %98 = vector.multi_reduction <add>, %97, %cst_37 [1] : vector<16x32xf32> to vector<16xf32>
    %99 = vector.shape_cast %98 : vector<16xf32> to vector<16x1xf32>
    %cst_38 = arith.constant 3.200000e+01 : f32
    %100 = vector.broadcast %cst_38 : f32 to vector<16x1xf32>
    %101 = arith.divf %99, %100 : vector<16x1xf32>
    %102 = vector.broadcast %94 : vector<16x1xf32> to vector<16x32xf32>
    %103 = arith.subf %90, %102 : vector<16x32xf32>
    %cst_39 = arith.constant 9.99999974E-6 : f32
    %104 = vector.broadcast %cst_39 : f32 to vector<16x1xf32>
    %105 = arith.addf %101, %104 : vector<16x1xf32>
    %106 = math.rsqrt %105 : vector<16x1xf32>
    %107 = vector.broadcast %106 : vector<16x1xf32> to vector<16x32xf32>
    %108 = arith.mulf %103, %107 : vector<16x32xf32>
    %109 = vector.broadcast %88 : vector<1x32xf32> to vector<16x32xf32>
    %110 = arith.mulf %108, %109 : vector<16x32xf32>
    %111 = vector.broadcast %89 : vector<1x32xf32> to vector<16x32xf32>
    %112 = arith.addf %110, %111 : vector<16x32xf32>
    %c0_40 = arith.constant 0 : index
    %c0_41 = arith.constant 0 : index
    %113 = vector.load %arg8[%c0_40, %c0_41] : memref<32x128xf32, #tpu.memory_space<vmem>>, vector<32x128xf32>
    %cst_42 = arith.constant dense<0.000000e+00> : vector<16x128xf32>
    %114 = tpu.matmul %112, %113, %cst_42 {dimension_numbers = #tpu.dot_dimension_numbers<[1], [0], [0], [1], [0, 0, 1, 1], [], []>} : vector<16x32xf32>, vector<32x128xf32>, vector<16x128xf32> -> vector<16x128xf32>
    %c0_43 = arith.constant 0 : index
    %c0_44 = arith.constant 0 : index
    %115 = vector.load %arg9[%c0_43, %c0_44] : memref<1x128xf32, #tpu.memory_space<vmem>>, vector<1x128xf32>
    %116 = vector.broadcast %115 : vector<1x128xf32> to vector<16x128xf32>
    %117 = arith.addf %114, %116 : vector<16x128xf32>
    %cst_45 = arith.constant 0.000000e+00 : f32
    %118 = vector.broadcast %cst_45 : f32 to vector<16x128xf32>
    %119 = arith.maximumf %117, %118 : vector<16x128xf32>
    %c0_46 = arith.constant 0 : index
    %c0_47 = arith.constant 0 : index
    %120 = vector.load %arg10[%c0_46, %c0_47] : memref<128x32xf32, #tpu.memory_space<vmem>>, vector<128x32xf32>
    %cst_48 = arith.constant dense<0.000000e+00> : vector<16x32xf32>
    %121 = tpu.matmul %119, %120, %cst_48 {dimension_numbers = #tpu.dot_dimension_numbers<[1], [0], [0], [1], [0, 0, 1, 1], [], []>} : vector<16x128xf32>, vector<128x32xf32>, vector<16x32xf32> -> vector<16x32xf32>
    %c0_49 = arith.constant 0 : index
    %c0_50 = arith.constant 0 : index
    %122 = vector.load %arg11[%c0_49, %c0_50] : memref<1x32xf32, #tpu.memory_space<vmem>>, vector<1x32xf32>
    %123 = vector.broadcast %122 : vector<1x32xf32> to vector<16x32xf32>
    %124 = arith.addf %121, %123 : vector<16x32xf32>
    %c0_51 = arith.constant 0 : index
    %c0_52 = arith.constant 0 : index
    %125 = vector.load %arg12[%c0_51, %c0_52] : memref<1x32xf32, #tpu.memory_space<vmem>>, vector<1x32xf32>
    %c0_53 = arith.constant 0 : index
    %c0_54 = arith.constant 0 : index
    %126 = vector.load %arg13[%c0_53, %c0_54] : memref<1x32xf32, #tpu.memory_space<vmem>>, vector<1x32xf32>
    %127 = arith.addf %124, %112 : vector<16x32xf32>
    %cst_55 = arith.constant dense<0.000000e+00> : vector<16xf32>
    %128 = vector.multi_reduction <add>, %127, %cst_55 [1] : vector<16x32xf32> to vector<16xf32>
    %129 = vector.shape_cast %128 : vector<16xf32> to vector<16x1xf32>
    %cst_56 = arith.constant 3.200000e+01 : f32
    %130 = vector.broadcast %cst_56 : f32 to vector<16x1xf32>
    %131 = arith.divf %129, %130 : vector<16x1xf32>
    %132 = vector.broadcast %131 : vector<16x1xf32> to vector<16x32xf32>
    %133 = arith.subf %127, %132 : vector<16x32xf32>
    %134 = arith.mulf %133, %133 : vector<16x32xf32>
    %cst_57 = arith.constant dense<0.000000e+00> : vector<16xf32>
    %135 = vector.multi_reduction <add>, %134, %cst_57 [1] : vector<16x32xf32> to vector<16xf32>
    %136 = vector.shape_cast %135 : vector<16xf32> to vector<16x1xf32>
    %cst_58 = arith.constant 3.200000e+01 : f32
    %137 = vector.broadcast %cst_58 : f32 to vector<16x1xf32>
    %138 = arith.divf %136, %137 : vector<16x1xf32>
    %139 = vector.broadcast %131 : vector<16x1xf32> to vector<16x32xf32>
    %140 = arith.subf %127, %139 : vector<16x32xf32>
    %cst_59 = arith.constant 9.99999974E-6 : f32
    %141 = vector.broadcast %cst_59 : f32 to vector<16x1xf32>
    %142 = arith.addf %138, %141 : vector<16x1xf32>
    %143 = math.rsqrt %142 : vector<16x1xf32>
    %144 = vector.broadcast %143 : vector<16x1xf32> to vector<16x32xf32>
    %145 = arith.mulf %140, %144 : vector<16x32xf32>
    %146 = vector.broadcast %125 : vector<1x32xf32> to vector<16x32xf32>
    %147 = arith.mulf %145, %146 : vector<16x32xf32>
    %148 = vector.broadcast %126 : vector<1x32xf32> to vector<16x32xf32>
    %149 = arith.addf %147, %148 : vector<16x32xf32>
    %150 = vector.shape_cast %149 : vector<16x32xf32> to vector<8x2x32xf32>
    %c0_60 = arith.constant 0 : index
    %c0_61 = arith.constant 0 : index
    %c0_62 = arith.constant 0 : index
    %151 = vector.load %arg14[%c0_60, %c0_61, %c0_62] : memref<8x2x32xf32, #tpu.memory_space<vmem>>, vector<8x2x32xf32>
    tpu.vector_store %arg14[%c0_60, %c0_61, %c0_62], %150 {strides = array<i32>} : memref<8x2x32xf32, #tpu.memory_space<vmem>>, vector<8x2x32xf32>,
    return
  }
  func.func @transform_0(%arg0: i32) -> (i32, i32, i32) {
    %c0_i32 = arith.constant 0 : i32
    %c0_i32_0 = arith.constant 0 : i32
    %c0_i32_1 = arith.constant 0 : i32
    return %arg0, %c0_i32, %c0_i32_0 : i32, i32, i32
  }
  func.func @transform_1(%arg0: i32) -> (i32, i32) {
    %c0_i32 = arith.constant 0 : i32
    %c0_i32_0 = arith.constant 0 : i32
    %c0_i32_1 = arith.constant 0 : i32
    return %c0_i32, %c0_i32_0 : i32, i32
  }
  func.func @transform_2(%arg0: i32) -> (i32, i32) {
    %c0_i32 = arith.constant 0 : i32
    %c0_i32_0 = arith.constant 0 : i32
    %c0_i32_1 = arith.constant 0 : i32
    return %c0_i32, %c0_i32_0 : i32, i32
  }
  func.func @transform_3(%arg0: i32) -> (i32, i32) {
    %c0_i32 = arith.constant 0 : i32
    %c0_i32_0 = arith.constant 0 : i32
    %c0_i32_1 = arith.constant 0 : i32
    return %c0_i32, %c0_i32_0 : i32, i32
  }
  func.func @transform_4(%arg0: i32) -> (i32, i32) {
    %c0_i32 = arith.constant 0 : i32
    %c0_i32_0 = arith.constant 0 : i32
    %c0_i32_1 = arith.constant 0 : i32
    return %c0_i32, %c0_i32_0 : i32, i32
  }
  func.func @transform_5(%arg0: i32) -> (i32, i32) {
    %c0_i32 = arith.constant 0 : i32
    %c0_i32_0 = arith.constant 0 : i32
    %c0_i32_1 = arith.constant 0 : i32
    return %c0_i32, %c0_i32_0 : i32, i32
  }
  func.func @transform_6(%arg0: i32) -> (i32, i32) {
    %c0_i32 = arith.constant 0 : i32
    %c0_i32_0 = arith.constant 0 : i32
    %c0_i32_1 = arith.constant 0 : i32
    return %c0_i32, %c0_i32_0 : i32, i32
  }
  func.func @transform_7(%arg0: i32) -> (i32, i32) {
    %c0_i32 = arith.constant 0 : i32
    %c0_i32_0 = arith.constant 0 : i32
    %c0_i32_1 = arith.constant 0 : i32
    return %c0_i32, %c0_i32_0 : i32, i32
  }
  func.func @transform_8(%arg0: i32) -> (i32, i32) {
    %c0_i32 = arith.constant 0 : i32
    %c0_i32_0 = arith.constant 0 : i32
    %c0_i32_1 = arith.constant 0 : i32
    return %c0_i32, %c0_i32_0 : i32, i32
  }
  func.func @transform_9(%arg0: i32) -> (i32, i32) {
    %c0_i32 = arith.constant 0 : i32
    %c0_i32_0 = arith.constant 0 : i32
    %c0_i32_1 = arith.constant 0 : i32
    return %c0_i32, %c0_i32_0 : i32, i32
  }
  func.func @transform_10(%arg0: i32) -> (i32, i32) {
    %c0_i32 = arith.constant 0 : i32
    %c0_i32_0 = arith.constant 0 : i32
    %c0_i32_1 = arith.constant 0 : i32
    return %c0_i32, %c0_i32_0 : i32, i32
  }
  func.func @transform_11(%arg0: i32) -> (i32, i32) {
    %c0_i32 = arith.constant 0 : i32
    %c0_i32_0 = arith.constant 0 : i32
    %c0_i32_1 = arith.constant 0 : i32
    return %c0_i32, %c0_i32_0 : i32, i32
  }
  func.func @transform_12(%arg0: i32) -> (i32, i32) {
    %c0_i32 = arith.constant 0 : i32
    %c0_i32_0 = arith.constant 0 : i32
    %c0_i32_1 = arith.constant 0 : i32
    return %c0_i32, %c0_i32_0 : i32, i32
  }
  func.func @transform_13(%arg0: i32) -> (i32, i32, i32) {
    %c0_i32 = arith.constant 0 : i32
    %c0_i32_0 = arith.constant 0 : i32
    %c0_i32_1 = arith.constant 0 : i32
    return %arg0, %c0_i32, %c0_i32_0 : i32, i32, i32
  }
}

module attributes {stable_mosaic.version = 11 : i64} {
  func.func @_decoder_layer_kernel(%arg0: i32, %arg1: memref<1x8x32xf32, #tpu.memory_space<vmem>>, %arg2: memref<1x16x32xf32, #tpu.memory_space<vmem>>, %arg3: memref<32x96xf32, #tpu.memory_space<vmem>>, %arg4: memref<1x96xf32, #tpu.memory_space<vmem>>, %arg5: memref<32x32xf32, #tpu.memory_space<vmem>>, %arg6: memref<1x32xf32, #tpu.memory_space<vmem>>, %arg7: memref<1x32xf32, #tpu.memory_space<vmem>>, %arg8: memref<1x32xf32, #tpu.memory_space<vmem>>, %arg9: memref<32x32xf32, #tpu.memory_space<vmem>>, %arg10: memref<1x32xf32, #tpu.memory_space<vmem>>, %arg11: memref<32x64xf32, #tpu.memory_space<vmem>>, %arg12: memref<1x64xf32, #tpu.memory_space<vmem>>, %arg13: memref<32x32xf32, #tpu.memory_space<vmem>>, %arg14: memref<1x32xf32, #tpu.memory_space<vmem>>, %arg15: memref<1x32xf32, #tpu.memory_space<vmem>>, %arg16: memref<1x32xf32, #tpu.memory_space<vmem>>, %arg17: memref<32x128xf32, #tpu.memory_space<vmem>>, %arg18: memref<1x128xf32, #tpu.memory_space<vmem>>, %arg19: memref<128x32xf32, #tpu.memory_space<vmem>>, %arg20: memref<1x32xf32, #tpu.memory_space<vmem>>, %arg21: memref<1x32xf32, #tpu.memory_space<vmem>>, %arg22: memref<1x32xf32, #tpu.memory_space<vmem>>, %arg23: memref<1x8x32xf32, #tpu.memory_space<vmem>>) attributes {dimension_semantics = [#tpu.dimension_semantics<parallel>], iteration_bounds = array<i64: 2>, scalar_prefetch = 0 : i64, scratch_operands = 0 : i64, tpu.core_type = #tpu.core_type<tc>, window_params = [{transform_indices = @transform_0, window_bounds = array<i64: 1, 8, 32>}, {transform_indices = @transform_1, window_bounds = array<i64: 1, 16, 32>}, {pipeline_mode = #tpu.pipeline_mode<synchronous>, transform_indices = @transform_2, window_bounds = array<i64: 32, 96>}, {pipeline_mode = #tpu.pipeline_mode<synchronous>, transform_indices = @transform_3, window_bounds = array<i64: 1, 96>}, {pipeline_mode = #tpu.pipeline_mode<synchronous>, transform_indices = @transform_4, window_bounds = array<i64: 32, 32>}, {pipeline_mode = #tpu.pipeline_mode<synchronous>, transform_indices = @transform_5, window_bounds = array<i64: 1, 32>}, {pipeline_mode = #tpu.pipeline_mode<synchronous>, transform_indices = @transform_6, window_bounds = array<i64: 1, 32>}, {pipeline_mode = #tpu.pipeline_mode<synchronous>, transform_indices = @transform_7, window_bounds = array<i64: 1, 32>}, {pipeline_mode = #tpu.pipeline_mode<synchronous>, transform_indices = @transform_8, window_bounds = array<i64: 32, 32>}, {pipeline_mode = #tpu.pipeline_mode<synchronous>, transform_indices = @transform_9, window_bounds = array<i64: 1, 32>}, {pipeline_mode = #tpu.pipeline_mode<synchronous>, transform_indices = @transform_10, window_bounds = array<i64: 32, 64>}, {pipeline_mode = #tpu.pipeline_mode<synchronous>, transform_indices = @transform_11, window_bounds = array<i64: 1, 64>}, {pipeline_mode = #tpu.pipeline_mode<synchronous>, transform_indices = @transform_12, window_bounds = array<i64: 32, 32>}, {pipeline_mode = #tpu.pipeline_mode<synchronous>, transform_indices = @transform_13, window_bounds = array<i64: 1, 32>}, {pipeline_mode = #tpu.pipeline_mode<synchronous>, transform_indices = @transform_14, window_bounds = array<i64: 1, 32>}, {pipeline_mode = #tpu.pipeline_mode<synchronous>, transform_indices = @transform_15, window_bounds = array<i64: 1, 32>}, {pipeline_mode = #tpu.pipeline_mode<synchronous>, transform_indices = @transform_16, window_bounds = array<i64: 32, 128>}, {pipeline_mode = #tpu.pipeline_mode<synchronous>, transform_indices = @transform_17, window_bounds = array<i64: 1, 128>}, {pipeline_mode = #tpu.pipeline_mode<synchronous>, transform_indices = @transform_18, window_bounds = array<i64: 128, 32>}, {pipeline_mode = #tpu.pipeline_mode<synchronous>, transform_indices = @transform_19, window_bounds = array<i64: 1, 32>}, {pipeline_mode = #tpu.pipeline_mode<synchronous>, transform_indices = @transform_20, window_bounds = array<i64: 1, 32>}, {pipeline_mode = #tpu.pipeline_mode<synchronous>, transform_indices = @transform_21, window_bounds = array<i64: 1, 32>}, {transform_indices = @transform_22, window_bounds = array<i64: 1, 8, 32>}]} {
    %c0 = arith.constant 0 : index
    %c0_0 = arith.constant 0 : index
    %c0_1 = arith.constant 0 : index
    %0 = vector.load %arg1[%c0, %c0_0, %c0_1] : memref<1x8x32xf32, #tpu.memory_space<vmem>>, vector<1x8x32xf32>
    %1 = vector.shape_cast %0 : vector<1x8x32xf32> to vector<8x32xf32>
    %c0_2 = arith.constant 0 : index
    %c0_3 = arith.constant 0 : index
    %c0_4 = arith.constant 0 : index
    %2 = vector.load %arg2[%c0_2, %c0_3, %c0_4] : memref<1x16x32xf32, #tpu.memory_space<vmem>>, vector<1x16x32xf32>
    %3 = vector.shape_cast %2 : vector<1x16x32xf32> to vector<16x32xf32>
    %c0_5 = arith.constant 0 : index
    %c0_6 = arith.constant 0 : index
    %4 = vector.load %arg3[%c0_5, %c0_6] : memref<32x96xf32, #tpu.memory_space<vmem>>, vector<32x96xf32>
    %cst = arith.constant dense<0.000000e+00> : vector<8x96xf32>
    %5 = tpu.matmul %1, %4, %cst {dimension_numbers = #tpu.dot_dimension_numbers<[1], [0], [0], [1], [0, 0, 1, 1], [], []>} : vector<8x32xf32>, vector<32x96xf32>, vector<8x96xf32> -> vector<8x96xf32>
    %c0_7 = arith.constant 0 : index
    %c0_8 = arith.constant 0 : index
    %6 = vector.load %arg4[%c0_7, %c0_8] : memref<1x96xf32, #tpu.memory_space<vmem>>, vector<1x96xf32>
    %7 = vector.broadcast %6 : vector<1x96xf32> to vector<8x96xf32>
    %8 = arith.addf %5, %7 : vector<8x96xf32>
    %9 = vector.extract_strided_slice %8 {offsets = [0, 0], sizes = [8, 32], strides = [1, 1]} : vector<8x96xf32> to vector<8x32xf32>
    %10 = vector.shape_cast %9 : vector<8x32xf32> to vector<1x8x32xf32>
    %11 = vector.extract_strided_slice %8 {offsets = [0, 32], sizes = [8, 32], strides = [1, 1]} : vector<8x96xf32> to vector<8x32xf32>
    %12 = vector.shape_cast %11 : vector<8x32xf32> to vector<1x8x32xf32>
    %13 = vector.extract_strided_slice %8 {offsets = [0, 64], sizes = [8, 32], strides = [1, 1]} : vector<8x96xf32> to vector<8x32xf32>
    %14 = vector.shape_cast %13 : vector<8x32xf32> to vector<1x8x32xf32>
    %15 = vector.extract_strided_slice %10 {offsets = [0, 0, 0], sizes = [1, 8, 8], strides = [1, 1, 1]} : vector<1x8x32xf32> to vector<1x8x8xf32>
    %cst_9 = arith.constant 0.353553385 : f32
    %16 = vector.broadcast %cst_9 : f32 to vector<1x8x8xf32>
    %17 = arith.mulf %15, %16 : vector<1x8x8xf32>
    %18 = vector.extract_strided_slice %12 {offsets = [0, 0, 0], sizes = [1, 8, 8], strides = [1, 1, 1]} : vector<1x8x32xf32> to vector<1x8x8xf32>
    %19 = vector.extract_strided_slice %14 {offsets = [0, 0, 0], sizes = [1, 8, 8], strides = [1, 1, 1]} : vector<1x8x32xf32> to vector<1x8x8xf32>
    "tpu.trace_start"() <{level = 10 : i32, message = "bqd,bkd->bqk"}> : () -> ()
    %cst_10 = arith.constant dense<0.000000e+00> : vector<1x8x8xf32>
    %20 = tpu.matmul %17, %18, %cst_10 {dimension_numbers = #tpu.dot_dimension_numbers<[2], [2], [1], [1], [0, 0, 0, 1, 1, 1], [0], [0]>} : vector<1x8x8xf32>, vector<1x8x8xf32>, vector<1x8x8xf32> -> vector<1x8x8xf32>
    "tpu.trace_stop"() : () -> ()
    %cst_11 = arith.constant dense<0xFF800000> : vector<1x8xf32>
    %21 = vector.multi_reduction <maximumf>, %20, %cst_11 [2] : vector<1x8x8xf32> to vector<1x8xf32>
    %22 = vector.shape_cast %21 : vector<1x8xf32> to vector<1x8x1xf32>
    %23 = vector.broadcast %22 : vector<1x8x1xf32> to vector<1x8x8xf32>
    %24 = arith.subf %20, %23 : vector<1x8x8xf32>
    %25 = math.exp %24 : vector<1x8x8xf32>
    %cst_12 = arith.constant dense<0.000000e+00> : vector<1x8xf32>
    %26 = vector.multi_reduction <add>, %25, %cst_12 [2] : vector<1x8x8xf32> to vector<1x8xf32>
    %27 = vector.shape_cast %26 : vector<1x8xf32> to vector<1x8x1xf32>
    %28 = tpu.reciprocal %27 {approx = true} : vector<1x8x1xf32> -> vector<1x8x1xf32>
    %29 = vector.broadcast %28 : vector<1x8x1xf32> to vector<1x8x8xf32>
    %30 = arith.mulf %25, %29 : vector<1x8x8xf32>
    "tpu.trace_start"() <{level = 10 : i32, message = "bqk,bkd->bqd"}> : () -> ()
    %cst_13 = arith.constant dense<0.000000e+00> : vector<1x8x8xf32>
    %31 = tpu.matmul %30, %19, %cst_13 {dimension_numbers = #tpu.dot_dimension_numbers<[2], [1], [1], [2], [0, 0, 0, 1, 1, 2], [0], [0]>} : vector<1x8x8xf32>, vector<1x8x8xf32>, vector<1x8x8xf32> -> vector<1x8x8xf32>
    "tpu.trace_stop"() : () -> ()
    %32 = vector.extract_strided_slice %10 {offsets = [0, 0, 8], sizes = [1, 8, 8], strides = [1, 1, 1]} : vector<1x8x32xf32> to vector<1x8x8xf32>
    %cst_14 = arith.constant 0.353553385 : f32
    %33 = vector.broadcast %cst_14 : f32 to vector<1x8x8xf32>
    %34 = arith.mulf %32, %33 : vector<1x8x8xf32>
    %35 = vector.extract_strided_slice %12 {offsets = [0, 0, 8], sizes = [1, 8, 8], strides = [1, 1, 1]} : vector<1x8x32xf32> to vector<1x8x8xf32>
    %36 = vector.extract_strided_slice %14 {offsets = [0, 0, 8], sizes = [1, 8, 8], strides = [1, 1, 1]} : vector<1x8x32xf32> to vector<1x8x8xf32>
    "tpu.trace_start"() <{level = 10 : i32, message = "bqd,bkd->bqk"}> : () -> ()
    %cst_15 = arith.constant dense<0.000000e+00> : vector<1x8x8xf32>
    %37 = tpu.matmul %34, %35, %cst_15 {dimension_numbers = #tpu.dot_dimension_numbers<[2], [2], [1], [1], [0, 0, 0, 1, 1, 1], [0], [0]>} : vector<1x8x8xf32>, vector<1x8x8xf32>, vector<1x8x8xf32> -> vector<1x8x8xf32>
    "tpu.trace_stop"() : () -> ()
    %cst_16 = arith.constant dense<0xFF800000> : vector<1x8xf32>
    %38 = vector.multi_reduction <maximumf>, %37, %cst_16 [2] : vector<1x8x8xf32> to vector<1x8xf32>
    %39 = vector.shape_cast %38 : vector<1x8xf32> to vector<1x8x1xf32>
    %40 = vector.broadcast %39 : vector<1x8x1xf32> to vector<1x8x8xf32>
    %41 = arith.subf %37, %40 : vector<1x8x8xf32>
    %42 = math.exp %41 : vector<1x8x8xf32>
    %cst_17 = arith.constant dense<0.000000e+00> : vector<1x8xf32>
    %43 = vector.multi_reduction <add>, %42, %cst_17 [2] : vector<1x8x8xf32> to vector<1x8xf32>
    %44 = vector.shape_cast %43 : vector<1x8xf32> to vector<1x8x1xf32>
    %45 = tpu.reciprocal %44 {approx = true} : vector<1x8x1xf32> -> vector<1x8x1xf32>
    %46 = vector.broadcast %45 : vector<1x8x1xf32> to vector<1x8x8xf32>
    %47 = arith.mulf %42, %46 : vector<1x8x8xf32>
    "tpu.trace_start"() <{level = 10 : i32, message = "bqk,bkd->bqd"}> : () -> ()
    %cst_18 = arith.constant dense<0.000000e+00> : vector<1x8x8xf32>
    %48 = tpu.matmul %47, %36, %cst_18 {dimension_numbers = #tpu.dot_dimension_numbers<[2], [1], [1], [2], [0, 0, 0, 1, 1, 2], [0], [0]>} : vector<1x8x8xf32>, vector<1x8x8xf32>, vector<1x8x8xf32> -> vector<1x8x8xf32>
    "tpu.trace_stop"() : () -> ()
    %49 = vector.extract_strided_slice %10 {offsets = [0, 0, 16], sizes = [1, 8, 8], strides = [1, 1, 1]} : vector<1x8x32xf32> to vector<1x8x8xf32>
    %cst_19 = arith.constant 0.353553385 : f32
    %50 = vector.broadcast %cst_19 : f32 to vector<1x8x8xf32>
    %51 = arith.mulf %49, %50 : vector<1x8x8xf32>
    %52 = vector.extract_strided_slice %12 {offsets = [0, 0, 16], sizes = [1, 8, 8], strides = [1, 1, 1]} : vector<1x8x32xf32> to vector<1x8x8xf32>
    %53 = vector.extract_strided_slice %14 {offsets = [0, 0, 16], sizes = [1, 8, 8], strides = [1, 1, 1]} : vector<1x8x32xf32> to vector<1x8x8xf32>
    "tpu.trace_start"() <{level = 10 : i32, message = "bqd,bkd->bqk"}> : () -> ()
    %cst_20 = arith.constant dense<0.000000e+00> : vector<1x8x8xf32>
    %54 = tpu.matmul %51, %52, %cst_20 {dimension_numbers = #tpu.dot_dimension_numbers<[2], [2], [1], [1], [0, 0, 0, 1, 1, 1], [0], [0]>} : vector<1x8x8xf32>, vector<1x8x8xf32>, vector<1x8x8xf32> -> vector<1x8x8xf32>
    "tpu.trace_stop"() : () -> ()
    %cst_21 = arith.constant dense<0xFF800000> : vector<1x8xf32>
    %55 = vector.multi_reduction <maximumf>, %54, %cst_21 [2] : vector<1x8x8xf32> to vector<1x8xf32>
    %56 = vector.shape_cast %55 : vector<1x8xf32> to vector<1x8x1xf32>
    %57 = vector.broadcast %56 : vector<1x8x1xf32> to vector<1x8x8xf32>
    %58 = arith.subf %54, %57 : vector<1x8x8xf32>
    %59 = math.exp %58 : vector<1x8x8xf32>
    %cst_22 = arith.constant dense<0.000000e+00> : vector<1x8xf32>
    %60 = vector.multi_reduction <add>, %59, %cst_22 [2] : vector<1x8x8xf32> to vector<1x8xf32>
    %61 = vector.shape_cast %60 : vector<1x8xf32> to vector<1x8x1xf32>
    %62 = tpu.reciprocal %61 {approx = true} : vector<1x8x1xf32> -> vector<1x8x1xf32>
    %63 = vector.broadcast %62 : vector<1x8x1xf32> to vector<1x8x8xf32>
    %64 = arith.mulf %59, %63 : vector<1x8x8xf32>
    "tpu.trace_start"() <{level = 10 : i32, message = "bqk,bkd->bqd"}> : () -> ()
    %cst_23 = arith.constant dense<0.000000e+00> : vector<1x8x8xf32>
    %65 = tpu.matmul %64, %53, %cst_23 {dimension_numbers = #tpu.dot_dimension_numbers<[2], [1], [1], [2], [0, 0, 0, 1, 1, 2], [0], [0]>} : vector<1x8x8xf32>, vector<1x8x8xf32>, vector<1x8x8xf32> -> vector<1x8x8xf32>
    "tpu.trace_stop"() : () -> ()
    %66 = vector.extract_strided_slice %10 {offsets = [0, 0, 24], sizes = [1, 8, 8], strides = [1, 1, 1]} : vector<1x8x32xf32> to vector<1x8x8xf32>
    %cst_24 = arith.constant 0.353553385 : f32
    %67 = vector.broadcast %cst_24 : f32 to vector<1x8x8xf32>
    %68 = arith.mulf %66, %67 : vector<1x8x8xf32>
    %69 = vector.extract_strided_slice %12 {offsets = [0, 0, 24], sizes = [1, 8, 8], strides = [1, 1, 1]} : vector<1x8x32xf32> to vector<1x8x8xf32>
    %70 = vector.extract_strided_slice %14 {offsets = [0, 0, 24], sizes = [1, 8, 8], strides = [1, 1, 1]} : vector<1x8x32xf32> to vector<1x8x8xf32>
    "tpu.trace_start"() <{level = 10 : i32, message = "bqd,bkd->bqk"}> : () -> ()
    %cst_25 = arith.constant dense<0.000000e+00> : vector<1x8x8xf32>
    %71 = tpu.matmul %68, %69, %cst_25 {dimension_numbers = #tpu.dot_dimension_numbers<[2], [2], [1], [1], [0, 0, 0, 1, 1, 1], [0], [0]>} : vector<1x8x8xf32>, vector<1x8x8xf32>, vector<1x8x8xf32> -> vector<1x8x8xf32>
    "tpu.trace_stop"() : () -> ()
    %cst_26 = arith.constant dense<0xFF800000> : vector<1x8xf32>
    %72 = vector.multi_reduction <maximumf>, %71, %cst_26 [2] : vector<1x8x8xf32> to vector<1x8xf32>
    %73 = vector.shape_cast %72 : vector<1x8xf32> to vector<1x8x1xf32>
    %74 = vector.broadcast %73 : vector<1x8x1xf32> to vector<1x8x8xf32>
    %75 = arith.subf %71, %74 : vector<1x8x8xf32>
    %76 = math.exp %75 : vector<1x8x8xf32>
    %cst_27 = arith.constant dense<0.000000e+00> : vector<1x8xf32>
    %77 = vector.multi_reduction <add>, %76, %cst_27 [2] : vector<1x8x8xf32> to vector<1x8xf32>
    %78 = vector.shape_cast %77 : vector<1x8xf32> to vector<1x8x1xf32>
    %79 = tpu.reciprocal %78 {approx = true} : vector<1x8x1xf32> -> vector<1x8x1xf32>
    %80 = vector.broadcast %79 : vector<1x8x1xf32> to vector<1x8x8xf32>
    %81 = arith.mulf %76, %80 : vector<1x8x8xf32>
    "tpu.trace_start"() <{level = 10 : i32, message = "bqk,bkd->bqd"}> : () -> ()
    %cst_28 = arith.constant dense<0.000000e+00> : vector<1x8x8xf32>
    %82 = tpu.matmul %81, %70, %cst_28 {dimension_numbers = #tpu.dot_dimension_numbers<[2], [1], [1], [2], [0, 0, 0, 1, 1, 2], [0], [0]>} : vector<1x8x8xf32>, vector<1x8x8xf32>, vector<1x8x8xf32> -> vector<1x8x8xf32>
    "tpu.trace_stop"() : () -> ()
    %83 = tpu.concatenate %31, %48, %65, %82 in 2 : vector<1x8x8xf32>, vector<1x8x8xf32>, vector<1x8x8xf32>, vector<1x8x8xf32> -> vector<1x8x32xf32>
    %84 = vector.shape_cast %83 : vector<1x8x32xf32> to vector<8x32xf32>
    %c0_29 = arith.constant 0 : index
    %c0_30 = arith.constant 0 : index
    %85 = vector.load %arg5[%c0_29, %c0_30] : memref<32x32xf32, #tpu.memory_space<vmem>>, vector<32x32xf32>
    %cst_31 = arith.constant dense<0.000000e+00> : vector<8x32xf32>
    %86 = tpu.matmul %84, %85, %cst_31 {dimension_numbers = #tpu.dot_dimension_numbers<[1], [0], [0], [1], [0, 0, 1, 1], [], []>} : vector<8x32xf32>, vector<32x32xf32>, vector<8x32xf32> -> vector<8x32xf32>
    %c0_32 = arith.constant 0 : index
    %c0_33 = arith.constant 0 : index
    %87 = vector.load %arg6[%c0_32, %c0_33] : memref<1x32xf32, #tpu.memory_space<vmem>>, vector<1x32xf32>
    %88 = vector.broadcast %87 : vector<1x32xf32> to vector<8x32xf32>
    %89 = arith.addf %86, %88 : vector<8x32xf32>
    %c0_34 = arith.constant 0 : index
    %c0_35 = arith.constant 0 : index
    %90 = vector.load %arg7[%c0_34, %c0_35] : memref<1x32xf32, #tpu.memory_space<vmem>>, vector<1x32xf32>
    %c0_36 = arith.constant 0 : index
    %c0_37 = arith.constant 0 : index
    %91 = vector.load %arg8[%c0_36, %c0_37] : memref<1x32xf32, #tpu.memory_space<vmem>>, vector<1x32xf32>
    %92 = arith.addf %89, %1 : vector<8x32xf32>
    %cst_38 = arith.constant dense<0.000000e+00> : vector<8xf32>
    %93 = vector.multi_reduction <add>, %92, %cst_38 [1] : vector<8x32xf32> to vector<8xf32>
    %94 = vector.shape_cast %93 : vector<8xf32> to vector<8x1xf32>
    %cst_39 = arith.constant 3.200000e+01 : f32
    %95 = vector.broadcast %cst_39 : f32 to vector<8x1xf32>
    %96 = arith.divf %94, %95 : vector<8x1xf32>
    %97 = vector.broadcast %96 : vector<8x1xf32> to vector<8x32xf32>
    %98 = arith.subf %92, %97 : vector<8x32xf32>
    %99 = arith.mulf %98, %98 : vector<8x32xf32>
    %cst_40 = arith.constant dense<0.000000e+00> : vector<8xf32>
    %100 = vector.multi_reduction <add>, %99, %cst_40 [1] : vector<8x32xf32> to vector<8xf32>
    %101 = vector.shape_cast %100 : vector<8xf32> to vector<8x1xf32>
    %cst_41 = arith.constant 3.200000e+01 : f32
    %102 = vector.broadcast %cst_41 : f32 to vector<8x1xf32>
    %103 = arith.divf %101, %102 : vector<8x1xf32>
    %104 = vector.broadcast %96 : vector<8x1xf32> to vector<8x32xf32>
    %105 = arith.subf %92, %104 : vector<8x32xf32>
    %cst_42 = arith.constant 9.99999974E-6 : f32
    %106 = vector.broadcast %cst_42 : f32 to vector<8x1xf32>
    %107 = arith.addf %103, %106 : vector<8x1xf32>
    %108 = math.rsqrt %107 : vector<8x1xf32>
    %109 = vector.broadcast %108 : vector<8x1xf32> to vector<8x32xf32>
    %110 = arith.mulf %105, %109 : vector<8x32xf32>
    %111 = vector.broadcast %90 : vector<1x32xf32> to vector<8x32xf32>
    %112 = arith.mulf %110, %111 : vector<8x32xf32>
    %113 = vector.broadcast %91 : vector<1x32xf32> to vector<8x32xf32>
    %114 = arith.addf %112, %113 : vector<8x32xf32>
    %c0_43 = arith.constant 0 : index
    %c0_44 = arith.constant 0 : index
    %115 = vector.load %arg9[%c0_43, %c0_44] : memref<32x32xf32, #tpu.memory_space<vmem>>, vector<32x32xf32>
    %cst_45 = arith.constant dense<0.000000e+00> : vector<8x32xf32>
    %116 = tpu.matmul %114, %115, %cst_45 {dimension_numbers = #tpu.dot_dimension_numbers<[1], [0], [0], [1], [0, 0, 1, 1], [], []>} : vector<8x32xf32>, vector<32x32xf32>, vector<8x32xf32> -> vector<8x32xf32>
    %c0_46 = arith.constant 0 : index
    %c0_47 = arith.constant 0 : index
    %117 = vector.load %arg10[%c0_46, %c0_47] : memref<1x32xf32, #tpu.memory_space<vmem>>, vector<1x32xf32>
    %118 = vector.broadcast %117 : vector<1x32xf32> to vector<8x32xf32>
    %119 = arith.addf %116, %118 : vector<8x32xf32>
    %120 = vector.shape_cast %119 : vector<8x32xf32> to vector<1x8x32xf32>
    %c0_48 = arith.constant 0 : index
    %c0_49 = arith.constant 0 : index
    %121 = vector.load %arg11[%c0_48, %c0_49] : memref<32x64xf32, #tpu.memory_space<vmem>>, vector<32x64xf32>
    %cst_50 = arith.constant dense<0.000000e+00> : vector<16x64xf32>
    %122 = tpu.matmul %3, %121, %cst_50 {dimension_numbers = #tpu.dot_dimension_numbers<[1], [0], [0], [1], [0, 0, 1, 1], [], []>} : vector<16x32xf32>, vector<32x64xf32>, vector<16x64xf32> -> vector<16x64xf32>
    %c0_51 = arith.constant 0 : index
    %c0_52 = arith.constant 0 : index
    %123 = vector.load %arg12[%c0_51, %c0_52] : memref<1x64xf32, #tpu.memory_space<vmem>>, vector<1x64xf32>
    %124 = vector.broadcast %123 : vector<1x64xf32> to vector<16x64xf32>
    %125 = arith.addf %122, %124 : vector<16x64xf32>
    %126 = vector.extract_strided_slice %125 {offsets = [0, 0], sizes = [16, 32], strides = [1, 1]} : vector<16x64xf32> to vector<16x32xf32>
    %127 = vector.shape_cast %126 : vector<16x32xf32> to vector<1x16x32xf32>
    %128 = vector.extract_strided_slice %125 {offsets = [0, 32], sizes = [16, 32], strides = [1, 1]} : vector<16x64xf32> to vector<16x32xf32>
    %129 = vector.shape_cast %128 : vector<16x32xf32> to vector<1x16x32xf32>
    %130 = vector.extract_strided_slice %120 {offsets = [0, 0, 0], sizes = [1, 8, 8], strides = [1, 1, 1]} : vector<1x8x32xf32> to vector<1x8x8xf32>
    %cst_53 = arith.constant 0.353553385 : f32
    %131 = vector.broadcast %cst_53 : f32 to vector<1x8x8xf32>
    %132 = arith.mulf %130, %131 : vector<1x8x8xf32>
    %133 = vector.extract_strided_slice %127 {offsets = [0, 0, 0], sizes = [1, 16, 8], strides = [1, 1, 1]} : vector<1x16x32xf32> to vector<1x16x8xf32>
    %134 = vector.extract_strided_slice %129 {offsets = [0, 0, 0], sizes = [1, 16, 8], strides = [1, 1, 1]} : vector<1x16x32xf32> to vector<1x16x8xf32>
    "tpu.trace_start"() <{level = 10 : i32, message = "bqd,bkd->bqk"}> : () -> ()
    %cst_54 = arith.constant dense<0.000000e+00> : vector<1x8x16xf32>
    %135 = tpu.matmul %132, %133, %cst_54 {dimension_numbers = #tpu.dot_dimension_numbers<[2], [2], [1], [1], [0, 0, 0, 1, 1, 1], [0], [0]>} : vector<1x8x8xf32>, vector<1x16x8xf32>, vector<1x8x16xf32> -> vector<1x8x16xf32>
    "tpu.trace_stop"() : () -> ()
    %cst_55 = arith.constant dense<0xFF800000> : vector<1x8xf32>
    %136 = vector.multi_reduction <maximumf>, %135, %cst_55 [2] : vector<1x8x16xf32> to vector<1x8xf32>
    %137 = vector.shape_cast %136 : vector<1x8xf32> to vector<1x8x1xf32>
    %138 = vector.broadcast %137 : vector<1x8x1xf32> to vector<1x8x16xf32>
    %139 = arith.subf %135, %138 : vector<1x8x16xf32>
    %140 = math.exp %139 : vector<1x8x16xf32>
    %cst_56 = arith.constant dense<0.000000e+00> : vector<1x8xf32>
    %141 = vector.multi_reduction <add>, %140, %cst_56 [2] : vector<1x8x16xf32> to vector<1x8xf32>
    %142 = vector.shape_cast %141 : vector<1x8xf32> to vector<1x8x1xf32>
    %143 = tpu.reciprocal %142 {approx = true} : vector<1x8x1xf32> -> vector<1x8x1xf32>
    %144 = vector.broadcast %143 : vector<1x8x1xf32> to vector<1x8x16xf32>
    %145 = arith.mulf %140, %144 : vector<1x8x16xf32>
    "tpu.trace_start"() <{level = 10 : i32, message = "bqk,bkd->bqd"}> : () -> ()
    %cst_57 = arith.constant dense<0.000000e+00> : vector<1x8x8xf32>
    %146 = tpu.matmul %145, %134, %cst_57 {dimension_numbers = #tpu.dot_dimension_numbers<[2], [1], [1], [2], [0, 0, 0, 1, 1, 2], [0], [0]>} : vector<1x8x16xf32>, vector<1x16x8xf32>, vector<1x8x8xf32> -> vector<1x8x8xf32>
    "tpu.trace_stop"() : () -> ()
    %147 = vector.extract_strided_slice %120 {offsets = [0, 0, 8], sizes = [1, 8, 8], strides = [1, 1, 1]} : vector<1x8x32xf32> to vector<1x8x8xf32>
    %cst_58 = arith.constant 0.353553385 : f32
    %148 = vector.broadcast %cst_58 : f32 to vector<1x8x8xf32>
    %149 = arith.mulf %147, %148 : vector<1x8x8xf32>
    %150 = vector.extract_strided_slice %127 {offsets = [0, 0, 8], sizes = [1, 16, 8], strides = [1, 1, 1]} : vector<1x16x32xf32> to vector<1x16x8xf32>
    %151 = vector.extract_strided_slice %129 {offsets = [0, 0, 8], sizes = [1, 16, 8], strides = [1, 1, 1]} : vector<1x16x32xf32> to vector<1x16x8xf32>
    "tpu.trace_start"() <{level = 10 : i32, message = "bqd,bkd->bqk"}> : () -> ()
    %cst_59 = arith.constant dense<0.000000e+00> : vector<1x8x16xf32>
    %152 = tpu.matmul %149, %150, %cst_59 {dimension_numbers = #tpu.dot_dimension_numbers<[2], [2], [1], [1], [0, 0, 0, 1, 1, 1], [0], [0]>} : vector<1x8x8xf32>, vector<1x16x8xf32>, vector<1x8x16xf32> -> vector<1x8x16xf32>
    "tpu.trace_stop"() : () -> ()
    %cst_60 = arith.constant dense<0xFF800000> : vector<1x8xf32>
    %153 = vector.multi_reduction <maximumf>, %152, %cst_60 [2] : vector<1x8x16xf32> to vector<1x8xf32>
    %154 = vector.shape_cast %153 : vector<1x8xf32> to vector<1x8x1xf32>
    %155 = vector.broadcast %154 : vector<1x8x1xf32> to vector<1x8x16xf32>
    %156 = arith.subf %152, %155 : vector<1x8x16xf32>
    %157 = math.exp %156 : vector<1x8x16xf32>
    %cst_61 = arith.constant dense<0.000000e+00> : vector<1x8xf32>
    %158 = vector.multi_reduction <add>, %157, %cst_61 [2] : vector<1x8x16xf32> to vector<1x8xf32>
    %159 = vector.shape_cast %158 : vector<1x8xf32> to vector<1x8x1xf32>
    %160 = tpu.reciprocal %159 {approx = true} : vector<1x8x1xf32> -> vector<1x8x1xf32>
    %161 = vector.broadcast %160 : vector<1x8x1xf32> to vector<1x8x16xf32>
    %162 = arith.mulf %157, %161 : vector<1x8x16xf32>
    "tpu.trace_start"() <{level = 10 : i32, message = "bqk,bkd->bqd"}> : () -> ()
    %cst_62 = arith.constant dense<0.000000e+00> : vector<1x8x8xf32>
    %163 = tpu.matmul %162, %151, %cst_62 {dimension_numbers = #tpu.dot_dimension_numbers<[2], [1], [1], [2], [0, 0, 0, 1, 1, 2], [0], [0]>} : vector<1x8x16xf32>, vector<1x16x8xf32>, vector<1x8x8xf32> -> vector<1x8x8xf32>
    "tpu.trace_stop"() : () -> ()
    %164 = vector.extract_strided_slice %120 {offsets = [0, 0, 16], sizes = [1, 8, 8], strides = [1, 1, 1]} : vector<1x8x32xf32> to vector<1x8x8xf32>
    %cst_63 = arith.constant 0.353553385 : f32
    %165 = vector.broadcast %cst_63 : f32 to vector<1x8x8xf32>
    %166 = arith.mulf %164, %165 : vector<1x8x8xf32>
    %167 = vector.extract_strided_slice %127 {offsets = [0, 0, 16], sizes = [1, 16, 8], strides = [1, 1, 1]} : vector<1x16x32xf32> to vector<1x16x8xf32>
    %168 = vector.extract_strided_slice %129 {offsets = [0, 0, 16], sizes = [1, 16, 8], strides = [1, 1, 1]} : vector<1x16x32xf32> to vector<1x16x8xf32>
    "tpu.trace_start"() <{level = 10 : i32, message = "bqd,bkd->bqk"}> : () -> ()
    %cst_64 = arith.constant dense<0.000000e+00> : vector<1x8x16xf32>
    %169 = tpu.matmul %166, %167, %cst_64 {dimension_numbers = #tpu.dot_dimension_numbers<[2], [2], [1], [1], [0, 0, 0, 1, 1, 1], [0], [0]>} : vector<1x8x8xf32>, vector<1x16x8xf32>, vector<1x8x16xf32> -> vector<1x8x16xf32>
    "tpu.trace_stop"() : () -> ()
    %cst_65 = arith.constant dense<0xFF800000> : vector<1x8xf32>
    %170 = vector.multi_reduction <maximumf>, %169, %cst_65 [2] : vector<1x8x16xf32> to vector<1x8xf32>
    %171 = vector.shape_cast %170 : vector<1x8xf32> to vector<1x8x1xf32>
    %172 = vector.broadcast %171 : vector<1x8x1xf32> to vector<1x8x16xf32>
    %173 = arith.subf %169, %172 : vector<1x8x16xf32>
    %174 = math.exp %173 : vector<1x8x16xf32>
    %cst_66 = arith.constant dense<0.000000e+00> : vector<1x8xf32>
    %175 = vector.multi_reduction <add>, %174, %cst_66 [2] : vector<1x8x16xf32> to vector<1x8xf32>
    %176 = vector.shape_cast %175 : vector<1x8xf32> to vector<1x8x1xf32>
    %177 = tpu.reciprocal %176 {approx = true} : vector<1x8x1xf32> -> vector<1x8x1xf32>
    %178 = vector.broadcast %177 : vector<1x8x1xf32> to vector<1x8x16xf32>
    %179 = arith.mulf %174, %178 : vector<1x8x16xf32>
    "tpu.trace_start"() <{level = 10 : i32, message = "bqk,bkd->bqd"}> : () -> ()
    %cst_67 = arith.constant dense<0.000000e+00> : vector<1x8x8xf32>
    %180 = tpu.matmul %179, %168, %cst_67 {dimension_numbers = #tpu.dot_dimension_numbers<[2], [1], [1], [2], [0, 0, 0, 1, 1, 2], [0], [0]>} : vector<1x8x16xf32>, vector<1x16x8xf32>, vector<1x8x8xf32> -> vector<1x8x8xf32>
    "tpu.trace_stop"() : () -> ()
    %181 = vector.extract_strided_slice %120 {offsets = [0, 0, 24], sizes = [1, 8, 8], strides = [1, 1, 1]} : vector<1x8x32xf32> to vector<1x8x8xf32>
    %cst_68 = arith.constant 0.353553385 : f32
    %182 = vector.broadcast %cst_68 : f32 to vector<1x8x8xf32>
    %183 = arith.mulf %181, %182 : vector<1x8x8xf32>
    %184 = vector.extract_strided_slice %127 {offsets = [0, 0, 24], sizes = [1, 16, 8], strides = [1, 1, 1]} : vector<1x16x32xf32> to vector<1x16x8xf32>
    %185 = vector.extract_strided_slice %129 {offsets = [0, 0, 24], sizes = [1, 16, 8], strides = [1, 1, 1]} : vector<1x16x32xf32> to vector<1x16x8xf32>
    "tpu.trace_start"() <{level = 10 : i32, message = "bqd,bkd->bqk"}> : () -> ()
    %cst_69 = arith.constant dense<0.000000e+00> : vector<1x8x16xf32>
    %186 = tpu.matmul %183, %184, %cst_69 {dimension_numbers = #tpu.dot_dimension_numbers<[2], [2], [1], [1], [0, 0, 0, 1, 1, 1], [0], [0]>} : vector<1x8x8xf32>, vector<1x16x8xf32>, vector<1x8x16xf32> -> vector<1x8x16xf32>
    "tpu.trace_stop"() : () -> ()
    %cst_70 = arith.constant dense<0xFF800000> : vector<1x8xf32>
    %187 = vector.multi_reduction <maximumf>, %186, %cst_70 [2] : vector<1x8x16xf32> to vector<1x8xf32>
    %188 = vector.shape_cast %187 : vector<1x8xf32> to vector<1x8x1xf32>
    %189 = vector.broadcast %188 : vector<1x8x1xf32> to vector<1x8x16xf32>
    %190 = arith.subf %186, %189 : vector<1x8x16xf32>
    %191 = math.exp %190 : vector<1x8x16xf32>
    %cst_71 = arith.constant dense<0.000000e+00> : vector<1x8xf32>
    %192 = vector.multi_reduction <add>, %191, %cst_71 [2] : vector<1x8x16xf32> to vector<1x8xf32>
    %193 = vector.shape_cast %192 : vector<1x8xf32> to vector<1x8x1xf32>
    %194 = tpu.reciprocal %193 {approx = true} : vector<1x8x1xf32> -> vector<1x8x1xf32>
    %195 = vector.broadcast %194 : vector<1x8x1xf32> to vector<1x8x16xf32>
    %196 = arith.mulf %191, %195 : vector<1x8x16xf32>
    "tpu.trace_start"() <{level = 10 : i32, message = "bqk,bkd->bqd"}> : () -> ()
    %cst_72 = arith.constant dense<0.000000e+00> : vector<1x8x8xf32>
    %197 = tpu.matmul %196, %185, %cst_72 {dimension_numbers = #tpu.dot_dimension_numbers<[2], [1], [1], [2], [0, 0, 0, 1, 1, 2], [0], [0]>} : vector<1x8x16xf32>, vector<1x16x8xf32>, vector<1x8x8xf32> -> vector<1x8x8xf32>
    "tpu.trace_stop"() : () -> ()
    %198 = tpu.concatenate %146, %163, %180, %197 in 2 : vector<1x8x8xf32>, vector<1x8x8xf32>, vector<1x8x8xf32>, vector<1x8x8xf32> -> vector<1x8x32xf32>
    %199 = vector.shape_cast %198 : vector<1x8x32xf32> to vector<8x32xf32>
    %c0_73 = arith.constant 0 : index
    %c0_74 = arith.constant 0 : index
    %200 = vector.load %arg13[%c0_73, %c0_74] : memref<32x32xf32, #tpu.memory_space<vmem>>, vector<32x32xf32>
    %cst_75 = arith.constant dense<0.000000e+00> : vector<8x32xf32>
    %201 = tpu.matmul %199, %200, %cst_75 {dimension_numbers = #tpu.dot_dimension_numbers<[1], [0], [0], [1], [0, 0, 1, 1], [], []>} : vector<8x32xf32>, vector<32x32xf32>, vector<8x32xf32> -> vector<8x32xf32>
    %c0_76 = arith.constant 0 : index
    %c0_77 = arith.constant 0 : index
    %202 = vector.load %arg14[%c0_76, %c0_77] : memref<1x32xf32, #tpu.memory_space<vmem>>, vector<1x32xf32>
    %203 = vector.broadcast %202 : vector<1x32xf32> to vector<8x32xf32>
    %204 = arith.addf %201, %203 : vector<8x32xf32>
    %c0_78 = arith.constant 0 : index
    %c0_79 = arith.constant 0 : index
    %205 = vector.load %arg15[%c0_78, %c0_79] : memref<1x32xf32, #tpu.memory_space<vmem>>, vector<1x32xf32>
    %c0_80 = arith.constant 0 : index
    %c0_81 = arith.constant 0 : index
    %206 = vector.load %arg16[%c0_80, %c0_81] : memref<1x32xf32, #tpu.memory_space<vmem>>, vector<1x32xf32>
    %207 = arith.addf %204, %114 : vector<8x32xf32>
    %cst_82 = arith.constant dense<0.000000e+00> : vector<8xf32>
    %208 = vector.multi_reduction <add>, %207, %cst_82 [1] : vector<8x32xf32> to vector<8xf32>
    %209 = vector.shape_cast %208 : vector<8xf32> to vector<8x1xf32>
    %cst_83 = arith.constant 3.200000e+01 : f32
    %210 = vector.broadcast %cst_83 : f32 to vector<8x1xf32>
    %211 = arith.divf %209, %210 : vector<8x1xf32>
    %212 = vector.broadcast %211 : vector<8x1xf32> to vector<8x32xf32>
    %213 = arith.subf %207, %212 : vector<8x32xf32>
    %214 = arith.mulf %213, %213 : vector<8x32xf32>
    %cst_84 = arith.constant dense<0.000000e+00> : vector<8xf32>
    %215 = vector.multi_reduction <add>, %214, %cst_84 [1] : vector<8x32xf32> to vector<8xf32>
    %216 = vector.shape_cast %215 : vector<8xf32> to vector<8x1xf32>
    %cst_85 = arith.constant 3.200000e+01 : f32
    %217 = vector.broadcast %cst_85 : f32 to vector<8x1xf32>
    %218 = arith.divf %216, %217 : vector<8x1xf32>
    %219 = vector.broadcast %211 : vector<8x1xf32> to vector<8x32xf32>
    %220 = arith.subf %207, %219 : vector<8x32xf32>
    %cst_86 = arith.constant 9.99999974E-6 : f32
    %221 = vector.broadcast %cst_86 : f32 to vector<8x1xf32>
    %222 = arith.addf %218, %221 : vector<8x1xf32>
    %223 = math.rsqrt %222 : vector<8x1xf32>
    %224 = vector.broadcast %223 : vector<8x1xf32> to vector<8x32xf32>
    %225 = arith.mulf %220, %224 : vector<8x32xf32>
    %226 = vector.broadcast %205 : vector<1x32xf32> to vector<8x32xf32>
    %227 = arith.mulf %225, %226 : vector<8x32xf32>
    %228 = vector.broadcast %206 : vector<1x32xf32> to vector<8x32xf32>
    %229 = arith.addf %227, %228 : vector<8x32xf32>
    %c0_87 = arith.constant 0 : index
    %c0_88 = arith.constant 0 : index
    %230 = vector.load %arg17[%c0_87, %c0_88] : memref<32x128xf32, #tpu.memory_space<vmem>>, vector<32x128xf32>
    %cst_89 = arith.constant dense<0.000000e+00> : vector<8x128xf32>
    %231 = tpu.matmul %229, %230, %cst_89 {dimension_numbers = #tpu.dot_dimension_numbers<[1], [0], [0], [1], [0, 0, 1, 1], [], []>} : vector<8x32xf32>, vector<32x128xf32>, vector<8x128xf32> -> vector<8x128xf32>
    %c0_90 = arith.constant 0 : index
    %c0_91 = arith.constant 0 : index
    %232 = vector.load %arg18[%c0_90, %c0_91] : memref<1x128xf32, #tpu.memory_space<vmem>>, vector<1x128xf32>
    %233 = vector.broadcast %232 : vector<1x128xf32> to vector<8x128xf32>
    %234 = arith.addf %231, %233 : vector<8x128xf32>
    %cst_92 = arith.constant 0.000000e+00 : f32
    %235 = vector.broadcast %cst_92 : f32 to vector<8x128xf32>
    %236 = arith.maximumf %234, %235 : vector<8x128xf32>
    %c0_93 = arith.constant 0 : index
    %c0_94 = arith.constant 0 : index
    %237 = vector.load %arg19[%c0_93, %c0_94] : memref<128x32xf32, #tpu.memory_space<vmem>>, vector<128x32xf32>
    %cst_95 = arith.constant dense<0.000000e+00> : vector<8x32xf32>
    %238 = tpu.matmul %236, %237, %cst_95 {dimension_numbers = #tpu.dot_dimension_numbers<[1], [0], [0], [1], [0, 0, 1, 1], [], []>} : vector<8x128xf32>, vector<128x32xf32>, vector<8x32xf32> -> vector<8x32xf32>
    %c0_96 = arith.constant 0 : index
    %c0_97 = arith.constant 0 : index
    %239 = vector.load %arg20[%c0_96, %c0_97] : memref<1x32xf32, #tpu.memory_space<vmem>>, vector<1x32xf32>
    %240 = vector.broadcast %239 : vector<1x32xf32> to vector<8x32xf32>
    %241 = arith.addf %238, %240 : vector<8x32xf32>
    %c0_98 = arith.constant 0 : index
    %c0_99 = arith.constant 0 : index
    %242 = vector.load %arg21[%c0_98, %c0_99] : memref<1x32xf32, #tpu.memory_space<vmem>>, vector<1x32xf32>
    %c0_100 = arith.constant 0 : index
    %c0_101 = arith.constant 0 : index
    %243 = vector.load %arg22[%c0_100, %c0_101] : memref<1x32xf32, #tpu.memory_space<vmem>>, vector<1x32xf32>
    %244 = arith.addf %241, %229 : vector<8x32xf32>
    %cst_102 = arith.constant dense<0.000000e+00> : vector<8xf32>
    %245 = vector.multi_reduction <add>, %244, %cst_102 [1] : vector<8x32xf32> to vector<8xf32>
    %246 = vector.shape_cast %245 : vector<8xf32> to vector<8x1xf32>
    %cst_103 = arith.constant 3.200000e+01 : f32
    %247 = vector.broadcast %cst_103 : f32 to vector<8x1xf32>
    %248 = arith.divf %246, %247 : vector<8x1xf32>
    %249 = vector.broadcast %248 : vector<8x1xf32> to vector<8x32xf32>
    %250 = arith.subf %244, %249 : vector<8x32xf32>
    %251 = arith.mulf %250, %250 : vector<8x32xf32>
    %cst_104 = arith.constant dense<0.000000e+00> : vector<8xf32>
    %252 = vector.multi_reduction <add>, %251, %cst_104 [1] : vector<8x32xf32> to vector<8xf32>
    %253 = vector.shape_cast %252 : vector<8xf32> to vector<8x1xf32>
    %cst_105 = arith.constant 3.200000e+01 : f32
    %254 = vector.broadcast %cst_105 : f32 to vector<8x1xf32>
    %255 = arith.divf %253, %254 : vector<8x1xf32>
    %256 = vector.broadcast %248 : vector<8x1xf32> to vector<8x32xf32>
    %257 = arith.subf %244, %256 : vector<8x32xf32>
    %cst_106 = arith.constant 9.99999974E-6 : f32
    %258 = vector.broadcast %cst_106 : f32 to vector<8x1xf32>
    %259 = arith.addf %255, %258 : vector<8x1xf32>
    %260 = math.rsqrt %259 : vector<8x1xf32>
    %261 = vector.broadcast %260 : vector<8x1xf32> to vector<8x32xf32>
    %262 = arith.mulf %257, %261 : vector<8x32xf32>
    %263 = vector.broadcast %242 : vector<1x32xf32> to vector<8x32xf32>
    %264 = arith.mulf %262, %263 : vector<8x32xf32>
    %265 = vector.broadcast %243 : vector<1x32xf32> to vector<8x32xf32>
    %266 = arith.addf %264, %265 : vector<8x32xf32>
    %267 = vector.shape_cast %266 : vector<8x32xf32> to vector<1x8x32xf32>
    %c0_107 = arith.constant 0 : index
    %c0_108 = arith.constant 0 : index
    %c0_109 = arith.constant 0 : index
    %268 = vector.load %arg23[%c0_107, %c0_108, %c0_109] : memref<1x8x32xf32, #tpu.memory_space<vmem>>, vector<1x8x32xf32>
    tpu.vector_store %arg23[%c0_107, %c0_108, %c0_109], %267 {strides = array<i32>} : memref<1x8x32xf32, #tpu.memory_space<vmem>>, vector<1x8x32xf32>,
    return
  }
  func.func @transform_0(%arg0: i32) -> (i32, i32, i32) {
    %c0_i32 = arith.constant 0 : i32
    %c0_i32_0 = arith.constant 0 : i32
    %c0_i32_1 = arith.constant 0 : i32
    return %arg0, %c0_i32, %c0_i32_0 : i32, i32, i32
  }
  func.func @transform_1(%arg0: i32) -> (i32, i32, i32) {
    %c0_i32 = arith.constant 0 : i32
    %c0_i32_0 = arith.constant 0 : i32
    %c0_i32_1 = arith.constant 0 : i32
    return %arg0, %c0_i32, %c0_i32_0 : i32, i32, i32
  }
  func.func @transform_2(%arg0: i32) -> (i32, i32) {
    %c0_i32 = arith.constant 0 : i32
    %c0_i32_0 = arith.constant 0 : i32
    %c0_i32_1 = arith.constant 0 : i32
    return %c0_i32, %c0_i32_0 : i32, i32
  }
  func.func @transform_3(%arg0: i32) -> (i32, i32) {
    %c0_i32 = arith.constant 0 : i32
    %c0_i32_0 = arith.constant 0 : i32
    %c0_i32_1 = arith.constant 0 : i32
    return %c0_i32, %c0_i32_0 : i32, i32
  }
  func.func @transform_4(%arg0: i32) -> (i32, i32) {
    %c0_i32 = arith.constant 0 : i32
    %c0_i32_0 = arith.constant 0 : i32
    %c0_i32_1 = arith.constant 0 : i32
    return %c0_i32, %c0_i32_0 : i32, i32
  }
  func.func @transform_5(%arg0: i32) -> (i32, i32) {
    %c0_i32 = arith.constant 0 : i32
    %c0_i32_0 = arith.constant 0 : i32
    %c0_i32_1 = arith.constant 0 : i32
    return %c0_i32, %c0_i32_0 : i32, i32
  }
  func.func @transform_6(%arg0: i32) -> (i32, i32) {
    %c0_i32 = arith.constant 0 : i32
    %c0_i32_0 = arith.constant 0 : i32
    %c0_i32_1 = arith.constant 0 : i32
    return %c0_i32, %c0_i32_0 : i32, i32
  }
  func.func @transform_7(%arg0: i32) -> (i32, i32) {
    %c0_i32 = arith.constant 0 : i32
    %c0_i32_0 = arith.constant 0 : i32
    %c0_i32_1 = arith.constant 0 : i32
    return %c0_i32, %c0_i32_0 : i32, i32
  }
  func.func @transform_8(%arg0: i32) -> (i32, i32) {
    %c0_i32 = arith.constant 0 : i32
    %c0_i32_0 = arith.constant 0 : i32
    %c0_i32_1 = arith.constant 0 : i32
    return %c0_i32, %c0_i32_0 : i32, i32
  }
  func.func @transform_9(%arg0: i32) -> (i32, i32) {
    %c0_i32 = arith.constant 0 : i32
    %c0_i32_0 = arith.constant 0 : i32
    %c0_i32_1 = arith.constant 0 : i32
    return %c0_i32, %c0_i32_0 : i32, i32
  }
  func.func @transform_10(%arg0: i32) -> (i32, i32) {
    %c0_i32 = arith.constant 0 : i32
    %c0_i32_0 = arith.constant 0 : i32
    %c0_i32_1 = arith.constant 0 : i32
    return %c0_i32, %c0_i32_0 : i32, i32
  }
  func.func @transform_11(%arg0: i32) -> (i32, i32) {
    %c0_i32 = arith.constant 0 : i32
    %c0_i32_0 = arith.constant 0 : i32
    %c0_i32_1 = arith.constant 0 : i32
    return %c0_i32, %c0_i32_0 : i32, i32
  }
  func.func @transform_12(%arg0: i32) -> (i32, i32) {
    %c0_i32 = arith.constant 0 : i32
    %c0_i32_0 = arith.constant 0 : i32
    %c0_i32_1 = arith.constant 0 : i32
    return %c0_i32, %c0_i32_0 : i32, i32
  }
  func.func @transform_13(%arg0: i32) -> (i32, i32) {
    %c0_i32 = arith.constant 0 : i32
    %c0_i32_0 = arith.constant 0 : i32
    %c0_i32_1 = arith.constant 0 : i32
    return %c0_i32, %c0_i32_0 : i32, i32
  }
  func.func @transform_14(%arg0: i32) -> (i32, i32) {
    %c0_i32 = arith.constant 0 : i32
    %c0_i32_0 = arith.constant 0 : i32
    %c0_i32_1 = arith.constant 0 : i32
    return %c0_i32, %c0_i32_0 : i32, i32
  }
  func.func @transform_15(%arg0: i32) -> (i32, i32) {
    %c0_i32 = arith.constant 0 : i32
    %c0_i32_0 = arith.constant 0 : i32
    %c0_i32_1 = arith.constant 0 : i32
    return %c0_i32, %c0_i32_0 : i32, i32
  }
  func.func @transform_16(%arg0: i32) -> (i32, i32) {
    %c0_i32 = arith.constant 0 : i32
    %c0_i32_0 = arith.constant 0 : i32
    %c0_i32_1 = arith.constant 0 : i32
    return %c0_i32, %c0_i32_0 : i32, i32
  }
  func.func @transform_17(%arg0: i32) -> (i32, i32) {
    %c0_i32 = arith.constant 0 : i32
    %c0_i32_0 = arith.constant 0 : i32
    %c0_i32_1 = arith.constant 0 : i32
    return %c0_i32, %c0_i32_0 : i32, i32
  }
  func.func @transform_18(%arg0: i32) -> (i32, i32) {
    %c0_i32 = arith.constant 0 : i32
    %c0_i32_0 = arith.constant 0 : i32
    %c0_i32_1 = arith.constant 0 : i32
    return %c0_i32, %c0_i32_0 : i32, i32
  }
  func.func @transform_19(%arg0: i32) -> (i32, i32) {
    %c0_i32 = arith.constant 0 : i32
    %c0_i32_0 = arith.constant 0 : i32
    %c0_i32_1 = arith.constant 0 : i32
    return %c0_i32, %c0_i32_0 : i32, i32
  }
  func.func @transform_20(%arg0: i32) -> (i32, i32) {
    %c0_i32 = arith.constant 0 : i32
    %c0_i32_0 = arith.constant 0 : i32
    %c0_i32_1 = arith.constant 0 : i32
    return %c0_i32, %c0_i32_0 : i32, i32
  }
  func.func @transform_21(%arg0: i32) -> (i32, i32) {
    %c0_i32 = arith.constant 0 : i32
    %c0_i32_0 = arith.constant 0 : i32
    %c0_i32_1 = arith.constant 0 : i32
    return %c0_i32, %c0_i32_0 : i32, i32
  }
  func.func @transform_22(%arg0: i32) -> (i32, i32, i32) {
    %c0_i32 = arith.constant 0 : i32
    %c0_i32_0 = arith.constant 0 : i32
    %c0_i32_1 = arith.constant 0 : i32
    return %arg0, %c0_i32, %c0_i32_0 : i32, i32, i32
  }
}

module attributes {stable_mosaic.version = 11 : i64} {
  func.func @_decoder_layer_kernel(%arg0: i32, %arg1: memref<1x8x32xf32, #tpu.memory_space<vmem>>, %arg2: memref<1x16x32xf32, #tpu.memory_space<vmem>>, %arg3: memref<32x96xf32, #tpu.memory_space<vmem>>, %arg4: memref<1x96xf32, #tpu.memory_space<vmem>>, %arg5: memref<32x32xf32, #tpu.memory_space<vmem>>, %arg6: memref<1x32xf32, #tpu.memory_space<vmem>>, %arg7: memref<1x32xf32, #tpu.memory_space<vmem>>, %arg8: memref<1x32xf32, #tpu.memory_space<vmem>>, %arg9: memref<32x32xf32, #tpu.memory_space<vmem>>, %arg10: memref<1x32xf32, #tpu.memory_space<vmem>>, %arg11: memref<32x64xf32, #tpu.memory_space<vmem>>, %arg12: memref<1x64xf32, #tpu.memory_space<vmem>>, %arg13: memref<32x32xf32, #tpu.memory_space<vmem>>, %arg14: memref<1x32xf32, #tpu.memory_space<vmem>>, %arg15: memref<1x32xf32, #tpu.memory_space<vmem>>, %arg16: memref<1x32xf32, #tpu.memory_space<vmem>>, %arg17: memref<32x128xf32, #tpu.memory_space<vmem>>, %arg18: memref<1x128xf32, #tpu.memory_space<vmem>>, %arg19: memref<128x32xf32, #tpu.memory_space<vmem>>, %arg20: memref<1x32xf32, #tpu.memory_space<vmem>>, %arg21: memref<1x32xf32, #tpu.memory_space<vmem>>, %arg22: memref<1x32xf32, #tpu.memory_space<vmem>>, %arg23: memref<1x8x32xf32, #tpu.memory_space<vmem>>) attributes {dimension_semantics = [#tpu.dimension_semantics<parallel>], iteration_bounds = array<i64: 2>, scalar_prefetch = 0 : i64, scratch_operands = 0 : i64, tpu.core_type = #tpu.core_type<tc>, window_params = [{transform_indices = @transform_0, window_bounds = array<i64: 1, 8, 32>}, {transform_indices = @transform_1, window_bounds = array<i64: 1, 16, 32>}, {pipeline_mode = #tpu.pipeline_mode<synchronous>, transform_indices = @transform_2, window_bounds = array<i64: 32, 96>}, {pipeline_mode = #tpu.pipeline_mode<synchronous>, transform_indices = @transform_3, window_bounds = array<i64: 1, 96>}, {pipeline_mode = #tpu.pipeline_mode<synchronous>, transform_indices = @transform_4, window_bounds = array<i64: 32, 32>}, {pipeline_mode = #tpu.pipeline_mode<synchronous>, transform_indices = @transform_5, window_bounds = array<i64: 1, 32>}, {pipeline_mode = #tpu.pipeline_mode<synchronous>, transform_indices = @transform_6, window_bounds = array<i64: 1, 32>}, {pipeline_mode = #tpu.pipeline_mode<synchronous>, transform_indices = @transform_7, window_bounds = array<i64: 1, 32>}, {pipeline_mode = #tpu.pipeline_mode<synchronous>, transform_indices = @transform_8, window_bounds = array<i64: 32, 32>}, {pipeline_mode = #tpu.pipeline_mode<synchronous>, transform_indices = @transform_9, window_bounds = array<i64: 1, 32>}, {pipeline_mode = #tpu.pipeline_mode<synchronous>, transform_indices = @transform_10, window_bounds = array<i64: 32, 64>}, {pipeline_mode = #tpu.pipeline_mode<synchronous>, transform_indices = @transform_11, window_bounds = array<i64: 1, 64>}, {pipeline_mode = #tpu.pipeline_mode<synchronous>, transform_indices = @transform_12, window_bounds = array<i64: 32, 32>}, {pipeline_mode = #tpu.pipeline_mode<synchronous>, transform_indices = @transform_13, window_bounds = array<i64: 1, 32>}, {pipeline_mode = #tpu.pipeline_mode<synchronous>, transform_indices = @transform_14, window_bounds = array<i64: 1, 32>}, {pipeline_mode = #tpu.pipeline_mode<synchronous>, transform_indices = @transform_15, window_bounds = array<i64: 1, 32>}, {pipeline_mode = #tpu.pipeline_mode<synchronous>, transform_indices = @transform_16, window_bounds = array<i64: 32, 128>}, {pipeline_mode = #tpu.pipeline_mode<synchronous>, transform_indices = @transform_17, window_bounds = array<i64: 1, 128>}, {pipeline_mode = #tpu.pipeline_mode<synchronous>, transform_indices = @transform_18, window_bounds = array<i64: 128, 32>}, {pipeline_mode = #tpu.pipeline_mode<synchronous>, transform_indices = @transform_19, window_bounds = array<i64: 1, 32>}, {pipeline_mode = #tpu.pipeline_mode<synchronous>, transform_indices = @transform_20, window_bounds = array<i64: 1, 32>}, {pipeline_mode = #tpu.pipeline_mode<synchronous>, transform_indices = @transform_21, window_bounds = array<i64: 1, 32>}, {transform_indices = @transform_22, window_bounds = array<i64: 1, 8, 32>}]} {
    %c0 = arith.constant 0 : index
    %c0_0 = arith.constant 0 : index
    %c0_1 = arith.constant 0 : index
    %0 = vector.load %arg1[%c0, %c0_0, %c0_1] : memref<1x8x32xf32, #tpu.memory_space<vmem>>, vector<1x8x32xf32>
    %1 = vector.shape_cast %0 : vector<1x8x32xf32> to vector<8x32xf32>
    %c0_2 = arith.constant 0 : index
    %c0_3 = arith.constant 0 : index
    %c0_4 = arith.constant 0 : index
    %2 = vector.load %arg2[%c0_2, %c0_3, %c0_4] : memref<1x16x32xf32, #tpu.memory_space<vmem>>, vector<1x16x32xf32>
    %3 = vector.shape_cast %2 : vector<1x16x32xf32> to vector<16x32xf32>
    %c0_5 = arith.constant 0 : index
    %c0_6 = arith.constant 0 : index
    %4 = vector.load %arg3[%c0_5, %c0_6] : memref<32x96xf32, #tpu.memory_space<vmem>>, vector<32x96xf32>
    %cst = arith.constant dense<0.000000e+00> : vector<8x96xf32>
    %5 = tpu.matmul %1, %4, %cst {dimension_numbers = #tpu.dot_dimension_numbers<[1], [0], [0], [1], [0, 0, 1, 1], [], []>} : vector<8x32xf32>, vector<32x96xf32>, vector<8x96xf32> -> vector<8x96xf32>
    %c0_7 = arith.constant 0 : index
    %c0_8 = arith.constant 0 : index
    %6 = vector.load %arg4[%c0_7, %c0_8] : memref<1x96xf32, #tpu.memory_space<vmem>>, vector<1x96xf32>
    %7 = vector.broadcast %6 : vector<1x96xf32> to vector<8x96xf32>
    %8 = arith.addf %5, %7 : vector<8x96xf32>
    %9 = vector.extract_strided_slice %8 {offsets = [0, 0], sizes = [8, 32], strides = [1, 1]} : vector<8x96xf32> to vector<8x32xf32>
    %10 = vector.shape_cast %9 : vector<8x32xf32> to vector<1x8x32xf32>
    %11 = vector.extract_strided_slice %8 {offsets = [0, 32], sizes = [8, 32], strides = [1, 1]} : vector<8x96xf32> to vector<8x32xf32>
    %12 = vector.shape_cast %11 : vector<8x32xf32> to vector<1x8x32xf32>
    %13 = vector.extract_strided_slice %8 {offsets = [0, 64], sizes = [8, 32], strides = [1, 1]} : vector<8x96xf32> to vector<8x32xf32>
    %14 = vector.shape_cast %13 : vector<8x32xf32> to vector<1x8x32xf32>
    %15 = vector.extract_strided_slice %10 {offsets = [0, 0, 0], sizes = [1, 8, 8], strides = [1, 1, 1]} : vector<1x8x32xf32> to vector<1x8x8xf32>
    %cst_9 = arith.constant 0.353553385 : f32
    %16 = vector.broadcast %cst_9 : f32 to vector<1x8x8xf32>
    %17 = arith.mulf %15, %16 : vector<1x8x8xf32>
    %18 = vector.extract_strided_slice %12 {offsets = [0, 0, 0], sizes = [1, 8, 8], strides = [1, 1, 1]} : vector<1x8x32xf32> to vector<1x8x8xf32>
    %19 = vector.extract_strided_slice %14 {offsets = [0, 0, 0], sizes = [1, 8, 8], strides = [1, 1, 1]} : vector<1x8x32xf32> to vector<1x8x8xf32>
    "tpu.trace_start"() <{level = 10 : i32, message = "bqd,bkd->bqk"}> : () -> ()
    %cst_10 = arith.constant dense<0.000000e+00> : vector<1x8x8xf32>
    %20 = tpu.matmul %17, %18, %cst_10 {dimension_numbers = #tpu.dot_dimension_numbers<[2], [2], [1], [1], [0, 0, 0, 1, 1, 1], [0], [0]>} : vector<1x8x8xf32>, vector<1x8x8xf32>, vector<1x8x8xf32> -> vector<1x8x8xf32>
    "tpu.trace_stop"() : () -> ()
    %cst_11 = arith.constant dense<0xFF800000> : vector<1x8xf32>
    %21 = vector.multi_reduction <maximumf>, %20, %cst_11 [2] : vector<1x8x8xf32> to vector<1x8xf32>
    %22 = vector.shape_cast %21 : vector<1x8xf32> to vector<1x8x1xf32>
    %23 = vector.broadcast %22 : vector<1x8x1xf32> to vector<1x8x8xf32>
    %24 = arith.subf %20, %23 : vector<1x8x8xf32>
    %25 = math.exp %24 : vector<1x8x8xf32>
    %cst_12 = arith.constant dense<0.000000e+00> : vector<1x8xf32>
    %26 = vector.multi_reduction <add>, %25, %cst_12 [2] : vector<1x8x8xf32> to vector<1x8xf32>
    %27 = vector.shape_cast %26 : vector<1x8xf32> to vector<1x8x1xf32>
    %28 = tpu.reciprocal %27 {approx = true} : vector<1x8x1xf32> -> vector<1x8x1xf32>
    %29 = vector.broadcast %28 : vector<1x8x1xf32> to vector<1x8x8xf32>
    %30 = arith.mulf %25, %29 : vector<1x8x8xf32>
    "tpu.trace_start"() <{level = 10 : i32, message = "bqk,bkd->bqd"}> : () -> ()
    %cst_13 = arith.constant dense<0.000000e+00> : vector<1x8x8xf32>
    %31 = tpu.matmul %30, %19, %cst_13 {dimension_numbers = #tpu.dot_dimension_numbers<[2], [1], [1], [2], [0, 0, 0, 1, 1, 2], [0], [0]>} : vector<1x8x8xf32>, vector<1x8x8xf32>, vector<1x8x8xf32> -> vector<1x8x8xf32>
    "tpu.trace_stop"() : () -> ()
    %32 = vector.extract_strided_slice %10 {offsets = [0, 0, 8], sizes = [1, 8, 8], strides = [1, 1, 1]} : vector<1x8x32xf32> to vector<1x8x8xf32>
    %cst_14 = arith.constant 0.353553385 : f32
    %33 = vector.broadcast %cst_14 : f32 to vector<1x8x8xf32>
    %34 = arith.mulf %32, %33 : vector<1x8x8xf32>
    %35 = vector.extract_strided_slice %12 {offsets = [0, 0, 8], sizes = [1, 8, 8], strides = [1, 1, 1]} : vector<1x8x32xf32> to vector<1x8x8xf32>
    %36 = vector.extract_strided_slice %14 {offsets = [0, 0, 8], sizes = [1, 8, 8], strides = [1, 1, 1]} : vector<1x8x32xf32> to vector<1x8x8xf32>
    "tpu.trace_start"() <{level = 10 : i32, message = "bqd,bkd->bqk"}> : () -> ()
    %cst_15 = arith.constant dense<0.000000e+00> : vector<1x8x8xf32>
    %37 = tpu.matmul %34, %35, %cst_15 {dimension_numbers = #tpu.dot_dimension_numbers<[2], [2], [1], [1], [0, 0, 0, 1, 1, 1], [0], [0]>} : vector<1x8x8xf32>, vector<1x8x8xf32>, vector<1x8x8xf32> -> vector<1x8x8xf32>
    "tpu.trace_stop"() : () -> ()
    %cst_16 = arith.constant dense<0xFF800000> : vector<1x8xf32>
    %38 = vector.multi_reduction <maximumf>, %37, %cst_16 [2] : vector<1x8x8xf32> to vector<1x8xf32>
    %39 = vector.shape_cast %38 : vector<1x8xf32> to vector<1x8x1xf32>
    %40 = vector.broadcast %39 : vector<1x8x1xf32> to vector<1x8x8xf32>
    %41 = arith.subf %37, %40 : vector<1x8x8xf32>
    %42 = math.exp %41 : vector<1x8x8xf32>
    %cst_17 = arith.constant dense<0.000000e+00> : vector<1x8xf32>
    %43 = vector.multi_reduction <add>, %42, %cst_17 [2] : vector<1x8x8xf32> to vector<1x8xf32>
    %44 = vector.shape_cast %43 : vector<1x8xf32> to vector<1x8x1xf32>
    %45 = tpu.reciprocal %44 {approx = true} : vector<1x8x1xf32> -> vector<1x8x1xf32>
    %46 = vector.broadcast %45 : vector<1x8x1xf32> to vector<1x8x8xf32>
    %47 = arith.mulf %42, %46 : vector<1x8x8xf32>
    "tpu.trace_start"() <{level = 10 : i32, message = "bqk,bkd->bqd"}> : () -> ()
    %cst_18 = arith.constant dense<0.000000e+00> : vector<1x8x8xf32>
    %48 = tpu.matmul %47, %36, %cst_18 {dimension_numbers = #tpu.dot_dimension_numbers<[2], [1], [1], [2], [0, 0, 0, 1, 1, 2], [0], [0]>} : vector<1x8x8xf32>, vector<1x8x8xf32>, vector<1x8x8xf32> -> vector<1x8x8xf32>
    "tpu.trace_stop"() : () -> ()
    %49 = vector.extract_strided_slice %10 {offsets = [0, 0, 16], sizes = [1, 8, 8], strides = [1, 1, 1]} : vector<1x8x32xf32> to vector<1x8x8xf32>
    %cst_19 = arith.constant 0.353553385 : f32
    %50 = vector.broadcast %cst_19 : f32 to vector<1x8x8xf32>
    %51 = arith.mulf %49, %50 : vector<1x8x8xf32>
    %52 = vector.extract_strided_slice %12 {offsets = [0, 0, 16], sizes = [1, 8, 8], strides = [1, 1, 1]} : vector<1x8x32xf32> to vector<1x8x8xf32>
    %53 = vector.extract_strided_slice %14 {offsets = [0, 0, 16], sizes = [1, 8, 8], strides = [1, 1, 1]} : vector<1x8x32xf32> to vector<1x8x8xf32>
    "tpu.trace_start"() <{level = 10 : i32, message = "bqd,bkd->bqk"}> : () -> ()
    %cst_20 = arith.constant dense<0.000000e+00> : vector<1x8x8xf32>
    %54 = tpu.matmul %51, %52, %cst_20 {dimension_numbers = #tpu.dot_dimension_numbers<[2], [2], [1], [1], [0, 0, 0, 1, 1, 1], [0], [0]>} : vector<1x8x8xf32>, vector<1x8x8xf32>, vector<1x8x8xf32> -> vector<1x8x8xf32>
    "tpu.trace_stop"() : () -> ()
    %cst_21 = arith.constant dense<0xFF800000> : vector<1x8xf32>
    %55 = vector.multi_reduction <maximumf>, %54, %cst_21 [2] : vector<1x8x8xf32> to vector<1x8xf32>
    %56 = vector.shape_cast %55 : vector<1x8xf32> to vector<1x8x1xf32>
    %57 = vector.broadcast %56 : vector<1x8x1xf32> to vector<1x8x8xf32>
    %58 = arith.subf %54, %57 : vector<1x8x8xf32>
    %59 = math.exp %58 : vector<1x8x8xf32>
    %cst_22 = arith.constant dense<0.000000e+00> : vector<1x8xf32>
    %60 = vector.multi_reduction <add>, %59, %cst_22 [2] : vector<1x8x8xf32> to vector<1x8xf32>
    %61 = vector.shape_cast %60 : vector<1x8xf32> to vector<1x8x1xf32>
    %62 = tpu.reciprocal %61 {approx = true} : vector<1x8x1xf32> -> vector<1x8x1xf32>
    %63 = vector.broadcast %62 : vector<1x8x1xf32> to vector<1x8x8xf32>
    %64 = arith.mulf %59, %63 : vector<1x8x8xf32>
    "tpu.trace_start"() <{level = 10 : i32, message = "bqk,bkd->bqd"}> : () -> ()
    %cst_23 = arith.constant dense<0.000000e+00> : vector<1x8x8xf32>
    %65 = tpu.matmul %64, %53, %cst_23 {dimension_numbers = #tpu.dot_dimension_numbers<[2], [1], [1], [2], [0, 0, 0, 1, 1, 2], [0], [0]>} : vector<1x8x8xf32>, vector<1x8x8xf32>, vector<1x8x8xf32> -> vector<1x8x8xf32>
    "tpu.trace_stop"() : () -> ()
    %66 = vector.extract_strided_slice %10 {offsets = [0, 0, 24], sizes = [1, 8, 8], strides = [1, 1, 1]} : vector<1x8x32xf32> to vector<1x8x8xf32>
    %cst_24 = arith.constant 0.353553385 : f32
    %67 = vector.broadcast %cst_24 : f32 to vector<1x8x8xf32>
    %68 = arith.mulf %66, %67 : vector<1x8x8xf32>
    %69 = vector.extract_strided_slice %12 {offsets = [0, 0, 24], sizes = [1, 8, 8], strides = [1, 1, 1]} : vector<1x8x32xf32> to vector<1x8x8xf32>
    %70 = vector.extract_strided_slice %14 {offsets = [0, 0, 24], sizes = [1, 8, 8], strides = [1, 1, 1]} : vector<1x8x32xf32> to vector<1x8x8xf32>
    "tpu.trace_start"() <{level = 10 : i32, message = "bqd,bkd->bqk"}> : () -> ()
    %cst_25 = arith.constant dense<0.000000e+00> : vector<1x8x8xf32>
    %71 = tpu.matmul %68, %69, %cst_25 {dimension_numbers = #tpu.dot_dimension_numbers<[2], [2], [1], [1], [0, 0, 0, 1, 1, 1], [0], [0]>} : vector<1x8x8xf32>, vector<1x8x8xf32>, vector<1x8x8xf32> -> vector<1x8x8xf32>
    "tpu.trace_stop"() : () -> ()
    %cst_26 = arith.constant dense<0xFF800000> : vector<1x8xf32>
    %72 = vector.multi_reduction <maximumf>, %71, %cst_26 [2] : vector<1x8x8xf32> to vector<1x8xf32>
    %73 = vector.shape_cast %72 : vector<1x8xf32> to vector<1x8x1xf32>
    %74 = vector.broadcast %73 : vector<1x8x1xf32> to vector<1x8x8xf32>
    %75 = arith.subf %71, %74 : vector<1x8x8xf32>
    %76 = math.exp %75 : vector<1x8x8xf32>
    %cst_27 = arith.constant dense<0.000000e+00> : vector<1x8xf32>
    %77 = vector.multi_reduction <add>, %76, %cst_27 [2] : vector<1x8x8xf32> to vector<1x8xf32>
    %78 = vector.shape_cast %77 : vector<1x8xf32> to vector<1x8x1xf32>
    %79 = tpu.reciprocal %78 {approx = true} : vector<1x8x1xf32> -> vector<1x8x1xf32>
    %80 = vector.broadcast %79 : vector<1x8x1xf32> to vector<1x8x8xf32>
    %81 = arith.mulf %76, %80 : vector<1x8x8xf32>
    "tpu.trace_start"() <{level = 10 : i32, message = "bqk,bkd->bqd"}> : () -> ()
    %cst_28 = arith.constant dense<0.000000e+00> : vector<1x8x8xf32>
    %82 = tpu.matmul %81, %70, %cst_28 {dimension_numbers = #tpu.dot_dimension_numbers<[2], [1], [1], [2], [0, 0, 0, 1, 1, 2], [0], [0]>} : vector<1x8x8xf32>, vector<1x8x8xf32>, vector<1x8x8xf32> -> vector<1x8x8xf32>
    "tpu.trace_stop"() : () -> ()
    %83 = tpu.concatenate %31, %48, %65, %82 in 2 : vector<1x8x8xf32>, vector<1x8x8xf32>, vector<1x8x8xf32>, vector<1x8x8xf32> -> vector<1x8x32xf32>
    %84 = vector.shape_cast %83 : vector<1x8x32xf32> to vector<8x32xf32>
    %c0_29 = arith.constant 0 : index
    %c0_30 = arith.constant 0 : index
    %85 = vector.load %arg5[%c0_29, %c0_30] : memref<32x32xf32, #tpu.memory_space<vmem>>, vector<32x32xf32>
    %cst_31 = arith.constant dense<0.000000e+00> : vector<8x32xf32>
    %86 = tpu.matmul %84, %85, %cst_31 {dimension_numbers = #tpu.dot_dimension_numbers<[1], [0], [0], [1], [0, 0, 1, 1], [], []>} : vector<8x32xf32>, vector<32x32xf32>, vector<8x32xf32> -> vector<8x32xf32>
    %c0_32 = arith.constant 0 : index
    %c0_33 = arith.constant 0 : index
    %87 = vector.load %arg6[%c0_32, %c0_33] : memref<1x32xf32, #tpu.memory_space<vmem>>, vector<1x32xf32>
    %88 = vector.broadcast %87 : vector<1x32xf32> to vector<8x32xf32>
    %89 = arith.addf %86, %88 : vector<8x32xf32>
    %c0_34 = arith.constant 0 : index
    %c0_35 = arith.constant 0 : index
    %90 = vector.load %arg7[%c0_34, %c0_35] : memref<1x32xf32, #tpu.memory_space<vmem>>, vector<1x32xf32>
    %c0_36 = arith.constant 0 : index
    %c0_37 = arith.constant 0 : index
    %91 = vector.load %arg8[%c0_36, %c0_37] : memref<1x32xf32, #tpu.memory_space<vmem>>, vector<1x32xf32>
    %92 = arith.addf %89, %1 : vector<8x32xf32>
    %cst_38 = arith.constant dense<0.000000e+00> : vector<8xf32>
    %93 = vector.multi_reduction <add>, %92, %cst_38 [1] : vector<8x32xf32> to vector<8xf32>
    %94 = vector.shape_cast %93 : vector<8xf32> to vector<8x1xf32>
    %cst_39 = arith.constant 3.200000e+01 : f32
    %95 = vector.broadcast %cst_39 : f32 to vector<8x1xf32>
    %96 = arith.divf %94, %95 : vector<8x1xf32>
    %97 = vector.broadcast %96 : vector<8x1xf32> to vector<8x32xf32>
    %98 = arith.subf %92, %97 : vector<8x32xf32>
    %99 = arith.mulf %98, %98 : vector<8x32xf32>
    %cst_40 = arith.constant dense<0.000000e+00> : vector<8xf32>
    %100 = vector.multi_reduction <add>, %99, %cst_40 [1] : vector<8x32xf32> to vector<8xf32>
    %101 = vector.shape_cast %100 : vector<8xf32> to vector<8x1xf32>
    %cst_41 = arith.constant 3.200000e+01 : f32
    %102 = vector.broadcast %cst_41 : f32 to vector<8x1xf32>
    %103 = arith.divf %101, %102 : vector<8x1xf32>
    %104 = vector.broadcast %96 : vector<8x1xf32> to vector<8x32xf32>
    %105 = arith.subf %92, %104 : vector<8x32xf32>
    %cst_42 = arith.constant 9.99999974E-6 : f32
    %106 = vector.broadcast %cst_42 : f32 to vector<8x1xf32>
    %107 = arith.addf %103, %106 : vector<8x1xf32>
    %108 = math.rsqrt %107 : vector<8x1xf32>
    %109 = vector.broadcast %108 : vector<8x1xf32> to vector<8x32xf32>
    %110 = arith.mulf %105, %109 : vector<8x32xf32>
    %111 = vector.broadcast %90 : vector<1x32xf32> to vector<8x32xf32>
    %112 = arith.mulf %110, %111 : vector<8x32xf32>
    %113 = vector.broadcast %91 : vector<1x32xf32> to vector<8x32xf32>
    %114 = arith.addf %112, %113 : vector<8x32xf32>
    %c0_43 = arith.constant 0 : index
    %c0_44 = arith.constant 0 : index
    %115 = vector.load %arg9[%c0_43, %c0_44] : memref<32x32xf32, #tpu.memory_space<vmem>>, vector<32x32xf32>
    %cst_45 = arith.constant dense<0.000000e+00> : vector<8x32xf32>
    %116 = tpu.matmul %114, %115, %cst_45 {dimension_numbers = #tpu.dot_dimension_numbers<[1], [0], [0], [1], [0, 0, 1, 1], [], []>} : vector<8x32xf32>, vector<32x32xf32>, vector<8x32xf32> -> vector<8x32xf32>
    %c0_46 = arith.constant 0 : index
    %c0_47 = arith.constant 0 : index
    %117 = vector.load %arg10[%c0_46, %c0_47] : memref<1x32xf32, #tpu.memory_space<vmem>>, vector<1x32xf32>
    %118 = vector.broadcast %117 : vector<1x32xf32> to vector<8x32xf32>
    %119 = arith.addf %116, %118 : vector<8x32xf32>
    %120 = vector.shape_cast %119 : vector<8x32xf32> to vector<1x8x32xf32>
    %c0_48 = arith.constant 0 : index
    %c0_49 = arith.constant 0 : index
    %121 = vector.load %arg11[%c0_48, %c0_49] : memref<32x64xf32, #tpu.memory_space<vmem>>, vector<32x64xf32>
    %cst_50 = arith.constant dense<0.000000e+00> : vector<16x64xf32>
    %122 = tpu.matmul %3, %121, %cst_50 {dimension_numbers = #tpu.dot_dimension_numbers<[1], [0], [0], [1], [0, 0, 1, 1], [], []>} : vector<16x32xf32>, vector<32x64xf32>, vector<16x64xf32> -> vector<16x64xf32>
    %c0_51 = arith.constant 0 : index
    %c0_52 = arith.constant 0 : index
    %123 = vector.load %arg12[%c0_51, %c0_52] : memref<1x64xf32, #tpu.memory_space<vmem>>, vector<1x64xf32>
    %124 = vector.broadcast %123 : vector<1x64xf32> to vector<16x64xf32>
    %125 = arith.addf %122, %124 : vector<16x64xf32>
    %126 = vector.extract_strided_slice %125 {offsets = [0, 0], sizes = [16, 32], strides = [1, 1]} : vector<16x64xf32> to vector<16x32xf32>
    %127 = vector.shape_cast %126 : vector<16x32xf32> to vector<1x16x32xf32>
    %128 = vector.extract_strided_slice %125 {offsets = [0, 32], sizes = [16, 32], strides = [1, 1]} : vector<16x64xf32> to vector<16x32xf32>
    %129 = vector.shape_cast %128 : vector<16x32xf32> to vector<1x16x32xf32>
    %130 = vector.extract_strided_slice %120 {offsets = [0, 0, 0], sizes = [1, 8, 8], strides = [1, 1, 1]} : vector<1x8x32xf32> to vector<1x8x8xf32>
    %cst_53 = arith.constant 0.353553385 : f32
    %131 = vector.broadcast %cst_53 : f32 to vector<1x8x8xf32>
    %132 = arith.mulf %130, %131 : vector<1x8x8xf32>
    %133 = vector.extract_strided_slice %127 {offsets = [0, 0, 0], sizes = [1, 16, 8], strides = [1, 1, 1]} : vector<1x16x32xf32> to vector<1x16x8xf32>
    %134 = vector.extract_strided_slice %129 {offsets = [0, 0, 0], sizes = [1, 16, 8], strides = [1, 1, 1]} : vector<1x16x32xf32> to vector<1x16x8xf32>
    "tpu.trace_start"() <{level = 10 : i32, message = "bqd,bkd->bqk"}> : () -> ()
    %cst_54 = arith.constant dense<0.000000e+00> : vector<1x8x16xf32>
    %135 = tpu.matmul %132, %133, %cst_54 {dimension_numbers = #tpu.dot_dimension_numbers<[2], [2], [1], [1], [0, 0, 0, 1, 1, 1], [0], [0]>} : vector<1x8x8xf32>, vector<1x16x8xf32>, vector<1x8x16xf32> -> vector<1x8x16xf32>
    "tpu.trace_stop"() : () -> ()
    %cst_55 = arith.constant dense<0xFF800000> : vector<1x8xf32>
    %136 = vector.multi_reduction <maximumf>, %135, %cst_55 [2] : vector<1x8x16xf32> to vector<1x8xf32>
    %137 = vector.shape_cast %136 : vector<1x8xf32> to vector<1x8x1xf32>
    %138 = vector.broadcast %137 : vector<1x8x1xf32> to vector<1x8x16xf32>
    %139 = arith.subf %135, %138 : vector<1x8x16xf32>
    %140 = math.exp %139 : vector<1x8x16xf32>
    %cst_56 = arith.constant dense<0.000000e+00> : vector<1x8xf32>
    %141 = vector.multi_reduction <add>, %140, %cst_56 [2] : vector<1x8x16xf32> to vector<1x8xf32>
    %142 = vector.shape_cast %141 : vector<1x8xf32> to vector<1x8x1xf32>
    %143 = tpu.reciprocal %142 {approx = true} : vector<1x8x1xf32> -> vector<1x8x1xf32>
    %144 = vector.broadcast %143 : vector<1x8x1xf32> to vector<1x8x16xf32>
    %145 = arith.mulf %140, %144 : vector<1x8x16xf32>
    "tpu.trace_start"() <{level = 10 : i32, message = "bqk,bkd->bqd"}> : () -> ()
    %cst_57 = arith.constant dense<0.000000e+00> : vector<1x8x8xf32>
    %146 = tpu.matmul %145, %134, %cst_57 {dimension_numbers = #tpu.dot_dimension_numbers<[2], [1], [1], [2], [0, 0, 0, 1, 1, 2], [0], [0]>} : vector<1x8x16xf32>, vector<1x16x8xf32>, vector<1x8x8xf32> -> vector<1x8x8xf32>
    "tpu.trace_stop"() : () -> ()
    %147 = vector.extract_strided_slice %120 {offsets = [0, 0, 8], sizes = [1, 8, 8], strides = [1, 1, 1]} : vector<1x8x32xf32> to vector<1x8x8xf32>
    %cst_58 = arith.constant 0.353553385 : f32
    %148 = vector.broadcast %cst_58 : f32 to vector<1x8x8xf32>
    %149 = arith.mulf %147, %148 : vector<1x8x8xf32>
    %150 = vector.extract_strided_slice %127 {offsets = [0, 0, 8], sizes = [1, 16, 8], strides = [1, 1, 1]} : vector<1x16x32xf32> to vector<1x16x8xf32>
    %151 = vector.extract_strided_slice %129 {offsets = [0, 0, 8], sizes = [1, 16, 8], strides = [1, 1, 1]} : vector<1x16x32xf32> to vector<1x16x8xf32>
    "tpu.trace_start"() <{level = 10 : i32, message = "bqd,bkd->bqk"}> : () -> ()
    %cst_59 = arith.constant dense<0.000000e+00> : vector<1x8x16xf32>
    %152 = tpu.matmul %149, %150, %cst_59 {dimension_numbers = #tpu.dot_dimension_numbers<[2], [2], [1], [1], [0, 0, 0, 1, 1, 1], [0], [0]>} : vector<1x8x8xf32>, vector<1x16x8xf32>, vector<1x8x16xf32> -> vector<1x8x16xf32>
    "tpu.trace_stop"() : () -> ()
    %cst_60 = arith.constant dense<0xFF800000> : vector<1x8xf32>
    %153 = vector.multi_reduction <maximumf>, %152, %cst_60 [2] : vector<1x8x16xf32> to vector<1x8xf32>
    %154 = vector.shape_cast %153 : vector<1x8xf32> to vector<1x8x1xf32>
    %155 = vector.broadcast %154 : vector<1x8x1xf32> to vector<1x8x16xf32>
    %156 = arith.subf %152, %155 : vector<1x8x16xf32>
    %157 = math.exp %156 : vector<1x8x16xf32>
    %cst_61 = arith.constant dense<0.000000e+00> : vector<1x8xf32>
    %158 = vector.multi_reduction <add>, %157, %cst_61 [2] : vector<1x8x16xf32> to vector<1x8xf32>
    %159 = vector.shape_cast %158 : vector<1x8xf32> to vector<1x8x1xf32>
    %160 = tpu.reciprocal %159 {approx = true} : vector<1x8x1xf32> -> vector<1x8x1xf32>
    %161 = vector.broadcast %160 : vector<1x8x1xf32> to vector<1x8x16xf32>
    %162 = arith.mulf %157, %161 : vector<1x8x16xf32>
    "tpu.trace_start"() <{level = 10 : i32, message = "bqk,bkd->bqd"}> : () -> ()
    %cst_62 = arith.constant dense<0.000000e+00> : vector<1x8x8xf32>
    %163 = tpu.matmul %162, %151, %cst_62 {dimension_numbers = #tpu.dot_dimension_numbers<[2], [1], [1], [2], [0, 0, 0, 1, 1, 2], [0], [0]>} : vector<1x8x16xf32>, vector<1x16x8xf32>, vector<1x8x8xf32> -> vector<1x8x8xf32>
    "tpu.trace_stop"() : () -> ()
    %164 = vector.extract_strided_slice %120 {offsets = [0, 0, 16], sizes = [1, 8, 8], strides = [1, 1, 1]} : vector<1x8x32xf32> to vector<1x8x8xf32>
    %cst_63 = arith.constant 0.353553385 : f32
    %165 = vector.broadcast %cst_63 : f32 to vector<1x8x8xf32>
    %166 = arith.mulf %164, %165 : vector<1x8x8xf32>
    %167 = vector.extract_strided_slice %127 {offsets = [0, 0, 16], sizes = [1, 16, 8], strides = [1, 1, 1]} : vector<1x16x32xf32> to vector<1x16x8xf32>
    %168 = vector.extract_strided_slice %129 {offsets = [0, 0, 16], sizes = [1, 16, 8], strides = [1, 1, 1]} : vector<1x16x32xf32> to vector<1x16x8xf32>
    "tpu.trace_start"() <{level = 10 : i32, message = "bqd,bkd->bqk"}> : () -> ()
    %cst_64 = arith.constant dense<0.000000e+00> : vector<1x8x16xf32>
    %169 = tpu.matmul %166, %167, %cst_64 {dimension_numbers = #tpu.dot_dimension_numbers<[2], [2], [1], [1], [0, 0, 0, 1, 1, 1], [0], [0]>} : vector<1x8x8xf32>, vector<1x16x8xf32>, vector<1x8x16xf32> -> vector<1x8x16xf32>
    "tpu.trace_stop"() : () -> ()
    %cst_65 = arith.constant dense<0xFF800000> : vector<1x8xf32>
    %170 = vector.multi_reduction <maximumf>, %169, %cst_65 [2] : vector<1x8x16xf32> to vector<1x8xf32>
    %171 = vector.shape_cast %170 : vector<1x8xf32> to vector<1x8x1xf32>
    %172 = vector.broadcast %171 : vector<1x8x1xf32> to vector<1x8x16xf32>
    %173 = arith.subf %169, %172 : vector<1x8x16xf32>
    %174 = math.exp %173 : vector<1x8x16xf32>
    %cst_66 = arith.constant dense<0.000000e+00> : vector<1x8xf32>
    %175 = vector.multi_reduction <add>, %174, %cst_66 [2] : vector<1x8x16xf32> to vector<1x8xf32>
    %176 = vector.shape_cast %175 : vector<1x8xf32> to vector<1x8x1xf32>
    %177 = tpu.reciprocal %176 {approx = true} : vector<1x8x1xf32> -> vector<1x8x1xf32>
    %178 = vector.broadcast %177 : vector<1x8x1xf32> to vector<1x8x16xf32>
    %179 = arith.mulf %174, %178 : vector<1x8x16xf32>
    "tpu.trace_start"() <{level = 10 : i32, message = "bqk,bkd->bqd"}> : () -> ()
    %cst_67 = arith.constant dense<0.000000e+00> : vector<1x8x8xf32>
    %180 = tpu.matmul %179, %168, %cst_67 {dimension_numbers = #tpu.dot_dimension_numbers<[2], [1], [1], [2], [0, 0, 0, 1, 1, 2], [0], [0]>} : vector<1x8x16xf32>, vector<1x16x8xf32>, vector<1x8x8xf32> -> vector<1x8x8xf32>
    "tpu.trace_stop"() : () -> ()
    %181 = vector.extract_strided_slice %120 {offsets = [0, 0, 24], sizes = [1, 8, 8], strides = [1, 1, 1]} : vector<1x8x32xf32> to vector<1x8x8xf32>
    %cst_68 = arith.constant 0.353553385 : f32
    %182 = vector.broadcast %cst_68 : f32 to vector<1x8x8xf32>
    %183 = arith.mulf %181, %182 : vector<1x8x8xf32>
    %184 = vector.extract_strided_slice %127 {offsets = [0, 0, 24], sizes = [1, 16, 8], strides = [1, 1, 1]} : vector<1x16x32xf32> to vector<1x16x8xf32>
    %185 = vector.extract_strided_slice %129 {offsets = [0, 0, 24], sizes = [1, 16, 8], strides = [1, 1, 1]} : vector<1x16x32xf32> to vector<1x16x8xf32>
    "tpu.trace_start"() <{level = 10 : i32, message = "bqd,bkd->bqk"}> : () -> ()
    %cst_69 = arith.constant dense<0.000000e+00> : vector<1x8x16xf32>
    %186 = tpu.matmul %183, %184, %cst_69 {dimension_numbers = #tpu.dot_dimension_numbers<[2], [2], [1], [1], [0, 0, 0, 1, 1, 1], [0], [0]>} : vector<1x8x8xf32>, vector<1x16x8xf32>, vector<1x8x16xf32> -> vector<1x8x16xf32>
    "tpu.trace_stop"() : () -> ()
    %cst_70 = arith.constant dense<0xFF800000> : vector<1x8xf32>
    %187 = vector.multi_reduction <maximumf>, %186, %cst_70 [2] : vector<1x8x16xf32> to vector<1x8xf32>
    %188 = vector.shape_cast %187 : vector<1x8xf32> to vector<1x8x1xf32>
    %189 = vector.broadcast %188 : vector<1x8x1xf32> to vector<1x8x16xf32>
    %190 = arith.subf %186, %189 : vector<1x8x16xf32>
    %191 = math.exp %190 : vector<1x8x16xf32>
    %cst_71 = arith.constant dense<0.000000e+00> : vector<1x8xf32>
    %192 = vector.multi_reduction <add>, %191, %cst_71 [2] : vector<1x8x16xf32> to vector<1x8xf32>
    %193 = vector.shape_cast %192 : vector<1x8xf32> to vector<1x8x1xf32>
    %194 = tpu.reciprocal %193 {approx = true} : vector<1x8x1xf32> -> vector<1x8x1xf32>
    %195 = vector.broadcast %194 : vector<1x8x1xf32> to vector<1x8x16xf32>
    %196 = arith.mulf %191, %195 : vector<1x8x16xf32>
    "tpu.trace_start"() <{level = 10 : i32, message = "bqk,bkd->bqd"}> : () -> ()
    %cst_72 = arith.constant dense<0.000000e+00> : vector<1x8x8xf32>
    %197 = tpu.matmul %196, %185, %cst_72 {dimension_numbers = #tpu.dot_dimension_numbers<[2], [1], [1], [2], [0, 0, 0, 1, 1, 2], [0], [0]>} : vector<1x8x16xf32>, vector<1x16x8xf32>, vector<1x8x8xf32> -> vector<1x8x8xf32>
    "tpu.trace_stop"() : () -> ()
    %198 = tpu.concatenate %146, %163, %180, %197 in 2 : vector<1x8x8xf32>, vector<1x8x8xf32>, vector<1x8x8xf32>, vector<1x8x8xf32> -> vector<1x8x32xf32>
    %199 = vector.shape_cast %198 : vector<1x8x32xf32> to vector<8x32xf32>
    %c0_73 = arith.constant 0 : index
    %c0_74 = arith.constant 0 : index
    %200 = vector.load %arg13[%c0_73, %c0_74] : memref<32x32xf32, #tpu.memory_space<vmem>>, vector<32x32xf32>
    %cst_75 = arith.constant dense<0.000000e+00> : vector<8x32xf32>
    %201 = tpu.matmul %199, %200, %cst_75 {dimension_numbers = #tpu.dot_dimension_numbers<[1], [0], [0], [1], [0, 0, 1, 1], [], []>} : vector<8x32xf32>, vector<32x32xf32>, vector<8x32xf32> -> vector<8x32xf32>
    %c0_76 = arith.constant 0 : index
    %c0_77 = arith.constant 0 : index
    %202 = vector.load %arg14[%c0_76, %c0_77] : memref<1x32xf32, #tpu.memory_space<vmem>>, vector<1x32xf32>
    %203 = vector.broadcast %202 : vector<1x32xf32> to vector<8x32xf32>
    %204 = arith.addf %201, %203 : vector<8x32xf32>
    %c0_78 = arith.constant 0 : index
    %c0_79 = arith.constant 0 : index
    %205 = vector.load %arg15[%c0_78, %c0_79] : memref<1x32xf32, #tpu.memory_space<vmem>>, vector<1x32xf32>
    %c0_80 = arith.constant 0 : index
    %c0_81 = arith.constant 0 : index
    %206 = vector.load %arg16[%c0_80, %c0_81] : memref<1x32xf32, #tpu.memory_space<vmem>>, vector<1x32xf32>
    %207 = arith.addf %204, %114 : vector<8x32xf32>
    %cst_82 = arith.constant dense<0.000000e+00> : vector<8xf32>
    %208 = vector.multi_reduction <add>, %207, %cst_82 [1] : vector<8x32xf32> to vector<8xf32>
    %209 = vector.shape_cast %208 : vector<8xf32> to vector<8x1xf32>
    %cst_83 = arith.constant 3.200000e+01 : f32
    %210 = vector.broadcast %cst_83 : f32 to vector<8x1xf32>
    %211 = arith.divf %209, %210 : vector<8x1xf32>
    %212 = vector.broadcast %211 : vector<8x1xf32> to vector<8x32xf32>
    %213 = arith.subf %207, %212 : vector<8x32xf32>
    %214 = arith.mulf %213, %213 : vector<8x32xf32>
    %cst_84 = arith.constant dense<0.000000e+00> : vector<8xf32>
    %215 = vector.multi_reduction <add>, %214, %cst_84 [1] : vector<8x32xf32> to vector<8xf32>
    %216 = vector.shape_cast %215 : vector<8xf32> to vector<8x1xf32>
    %cst_85 = arith.constant 3.200000e+01 : f32
    %217 = vector.broadcast %cst_85 : f32 to vector<8x1xf32>
    %218 = arith.divf %216, %217 : vector<8x1xf32>
    %219 = vector.broadcast %211 : vector<8x1xf32> to vector<8x32xf32>
    %220 = arith.subf %207, %219 : vector<8x32xf32>
    %cst_86 = arith.constant 9.99999974E-6 : f32
    %221 = vector.broadcast %cst_86 : f32 to vector<8x1xf32>
    %222 = arith.addf %218, %221 : vector<8x1xf32>
    %223 = math.rsqrt %222 : vector<8x1xf32>
    %224 = vector.broadcast %223 : vector<8x1xf32> to vector<8x32xf32>
    %225 = arith.mulf %220, %224 : vector<8x32xf32>
    %226 = vector.broadcast %205 : vector<1x32xf32> to vector<8x32xf32>
    %227 = arith.mulf %225, %226 : vector<8x32xf32>
    %228 = vector.broadcast %206 : vector<1x32xf32> to vector<8x32xf32>
    %229 = arith.addf %227, %228 : vector<8x32xf32>
    %c0_87 = arith.constant 0 : index
    %c0_88 = arith.constant 0 : index
    %230 = vector.load %arg17[%c0_87, %c0_88] : memref<32x128xf32, #tpu.memory_space<vmem>>, vector<32x128xf32>
    %cst_89 = arith.constant dense<0.000000e+00> : vector<8x128xf32>
    %231 = tpu.matmul %229, %230, %cst_89 {dimension_numbers = #tpu.dot_dimension_numbers<[1], [0], [0], [1], [0, 0, 1, 1], [], []>} : vector<8x32xf32>, vector<32x128xf32>, vector<8x128xf32> -> vector<8x128xf32>
    %c0_90 = arith.constant 0 : index
    %c0_91 = arith.constant 0 : index
    %232 = vector.load %arg18[%c0_90, %c0_91] : memref<1x128xf32, #tpu.memory_space<vmem>>, vector<1x128xf32>
    %233 = vector.broadcast %232 : vector<1x128xf32> to vector<8x128xf32>
    %234 = arith.addf %231, %233 : vector<8x128xf32>
    %cst_92 = arith.constant 0.000000e+00 : f32
    %235 = vector.broadcast %cst_92 : f32 to vector<8x128xf32>
    %236 = arith.maximumf %234, %235 : vector<8x128xf32>
    %c0_93 = arith.constant 0 : index
    %c0_94 = arith.constant 0 : index
    %237 = vector.load %arg19[%c0_93, %c0_94] : memref<128x32xf32, #tpu.memory_space<vmem>>, vector<128x32xf32>
    %cst_95 = arith.constant dense<0.000000e+00> : vector<8x32xf32>
    %238 = tpu.matmul %236, %237, %cst_95 {dimension_numbers = #tpu.dot_dimension_numbers<[1], [0], [0], [1], [0, 0, 1, 1], [], []>} : vector<8x128xf32>, vector<128x32xf32>, vector<8x32xf32> -> vector<8x32xf32>
    %c0_96 = arith.constant 0 : index
    %c0_97 = arith.constant 0 : index
    %239 = vector.load %arg20[%c0_96, %c0_97] : memref<1x32xf32, #tpu.memory_space<vmem>>, vector<1x32xf32>
    %240 = vector.broadcast %239 : vector<1x32xf32> to vector<8x32xf32>
    %241 = arith.addf %238, %240 : vector<8x32xf32>
    %c0_98 = arith.constant 0 : index
    %c0_99 = arith.constant 0 : index
    %242 = vector.load %arg21[%c0_98, %c0_99] : memref<1x32xf32, #tpu.memory_space<vmem>>, vector<1x32xf32>
    %c0_100 = arith.constant 0 : index
    %c0_101 = arith.constant 0 : index
    %243 = vector.load %arg22[%c0_100, %c0_101] : memref<1x32xf32, #tpu.memory_space<vmem>>, vector<1x32xf32>
    %244 = arith.addf %241, %229 : vector<8x32xf32>
    %cst_102 = arith.constant dense<0.000000e+00> : vector<8xf32>
    %245 = vector.multi_reduction <add>, %244, %cst_102 [1] : vector<8x32xf32> to vector<8xf32>
    %246 = vector.shape_cast %245 : vector<8xf32> to vector<8x1xf32>
    %cst_103 = arith.constant 3.200000e+01 : f32
    %247 = vector.broadcast %cst_103 : f32 to vector<8x1xf32>
    %248 = arith.divf %246, %247 : vector<8x1xf32>
    %249 = vector.broadcast %248 : vector<8x1xf32> to vector<8x32xf32>
    %250 = arith.subf %244, %249 : vector<8x32xf32>
    %251 = arith.mulf %250, %250 : vector<8x32xf32>
    %cst_104 = arith.constant dense<0.000000e+00> : vector<8xf32>
    %252 = vector.multi_reduction <add>, %251, %cst_104 [1] : vector<8x32xf32> to vector<8xf32>
    %253 = vector.shape_cast %252 : vector<8xf32> to vector<8x1xf32>
    %cst_105 = arith.constant 3.200000e+01 : f32
    %254 = vector.broadcast %cst_105 : f32 to vector<8x1xf32>
    %255 = arith.divf %253, %254 : vector<8x1xf32>
    %256 = vector.broadcast %248 : vector<8x1xf32> to vector<8x32xf32>
    %257 = arith.subf %244, %256 : vector<8x32xf32>
    %cst_106 = arith.constant 9.99999974E-6 : f32
    %258 = vector.broadcast %cst_106 : f32 to vector<8x1xf32>
    %259 = arith.addf %255, %258 : vector<8x1xf32>
    %260 = math.rsqrt %259 : vector<8x1xf32>
    %261 = vector.broadcast %260 : vector<8x1xf32> to vector<8x32xf32>
    %262 = arith.mulf %257, %261 : vector<8x32xf32>
    %263 = vector.broadcast %242 : vector<1x32xf32> to vector<8x32xf32>
    %264 = arith.mulf %262, %263 : vector<8x32xf32>
    %265 = vector.broadcast %243 : vector<1x32xf32> to vector<8x32xf32>
    %266 = arith.addf %264, %265 : vector<8x32xf32>
    %267 = vector.shape_cast %266 : vector<8x32xf32> to vector<1x8x32xf32>
    %c0_107 = arith.constant 0 : index
    %c0_108 = arith.constant 0 : index
    %c0_109 = arith.constant 0 : index
    %268 = vector.load %arg23[%c0_107, %c0_108, %c0_109] : memref<1x8x32xf32, #tpu.memory_space<vmem>>, vector<1x8x32xf32>
    tpu.vector_store %arg23[%c0_107, %c0_108, %c0_109], %267 {strides = array<i32>} : memref<1x8x32xf32, #tpu.memory_space<vmem>>, vector<1x8x32xf32>,
    return
  }
  func.func @transform_0(%arg0: i32) -> (i32, i32, i32) {
    %c0_i32 = arith.constant 0 : i32
    %c0_i32_0 = arith.constant 0 : i32
    %c0_i32_1 = arith.constant 0 : i32
    return %arg0, %c0_i32, %c0_i32_0 : i32, i32, i32
  }
  func.func @transform_1(%arg0: i32) -> (i32, i32, i32) {
    %c0_i32 = arith.constant 0 : i32
    %c0_i32_0 = arith.constant 0 : i32
    %c0_i32_1 = arith.constant 0 : i32
    return %arg0, %c0_i32, %c0_i32_0 : i32, i32, i32
  }
  func.func @transform_2(%arg0: i32) -> (i32, i32) {
    %c0_i32 = arith.constant 0 : i32
    %c0_i32_0 = arith.constant 0 : i32
    %c0_i32_1 = arith.constant 0 : i32
    return %c0_i32, %c0_i32_0 : i32, i32
  }
  func.func @transform_3(%arg0: i32) -> (i32, i32) {
    %c0_i32 = arith.constant 0 : i32
    %c0_i32_0 = arith.constant 0 : i32
    %c0_i32_1 = arith.constant 0 : i32
    return %c0_i32, %c0_i32_0 : i32, i32
  }
  func.func @transform_4(%arg0: i32) -> (i32, i32) {
    %c0_i32 = arith.constant 0 : i32
    %c0_i32_0 = arith.constant 0 : i32
    %c0_i32_1 = arith.constant 0 : i32
    return %c0_i32, %c0_i32_0 : i32, i32
  }
  func.func @transform_5(%arg0: i32) -> (i32, i32) {
    %c0_i32 = arith.constant 0 : i32
    %c0_i32_0 = arith.constant 0 : i32
    %c0_i32_1 = arith.constant 0 : i32
    return %c0_i32, %c0_i32_0 : i32, i32
  }
  func.func @transform_6(%arg0: i32) -> (i32, i32) {
    %c0_i32 = arith.constant 0 : i32
    %c0_i32_0 = arith.constant 0 : i32
    %c0_i32_1 = arith.constant 0 : i32
    return %c0_i32, %c0_i32_0 : i32, i32
  }
  func.func @transform_7(%arg0: i32) -> (i32, i32) {
    %c0_i32 = arith.constant 0 : i32
    %c0_i32_0 = arith.constant 0 : i32
    %c0_i32_1 = arith.constant 0 : i32
    return %c0_i32, %c0_i32_0 : i32, i32
  }
  func.func @transform_8(%arg0: i32) -> (i32, i32) {
    %c0_i32 = arith.constant 0 : i32
    %c0_i32_0 = arith.constant 0 : i32
    %c0_i32_1 = arith.constant 0 : i32
    return %c0_i32, %c0_i32_0 : i32, i32
  }
  func.func @transform_9(%arg0: i32) -> (i32, i32) {
    %c0_i32 = arith.constant 0 : i32
    %c0_i32_0 = arith.constant 0 : i32
    %c0_i32_1 = arith.constant 0 : i32
    return %c0_i32, %c0_i32_0 : i32, i32
  }
  func.func @transform_10(%arg0: i32) -> (i32, i32) {
    %c0_i32 = arith.constant 0 : i32
    %c0_i32_0 = arith.constant 0 : i32
    %c0_i32_1 = arith.constant 0 : i32
    return %c0_i32, %c0_i32_0 : i32, i32
  }
  func.func @transform_11(%arg0: i32) -> (i32, i32) {
    %c0_i32 = arith.constant 0 : i32
    %c0_i32_0 = arith.constant 0 : i32
    %c0_i32_1 = arith.constant 0 : i32
    return %c0_i32, %c0_i32_0 : i32, i32
  }
  func.func @transform_12(%arg0: i32) -> (i32, i32) {
    %c0_i32 = arith.constant 0 : i32
    %c0_i32_0 = arith.constant 0 : i32
    %c0_i32_1 = arith.constant 0 : i32
    return %c0_i32, %c0_i32_0 : i32, i32
  }
  func.func @transform_13(%arg0: i32) -> (i32, i32) {
    %c0_i32 = arith.constant 0 : i32
    %c0_i32_0 = arith.constant 0 : i32
    %c0_i32_1 = arith.constant 0 : i32
    return %c0_i32, %c0_i32_0 : i32, i32
  }
  func.func @transform_14(%arg0: i32) -> (i32, i32) {
    %c0_i32 = arith.constant 0 : i32
    %c0_i32_0 = arith.constant 0 : i32
    %c0_i32_1 = arith.constant 0 : i32
    return %c0_i32, %c0_i32_0 : i32, i32
  }
  func.func @transform_15(%arg0: i32) -> (i32, i32) {
    %c0_i32 = arith.constant 0 : i32
    %c0_i32_0 = arith.constant 0 : i32
    %c0_i32_1 = arith.constant 0 : i32
    return %c0_i32, %c0_i32_0 : i32, i32
  }
  func.func @transform_16(%arg0: i32) -> (i32, i32) {
    %c0_i32 = arith.constant 0 : i32
    %c0_i32_0 = arith.constant 0 : i32
    %c0_i32_1 = arith.constant 0 : i32
    return %c0_i32, %c0_i32_0 : i32, i32
  }
  func.func @transform_17(%arg0: i32) -> (i32, i32) {
    %c0_i32 = arith.constant 0 : i32
    %c0_i32_0 = arith.constant 0 : i32
    %c0_i32_1 = arith.constant 0 : i32
    return %c0_i32, %c0_i32_0 : i32, i32
  }
  func.func @transform_18(%arg0: i32) -> (i32, i32) {
    %c0_i32 = arith.constant 0 : i32
    %c0_i32_0 = arith.constant 0 : i32
    %c0_i32_1 = arith.constant 0 : i32
    return %c0_i32, %c0_i32_0 : i32, i32
  }
  func.func @transform_19(%arg0: i32) -> (i32, i32) {
    %c0_i32 = arith.constant 0 : i32
    %c0_i32_0 = arith.constant 0 : i32
    %c0_i32_1 = arith.constant 0 : i32
    return %c0_i32, %c0_i32_0 : i32, i32
  }
  func.func @transform_20(%arg0: i32) -> (i32, i32) {
    %c0_i32 = arith.constant 0 : i32
    %c0_i32_0 = arith.constant 0 : i32
    %c0_i32_1 = arith.constant 0 : i32
    return %c0_i32, %c0_i32_0 : i32, i32
  }
  func.func @transform_21(%arg0: i32) -> (i32, i32) {
    %c0_i32 = arith.constant 0 : i32
    %c0_i32_0 = arith.constant 0 : i32
    %c0_i32_1 = arith.constant 0 : i32
    return %c0_i32, %c0_i32_0 : i32, i32
  }
  func.func @transform_22(%arg0: i32) -> (i32, i32, i32) {
    %c0_i32 = arith.constant 0 : i32
    %c0_i32_0 = arith.constant 0 : i32
    %c0_i32_1 = arith.constant 0 : i32
    return %arg0, %c0_i32, %c0_i32_0 : i32, i32, i32
  }
}

module attributes {stable_mosaic.version = 11 : i64} {
  func.func @_heads_kernel(%arg0: i32, %arg1: memref<32x32xf32, #tpu.memory_space<vmem>>, %arg2: memref<32x16xf32, #tpu.memory_space<vmem>>, %arg3: memref<1x16xf32, #tpu.memory_space<vmem>>, %arg4: memref<32x16xf32, #tpu.memory_space<vmem>>) attributes {dimension_semantics = [#tpu.dimension_semantics<arbitrary>], iteration_bounds = array<i64: 1>, scalar_prefetch = 0 : i64, scratch_operands = 0 : i64, tpu.core_type = #tpu.core_type<tc>, window_params = [{pipeline_mode = #tpu.pipeline_mode<synchronous>, transform_indices = @transform_0, window_bounds = array<i64: 32, 32>}, {pipeline_mode = #tpu.pipeline_mode<synchronous>, transform_indices = @transform_1, window_bounds = array<i64: 32, 16>}, {pipeline_mode = #tpu.pipeline_mode<synchronous>, transform_indices = @transform_2, window_bounds = array<i64: 1, 16>}, {pipeline_mode = #tpu.pipeline_mode<synchronous>, transform_indices = @transform_3, window_bounds = array<i64: 32, 16>}]} {
    %c0 = arith.constant 0 : index
    %c0_0 = arith.constant 0 : index
    %0 = vector.load %arg1[%c0, %c0_0] : memref<32x32xf32, #tpu.memory_space<vmem>>, vector<32x32xf32>
    %c0_1 = arith.constant 0 : index
    %c0_2 = arith.constant 0 : index
    %1 = vector.load %arg2[%c0_1, %c0_2] : memref<32x16xf32, #tpu.memory_space<vmem>>, vector<32x16xf32>
    %cst = arith.constant dense<0.000000e+00> : vector<32x16xf32>
    %2 = tpu.matmul %0, %1, %cst {dimension_numbers = #tpu.dot_dimension_numbers<[1], [0], [0], [1], [0, 0, 1, 1], [], []>} : vector<32x32xf32>, vector<32x16xf32>, vector<32x16xf32> -> vector<32x16xf32>
    %c0_3 = arith.constant 0 : index
    %c0_4 = arith.constant 0 : index
    %3 = vector.load %arg3[%c0_3, %c0_4] : memref<1x16xf32, #tpu.memory_space<vmem>>, vector<1x16xf32>
    %4 = vector.broadcast %3 : vector<1x16xf32> to vector<32x16xf32>
    %5 = arith.addf %2, %4 : vector<32x16xf32>
    %c0_5 = arith.constant 0 : index
    %c0_6 = arith.constant 0 : index
    %6 = vector.load %arg4[%c0_5, %c0_6] : memref<32x16xf32, #tpu.memory_space<vmem>>, vector<32x16xf32>
    tpu.vector_store %arg4[%c0_5, %c0_6], %5 {strides = array<i32>} : memref<32x16xf32, #tpu.memory_space<vmem>>, vector<32x16xf32>,
    return
  }
  func.func @transform_0(%arg0: i32) -> (i32, i32) {
    %c0_i32 = arith.constant 0 : i32
    %c0_i32_0 = arith.constant 0 : i32
    %c0_i32_1 = arith.constant 0 : i32
    return %c0_i32, %c0_i32_0 : i32, i32
  }
  func.func @transform_1(%arg0: i32) -> (i32, i32) {
    %c0_i32 = arith.constant 0 : i32
    %c0_i32_0 = arith.constant 0 : i32
    %c0_i32_1 = arith.constant 0 : i32
    return %c0_i32, %c0_i32_0 : i32, i32
  }
  func.func @transform_2(%arg0: i32) -> (i32, i32) {
    %c0_i32 = arith.constant 0 : i32
    %c0_i32_0 = arith.constant 0 : i32
    %c0_i32_1 = arith.constant 0 : i32
    return %c0_i32, %c0_i32_0 : i32, i32
  }
  func.func @transform_3(%arg0: i32) -> (i32, i32) {
    %c0_i32 = arith.constant 0 : i32
    %c0_i32_0 = arith.constant 0 : i32
    %c0_i32_1 = arith.constant 0 : i32
    return %c0_i32, %c0_i32_0 : i32, i32
  }
}

</mosaic_0001>

<bundles_post_ra>
// kernel: detr_forward.6
= control target key start
LH: loop header
LB: loop body
LE: loop exit
PB: predicated region body
PF: predicated region fallthrough
CT: control target
= control target key end

     0   :  { %s528_s21 = smov 0   ;;  %s665_s0 = inlined_call_operand.vmem [shape: f32[2,16,192], index: 0, kind: input, shape index: {}]   ;;  %s666_s1 = inlined_call_operand.vmem [shape: f32[192,64], index: 1, kind: input, shape index: {}]   ;;  %s667_s2 = inlined_call_operand.vmem [shape: f32[1,64], index: 2, kind: input, shape index: {}]   ;;  %s668_s3 = inlined_call_operand.vmem [shape: f32[64,32], index: 3, kind: input, shape index: {}]   ;;  %s669_s4 = inlined_call_operand.vmem [shape: f32[1,32], index: 4, kind: input, shape index: {}]   ;;  %s670_s5 = inlined_call_operand.vmem [shape: f32[1,16,32], index: 5, kind: input, shape index: {}]   ;;  %s671_s6 = inlined_call_operand.vmem [shape: f32[2,16,32], index: 6, kind: output, shape index: {}]  }
   0x1 LB: > { %s442_s22 = sadd.s32 4294967295, %s491_s21   ;;  %p446_p0 = scmp.ge.s32.totalorder %s491_s21, 1  ;;  %s491_s21 = sphi %s528_s21, %s16_s21  }
   0x2   : > { %p212_p1 = scmp.lt.s32.totalorder %s491_s21, 3 }
   0x4   : > { %p213_p2 = pnand %p446_p0, %p212_p1 }
   0x5   : > { %p242_p3 = scmp.lt.s32.totalorder (!%p213_p2), %s442_s22, 1 }
   0x6   : > { %216 = sbr.rel (%p213_p2) target bundleno = 320 (0x140), region = 44 }
   0xb   : > { %v271_v0 = vld [vmem:[%s666_s1 + $0x78] sm:$0xff]  ;;  %v270_v1 = vld [vmem:[%s666_s1 + $0x70] sm:$0xff]  ;;  %v269_v2 = vld [vmem:[%s666_s1 + $0x68] sm:$0xff]  ;;  %s673_s22 = smov (!%p242_p3, %s442_s22), 1  ;;  %vm284_vm0 = vcmask 523264   ;;  %vm384_vm1 = vcmask 261120  }
   0xc   : > { %291 = vmatpush.msra.mxu0 %v271_v0  ;;  %459 = vmatpush.msra.mxu3 %v271_v0  ;;  %v279_v3 = vld [vmem:[%s666_s1 + $0xb8] sm:$0xff]  ;;  %v268_v4 = vld [vmem:[%s666_s1 + $0x60] sm:$0xff]  ;;  %v278_v5 = vld [vmem:[%s666_s1 + $0xb0] sm:$0xff]  ;;  %s457_s13 = sshll.u32 %s673_s22, 5  ;;  %s458_s29 = sshll.u32 %s673_s22, 4 }
   0xd   : > { %322 = vmatpush.msra.mxu1 %v279_v3  ;;  %v277_v6 = vld [vmem:[%s666_s1 + $0xa8] sm:$0xff]  ;;  %v267_v7 = vld [vmem:[%s666_s1 + $0x58] sm:$0xff]  ;;  %v276_v8 = vld [vmem:[%s666_s1 + $0xa0] sm:$0xff]  ;;  %s246_s26 = scalar_lea.vmem %s665_s0, %s457_s13  ;;  %s251_s10 = scalar_lea.vmem %s671_s6, %s458_s29 }
   0xe   : > { %292 = vmatpush.msra.mxu0 %v270_v1  ;;  %460 = vmatpush.msra.mxu3 %v270_v1  ;;  %v266_v9 = vld [vmem:[%s666_s1 + $0x50] sm:$0xff]  ;;  %v275_v10 = vld [vmem:[%s666_s1 + $0x98] sm:$0xff]  ;;  %v265_v13 = vld [vmem:[%s666_s1 + $0x48] sm:$0xff] }
   0xf   : > { %323 = vmatpush.msra.mxu1 %v278_v5  ;;  %v346_v11 = vld [vmem:[%s668_s3 + $0x38] sm:$0xff]  ;;  %v345_v12 = vld [vmem:[%s668_s3 + $0x30] sm:$0xff]  ;;  %v344_v15 = vld [vmem:[%s668_s3 + $0x28] sm:$0xff] }
  0x10   : > { %293 = vmatpush.msra.mxu0 %v269_v2  ;;  %461 = vmatpush.msra.mxu3 %v269_v2  ;;  %v274_v14 = vld [vmem:[%s666_s1 + $0x90] sm:$0xff]  ;;  %v264_v16 = vld [vmem:[%s666_s1 + $0x40] sm:$0xff]  ;;  %v273_v17 = vld [vmem:[%s666_s1 + $0x88] sm:$0xff] }
  0x11   : > { %324 = vmatpush.msra.mxu1 %v277_v6  ;;  %365 = vmatpush.msra.mxu2 %v346_v11  ;;  %v343_v18 = vld [vmem:[%s668_s3 + $0x20] sm:$0xff]  ;;  %v263_v19 = vld [vmem:[%s666_s1 + $0x38] sm:$0xff]  ;;  %v262_v21 = vld [vmem:[%s666_s1 + $0x30] sm:$0xff] }
  0x12   : > { %294 = vmatpush.msra.mxu0 %v268_v4  ;;  %462 = vmatpush.msra.mxu3 %v268_v4  ;;  %v272_v20 = vld [vmem:[%s666_s1 + $0x80] sm:$0xff]  ;;  %v253_v22 = vld [vmem:[%s246_s26 + $0x8] sm:$0xff]  ;;  %v259_v25 = vld [vmem:[%s666_s1 + $0x18] sm:$0xff] }
  0x13   : > { %325 = vmatpush.msra.mxu1 %v276_v8  ;;  %366 = vmatpush.msra.mxu2 %v345_v12  ;;  %v261_v23 = vld [vmem:[%s666_s1 + $0x28] sm:$0xff]  ;;  %v260_v24 = vld [vmem:[%s666_s1 + $0x20] sm:$0xff]  ;;  %v258_v26 = vld [vmem:[%s666_s1 + $0x10] sm:$0xff] }
  0x14   : > { %295 = vmatpush.msra.mxu0 %v267_v7  ;;  %463 = vmatpush.msra.mxu3 %v267_v7  ;;  %v255_v27 = vld [vmem:[%s246_s26 + $0x18] sm:$0xff]  ;;  %v257_v28 = vld [vmem:[%s666_s1 + $0x8] sm:$0xff]  ;;  %v256_v29 = vld [vmem:[%s666_s1] sm:$0xff] }
  0x15   : > { %326 = vmatpush.msra.mxu1 %v275_v10  ;;  %367 = vmatpush.msra.mxu2 %v344_v15  ;;  %v252_v30 = vld [vmem:[%s246_s26] sm:$0xff]  ;;  %v254_v31 = vld [vmem:[%s246_s26 + $0x10] sm:$0xff]  ;;  %v342_v32 = vld [vmem:[%s668_s3 + $0x18] sm:$0xff] }
  0x16   : > { %296 = vmatpush.msra.mxu0 %v266_v9  ;;  %464 = vmatpush.msra.mxu3 %v266_v9  ;;  %v341_v33 = vld [vmem:[%s668_s3 + $0x10] sm:$0xff]  ;;  %v340_v34 = vld [vmem:[%s668_s3 + $0x8] sm:$0xff]  ;;  %v339_v35 = vld [vmem:[%s668_s3] sm:$0xff] }
  0x17   : > { %327 = vmatpush.msra.mxu1 %v274_v14  ;;  %368 = vmatpush.msra.mxu2 %v343_v18  ;;  %v483_v37 = vld [vmem:[%s667_s2] ss:$0 sm:$0xff]  ;;  %v381_v53 = vld [vmem:[%s670_s5 + $0x8] sm:$0xff] }
  0x18   : > { %297 = vmatpush.msra.mxu0 %v265_v13  ;;  %465 = vmatpush.msra.mxu3 %v265_v13  ;;  %v484_v47 = vld [vmem:[%s669_s4] ss:$0 sm:$0xff] }
  0x19   : > { %328 = vmatpush.msra.mxu1 %v273_v17  ;;  %369 = vmatpush.msra.mxu2 %v342_v32  ;;  %v380_v49 = vld [vmem:[%s670_s5] sm:$0xff] }
  0x1a   : > { %298 = vmatpush.msra.mxu0 %v264_v16  ;;  %466 = vmatpush.msra.mxu3 %v264_v16 }
  0x1b   : > { %329 = vmatpush.msra.mxu1 %v272_v20  ;;  %370 = vmatpush.msra.mxu2 %v341_v33 }
  0x1c   : > { %299 = vmatpush.msra.mxu0 %v263_v19  ;;  %467 = vmatpush.msra.mxu3 %v263_v19 }
  0x1d   : > { %451 = vmatmul.msk.f32.vlgmr.msra.gmra.mxu1 %vm284_vm0, %v253_v22  ;;  %371 = vmatpush.msra.mxu2 %v340_v34 }
  0x1e   : > { %300 = vmatpush.msra.mxu0 %v262_v21  ;;  %468 = vmatpush.msra.mxu3 %v262_v21 }
  0x1f   : > { %372 = vmatpush.msra.mxu2 %v339_v35 }
  0x20   : > { %301 = vmatpush.msra.mxu0 %v261_v23  ;;  %469 = vmatpush.msra.mxu3 %v261_v23 }
  0x22   : > { %302 = vmatpush.msra.mxu0 %v260_v24  ;;  %470 = vmatpush.msra.mxu3 %v260_v24 }
  0x24   : > { %303 = vmatpush.msra.mxu0 %v259_v25  ;;  %471 = vmatpush.msra.mxu3 %v259_v25 }
  0x25   : > { %452 = vmatmul.msk.f32.gmra.mxu1 %vm284_vm0, %v255_v27 }
  0x26   : > { %304 = vmatpush.msra.mxu0 %v258_v26  ;;  %472 = vmatpush.msra.mxu3 %v258_v26 }
  0x28   : > { %305 = vmatpush.msra.mxu0 %v257_v28  ;;  %473 = vmatpush.msra.mxu3 %v257_v28 }
  0x2a   : > { %306 = vmatpush.msra.mxu0 %v256_v29  ;;  %474 = vmatpush.msra.mxu3 %v256_v29 }
  0x2b   : > { %307 = vmatmul.f32.vlgmr.msra.gmra.mxu0 %v252_v30  ;;  %310 = vmatmul.f32.vlgmr.msra.gmra.mxu3 %v254_v31 }
  0x9a   : > { %v331_v36 = vpop.f32.mrf.mxu1 }
  0xa2   : > { %v334_v43 = vpop.f32.mrf.mxu1 }
  0xa8   : > { %v308_v38 = vpop.f32.mrf.mxu0 }
  0xa9   : > { %v309_v39 = vadd.f32 %v483_v37, %v308_v38 }
  0xab   : > { %v332_v40 = vadd.f32 %v331_v36, %v309_v39 }
  0xad   : > { %v337_v41 = vmax.f32 %v332_v40, 0.0 }
  0xae   : > { %v311_v42 = vpop.f32.mrf.mxu3 }
  0xaf   : > { %453 = vmatmul.msk.f32.vlgmr.msra.gmra.mxu2 %vm284_vm0, %v337_v41  ;;  %v312_v44 = vadd.f32 %v483_v37, %v311_v42 }
  0xb1   : > { %v335_v45 = vadd.f32 %v334_v43, %v312_v44 }
  0xb3   : > { %v338_v46 = vmax.f32 %v335_v45, 0.0 }
  0xb7   : > { %454 = vmatmul.msk.f32.gmra.mxu2 %vm284_vm0, %v338_v46 }
 0x132   : > { %v374_v48 = vpop.f32.mrf.mxu2 }
 0x133   : > { %v375_v50 = vadd.f32 %v484_v47, %v374_v48 }
 0x135   : > { %v382_v51 = vadd.f32 %v380_v49, %v375_v50 }
 0x137   : > { %385 = vst.msk [vmem:[%s251_s10] sm:$0xff] %vm384_vm1, %v382_v51 }
 0x13a   : > { %v377_v52 = vpop.f32.mrf.mxu2 }
 0x13b   : > { %v378_v54 = vadd.f32 %v484_v47, %v377_v52 }
 0x13d   : > { %v383_v55 = vadd.f32 %v381_v53, %v378_v54 }
 0x13f   : > { %386 = vst.msk [vmem:[%s251_s10 + $0x8] sm:$0xff] %vm384_vm1, %v383_v55 }
 0x140 PF: > { %s16_s21 = sadd.s32 1, %s491_s21  }
 0x141   : > { %p13_p4 = scmp.ge.s32.totalorder %s16_s21, 4  }
 0x143   :  { %15 = sbr.rel (!%p13_p4) target bundleno = 1 (0x1), region = 74 }

// kernel: detr_forward.9
= control target key start
LH: loop header
LB: loop body
LE: loop exit
PB: predicated region body
PF: predicated region fallthrough
CT: control target
= control target key end

     0   :  { %s2279_s0 = inlined_call_operand.vmem [shape: f32[2,8,32], index: 0, kind: input, shape index: {}]   ;;  %s2280_s1 = inlined_call_operand.vmem [shape: f32[2,16,32], index: 1, kind: input, shape index: {}]   ;;  %s2281_s2 = inlined_call_operand.vmem [shape: f32[32,96], index: 2, kind: input, shape index: {}]   ;;  %s2282_s3 = inlined_call_operand.vmem [shape: f32[1,96], index: 3, kind: input, shape index: {}]   ;;  %s2283_s4 = inlined_call_operand.vmem [shape: f32[32,32], index: 4, kind: input, shape index: {}]   ;;  %s2284_s5 = inlined_call_operand.vmem [shape: f32[1,32], index: 5, kind: input, shape index: {}]   ;;  %s2285_s6 = inlined_call_operand.vmem [shape: f32[1,32], index: 6, kind: input, shape index: {}]   ;;  %s2286_s7 = inlined_call_operand.vmem [shape: f32[1,32], index: 7, kind: input, shape index: {}]   ;;  %s2287_s8 = inlined_call_operand.vmem [shape: f32[32,32], index: 8, kind: input, shape index: {}]   ;;  %s2288_s9 = inlined_call_operand.vmem [shape: f32[1,32], index: 9, kind: input, shape index: {}]   ;;  %s2289_s10 = inlined_call_operand.vmem [shape: f32[32,64], index: 10, kind: input, shape index: {}]   ;;  %s2290_s11 = inlined_call_operand.vmem [shape: f32[1,64], index: 11, kind: input, shape index: {}]   ;;  %s2291_s12 = inlined_call_operand.vmem [shape: f32[32,32], index: 12, kind: input, shape index: {}]   ;;  %s2292_s13 = inlined_call_operand.vmem [shape: f32[1,32], index: 13, kind: input, shape index: {}]   ;;  %s2293_s14 = inlined_call_operand.vmem [shape: f32[1,32], index: 14, kind: input, shape index: {}]   ;;  %s2294_s15 = inlined_call_operand.vmem [shape: f32[1,32], index: 15, kind: input, shape index: {}]   ;;  %s2295_s16 = inlined_call_operand.vmem [shape: f32[32,128], index: 16, kind: input, shape index: {}]   ;;  %s2296_s17 = inlined_call_operand.vmem [shape: f32[1,128], index: 17, kind: input, shape index: {}]   ;;  %s2297_s18 = inlined_call_operand.vmem [shape: f32[128,32], index: 18, kind: input, shape index: {}]   ;;  %s2298_s19 = inlined_call_operand.vmem [shape: f32[1,32], index: 19, kind: input, shape index: {}]   ;;  %s2299_s20 = inlined_call_operand.vmem [shape: f32[1,32], index: 20, kind: input, shape index: {}]   ;;  %s2300_s21 = inlined_call_operand.vmem [shape: f32[1,32], index: 21, kind: input, shape index: {}]   ;;  %s2301_s22 = inlined_call_operand.vmem [shape: f32[2,8,32], index: 22, kind: output, shape index: {}]  }
   0x1   :  { %2318 = sst [smem:[#allocation2_spill]] %s2279_s0 }
   0x2   :  { %2319 = sst [smem:[#allocation3_spill]] %s2280_s1 }
   0x3   :  { %2320 = sst [smem:[#allocation4_spill]] %s2281_s2 }
   0x4   :  { %2321 = sst [smem:[#allocation5_spill]] %s2282_s3  ;;  %s1969_s3 = smov 0  }
   0x5   :  { %2322 = sst [smem:[#allocation6_spill]] %s2283_s4 }
   0x6   :  { %2323 = sst [smem:[#allocation7_spill]] %s2284_s5 }
   0x7   :  { %2324 = sst [smem:[#allocation8_spill]] %s2285_s6 }
   0x8 LB: > { %s1688_s28 = sadd.s32 4294967295, %s1837_s3   ;;  %p1692_p0 = scmp.ge.s32.totalorder %s1837_s3, 1  ;;  %s1837_s3 = sphi %s1969_s3, %s32_s3  }
   0x9   : > { %p621_p1 = scmp.lt.s32.totalorder %s1837_s3, 3 }
   0xb   : > { %p622_p2 = pnand %p1692_p0, %p621_p1 }
   0xc   : > { %s2325_s4 = sld [smem:[#allocation4_spill]] (!%p622_p2)  ;;  %p686_p3 = scmp.lt.s32.totalorder (!%p622_p2), %s1688_s28, 1 }
   0xd   : > { %625 = sbr.rel (%p622_p2) target bundleno = 3527 (0xdc7), region = 108  ;;  %s2326_s27 = sld [smem:[#allocation2_spill]] (!%p622_p2) }
   0xe   : > { %s2327_s23 = sld [smem:[#allocation5_spill]] (!%p622_p2)  ;;  %s2307_s1 = smov (!%p622_p2), 96  }
   0xf   : > { %s2308_s5 = smov (!%p622_p2), 112   ;;  %s2316_s24 = smov (!%p622_p2), 120  }
  0x10   : > { %s2315_s6 = smov (!%p622_p2), 88   ;;  %s2306_s26 = smov (!%p622_p2), 72  }
  0x11   : > { %s2305_s2 = smov (!%p622_p2), 80   ;;  %s1847_s30 = smov (!%p622_p2), 40  }
  0x12   : > { %v705_v0 = vld [vmem:[%s2325_s4 + $0x18] sm:$0xff]  ;;  %v704_v1 = vld [vmem:[%s2325_s4 + $0x10] sm:$0xff]  ;;  %v703_v2 = vld [vmem:[%s2325_s4 + $0x8] sm:$0xff]  ;;  %s2344_s28 = smov (!%p686_p3, %s1688_s28), 1  ;;  %vm710_vm0 = vcmask 261120   ;;  %vm738_vm1 = vcmask 64512  }
  0x13   : > { %726 = vmatpush.msra.mxu0 %v705_v0  ;;  %v702_v3 = vld [vmem:[%s2325_s4] sm:$0xff]  ;;  %s2304_s25 = sshll.u32 %s2344_s28, 3  ;;  %s1848_s0 = smov 56   ;;  %vm1009_vm2 = vcmask 130048   ;;  %vm1011_vm3 = vcmask 195584  }
  0x14   : > { %s689_s29 = scalar_lea.vmem %s2326_s27, %s2304_s25  ;;  %v1778_v5 = vld [vmem:[%s2327_s23] ss:$0 sm:$0xff]  ;;  %s2310_s27 = smov 104  }
  0x15   : > { %727 = vmatpush.msra.mxu0 %v704_v1  ;;  %v1997_v4 = vld [vmem:[%s689_s29] sm:$0xff]  ;;  %s1846_s29 = smov 64   ;;  %s1849_s23 = smov 48  }
  0x16   : > { %s2340_s25 = smov 16  }
  0x17   : > { %728 = vmatpush.msra.mxu0 %v703_v2 }
  0x19   : > { %729 = vmatpush.msra.mxu0 %v702_v3 }
  0x1a   : > { %1697 = vmatmul.msk.f32.vlgmr.msra.gmra.mxu0 %vm710_vm0, %v1997_v4 }
  0x97   : > { %v731_v6 = vpop.f32.mrf.mxu0 }
  0x98   : > { %v2004_v7 = vadd.f32 %v1778_v5, %v731_v6 }
  0x9a   : > { %736 = vrot.lane.b32.xlu0 %v2004_v7, %s2307_s1  ;;  %v734_v8 = vmul.f32 0.35355338, %v2004_v7  ;;  %s1734_s1 = sshll.u32 %s2344_s28, 4 }
  0x9c   : > { %866 = vrot.lane.b32.xlu2 %v734_v8, %s2308_s5  ;;  %801 = vrot.lane.b32.xlu1 %v734_v8, %s2316_s24  ;;  %s2329_s5 = sld [smem:[#allocation7_spill]] }
  0xa2   : > { %803 = vrot.lane.b32.xlu0 %v2004_v7, %s2315_s6  ;;  %s2335_s6 = smov 112  }
  0xa4   : > { %933 = vrot.lane.b32.xlu2 %v2004_v7, %s2306_s26  ;;  %868 = vrot.lane.b32.xlu1 %v2004_v7, %s2305_s2  ;;  %s2328_s2 = sld [smem:[#allocation6_spill]]  ;;  %s2334_s26 = smov 104  }
  0xaa   : > { %931 = vrot.lane.b32.xlu0 %v734_v8, %s2310_s27  ;;  %v1016_v0 = vld [vmem:[%s2328_s2 + $0x18] sm:$0xff]  ;;  %v1015_v1 = vld [vmem:[%s2328_s2 + $0x10] sm:$0xff]  ;;  %v1014_v2 = vld [vmem:[%s2328_s2 + $0x8] sm:$0xff]  ;;  %s2330_s27 = sld [smem:[#allocation3_spill]] }
  0xab   : > { %v1013_v3 = vld [vmem:[%s2328_s2] sm:$0xff] }
  0xf6   : > { %v867_v10 = vpop.permute.xlu2 %866 }
  0xfe   : > { %v934_v14 = vpop.permute.xlu2 %933 }
 0x10c   : > { %v737_v9 = vpop.permute.xlu0 %736 }
 0x10d   : > { %1698 = vmatpush.xpose.msk.msra.mxu1 %vm738_vm1, %v737_v9 }
 0x10e   : > { %v802_v11 = vpop.permute.xlu1 %801 }
 0x110   : > { %1699 = vmatmul.msk.f32.vlgmr.msra.gmra.mxu1 %vm738_vm1, %v734_v8 }
 0x114   : > { %v804_v12 = vpop.permute.xlu0 %803 }
 0x115   : > { %1701 = vmatpush.xpose.msk.msra.mxu3 %vm738_vm1, %v804_v12 }
 0x116   : > { %v869_v13 = vpop.permute.xlu1 %868 }
 0x117   : > { %1704 = vmatpush.xpose.msk.msrb.mxu1 %vm738_vm1, %v869_v13 }
 0x118   : > { %1702 = vmatmul.msk.f32.vlgmr.msra.gmra.mxu3 %vm738_vm1, %v802_v11  ;;  %v1779_v11 = vld [vmem:[%s2329_s5] ss:$0 sm:$0xff]  ;;  %s2333_s5 = smov 88  }
 0x11a   : > { %1705 = vmatmul.msk.f32.vlgmr.msrb.gmra.mxu1 %vm738_vm1, %v867_v10 }
 0x11b   : > { %1707 = vmatpush.xpose.msk.msra.mxu1 %vm738_vm1, %v934_v14 }
 0x11c   : > { %v932_v15 = vpop.permute.xlu0 %931 }
 0x11f   : > { %1036 = vmatpush.msrb.mxu1 %v1016_v0 }
 0x121   : > { %1037 = vmatpush.msrb.mxu1 %v1015_v1 }
 0x122   : > { %1708 = vmatmul.msk.f32.vlgmr.msra.gmra.mxu1 %vm738_vm1, %v932_v15 }
 0x123   : > { %1038 = vmatpush.msrb.mxu1 %v1014_v2 }
 0x125   : > { %1039 = vmatpush.msrb.mxu1 %v1013_v3 }
 0x18d   : > { %v761_v16 = vpop.f32.mrf.mxu1 }
 0x18e   : > { %v764_v17 = vsel %vm738_vm1, %v761_v16, -inf }
 0x18f   : > { %765 = vmax.xlane.f32.xlu1 %v764_v17  ;;  %v1118_v17 = vld [vmem:[%s2289_s10 + $0x18] sm:$0xff] }
 0x190   : > { %1141 = vmatpush.msrb.mxu0 %v1118_v17 }
 0x197   : > { %v891_v18 = vpop.f32.mrf.mxu1 }
 0x198   : > { %v894_v19 = vsel %vm738_vm1, %v891_v18, -inf }
 0x199   : > { %895 = vmax.xlane.f32.xlu0 %v894_v19  ;;  %v1116_v19 = vld [vmem:[%s2289_s10 + $0x8] sm:$0xff] }
 0x19b   : > { %v826_v20 = vpop.f32.mrf.mxu3 }
 0x19c   : > { %v829_v21 = vsel %vm738_vm1, %v826_v20, -inf }
 0x19d   : > { %830 = vmax.xlane.f32.xlu2 %v829_v21 }
 0x19f   : > { %v956_v22 = vpop.f32.mrf.mxu1 }
 0x1a0   : > { %v959_v23 = vsel %vm738_vm1, %v956_v22, -inf }
 0x1a5   : > { %960 = vmax.xlane.f32.xlu2 %v959_v23 }
 0x1ad   : > { %775 = vrot.lane.b32.xlu0 %v2004_v7, %s1846_s29  ;;  %s2312_s29 = smov 16  }
 0x1b5   : > { %970 = vrot.lane.b32.xlu0 %v2004_v7, %s1847_s30  ;;  %s2313_s30 = smov 8  }
 0x202   : > { %v766_v24 = vpop.xlane.xlu1 %765 }
 0x203   : > { %v767_v25 = vsub.f32 %v761_v16, %v766_v24  ;;  %v1853_v16 = vmov 32.0  }
 0x205   : > { %v768_v26 = vmul.f32 1.442695, %v767_v25 }
 0x207   : > { %1791 = vpow2.f32 %v768_v26 }
 0x20c   : > { %v896_v27 = vpop.xlane.xlu0 %895 }
 0x20d   : > { %v1792_v28 = vpop.eup %1791  ;;  %v897_v29 = vsub.f32 %v891_v18, %v896_v27  ;;  %v1117_v18 = vld [vmem:[%s2289_s10 + $0x10] sm:$0xff] }
 0x20e   : > { %v770_v30 = vsel %vm738_vm1, %v1792_v28, 0.0  ;;  %1142 = vmatpush.msrb.mxu0 %v1117_v18 }
 0x20f   : > { %v898_v31 = vmul.f32 1.442695, %v897_v29  ;;  %771 = vadd.xlane.f32.xlu1 %v770_v30  ;;  %v1115_v30 = vld [vmem:[%s2289_s10] sm:$0xff] }
 0x210   : > { %v831_v32 = vpop.xlane.xlu2 %830  ;;  %1143 = vmatpush.msrb.mxu0 %v1116_v19 }
 0x211   : > { %1793 = vpow2.f32 %v898_v31  ;;  %v832_v33 = vsub.f32 %v826_v20, %v831_v32 }
 0x212   : > { %1144 = vmatpush.msrb.mxu0 %v1115_v30 }
 0x213   : > { %v833_v34 = vmul.f32 1.442695, %v832_v33  ;;  %v1087_v33 = vld [vmem:[%s2287_s8 + $0x18] sm:$0xff] }
 0x215   : > { %1795 = vpow2.f32 %v833_v34  ;;  %v1086_v34 = vld [vmem:[%s2287_s8 + $0x10] sm:$0xff] }
 0x217   : > { %v1794_v35 = vpop.eup %1793 }
 0x218   : > { %v961_v36 = vpop.xlane.xlu2 %960  ;;  %v900_v37 = vsel %vm738_vm1, %v1794_v35, 0.0 }
 0x219   : > { %v962_v38 = vsub.f32 %v956_v22, %v961_v36  ;;  %901 = vadd.xlane.f32.xlu1 %v900_v37  ;;  %v1084_v36 = vld [vmem:[%s2287_s8] sm:$0xff] }
 0x21b   : > { %v1796_v39 = vpop.eup %1795  ;;  %v963_v40 = vmul.f32 1.442695, %v962_v38 }
 0x21c   : > { %v835_v41 = vsel %vm738_vm1, %v1796_v39, 0.0 }
 0x21d   : > { %1797 = vpow2.f32 %v963_v40  ;;  %836 = vadd.xlane.f32.xlu2 %v835_v41 }
 0x21f   : > { %v776_v42 = vpop.permute.xlu0 %775 }
 0x220   : > { %796 = vmatpush.msra.mxu2 %v776_v42 }
 0x223   : > { %v1798_v43 = vpop.eup %1797 }
 0x224   : > { %v965_v44 = vsel %vm738_vm1, %v1798_v43, 0.0 }
 0x225   : > { %966 = vadd.xlane.f32.xlu2 %v965_v44 }
 0x227   : > { %v971_v57 = vpop.permute.xlu0 %970 }
 0x232   : > { %840 = vrot.lane.b32.xlu1 %v2004_v7, %s1848_s0  ;;  %s2314_s0 = smov 24  }
 0x23d   : > { %905 = vrot.lane.b32.xlu2 %v2004_v7, %s1849_s23  ;;  %s2339_s23 = smov 8  }
 0x282   : > { %v772_v45 = vpop.xlane.xlu1 %771 }
 0x283   : > { %1799 = vrcp.f32 %v772_v45 }
 0x289   : > { %v1800_v46 = vpop.eup %1799 }
 0x28a   : > { %v774_v47 = vmul.f32 %v1800_v46, %v1792_v28 }
 0x28c   : > { %1700 = vmatmul.msk.f32.vlgmr.msra.gmra.mxu2 %vm738_vm1, %v774_v47  ;;  %v902_v49 = vpop.xlane.xlu1 %901 }
 0x28d   : > { %1801 = vrcp.f32 %v902_v49  ;;  %v1781_v49 = vld [vmem:[%s2286_s7] ss:$0 sm:$0xff] }
 0x290   : > { %v837_v48 = vpop.xlane.xlu2 %836 }
 0x291   : > { %1803 = vrcp.f32 %v837_v48 }
 0x293   : > { %v1802_v51 = vpop.eup %1801 }
 0x294   : > { %v904_v53 = vmul.f32 %v1802_v51, %v1794_v35  ;;  %v1085_v35 = vld [vmem:[%s2287_s8 + $0x8] sm:$0xff] }
 0x297   : > { %v1804_v54 = vpop.eup %1803 }
 0x298   : > { %v967_v50 = vpop.xlane.xlu2 %966  ;;  %v839_v56 = vmul.f32 %v1804_v54, %v1796_v39 }
 0x299   : > { %1805 = vrcp.f32 %v967_v50 }
 0x29a   : > { %1807 = vrcp.f32 %v1853_v16 }
 0x29f   : > { %v1806_v58 = vpop.eup %1805 }
 0x2a0   : > { %v906_v52 = vpop.permute.xlu2 %905  ;;  %v969_v59 = vmul.f32 %v1806_v58, %v1798_v43  ;;  %v1783_v58 = vld [vmem:[%s2288_s9] ss:$0 sm:$0xff] }
 0x2a1   : > { %926 = vmatpush.msrb.mxu3 %v906_v52 }
 0x2a2   : > { %1706 = vmatmul.msk.f32.vlgmr.msrb.gmra.mxu3 %vm738_vm1, %v904_v53  ;;  %v1782_v53 = vld [vmem:[%s2290_s11] ss:$0 sm:$0xff] }
 0x2a3   : > { %1107 = vmatpush.msra.mxu3 %v1087_v33 }
 0x2a4   : > { %v841_v55 = vpop.permute.xlu1 %840 }
 0x2a5   : > { %861 = vmatpush.msrb.mxu2 %v841_v55  ;;  %1108 = vmatpush.msra.mxu3 %v1086_v34 }
 0x2a6   : > { %1703 = vmatmul.msk.f32.vlgmr.msrb.gmra.mxu2 %vm738_vm1, %v839_v56 }
 0x2a7   : > { %991 = vmatpush.msra.mxu2 %v971_v57  ;;  %1109 = vmatpush.msra.mxu3 %v1085_v35 }
 0x2a9   : > { %1110 = vmatpush.msra.mxu3 %v1084_v36 }
 0x2ae   : > { %1709 = vmatmul.msk.f32.vlgmr.msra.gmra.mxu2 %vm738_vm1, %v969_v59 }
 0x30f   : > { %v798_v60 = vpop.f32.mrf.mxu2 }
 0x325   : > { %v928_v61 = vpop.f32.mrf.mxu3 }
 0x326   : > { %1001 = vrot.lane.b32.xlu1 %v928_v61, %s2312_s29  ;;  %s694_s29 = scalar_lea.vmem %s2330_s27, %s1734_s1  ;;  %s2332_s1 = smov 120  }
 0x327   : > { %v700_v31 = vld [vmem:[%s694_s29] sm:$0xff]  ;;  %v701_v32 = vld [vmem:[%s694_s29 + $0x8] sm:$0xff]  ;;  %s2337_s29 = smov 72  }
 0x328   : > { %1712 = vmatmul.msk.f32.vlgmr.msrb.gmra.mxu0 %vm710_vm0, %v700_v31 }
 0x329   : > { %v863_v62 = vpop.f32.mrf.mxu2 }
 0x32a   : > { %997 = vrot.lane.b32.xlu0 %v863_v62, %s2313_s30  ;;  %s2338_s30 = smov 80  }
 0x330   : > { %1713 = vmatmul.msk.f32.gmra.mxu0 %vm710_vm0, %v701_v32 }
 0x331   : > { %v993_v63 = vpop.f32.mrf.mxu2 }
 0x332   : > { %1005 = vrot.lane.b32.xlu0 %v993_v63, %s2314_s0  ;;  %s2331_s0 = sld [smem:[#allocation8_spill]] }
 0x338   : > { %v1780_v46 = vld [vmem:[%s2331_s0] ss:$0 sm:$0xff]  ;;  %s2336_s0 = smov 96  }
 0x398   : > { %v1002_v7 = vpop.permute.xlu1 %1001 }
 0x39c   : > { %v998_v5 = vpop.permute.xlu0 %997 }
 0x39d   : > { %v1008_v6 = vsel %vm738_vm1, %v798_v60, %v998_v5 }
 0x39e   : > { %v1010_v9 = vsel %vm1009_vm2, %v1008_v6, %v1002_v7 }
 0x3a4   : > { %v1006_v8 = vpop.permute.xlu0 %1005 }
 0x3a5   : > { %v1012_v10 = vsel %vm1011_vm3, %v1010_v9, %v1006_v8  ;;  %v1146_v52 = vpop.f32.mrf.mxu0 }
 0x3a6   : > { %1710 = vmatmul.msk.f32.vlgmr.msrb.gmra.mxu1 %vm710_vm0, %v1012_v10  ;;  %v1147_v54 = vadd.f32 %v1782_v53, %v1146_v52 }
 0x3ad   : > { %v1149_v55 = vpop.f32.mrf.mxu0 }
 0x3ae   : > { %v1150_v56 = vadd.f32 %v1782_v53, %v1149_v55 }
 0x3b0   : > { %1226 = vrot.lane.b32.xlu0 %v1150_v56, %s2332_s1  ;;  %v2115_v57 = vpack.i.bf16 %v1147_v54, %v1150_v56  ;;  %1714 = vmatpush.xpose.msk.msrb.mxu2 %vm738_vm1, %v1150_v56 }
 0x3b4   : > { %1715 = vmatpush.xpose.msk.msrb.mxu2 %vm738_vm1, %v1147_v54 }
 0x3b8   : > { %1224 = vrot.lane.b32.xlu0 %v1147_v54, %s2332_s1 }
 0x422   : > { %v1227_v62 = vpop.permute.xlu0 %1226 }
 0x423   : > { %v1041_v12 = vpop.f32.mrf.mxu1  ;;  %1718 = vmatpush.xpose.msk.msrb.mxu3 %vm738_vm1, %v1227_v62 }
 0x424   : > { %v1042_v13 = vadd.f32 %v1779_v11, %v1041_v12 }
 0x426   : > { %v1046_v14 = vadd.f32 %v1042_v13, %v1997_v4  ;;  %v1808_v4 = vpop.eup %1807 }
 0x427   : > { %v1051_v20 = vmul.f32 32.0, %v1808_v4  ;;  %vm1055_vm4 = vweird.f32 %v1808_v4 }
 0x428   : > { %v1047_v15 = vsel %vm710_vm0, %v1046_v14, 0.0 }
 0x429   : > { %1048 = vadd.xlane.f32.xlu2 %v1047_v15  ;;  %v1052_v21 = vsub.f32 1.0, %v1051_v20 }
 0x42a   : > { %v1225_v2 = vpop.permute.xlu0 %1224 }
 0x42b   : > { %v1053_v22 = vmul.f32 %v1808_v4, %v1052_v21  ;;  %1719 = vmatpush.xpose.msk.msrb.mxu3 %vm738_vm1, %v1225_v2  ;;  %v1454_v2 = vld [vmem:[%s2291_s12 + $0x8] sm:$0xff] }
 0x42d   : > { %v1054_v23 = vadd.f32 %v1808_v4, %v1053_v22 }
 0x42f   : > { %v2075_v24 = vsel %vm1055_vm4, %v1808_v4, %v1054_v23 }
 0x49c   : > { %v1049_v25 = vpop.xlane.xlu2 %1048 }
 0x49d   : > { %v1057_v26 = vmul.f32 %v2075_v24, %v1049_v25 }
 0x49f   : > { %v1058_v27 = vsub.f32 %v1046_v14, %v1057_v26 }
 0x4a1   : > { %v1059_v28 = vmul.f32 %v1058_v27, %v1058_v27 }
 0x4a3   : > { %v1060_v29 = vsel %vm710_vm0, %v1059_v28, 0.0 }
 0x4a4   : > { %1061 = vadd.xlane.f32.xlu1 %v1060_v29 }
 0x4bd   : > { %1759 = vrot.lane.b32.xlu1 %v2115_v57, %s2333_s5 }
 0x4c5   : > { %1368 = vrot.lane.b32.xlu1 %v1147_v54, %s2334_s26 }
 0x517   : > { %v1062_v37 = vpop.xlane.xlu1 %1061 }
 0x518   : > { %v1063_v38 = vmul.f32 %v1062_v37, %v2075_v24 }
 0x51a   : > { %v1064_v39 = vadd.f32 1e-05, %v1063_v38 }
 0x51c   : > { %1809 = vrsqrt.f32 %v1064_v39  ;;  %vm1071_vm6 = vweird.f32 %v1064_v39 }
 0x522   : > { %v1810_v40 = vpop.eup %1809 }
 0x523   : > { %v1066_v41 = vmul.f32 %v1810_v40, %v1064_v39  ;;  %vm1072_vm5 = vweird.f32 %v1810_v40 }
 0x524   : > { %vm1073_vm7 = vmor %vm1071_vm6, %vm1072_vm5 }
 0x525   : > { %v1067_v42 = vmul.f32 %v1810_v40, %v1066_v41 }
 0x527   : > { %v1068_v43 = vmul.f32 0.5, %v1067_v42 }
 0x529   : > { %v1069_v44 = vsub.f32 1.5, %v1068_v43 }
 0x52b   : > { %v1070_v45 = vmul.f32 %v1810_v40, %v1069_v44 }
 0x52d   : > { %v1074_v47 = vsel %vm1073_vm7, %v1810_v40, %v1070_v45 }
 0x52e   : > { %v1075_v48 = vmul.f32 %v1074_v47, %v1058_v27 }
 0x52f   : > { %v1760_v63 = vpop.permute.xlu1 %1759 }
 0x530   : > { %v1079_v50 = vmul.f32 %v1780_v46, %v1075_v48  ;;  %v1762_v0 = vunpack.i.h.bf16 %v1760_v63  ;;  %v1761_v1 = vunpack.i.l.bf16 %v1760_v63 }
 0x532   : > { %v2107_v51 = vadd.f32 %v1781_v49, %v1079_v50  ;;  %1288 = vmatpush.msra.mxu2 %v1761_v1  ;;  %v1455_v1 = vld [vmem:[%s2291_s12 + $0x10] sm:$0xff] }
 0x534   : > { %1711 = vmatmul.msk.f32.vlgmr.msra.gmra.mxu3 %vm710_vm0, %v2107_v51  ;;  %1289 = vmatpush.msra.mxu2 %v1762_v0  ;;  %v1456_v0 = vld [vmem:[%s2291_s12 + $0x18] sm:$0xff] }
 0x537   : > { %v1369_v14 = vpop.permute.xlu1 %1368 }
 0x5b7   : > { %v1112_v59 = vpop.f32.mrf.mxu3 }
 0x5b8   : > { %v1113_v60 = vadd.f32 %v1783_v58, %v1112_v59 }
 0x5ba   : > { %v1152_v61 = vmul.f32 0.35355338, %v1113_v60 }
 0x5bc   : > { %1222 = vrot.lane.b32.xlu0 %v1152_v61, %s2332_s1  ;;  %1716 = vmatmul.msk.f32.vlgmr.msrb.gmra.mxu2 %vm738_vm1, %v1152_v61 }
 0x62e   : > { %v1223_v3 = vpop.permute.xlu0 %1222 }
 0x62f   : > { %1720 = vmatmul.msk.f32.vlgmr.msrb.gmra.mxu3 %vm738_vm1, %v1223_v3 }
 0x63f   : > { %v1179_v5 = vpop.f32.mrf.mxu2 }
 0x640   : > { %v1182_v6 = vsel %vm1009_vm2, %v1179_v5, -inf }
 0x641   : > { %1183 = vmax.xlane.f32.xlu2 %v1182_v6 }
 0x659   : > { %1370 = vrot.lane.b32.xlu2 %v1150_v56, %s2334_s26 }
 0x661   : > { %1298 = vrot.lane.b32.xlu2 %v1150_v56, %s2335_s6 }
 0x6b2   : > { %v1251_v7 = vpop.f32.mrf.mxu3 }
 0x6b3   : > { %v1254_v8 = vsel %vm1009_vm2, %v1251_v7, -inf }
 0x6b4   : > { %1255 = vmax.xlane.f32.xlu0 %v1254_v8  ;;  %v1184_v9 = vpop.xlane.xlu2 %1183 }
 0x6b5   : > { %v1185_v10 = vsub.f32 %v1179_v5, %v1184_v9  ;;  %v1453_v5 = vld [vmem:[%s2291_s12] sm:$0xff] }
 0x6b7   : > { %v1186_v11 = vmul.f32 1.442695, %v1185_v10 }
 0x6b9   : > { %1811 = vpow2.f32 %v1186_v11 }
 0x6bc   : > { %v1371_v12 = vpop.permute.xlu2 %1370 }
 0x6bd   : > { %1726 = vmatpush.xpose.msk.msrb.mxu2 %vm738_vm1, %v1371_v12  ;;  %v1784_v12 = vld [vmem:[%s2292_s13] ss:$0 sm:$0xff] }
 0x6bf   : > { %v1812_v13 = vpop.eup %1811 }
 0x6c0   : > { %v1188_v15 = vsel %vm1009_vm2, %v1812_v13, 0.0 }
 0x6c1   : > { %1189 = vadd.xlane.f32.xlu2 %v1188_v15  ;;  %1727 = vmatpush.xpose.msk.msrb.mxu2 %vm738_vm1, %v1369_v14 }
 0x6c4   : > { %v1299_v19 = vpop.permute.xlu2 %1298 }
 0x6c8   : > { %1764 = vrot.lane.b32.xlu0 %v2115_v57, %s2336_s0  ;;  %s2341_s0 = smov 24  }
 0x6d0   : > { %1294 = vrot.lane.b32.xlu0 %v1152_v61, %s2335_s6 }
 0x6d9   : > { %1296 = vrot.lane.b32.xlu2 %v1147_v54, %s2335_s6 }
 0x727   : > { %v1256_v16 = vpop.xlane.xlu0 %1255 }
 0x728   : > { %v1257_v17 = vsub.f32 %v1251_v7, %v1256_v16 }
 0x72a   : > { %v1258_v18 = vmul.f32 1.442695, %v1257_v17 }
 0x72c   : > { %1813 = vpow2.f32 %v1258_v18 }
 0x732   : > { %v1814_v4 = vpop.eup %1813 }
 0x733   : > { %v1260_v20 = vsel %vm1009_vm2, %v1814_v4, 0.0 }
 0x734   : > { %1261 = vadd.xlane.f32.xlu1 %v1260_v20  ;;  %v1190_v21 = vpop.xlane.xlu2 %1189 }
 0x735   : > { %1815 = vrcp.f32 %v1190_v21  ;;  %v1520_v21 = vld [vmem:[%s2295_s16 + $0x18] sm:$0xff] }
 0x73a   : > { %v1765_v22 = vpop.permute.xlu0 %1764 }
 0x73b   : > { %v1816_v23 = vpop.eup %1815  ;;  %v1766_v25 = vunpack.i.l.bf16 %v1765_v22  ;;  %v1767_v26 = vunpack.i.h.bf16 %v1765_v22  ;;  %v1518_v22 = vld [vmem:[%s2295_s16 + $0x8] sm:$0xff] }
 0x73c   : > { %v1192_v27 = vmul.f32 %v1816_v23, %v1812_v13  ;;  %v1297_v28 = vpop.permute.xlu2 %1296  ;;  %v1517_v23 = vld [vmem:[%s2295_s16] sm:$0xff] }
 0x73d   : > { %1216 = vmatpush.msra.mxu1 %v1766_v25  ;;  %v1564_v25 = vld [vmem:[%s2297_s18 + $0x78] sm:$0xff] }
 0x73e   : > { %1569 = vmatpush.msra.mxu0 %v1564_v25 }
 0x73f   : > { %1217 = vmatpush.msra.mxu1 %v1767_v26  ;;  %v1563_v26 = vld [vmem:[%s2297_s18 + $0x70] sm:$0xff] }
 0x740   : > { %1717 = vmatmul.msk.f32.vlgmr.msra.gmra.mxu1 %vm1009_vm2, %v1192_v27  ;;  %v1562_v27 = vld [vmem:[%s2297_s18 + $0x68] sm:$0xff]  ;;  %1570 = vmatpush.msra.mxu0 %v1563_v26 }
 0x741   : > { %1722 = vmatpush.xpose.msk.msrb.mxu1 %vm738_vm1, %v1299_v19 }
 0x742   : > { %v1295_v29 = vpop.permute.xlu0 %1294  ;;  %1571 = vmatpush.msra.mxu0 %v1562_v27 }
 0x745   : > { %1723 = vmatpush.xpose.msk.msrb.mxu1 %vm738_vm1, %v1297_v28 }
 0x748   : > { %1724 = vmatmul.msk.f32.vlgmr.msrb.gmra.mxu1 %vm738_vm1, %v1295_v29 }
 0x749   : > { %1476 = vmatpush.msra.mxu1 %v1456_v0 }
 0x74b   : > { %1477 = vmatpush.msra.mxu1 %v1455_v1 }
 0x74d   : > { %1366 = vrot.lane.b32.xlu1 %v1152_v61, %s2334_s26  ;;  %1478 = vmatpush.msra.mxu1 %v1454_v2 }
 0x74f   : > { %1479 = vmatpush.msra.mxu1 %v1453_v5 }
 0x7a7   : > { %v1262_v30 = vpop.xlane.xlu1 %1261 }
 0x7a8   : > { %1817 = vrcp.f32 %v1262_v30  ;;  %v1561_v30 = vld [vmem:[%s2297_s18 + $0x60] sm:$0xff] }
 0x7a9   : > { %1572 = vmatpush.msra.mxu0 %v1561_v30 }
 0x7ae   : > { %v1818_v31 = vpop.eup %1817 }
 0x7af   : > { %v1264_v32 = vmul.f32 %v1818_v31, %v1814_v4 }
 0x7b1   : > { %1721 = vmatmul.msk.f32.vlgmr.msra.gmra.mxu2 %vm1009_vm2, %v1264_v32  ;;  %v1560_v32 = vld [vmem:[%s2297_s18 + $0x58] sm:$0xff] }
 0x7b2   : > { %1573 = vmatpush.msra.mxu0 %v1560_v32 }
 0x7bd   : > { %v1219_v33 = vpop.f32.mrf.mxu1 }
 0x7bf   : > { %v1367_v34 = vpop.permute.xlu1 %1366 }
 0x7c0   : > { %1728 = vmatmul.msk.f32.vlgmr.msrb.gmra.mxu2 %vm738_vm1, %v1367_v34  ;;  %v1558_v34 = vld [vmem:[%s2297_s18 + $0x48] sm:$0xff] }
 0x7c5   : > { %v1323_v35 = vpop.f32.mrf.mxu1 }
 0x7c6   : > { %v1326_v36 = vsel %vm1009_vm2, %v1323_v35, -inf }
 0x7c7   : > { %1327 = vmax.xlane.f32.xlu1 %v1326_v36 }
 0x834   : > { %v1291_v38 = vpop.f32.mrf.mxu2 }
 0x83a   : > { %v1328_v37 = vpop.xlane.xlu1 %1327 }
 0x83b   : > { %v1329_v39 = vsub.f32 %v1323_v35, %v1328_v37  ;;  %v1557_v35 = vld [vmem:[%s2297_s18 + $0x40] sm:$0xff]  ;;  %v1556_v37 = vld [vmem:[%s2297_s18 + $0x38] sm:$0xff] }
 0x83d   : > { %v1330_v40 = vmul.f32 1.442695, %v1329_v39  ;;  %v1555_v39 = vld [vmem:[%s2297_s18 + $0x30] sm:$0xff] }
 0x83f   : > { %1819 = vpow2.f32 %v1330_v40 }
 0x843   : > { %v1395_v41 = vpop.f32.mrf.mxu2 }
 0x844   : > { %v1398_v42 = vsel %vm1009_vm2, %v1395_v41, -inf }
 0x845   : > { %v1820_v43 = vpop.eup %1819  ;;  %1399 = vmax.xlane.f32.xlu2 %v1398_v42 }
 0x846   : > { %v1332_v44 = vsel %vm1009_vm2, %v1820_v43, 0.0 }
 0x847   : > { %1333 = vadd.xlane.f32.xlu0 %v1332_v44 }
 0x85b   : > { %1774 = vrot.lane.b32.xlu0 %v2115_v57, %s2337_s29 }
 0x85d   : > { %1769 = vrot.lane.b32.xlu2 %v2115_v57, %s2338_s30  ;;  %s2342_s30 = sshll.u32 %s2344_s28, 3 }
 0x85e   : > { %s698_s1 = scalar_lea.vmem %s2301_s22, %s2342_s30 }
 0x8b8   : > { %v1400_v45 = vpop.xlane.xlu2 %1399 }
 0x8b9   : > { %v1401_v46 = vsub.f32 %v1395_v41, %v1400_v45  ;;  %v1554_v41 = vld [vmem:[%s2297_s18 + $0x28] sm:$0xff]  ;;  %v1552_v45 = vld [vmem:[%s2297_s18 + $0x18] sm:$0xff] }
 0x8ba   : > { %v1334_v47 = vpop.xlane.xlu0 %1333 }
 0x8bb   : > { %v1402_v48 = vmul.f32 1.442695, %v1401_v46  ;;  %1821 = vrcp.f32 %v1334_v47  ;;  %v1785_v47 = vld [vmem:[%s2293_s14] ss:$0 sm:$0xff] }
 0x8bd   : > { %1823 = vpow2.f32 %v1402_v48 }
 0x8c0   : > { %v1770_v49 = vpop.permute.xlu2 %1769 }
 0x8c1   : > { %v1822_v50 = vpop.eup %1821  ;;  %v1771_v52 = vunpack.i.l.bf16 %v1770_v49  ;;  %v1772_v54 = vunpack.i.h.bf16 %v1770_v49 }
 0x8c2   : > { %v1336_v55 = vmul.f32 %v1822_v50, %v1820_v43  ;;  %v1553_v43 = vld [vmem:[%s2297_s18 + $0x20] sm:$0xff] }
 0x8c3   : > { %v1824_v53 = vpop.eup %1823  ;;  %1360 = vmatpush.msra.mxu3 %v1771_v52  ;;  %v1786_v50 = vld [vmem:[%s2294_s15] ss:$0 sm:$0xff] }
 0x8c4   : > { %v1404_v56 = vsel %vm1009_vm2, %v1824_v53, 0.0 }
 0x8c5   : > { %1405 = vadd.xlane.f32.xlu1 %v1404_v56  ;;  %1361 = vmatpush.msra.mxu3 %v1772_v54  ;;  %v1551_v54 = vld [vmem:[%s2297_s18 + $0x10] sm:$0xff]  ;;  %v1549_v56 = vld [vmem:[%s2297_s18] sm:$0xff] }
 0x8c6   : > { %1725 = vmatmul.msk.f32.vlgmr.msra.gmra.mxu3 %vm1009_vm2, %v1336_v55  ;;  %v1550_v55 = vld [vmem:[%s2297_s18 + $0x8] sm:$0xff] }
 0x8c7   : > { %1540 = vmatpush.msrb.mxu3 %v1520_v21 }
 0x8cd   : > { %v1775_v57 = vpop.permute.xlu0 %1774 }
 0x8ce   : > { %v1776_v58 = vunpack.i.l.bf16 %v1775_v57  ;;  %v1777_v59 = vunpack.i.h.bf16 %v1775_v57  ;;  %v1787_v57 = vld [vmem:[%s2296_s17] ss:$0 sm:$0xff] }
 0x8d0   : > { %1432 = vmatpush.msra.mxu2 %v1776_v58 }
 0x8d2   : > { %1433 = vmatpush.msra.mxu2 %v1777_v59 }
 0x8de   : > { %1439 = vrot.lane.b32.xlu1 %v1291_v38, %s2339_s23 }
 0x938   : > { %v1406_v60 = vpop.xlane.xlu1 %1405 }
 0x939   : > { %1825 = vrcp.f32 %v1406_v60 }
 0x93f   : > { %v1826_v61 = vpop.eup %1825 }
 0x940   : > { %v1408_v62 = vmul.f32 %v1826_v61, %v1824_v53  ;;  %v1788_v61 = vld [vmem:[%s2298_s19] ss:$0 sm:$0xff] }
 0x942   : > { %1729 = vmatmul.msk.f32.vlgmr.msra.gmra.mxu2 %vm1009_vm2, %v1408_v62 }
 0x949   : > { %v1363_v63 = vpop.f32.mrf.mxu3 }
 0x94a   : > { %1443 = vrot.lane.b32.xlu0 %v1363_v63, %s2340_s25 }
 0x950   : > { %v1440_v6 = vpop.permute.xlu1 %1439 }
 0x951   : > { %v1450_v8 = vsel %vm738_vm1, %v1219_v33, %v1440_v6  ;;  %v1559_v33 = vld [vmem:[%s2297_s18 + $0x50] sm:$0xff] }
 0x952   : > { %1574 = vmatpush.msra.mxu0 %v1559_v33 }
 0x954   : > { %1575 = vmatpush.msra.mxu0 %v1558_v34 }
 0x956   : > { %1576 = vmatpush.msra.mxu0 %v1557_v35 }
 0x958   : > { %1577 = vmatpush.msra.mxu0 %v1556_v37 }
 0x95a   : > { %1578 = vmatpush.msra.mxu0 %v1555_v39 }
 0x95c   : > { %1579 = vmatpush.msra.mxu0 %v1554_v41 }
 0x95e   : > { %1580 = vmatpush.msra.mxu0 %v1553_v43 }
 0x960   : > { %1581 = vmatpush.msra.mxu0 %v1552_v45 }
 0x962   : > { %1582 = vmatpush.msra.mxu0 %v1551_v54 }
 0x964   : > { %1583 = vmatpush.msra.mxu0 %v1550_v55 }
 0x966   : > { %1584 = vmatpush.msra.mxu0 %v1549_v56 }
 0x9bc   : > { %v1444_v7 = vpop.permute.xlu0 %1443 }
 0x9bd   : > { %v1451_v9 = vsel %vm1009_vm2, %v1450_v8, %v1444_v7 }
 0x9c5   : > { %v1435_v3 = vpop.f32.mrf.mxu2 }
 0x9c6   : > { %1447 = vrot.lane.b32.xlu2 %v1435_v3, %s2341_s0 }
 0xa20   : > { %v1448_v10 = vpop.permute.xlu2 %1447 }
 0xa21   : > { %v1452_v11 = vsel %vm1011_vm3, %v1451_v9, %v1448_v10 }
 0xa22   : > { %1730 = vmatmul.msk.f32.vlgmr.msra.gmra.mxu1 %vm710_vm0, %v1452_v11 }
 0xa9f   : > { %v1481_v13 = vpop.f32.mrf.mxu1 }
 0xaa0   : > { %v1482_v14 = vadd.f32 %v1784_v12, %v1481_v13 }
 0xaa2   : > { %v1486_v15 = vadd.f32 %v1482_v14, %v2107_v51  ;;  %v1519_v51 = vld [vmem:[%s2295_s16 + $0x10] sm:$0xff] }
 0xaa3   : > { %1541 = vmatpush.msrb.mxu3 %v1519_v51 }
 0xaa4   : > { %v1487_v16 = vsel %vm710_vm0, %v1486_v15, 0.0 }
 0xaa5   : > { %1488 = vadd.xlane.f32.xlu1 %v1487_v16  ;;  %1542 = vmatpush.msrb.mxu3 %v1518_v22 }
 0xaa7   : > { %1543 = vmatpush.msrb.mxu3 %v1517_v23 }
 0xb18   : > { %v1489_v17 = vpop.xlane.xlu1 %1488 }
 0xb19   : > { %v1490_v18 = vmul.f32 %v1489_v17, %v2075_v24  ;;  %v1789_v17 = vld [vmem:[%s2299_s20] ss:$0 sm:$0xff] }
 0xb1b   : > { %v1491_v19 = vsub.f32 %v1486_v15, %v1490_v18 }
 0xb1d   : > { %v1492_v4 = vmul.f32 %v1491_v19, %v1491_v19 }
 0xb1f   : > { %v1493_v20 = vsel %vm710_vm0, %v1492_v4, 0.0 }
 0xb20   : > { %1494 = vadd.xlane.f32.xlu0 %v1493_v20 }
 0xb93   : > { %v1495_v28 = vpop.xlane.xlu0 %1494 }
 0xb94   : > { %v1496_v29 = vmul.f32 %v1495_v28, %v2075_v24 }
 0xb96   : > { %v1497_v31 = vadd.f32 1e-05, %v1496_v29 }
 0xb98   : > { %1827 = vrsqrt.f32 %v1497_v31  ;;  %vm1504_vm9 = vweird.f32 %v1497_v31 }
 0xb9e   : > { %v1828_v36 = vpop.eup %1827 }
 0xb9f   : > { %v1499_v38 = vmul.f32 %v1828_v36, %v1497_v31  ;;  %vm1505_vm8 = vweird.f32 %v1828_v36 }
 0xba0   : > { %vm1506_vm10 = vmor %vm1504_vm9, %vm1505_vm8 }
 0xba1   : > { %v1500_v40 = vmul.f32 %v1828_v36, %v1499_v38 }
 0xba3   : > { %v1501_v42 = vmul.f32 0.5, %v1500_v40 }
 0xba5   : > { %v1502_v44 = vsub.f32 1.5, %v1501_v42 }
 0xba7   : > { %v1503_v46 = vmul.f32 %v1828_v36, %v1502_v44 }
 0xba9   : > { %v1507_v48 = vsel %vm1506_vm10, %v1828_v36, %v1503_v46 }
 0xbaa   : > { %v1508_v49 = vmul.f32 %v1507_v48, %v1491_v19 }
 0xbac   : > { %v1512_v52 = vmul.f32 %v1785_v47, %v1508_v49 }
 0xbae   : > { %v1516_v53 = vadd.f32 %v1786_v50, %v1512_v52 }
 0xbb0   : > { %1731 = vmatmul.msk.f32.vlgmr.msrb.gmra.mxu3 %vm710_vm0, %v1516_v53 }
 0xc33   : > { %v1545_v58 = vpop.f32.mrf.mxu3 }
 0xc34   : > { %v1546_v59 = vadd.f32 %v1787_v57, %v1545_v58 }
 0xc36   : > { %v1548_v60 = vmax.f32 %v1546_v59, 0.0 }
 0xc38   : > { %1585 = vmatmul.f32.vlgmr.msra.gmra.mxu0 %v1548_v60 }
 0xcb5   : > { %v1586_v62 = vpop.f32.mrf.mxu0 }
 0xcb6   : > { %v1587_v63 = vadd.f32 %v1788_v61, %v1586_v62 }
 0xcb8   : > { %v1591_v0 = vadd.f32 %v1587_v63, %v1516_v53 }
 0xcba   : > { %v1592_v1 = vsel %vm710_vm0, %v1591_v0, 0.0 }
 0xcbb   : > { %1593 = vadd.xlane.f32.xlu2 %v1592_v1 }
 0xd2e   : > { %v1594_v2 = vpop.xlane.xlu2 %1593 }
 0xd2f   : > { %v1595_v3 = vmul.f32 %v1594_v2, %v2075_v24 }
 0xd31   : > { %v1596_v5 = vsub.f32 %v1591_v0, %v1595_v3 }
 0xd33   : > { %v1597_v6 = vmul.f32 %v1596_v5, %v1596_v5 }
 0xd35   : > { %v1598_v7 = vsel %vm710_vm0, %v1597_v6, 0.0 }
 0xd36   : > { %1599 = vadd.xlane.f32.xlu1 %v1598_v7 }
 0xda9   : > { %v1600_v8 = vpop.xlane.xlu1 %1599 }
 0xdaa   : > { %v1601_v9 = vmul.f32 %v1600_v8, %v2075_v24  ;;  %v1790_v24 = vld [vmem:[%s2300_s21] ss:$0 sm:$0xff] }
 0xdac   : > { %v1602_v10 = vadd.f32 1e-05, %v1601_v9 }
 0xdae   : > { %1829 = vrsqrt.f32 %v1602_v10  ;;  %vm1609_vm12 = vweird.f32 %v1602_v10 }
 0xdb4   : > { %v1830_v11 = vpop.eup %1829 }
 0xdb5   : > { %v1604_v12 = vmul.f32 %v1830_v11, %v1602_v10  ;;  %vm1610_vm11 = vweird.f32 %v1830_v11 }
 0xdb6   : > { %vm1611_vm13 = vmor %vm1609_vm12, %vm1610_vm11 }
 0xdb7   : > { %v1605_v13 = vmul.f32 %v1830_v11, %v1604_v12 }
 0xdb9   : > { %v1606_v14 = vmul.f32 0.5, %v1605_v13 }
 0xdbb   : > { %v1607_v15 = vsub.f32 1.5, %v1606_v14 }
 0xdbd   : > { %v1608_v16 = vmul.f32 %v1830_v11, %v1607_v15 }
 0xdbf   : > { %v1612_v18 = vsel %vm1611_vm13, %v1830_v11, %v1608_v16 }
 0xdc0   : > { %v1613_v19 = vmul.f32 %v1612_v18, %v1596_v5 }
 0xdc2   : > { %v1617_v4 = vmul.f32 %v1789_v17, %v1613_v19 }
 0xdc4   : > { %v1621_v20 = vadd.f32 %v1790_v24, %v1617_v4 }
 0xdc6   : > { %1622 = vst.msk [vmem:[%s698_s1] sm:$0xff] %vm710_vm0, %v1621_v20 }
 0xdc7 PF: > { %s32_s3 = sadd.s32 1, %s1837_s3  }
 0xdc8   : > { %p29_p4 = scmp.ge.s32.totalorder %s32_s3, 4  }
 0xdca   :  { %31 = sbr.rel (!%p29_p4) target bundleno = 8 (0x8), region = 141 }

// kernel: detr_forward.10
= control target key start
LH: loop header
LB: loop body
LE: loop exit
PB: predicated region body
PF: predicated region fallthrough
CT: control target
= control target key end

     0   :  { %s3041_s0 = inlined_call_operand.vmem [shape: f32[2,8,32], index: 0, kind: input, shape index: {}]   ;;  %s3042_s1 = inlined_call_operand.vmem [shape: f32[2,16,32], index: 1, kind: input, shape index: {}]   ;;  %s3043_s2 = inlined_call_operand.vmem [shape: f32[32,96], index: 2, kind: input, shape index: {}]   ;;  %s3044_s3 = inlined_call_operand.vmem [shape: f32[1,96], index: 3, kind: input, shape index: {}]   ;;  %s3045_s4 = inlined_call_operand.vmem [shape: f32[32,32], index: 4, kind: input, shape index: {}]   ;;  %s3046_s5 = inlined_call_operand.vmem [shape: f32[1,32], index: 5, kind: input, shape index: {}]   ;;  %s3047_s6 = inlined_call_operand.vmem [shape: f32[1,32], index: 6, kind: input, shape index: {}]   ;;  %s3048_s7 = inlined_call_operand.hbm [shape: f32[1,32], index: 7, kind: input, shape index: {}]   ;;  %s3049_s8 = inlined_call_operand.vmem [shape: f32[32,32], index: 8, kind: input, shape index: {}]   ;;  %s3050_s9 = inlined_call_operand.hbm [shape: f32[1,32], index: 9, kind: input, shape index: {}]   ;;  %s3051_s10 = inlined_call_operand.vmem [shape: f32[32,64], index: 10, kind: input, shape index: {}]   ;;  %s3052_s11 = inlined_call_operand.hbm [shape: f32[1,64], index: 11, kind: input, shape index: {}]   ;;  %s3053_s12 = inlined_call_operand.vmem [shape: f32[32,32], index: 12, kind: input, shape index: {}]   ;;  %s3054_s13 = inlined_call_operand.hbm [shape: f32[1,32], index: 13, kind: input, shape index: {}]   ;;  %s3055_s14 = inlined_call_operand.hbm [shape: f32[1,32], index: 14, kind: input, shape index: {}]   ;;  %s3056_s15 = inlined_call_operand.hbm [shape: f32[1,32], index: 15, kind: input, shape index: {}]   ;;  %s3057_s16 = inlined_call_operand.vmem [shape: f32[32,128], index: 16, kind: input, shape index: {}]   ;;  %s3058_s17 = inlined_call_operand.hbm [shape: f32[1,128], index: 17, kind: input, shape index: {}]   ;;  %s3059_s18 = inlined_call_operand.vmem [shape: f32[128,32], index: 18, kind: input, shape index: {}]   ;;  %s3060_s19 = inlined_call_operand.hbm [shape: f32[1,32], index: 19, kind: input, shape index: {}]   ;;  %s3061_s20 = inlined_call_operand.hbm [shape: f32[1,32], index: 20, kind: input, shape index: {}]   ;;  %s3062_s21 = inlined_call_operand.hbm [shape: f32[1,32], index: 21, kind: input, shape index: {}]   ;;  %s3063_s22 = inlined_call_operand.vmem [shape: f32[2,8,32], index: 22, kind: output, shape index: {}]  }
   0x1   :  { %3075 = sst [smem:[#allocation24_spill]] %s3041_s0 }
   0x2   :  { %3076 = sst [smem:[#allocation25_spill]] %s3042_s1 }
   0x3   :  { %3077 = sst [smem:[#allocation26_spill]] %s3043_s2 }
   0x4   :  { %3078 = sst [smem:[#allocation27_spill]] %s3044_s3 }
   0x5   :  { %3079 = sst [smem:[#allocation28_spill]] %s3045_s4 }
   0x6   :  { %3080 = sst [smem:[#allocation29_spill]] %s3046_s5 }
   0x7   :  { %3081 = sst [smem:[#allocation30_spill]] %s3047_s6 }
   0x8   :  { %3082 = sst [smem:[#allocation31_spill]] %s3050_s9 }
   0x9   :  { %3083 = sst [smem:[#allocation32_spill]] %s3054_s13 }
   0xa   :  { %3084 = sst [smem:[#allocation33_spill]] %s3056_s15 }
   0xb   :  { %27 = vsyncpa [#allocation3], 0 }
   0xc   :  { %28 = vsyncpa [#allocation5], 0 }
   0xd   :  { %29 = vsyncpa [#allocation8], 0 }
   0xe   :  { %30 = vsyncpa [#allocation11], 0 }
   0xf   :  { %31 = vsyncpa [#allocation14], 0 }
  0x10   :  { %32 = vsyncpa [#allocation17], 0  ;;  %s2668_s3 = smov 0  }
  0x11 LB: > { %s3085_s9 = sld [smem:[#allocation31_spill]]  ;;  %s2677_s4 = sadd.s32 4294967295, %s2526_s3   ;;  %s2526_s3 = sphi %s2668_s3, %s38_s3  }
  0x12   : > { %p1934_p0 = scmp.ge.s32.totalorder %s2526_s3, 1  ;;  %p541_p1 = scmp.lt.s32.totalorder %s2526_s3, 3 }
  0x13   : > { %p2070_p2 = scmp.eq.s32.totalorder %s2677_s4, 0  ;;  %s2528_s23 = smov [#allocation4]  }
  0x14   : > { %p2682_p3 = pnand %p1934_p0, %p541_p1  ;;  %s585_s1 = sshll.u32 %s2528_s23, 4  ;;  %s586_s1 = int_to_ptr.vmem [resolvable:$true] %s585_s1 }
  0x15   : > { %s3087_s13 = sld [smem:[#allocation32_spill]]  ;;  %s2529_s28 = smov [#allocation7]  }
  0x16   : > { %p2039_p4 = pneg %p2682_p3  ;;  %s3088_s15 = sld [smem:[#allocation33_spill]] }
  0x17   : > { %s583_s30 = sshll.u32 %s3085_s9, 4  ;;  %s615_s29 = sshll.u32 %s2529_s28, 4  ;;  %s584_s30 = int_to_ptr.hbm [resolvable:$true] %s583_s30  ;;  %s616_s29 = int_to_ptr.vmem [resolvable:$true] %s615_s29 }
  0x18   : > { %p2696_p5 = pnand %p2070_p2, %p2039_p4  ;;  %s2530_s23 = smov [#allocation10]  }
  0x19   : > { %s639_s5 = sshll.u32 %s2530_s23, 4  ;;  %s667_s26 = sshll.u32 %s3060_s19, 4  ;;  %s640_s5 = int_to_ptr.vmem [resolvable:$true] %s639_s5  ;;  %s668_s26 = int_to_ptr.hbm [resolvable:$true] %s667_s26 }
  0x1a   : > { %2045 = dma.hbm_to_vmem [thread:$0]  (!%p2696_p5), %s584_s30, 16, %s586_s1, [#allocation5]  }
  0x1b   : > { %s613_s6 = sshll.u32 %s3087_s13, 4  ;;  %s568_s13 = sshll.u32 %s3048_s7, 4  ;;  %s614_s6 = int_to_ptr.hbm [resolvable:$true] %s613_s6  ;;  %s569_s13 = int_to_ptr.hbm [resolvable:$true] %s568_s13 }
  0x1c   : > { %s637_s2 = sshll.u32 %s3088_s15, 4  ;;  %s2531_s15 = smov [#allocation13]   ;;  %s638_s2 = int_to_ptr.hbm [resolvable:$true] %s637_s2 }
  0x1d   : > { %2051 = dma.hbm_to_vmem [thread:$0]  (!%p2696_p5), %s614_s6, 16, %s616_s29, [#allocation8]  }
  0x1e   : > { %2057 = dma.hbm_to_vmem [thread:$0]  (!%p2696_p5), %s638_s2, 16, %s640_s5, [#allocation11]  }
  0x1f   : > { %s669_s30 = sshll.u32 %s2531_s15, 4  ;;  %s2532_s1 = smov [#allocation2]   ;;  %s670_s30 = int_to_ptr.vmem [resolvable:$true] %s669_s30 }
  0x20   : > { %2063 = dma.hbm_to_vmem [thread:$0]  (!%p2696_p5), %s668_s26, 16, %s670_s30, [#allocation14]  }
  0x21   : > { %s570_s6 = sshll.u32 %s2532_s1, 4  ;;  %s598_s24 = sshll.u32 %s3052_s11, 4  ;;  %s571_s6 = int_to_ptr.vmem [resolvable:$true] %s570_s6  ;;  %s599_s24 = int_to_ptr.hbm [resolvable:$true] %s598_s24 }
  0x22   : > { %2042 = dma.hbm_to_vmem [thread:$0]  (!%p2696_p5), %s569_s13, 16, %s571_s6, [#allocation3]  }
  0x23   : > { %s625_s5 = sshll.u32 %s3055_s14, 4  ;;  %s2533_s15 = smov [#allocation6]   ;;  %s626_s5 = int_to_ptr.hbm [resolvable:$true] %s625_s5 }
  0x24   : > { %s600_s25 = sshll.u32 %s2533_s15, 4  ;;  %s2534_s26 = smov [#allocation9]   ;;  %s601_s25 = int_to_ptr.vmem [resolvable:$true] %s600_s25 }
  0x25   : > { %2048 = dma.hbm_to_vmem [thread:$0]  (!%p2696_p5), %s599_s24, 16, %s601_s25, [#allocation5]  }
  0x26   : > { %s627_s28 = sshll.u32 %s2534_s26, 4  ;;  %s652_s29 = sshll.u32 %s3058_s17, 4  ;;  %s628_s28 = int_to_ptr.vmem [resolvable:$true] %s627_s28  ;;  %s653_s29 = int_to_ptr.hbm [resolvable:$true] %s652_s29 }
  0x27   : > { %2054 = dma.hbm_to_vmem [thread:$0]  (!%p2696_p5), %s626_s5, 16, %s628_s28, [#allocation8]  }
  0x28   : > { %s679_s23 = sshll.u32 %s3061_s20, 4  ;;  %s2535_s9 = smov [#allocation12]   ;;  %s680_s23 = int_to_ptr.hbm [resolvable:$true] %s679_s23 }
  0x29   : > { %s654_s2 = sshll.u32 %s2535_s9, 4  ;;  %s2536_s24 = smov [#allocation15]   ;;  %s655_s2 = int_to_ptr.vmem [resolvable:$true] %s654_s2 }
  0x2a   : > { %2060 = dma.hbm_to_vmem [thread:$0]  (!%p2696_p5), %s653_s29, 16, %s655_s2, [#allocation11]  }
  0x2b   : > { %s681_s15 = sshll.u32 %s2536_s24, 4  ;;  %s691_s30 = sshll.u32 %s3062_s21, 4  ;;  %s682_s15 = int_to_ptr.vmem [resolvable:$true] %s681_s15  ;;  %s692_s30 = int_to_ptr.hbm [resolvable:$true] %s691_s30 }
  0x2c   : > { %2066 = dma.hbm_to_vmem [thread:$0]  (!%p2696_p5), %s680_s23, 16, %s682_s15, [#allocation14]  }
  0x2d   : > { %s2537_s5 = smov [#allocation16]   ;;  %721 = sbr.rel (%p2682_p3) target bundleno = 3576 (0xdf8), region = 108 }
  0x2e   : > { %s693_s28 = sshll.u32 %s2537_s5, 4  ;;  %s694_s28 = int_to_ptr.vmem [resolvable:$true] %s693_s28 }
  0x2f   : > { %2069 = dma.hbm_to_vmem [thread:$0]  (!%p2696_p5), %s692_s30, 16, %s694_s28, [#allocation17]  }
  0x32   : > { %2501 = dma.done.wait (%p2070_p2), [#allocation3], 16  }
  0x33   : > { %2503 = vsyncadd (%p2070_p2), [#allocation3], 4294967280 }
  0x34   : > { %2505 = dma.done.wait (%p2070_p2), [#allocation5], 32  }
  0x35   : > { %2507 = vsyncadd (%p2070_p2), [#allocation5], 4294967264 }
  0x36   : > { %2509 = dma.done.wait (%p2070_p2), [#allocation8], 32  }
  0x37   : > { %2511 = vsyncadd (%p2070_p2), [#allocation8], 4294967264 }
  0x38   : > { %2513 = dma.done.wait (%p2070_p2), [#allocation11], 32  }
  0x39   : > { %2515 = vsyncadd (%p2070_p2), [#allocation11], 4294967264 }
  0x3a   : > { %2517 = dma.done.wait (%p2070_p2), [#allocation14], 32  }
  0x3b   : > { %2519 = vsyncadd (%p2070_p2), [#allocation14], 4294967264 }
  0x3c   : > { %2521 = dma.done.wait (%p2070_p2), [#allocation17], 16  }
  0x3d   : > { %2523 = vsyncadd (%p2070_p2), [#allocation17], 4294967280  ;;  %p832_p6 = scmp.lt.s32.totalorder %s2677_s4, 1  ;;  %s3090_s29 = sld [smem:[#allocation26_spill]]  ;;  %vm856_vm0 = vcmask 261120   ;;  %vm884_vm1 = vcmask 64512  }
  0x3e   : > { %s3091_s2 = sld [smem:[#allocation24_spill]]  ;;  %s3072_s1 = smov 96   ;;  %vm1155_vm2 = vcmask 130048   ;;  %vm1157_vm3 = vcmask 195584  }
  0x3f   : > { %s3106_s4 = smov (!%p832_p6, %s2677_s4), 1  ;;  %s3092_s27 = sld [smem:[#allocation27_spill]] }
  0x40   : > { %s3066_s0 = sshll.u32 %s3106_s4, 3  ;;  %s3073_s13 = smov 112  }
  0x41   : > { %s2540_s6 = smov 120   ;;  %s2541_s23 = smov 88  }
  0x42   : > { %s3068_s9 = smov 72   ;;  %s2545_s15 = smov 64  }
  0x43   : > { %v851_v0 = vld [vmem:[%s3090_s29 + $0x18] sm:$0xff]  ;;  %v850_v1 = vld [vmem:[%s3090_s29 + $0x10] sm:$0xff]  ;;  %v849_v2 = vld [vmem:[%s3090_s29 + $0x8] sm:$0xff]  ;;  %s2546_s25 = smov 40   ;;  %s2547_s26 = smov 56  }
  0x44   : > { %s835_s24 = scalar_lea.vmem %s3091_s2, %s3066_s0  ;;  %872 = vmatpush.msra.mxu0 %v851_v0  ;;  %v848_v3 = vld [vmem:[%s3090_s29] sm:$0xff]  ;;  %s3067_s2 = smov 80  }
  0x45   : > { %v2789_v4 = vld [vmem:[%s835_s24] sm:$0xff]  ;;  %s2544_s24 = smov 104   ;;  %s2548_s30 = smov 48  }
  0x46   : > { %873 = vmatpush.msra.mxu0 %v850_v1  ;;  %v2143_v5 = vld [vmem:[%s3092_s27] ss:$0 sm:$0xff]  ;;  %s3069_s5 = smov 16   ;;  %s3070_s28 = smov 8  }
  0x47   : > { %s3071_s27 = smov 24  }
  0x48   : > { %874 = vmatpush.msra.mxu0 %v849_v2 }
  0x4a   : > { %875 = vmatpush.msra.mxu0 %v848_v3 }
  0x4b   : > { %1961 = vmatmul.msk.f32.vlgmr.msra.gmra.mxu0 %vm856_vm0, %v2789_v4 }
  0xc8   : > { %v877_v6 = vpop.f32.mrf.mxu0 }
  0xc9   : > { %v2796_v7 = vadd.f32 %v2143_v5, %v877_v6 }
  0xcb   : > { %882 = vrot.lane.b32.xlu0 %v2796_v7, %s3072_s1  ;;  %v880_v8 = vmul.f32 0.35355338, %v2796_v7 }
  0xcd   : > { %1012 = vrot.lane.b32.xlu2 %v880_v8, %s3073_s13  ;;  %947 = vrot.lane.b32.xlu1 %v880_v8, %s2540_s6  ;;  %s3103_s13 = smov 24  }
  0xd3   : > { %949 = vrot.lane.b32.xlu0 %v2796_v7, %s2541_s23 }
  0xd5   : > { %1079 = vrot.lane.b32.xlu2 %v2796_v7, %s3068_s9  ;;  %1014 = vrot.lane.b32.xlu1 %v2796_v7, %s3067_s2  ;;  %s3094_s2 = sld [smem:[#allocation29_spill]]  ;;  %s1998_s9 = sshll.u32 %s3106_s4, 4 }
  0xdb   : > { %1077 = vrot.lane.b32.xlu0 %v880_v8, %s2544_s24 }
 0x127   : > { %v1013_v10 = vpop.permute.xlu2 %1012 }
 0x12f   : > { %v1080_v14 = vpop.permute.xlu2 %1079 }
 0x13d   : > { %v883_v9 = vpop.permute.xlu0 %882 }
 0x13e   : > { %1962 = vmatpush.xpose.msk.msra.mxu1 %vm884_vm1, %v883_v9 }
 0x13f   : > { %v948_v11 = vpop.permute.xlu1 %947 }
 0x141   : > { %1963 = vmatmul.msk.f32.vlgmr.msra.gmra.mxu1 %vm884_vm1, %v880_v8 }
 0x145   : > { %v950_v12 = vpop.permute.xlu0 %949 }
 0x146   : > { %1965 = vmatpush.xpose.msk.msra.mxu3 %vm884_vm1, %v950_v12 }
 0x147   : > { %v1015_v13 = vpop.permute.xlu1 %1014 }
 0x148   : > { %1968 = vmatpush.xpose.msk.msrb.mxu1 %vm884_vm1, %v1015_v13 }
 0x149   : > { %1966 = vmatmul.msk.f32.vlgmr.msra.gmra.mxu3 %vm884_vm1, %v948_v11  ;;  %v2144_v11 = vld [vmem:[%s3094_s2] ss:$0 sm:$0xff] }
 0x14b   : > { %1969 = vmatmul.msk.f32.vlgmr.msrb.gmra.mxu1 %vm884_vm1, %v1013_v10 }
 0x14c   : > { %1971 = vmatpush.xpose.msk.msra.mxu1 %vm884_vm1, %v1080_v14 }
 0x14d   : > { %v1078_v15 = vpop.permute.xlu0 %1077 }
 0x153   : > { %1972 = vmatmul.msk.f32.vlgmr.msra.gmra.mxu1 %vm884_vm1, %v1078_v15 }
 0x1be   : > { %v907_v16 = vpop.f32.mrf.mxu1 }
 0x1bf   : > { %v910_v17 = vsel %vm884_vm1, %v907_v16, -inf }
 0x1c0   : > { %911 = vmax.xlane.f32.xlu1 %v910_v17  ;;  %v1264_v17 = vld [vmem:[%s3051_s10 + $0x18] sm:$0xff] }
 0x1c1   : > { %1287 = vmatpush.msrb.mxu0 %v1264_v17 }
 0x1c8   : > { %v1037_v18 = vpop.f32.mrf.mxu1 }
 0x1c9   : > { %v1040_v19 = vsel %vm884_vm1, %v1037_v18, -inf }
 0x1ca   : > { %1041 = vmax.xlane.f32.xlu0 %v1040_v19  ;;  %v1262_v19 = vld [vmem:[%s3051_s10 + $0x8] sm:$0xff] }
 0x1cc   : > { %v972_v20 = vpop.f32.mrf.mxu3 }
 0x1cd   : > { %v975_v21 = vsel %vm884_vm1, %v972_v20, -inf }
 0x1ce   : > { %976 = vmax.xlane.f32.xlu2 %v975_v21 }
 0x1d0   : > { %v1102_v22 = vpop.f32.mrf.mxu1 }
 0x1d1   : > { %v1105_v23 = vsel %vm884_vm1, %v1102_v22, -inf }
 0x1d6   : > { %1106 = vmax.xlane.f32.xlu2 %v1105_v23 }
 0x1de   : > { %921 = vrot.lane.b32.xlu0 %v2796_v7, %s2545_s15 }
 0x1e6   : > { %1116 = vrot.lane.b32.xlu0 %v2796_v7, %s2546_s25  ;;  %s3101_s25 = smov 8  }
 0x233   : > { %v912_v24 = vpop.xlane.xlu1 %911 }
 0x234   : > { %v913_v25 = vsub.f32 %v907_v16, %v912_v24  ;;  %v2552_v16 = vmov 32.0  }
 0x236   : > { %v914_v26 = vmul.f32 1.442695, %v913_v25 }
 0x238   : > { %2156 = vpow2.f32 %v914_v26 }
 0x23d   : > { %v1042_v27 = vpop.xlane.xlu0 %1041 }
 0x23e   : > { %v2157_v28 = vpop.eup %2156  ;;  %v1043_v29 = vsub.f32 %v1037_v18, %v1042_v27  ;;  %v1263_v18 = vld [vmem:[%s3051_s10 + $0x10] sm:$0xff] }
 0x23f   : > { %v916_v30 = vsel %vm884_vm1, %v2157_v28, 0.0  ;;  %1288 = vmatpush.msrb.mxu0 %v1263_v18 }
 0x240   : > { %v1044_v31 = vmul.f32 1.442695, %v1043_v29  ;;  %917 = vadd.xlane.f32.xlu1 %v916_v30  ;;  %v1261_v30 = vld [vmem:[%s3051_s10] sm:$0xff] }
 0x241   : > { %v977_v32 = vpop.xlane.xlu2 %976  ;;  %1289 = vmatpush.msrb.mxu0 %v1262_v19 }
 0x242   : > { %2158 = vpow2.f32 %v1044_v31  ;;  %v978_v33 = vsub.f32 %v972_v20, %v977_v32 }
 0x243   : > { %1290 = vmatpush.msrb.mxu0 %v1261_v30 }
 0x244   : > { %v979_v34 = vmul.f32 1.442695, %v978_v33  ;;  %v1233_v33 = vld [vmem:[%s3049_s8 + $0x18] sm:$0xff] }
 0x246   : > { %2160 = vpow2.f32 %v979_v34  ;;  %v1232_v34 = vld [vmem:[%s3049_s8 + $0x10] sm:$0xff] }
 0x248   : > { %v2159_v35 = vpop.eup %2158 }
 0x249   : > { %v1107_v36 = vpop.xlane.xlu2 %1106  ;;  %v1046_v37 = vsel %vm884_vm1, %v2159_v35, 0.0 }
 0x24a   : > { %v1108_v38 = vsub.f32 %v1102_v22, %v1107_v36  ;;  %1047 = vadd.xlane.f32.xlu1 %v1046_v37  ;;  %v1230_v36 = vld [vmem:[%s3049_s8] sm:$0xff] }
 0x24c   : > { %v2161_v39 = vpop.eup %2160  ;;  %v1109_v40 = vmul.f32 1.442695, %v1108_v38 }
 0x24d   : > { %v981_v41 = vsel %vm884_vm1, %v2161_v39, 0.0 }
 0x24e   : > { %2162 = vpow2.f32 %v1109_v40  ;;  %982 = vadd.xlane.f32.xlu2 %v981_v41 }
 0x250   : > { %v922_v42 = vpop.permute.xlu0 %921 }
 0x251   : > { %942 = vmatpush.msra.mxu2 %v922_v42 }
 0x254   : > { %v2163_v43 = vpop.eup %2162 }
 0x255   : > { %v1111_v44 = vsel %vm884_vm1, %v2163_v43, 0.0 }
 0x256   : > { %1112 = vadd.xlane.f32.xlu2 %v1111_v44 }
 0x258   : > { %v1117_v57 = vpop.permute.xlu0 %1116 }
 0x263   : > { %986 = vrot.lane.b32.xlu1 %v2796_v7, %s2547_s26  ;;  %s3093_s26 = sld [smem:[#allocation28_spill]] }
 0x269   : > { %v1162_v0 = vld [vmem:[%s3093_s26 + $0x18] sm:$0xff]  ;;  %v1161_v1 = vld [vmem:[%s3093_s26 + $0x10] sm:$0xff]  ;;  %v1160_v2 = vld [vmem:[%s3093_s26 + $0x8] sm:$0xff] }
 0x26a   : > { %1182 = vmatpush.msrb.mxu1 %v1162_v0  ;;  %v1159_v3 = vld [vmem:[%s3093_s26] sm:$0xff] }
 0x26c   : > { %1183 = vmatpush.msrb.mxu1 %v1161_v1 }
 0x26e   : > { %1051 = vrot.lane.b32.xlu2 %v2796_v7, %s2548_s30  ;;  %1184 = vmatpush.msrb.mxu1 %v1160_v2  ;;  %s3102_s30 = smov 16  }
 0x270   : > { %1185 = vmatpush.msrb.mxu1 %v1159_v3 }
 0x2b3   : > { %v918_v45 = vpop.xlane.xlu1 %917 }
 0x2b4   : > { %2164 = vrcp.f32 %v918_v45 }
 0x2ba   : > { %v2165_v46 = vpop.eup %2164 }
 0x2bb   : > { %v920_v47 = vmul.f32 %v2165_v46, %v2157_v28 }
 0x2bd   : > { %1964 = vmatmul.msk.f32.vlgmr.msra.gmra.mxu2 %vm884_vm1, %v920_v47  ;;  %v1048_v49 = vpop.xlane.xlu1 %1047 }
 0x2be   : > { %2166 = vrcp.f32 %v1048_v49  ;;  %v2146_v49 = vld [vmem:[#allocation2] ss:$0 sm:$0xff] }
 0x2c1   : > { %v983_v48 = vpop.xlane.xlu2 %982 }
 0x2c2   : > { %2168 = vrcp.f32 %v983_v48 }
 0x2c4   : > { %v2167_v51 = vpop.eup %2166 }
 0x2c5   : > { %v1050_v53 = vmul.f32 %v2167_v51, %v2159_v35  ;;  %v1231_v35 = vld [vmem:[%s3049_s8 + $0x8] sm:$0xff] }
 0x2c8   : > { %v2169_v54 = vpop.eup %2168 }
 0x2c9   : > { %v1113_v50 = vpop.xlane.xlu2 %1112  ;;  %v985_v56 = vmul.f32 %v2169_v54, %v2161_v39 }
 0x2ca   : > { %2170 = vrcp.f32 %v1113_v50 }
 0x2cb   : > { %2172 = vrcp.f32 %v2552_v16 }
 0x2d0   : > { %v2171_v58 = vpop.eup %2170 }
 0x2d1   : > { %v1052_v52 = vpop.permute.xlu2 %1051  ;;  %v1115_v59 = vmul.f32 %v2171_v58, %v2163_v43  ;;  %v2148_v58 = vld [vmem:[#allocation4] ss:$0 sm:$0xff] }
 0x2d2   : > { %1072 = vmatpush.msrb.mxu3 %v1052_v52 }
 0x2d3   : > { %1970 = vmatmul.msk.f32.vlgmr.msrb.gmra.mxu3 %vm884_vm1, %v1050_v53  ;;  %v2147_v53 = vld [vmem:[#allocation6] ss:$0 sm:$0xff] }
 0x2d4   : > { %1253 = vmatpush.msra.mxu3 %v1233_v33 }
 0x2d5   : > { %v987_v55 = vpop.permute.xlu1 %986 }
 0x2d6   : > { %1007 = vmatpush.msrb.mxu2 %v987_v55  ;;  %1254 = vmatpush.msra.mxu3 %v1232_v34 }
 0x2d7   : > { %1967 = vmatmul.msk.f32.vlgmr.msrb.gmra.mxu2 %vm884_vm1, %v985_v56 }
 0x2d8   : > { %1137 = vmatpush.msra.mxu2 %v1117_v57  ;;  %1255 = vmatpush.msra.mxu3 %v1231_v35 }
 0x2da   : > { %1256 = vmatpush.msra.mxu3 %v1230_v36 }
 0x2df   : > { %1973 = vmatmul.msk.f32.vlgmr.msra.gmra.mxu2 %vm884_vm1, %v1115_v59 }
 0x340   : > { %v944_v60 = vpop.f32.mrf.mxu2 }
 0x356   : > { %v1074_v61 = vpop.f32.mrf.mxu3 }
 0x357   : > { %1147 = vrot.lane.b32.xlu1 %v1074_v61, %s3069_s5 }
 0x35a   : > { %v1009_v62 = vpop.f32.mrf.mxu2 }
 0x35b   : > { %1143 = vrot.lane.b32.xlu0 %v1009_v62, %s3070_s28  ;;  %s3095_s28 = sld [smem:[#allocation25_spill]] }
 0x361   : > { %s840_s15 = scalar_lea.vmem %s3095_s28, %s1998_s9 }
 0x362   : > { %v1139_v63 = vpop.f32.mrf.mxu2  ;;  %v846_v31 = vld [vmem:[%s840_s15] sm:$0xff]  ;;  %v847_v32 = vld [vmem:[%s840_s15 + $0x8] sm:$0xff]  ;;  %s3100_s15 = smov 80  }
 0x363   : > { %1151 = vrot.lane.b32.xlu0 %v1139_v63, %s3071_s27  ;;  %1976 = vmatmul.msk.f32.vlgmr.msrb.gmra.mxu0 %vm856_vm0, %v846_v31  ;;  %s3096_s27 = sld [smem:[#allocation30_spill]] }
 0x369   : > { %v2145_v46 = vld [vmem:[%s3096_s27] ss:$0 sm:$0xff]  ;;  %s3104_s27 = sshll.u32 %s3106_s4, 3 }
 0x36b   : > { %1977 = vmatmul.msk.f32.gmra.mxu0 %vm856_vm0, %v847_v32 }
 0x3c9   : > { %v1148_v7 = vpop.permute.xlu1 %1147 }
 0x3cd   : > { %v1144_v5 = vpop.permute.xlu0 %1143 }
 0x3ce   : > { %v1154_v6 = vsel %vm884_vm1, %v944_v60, %v1144_v5 }
 0x3cf   : > { %v1156_v9 = vsel %vm1155_vm2, %v1154_v6, %v1148_v7 }
 0x3d5   : > { %v1152_v8 = vpop.permute.xlu0 %1151 }
 0x3d6   : > { %v1158_v10 = vsel %vm1157_vm3, %v1156_v9, %v1152_v8 }
 0x3d7   : > { %1974 = vmatmul.msk.f32.vlgmr.msrb.gmra.mxu1 %vm856_vm0, %v1158_v10 }
 0x3e0   : > { %v1292_v52 = vpop.f32.mrf.mxu0 }
 0x3e1   : > { %v1293_v54 = vadd.f32 %v2147_v53, %v1292_v52 }
 0x3e8   : > { %v1295_v55 = vpop.f32.mrf.mxu0 }
 0x3e9   : > { %v1296_v56 = vadd.f32 %v2147_v53, %v1295_v55 }
 0x3eb   : > { %1372 = vrot.lane.b32.xlu0 %v1296_v56, %s2540_s6  ;;  %v2901_v57 = vpack.i.bf16 %v1293_v54, %v1296_v56  ;;  %1978 = vmatpush.xpose.msk.msrb.mxu2 %vm884_vm1, %v1296_v56 }
 0x3ef   : > { %1979 = vmatpush.xpose.msk.msrb.mxu2 %vm884_vm1, %v1293_v54 }
 0x3f3   : > { %1370 = vrot.lane.b32.xlu0 %v1293_v54, %s2540_s6 }
 0x454   : > { %v1187_v12 = vpop.f32.mrf.mxu1 }
 0x455   : > { %v1188_v13 = vadd.f32 %v2144_v11, %v1187_v12 }
 0x457   : > { %v1192_v14 = vadd.f32 %v1188_v13, %v2789_v4  ;;  %v2173_v4 = vpop.eup %2172 }
 0x458   : > { %v1197_v20 = vmul.f32 32.0, %v2173_v4  ;;  %vm1201_vm4 = vweird.f32 %v2173_v4 }
 0x459   : > { %v1193_v15 = vsel %vm856_vm0, %v1192_v14, 0.0 }
 0x45a   : > { %1194 = vadd.xlane.f32.xlu2 %v1193_v15  ;;  %v1198_v21 = vsub.f32 1.0, %v1197_v20 }
 0x45c   : > { %v1199_v22 = vmul.f32 %v2173_v4, %v1198_v21 }
 0x45d   : > { %v1373_v62 = vpop.permute.xlu0 %1372 }
 0x45e   : > { %v1200_v23 = vadd.f32 %v2173_v4, %v1199_v22  ;;  %1982 = vmatpush.xpose.msk.msrb.mxu3 %vm884_vm1, %v1373_v62 }
 0x460   : > { %v2867_v24 = vsel %vm1201_vm4, %v2173_v4, %v1200_v23 }
 0x465   : > { %v1371_v2 = vpop.permute.xlu0 %1370 }
 0x466   : > { %1983 = vmatpush.xpose.msk.msrb.mxu3 %vm884_vm1, %v1371_v2  ;;  %v1600_v2 = vld [vmem:[%s3053_s12 + $0x8] sm:$0xff] }
 0x4cd   : > { %v1195_v25 = vpop.xlane.xlu2 %1194 }
 0x4ce   : > { %v1203_v26 = vmul.f32 %v2867_v24, %v1195_v25 }
 0x4d0   : > { %v1204_v27 = vsub.f32 %v1192_v14, %v1203_v26 }
 0x4d2   : > { %v1205_v28 = vmul.f32 %v1204_v27, %v1204_v27 }
 0x4d4   : > { %v1206_v29 = vsel %vm856_vm0, %v1205_v28, 0.0 }
 0x4d5   : > { %1207 = vadd.xlane.f32.xlu1 %v1206_v29 }
 0x4ee   : > { %2124 = vrot.lane.b32.xlu1 %v2901_v57, %s2541_s23  ;;  %s3098_s23 = smov 96  }
 0x4f6   : > { %1514 = vrot.lane.b32.xlu1 %v1293_v54, %s2544_s24 }
 0x548   : > { %v1208_v37 = vpop.xlane.xlu1 %1207 }
 0x549   : > { %v1209_v38 = vmul.f32 %v1208_v37, %v2867_v24 }
 0x54b   : > { %v1210_v39 = vadd.f32 1e-05, %v1209_v38 }
 0x54d   : > { %2174 = vrsqrt.f32 %v1210_v39  ;;  %vm1217_vm6 = vweird.f32 %v1210_v39 }
 0x553   : > { %v2175_v40 = vpop.eup %2174 }
 0x554   : > { %v1212_v41 = vmul.f32 %v2175_v40, %v1210_v39  ;;  %vm1218_vm5 = vweird.f32 %v2175_v40 }
 0x555   : > { %vm1219_vm7 = vmor %vm1217_vm6, %vm1218_vm5 }
 0x556   : > { %v1213_v42 = vmul.f32 %v2175_v40, %v1212_v41 }
 0x558   : > { %v1214_v43 = vmul.f32 0.5, %v1213_v42 }
 0x55a   : > { %v1215_v44 = vsub.f32 1.5, %v1214_v43 }
 0x55c   : > { %v1216_v45 = vmul.f32 %v2175_v40, %v1215_v44 }
 0x55e   : > { %v1220_v47 = vsel %vm1219_vm7, %v2175_v40, %v1216_v45 }
 0x55f   : > { %v1221_v48 = vmul.f32 %v1220_v47, %v1204_v27 }
 0x560   : > { %v2125_v63 = vpop.permute.xlu1 %2124 }
 0x561   : > { %v1225_v50 = vmul.f32 %v2145_v46, %v1221_v48  ;;  %v2127_v0 = vunpack.i.h.bf16 %v2125_v63  ;;  %v2126_v1 = vunpack.i.l.bf16 %v2125_v63 }
 0x563   : > { %v2896_v51 = vadd.f32 %v2146_v49, %v1225_v50  ;;  %1434 = vmatpush.msra.mxu2 %v2126_v1  ;;  %v1601_v1 = vld [vmem:[%s3053_s12 + $0x10] sm:$0xff] }
 0x565   : > { %1975 = vmatmul.msk.f32.vlgmr.msra.gmra.mxu3 %vm856_vm0, %v2896_v51  ;;  %1435 = vmatpush.msra.mxu2 %v2127_v0  ;;  %v1602_v0 = vld [vmem:[%s3053_s12 + $0x18] sm:$0xff] }
 0x568   : > { %v1515_v14 = vpop.permute.xlu1 %1514 }
 0x5e8   : > { %v1258_v59 = vpop.f32.mrf.mxu3 }
 0x5e9   : > { %v1259_v60 = vadd.f32 %v2148_v58, %v1258_v59 }
 0x5eb   : > { %v1298_v61 = vmul.f32 0.35355338, %v1259_v60 }
 0x5ed   : > { %1368 = vrot.lane.b32.xlu0 %v1298_v61, %s2540_s6  ;;  %1980 = vmatmul.msk.f32.vlgmr.msrb.gmra.mxu2 %vm884_vm1, %v1298_v61  ;;  %s3097_s6 = smov 112  }
 0x65f   : > { %v1369_v3 = vpop.permute.xlu0 %1368 }
 0x660   : > { %1984 = vmatmul.msk.f32.vlgmr.msrb.gmra.mxu3 %vm884_vm1, %v1369_v3 }
 0x670   : > { %v1325_v5 = vpop.f32.mrf.mxu2 }
 0x671   : > { %v1328_v6 = vsel %vm1155_vm2, %v1325_v5, -inf }
 0x672   : > { %1329 = vmax.xlane.f32.xlu2 %v1328_v6 }
 0x68a   : > { %1516 = vrot.lane.b32.xlu2 %v1296_v56, %s2544_s24 }
 0x692   : > { %1444 = vrot.lane.b32.xlu2 %v1296_v56, %s3097_s6 }
 0x6e3   : > { %v1397_v7 = vpop.f32.mrf.mxu3 }
 0x6e4   : > { %v1400_v8 = vsel %vm1155_vm2, %v1397_v7, -inf }
 0x6e5   : > { %1401 = vmax.xlane.f32.xlu0 %v1400_v8  ;;  %v1330_v9 = vpop.xlane.xlu2 %1329 }
 0x6e6   : > { %v1331_v10 = vsub.f32 %v1325_v5, %v1330_v9  ;;  %v1599_v5 = vld [vmem:[%s3053_s12] sm:$0xff] }
 0x6e8   : > { %v1332_v11 = vmul.f32 1.442695, %v1331_v10 }
 0x6ea   : > { %2176 = vpow2.f32 %v1332_v11 }
 0x6ed   : > { %v1517_v12 = vpop.permute.xlu2 %1516 }
 0x6ee   : > { %1990 = vmatpush.xpose.msk.msrb.mxu2 %vm884_vm1, %v1517_v12  ;;  %v2149_v12 = vld [vmem:[#allocation7] ss:$0 sm:$0xff] }
 0x6f0   : > { %v2177_v13 = vpop.eup %2176 }
 0x6f1   : > { %v1334_v15 = vsel %vm1155_vm2, %v2177_v13, 0.0 }
 0x6f2   : > { %1335 = vadd.xlane.f32.xlu2 %v1334_v15  ;;  %1991 = vmatpush.xpose.msk.msrb.mxu2 %vm884_vm1, %v1515_v14 }
 0x6f5   : > { %v1445_v19 = vpop.permute.xlu2 %1444 }
 0x6f9   : > { %2129 = vrot.lane.b32.xlu0 %v2901_v57, %s3098_s23 }
 0x701   : > { %1440 = vrot.lane.b32.xlu0 %v1298_v61, %s3097_s6 }
 0x70a   : > { %1442 = vrot.lane.b32.xlu2 %v1293_v54, %s3097_s6 }
 0x758   : > { %v1402_v16 = vpop.xlane.xlu0 %1401 }
 0x759   : > { %v1403_v17 = vsub.f32 %v1397_v7, %v1402_v16 }
 0x75b   : > { %v1404_v18 = vmul.f32 1.442695, %v1403_v17 }
 0x75d   : > { %2178 = vpow2.f32 %v1404_v18 }
 0x763   : > { %v2179_v4 = vpop.eup %2178 }
 0x764   : > { %v1406_v20 = vsel %vm1155_vm2, %v2179_v4, 0.0 }
 0x765   : > { %1407 = vadd.xlane.f32.xlu1 %v1406_v20  ;;  %v1336_v21 = vpop.xlane.xlu2 %1335 }
 0x766   : > { %2180 = vrcp.f32 %v1336_v21  ;;  %v1666_v21 = vld [vmem:[%s3057_s16 + $0x18] sm:$0xff] }
 0x76b   : > { %v2130_v22 = vpop.permute.xlu0 %2129 }
 0x76c   : > { %v2181_v23 = vpop.eup %2180  ;;  %v2131_v25 = vunpack.i.l.bf16 %v2130_v22  ;;  %v2132_v26 = vunpack.i.h.bf16 %v2130_v22  ;;  %v1664_v22 = vld [vmem:[%s3057_s16 + $0x8] sm:$0xff] }
 0x76d   : > { %v1338_v27 = vmul.f32 %v2181_v23, %v2177_v13  ;;  %v1443_v28 = vpop.permute.xlu2 %1442  ;;  %v1663_v23 = vld [vmem:[%s3057_s16] sm:$0xff] }
 0x76e   : > { %1362 = vmatpush.msra.mxu1 %v2131_v25  ;;  %v1710_v25 = vld [vmem:[%s3059_s18 + $0x78] sm:$0xff] }
 0x76f   : > { %1715 = vmatpush.msra.mxu0 %v1710_v25 }
 0x770   : > { %1363 = vmatpush.msra.mxu1 %v2132_v26  ;;  %v1709_v26 = vld [vmem:[%s3059_s18 + $0x70] sm:$0xff] }
 0x771   : > { %1981 = vmatmul.msk.f32.vlgmr.msra.gmra.mxu1 %vm1155_vm2, %v1338_v27  ;;  %v1708_v27 = vld [vmem:[%s3059_s18 + $0x68] sm:$0xff]  ;;  %1716 = vmatpush.msra.mxu0 %v1709_v26 }
 0x772   : > { %1986 = vmatpush.xpose.msk.msrb.mxu1 %vm884_vm1, %v1445_v19 }
 0x773   : > { %v1441_v29 = vpop.permute.xlu0 %1440  ;;  %1717 = vmatpush.msra.mxu0 %v1708_v27 }
 0x776   : > { %1987 = vmatpush.xpose.msk.msrb.mxu1 %vm884_vm1, %v1443_v28 }
 0x779   : > { %1988 = vmatmul.msk.f32.vlgmr.msrb.gmra.mxu1 %vm884_vm1, %v1441_v29 }
 0x77a   : > { %1622 = vmatpush.msra.mxu1 %v1602_v0 }
 0x77c   : > { %1623 = vmatpush.msra.mxu1 %v1601_v1 }
 0x77e   : > { %1512 = vrot.lane.b32.xlu1 %v1298_v61, %s2544_s24  ;;  %s3099_s24 = smov 72   ;;  %1624 = vmatpush.msra.mxu1 %v1600_v2 }
 0x780   : > { %1625 = vmatpush.msra.mxu1 %v1599_v5 }
 0x7d8   : > { %v1408_v30 = vpop.xlane.xlu1 %1407 }
 0x7d9   : > { %2182 = vrcp.f32 %v1408_v30  ;;  %v1707_v30 = vld [vmem:[%s3059_s18 + $0x60] sm:$0xff] }
 0x7da   : > { %1718 = vmatpush.msra.mxu0 %v1707_v30 }
 0x7df   : > { %v2183_v31 = vpop.eup %2182 }
 0x7e0   : > { %v1410_v32 = vmul.f32 %v2183_v31, %v2179_v4 }
 0x7e2   : > { %1985 = vmatmul.msk.f32.vlgmr.msra.gmra.mxu2 %vm1155_vm2, %v1410_v32  ;;  %v1706_v32 = vld [vmem:[%s3059_s18 + $0x58] sm:$0xff] }
 0x7e3   : > { %1719 = vmatpush.msra.mxu0 %v1706_v32 }
 0x7ee   : > { %v1365_v33 = vpop.f32.mrf.mxu1 }
 0x7f0   : > { %v1513_v34 = vpop.permute.xlu1 %1512 }
 0x7f1   : > { %1992 = vmatmul.msk.f32.vlgmr.msrb.gmra.mxu2 %vm884_vm1, %v1513_v34  ;;  %v1704_v34 = vld [vmem:[%s3059_s18 + $0x48] sm:$0xff] }
 0x7f6   : > { %v1469_v35 = vpop.f32.mrf.mxu1 }
 0x7f7   : > { %v1472_v36 = vsel %vm1155_vm2, %v1469_v35, -inf }
 0x7f8   : > { %1473 = vmax.xlane.f32.xlu1 %v1472_v36 }
 0x865   : > { %v1437_v38 = vpop.f32.mrf.mxu2 }
 0x86b   : > { %v1474_v37 = vpop.xlane.xlu1 %1473 }
 0x86c   : > { %v1475_v39 = vsub.f32 %v1469_v35, %v1474_v37  ;;  %v1703_v35 = vld [vmem:[%s3059_s18 + $0x40] sm:$0xff]  ;;  %v1702_v37 = vld [vmem:[%s3059_s18 + $0x38] sm:$0xff] }
 0x86e   : > { %v1476_v40 = vmul.f32 1.442695, %v1475_v39  ;;  %v1701_v39 = vld [vmem:[%s3059_s18 + $0x30] sm:$0xff] }
 0x870   : > { %2184 = vpow2.f32 %v1476_v40 }
 0x874   : > { %v1541_v41 = vpop.f32.mrf.mxu2 }
 0x875   : > { %v1544_v42 = vsel %vm1155_vm2, %v1541_v41, -inf }
 0x876   : > { %v2185_v43 = vpop.eup %2184  ;;  %1545 = vmax.xlane.f32.xlu2 %v1544_v42 }
 0x877   : > { %v1478_v44 = vsel %vm1155_vm2, %v2185_v43, 0.0 }
 0x878   : > { %1479 = vadd.xlane.f32.xlu0 %v1478_v44 }
 0x88c   : > { %2139 = vrot.lane.b32.xlu0 %v2901_v57, %s3099_s24  ;;  %s844_s24 = scalar_lea.vmem %s3063_s22, %s3104_s27 }
 0x88e   : > { %2134 = vrot.lane.b32.xlu2 %v2901_v57, %s3100_s15 }
 0x8e9   : > { %v1546_v45 = vpop.xlane.xlu2 %1545 }
 0x8ea   : > { %v1547_v46 = vsub.f32 %v1541_v41, %v1546_v45  ;;  %v1700_v41 = vld [vmem:[%s3059_s18 + $0x28] sm:$0xff]  ;;  %v1698_v45 = vld [vmem:[%s3059_s18 + $0x18] sm:$0xff] }
 0x8eb   : > { %v1480_v47 = vpop.xlane.xlu0 %1479 }
 0x8ec   : > { %v1548_v48 = vmul.f32 1.442695, %v1547_v46  ;;  %2186 = vrcp.f32 %v1480_v47  ;;  %v2150_v47 = vld [vmem:[#allocation9] ss:$0 sm:$0xff] }
 0x8ee   : > { %2188 = vpow2.f32 %v1548_v48 }
 0x8f1   : > { %v2135_v49 = vpop.permute.xlu2 %2134 }
 0x8f2   : > { %v2187_v50 = vpop.eup %2186  ;;  %v2136_v52 = vunpack.i.l.bf16 %v2135_v49  ;;  %v2137_v54 = vunpack.i.h.bf16 %v2135_v49 }
 0x8f3   : > { %v1482_v55 = vmul.f32 %v2187_v50, %v2185_v43  ;;  %v1699_v43 = vld [vmem:[%s3059_s18 + $0x20] sm:$0xff]  ;;  %v2151_v50 = vld [vmem:[#allocation10] ss:$0 sm:$0xff] }
 0x8f4   : > { %v2189_v53 = vpop.eup %2188  ;;  %1506 = vmatpush.msra.mxu3 %v2136_v52 }
 0x8f5   : > { %v1550_v56 = vsel %vm1155_vm2, %v2189_v53, 0.0 }
 0x8f6   : > { %1551 = vadd.xlane.f32.xlu1 %v1550_v56  ;;  %1507 = vmatpush.msra.mxu3 %v2137_v54  ;;  %v1697_v54 = vld [vmem:[%s3059_s18 + $0x10] sm:$0xff]  ;;  %v1695_v56 = vld [vmem:[%s3059_s18] sm:$0xff] }
 0x8f7   : > { %1989 = vmatmul.msk.f32.vlgmr.msra.gmra.mxu3 %vm1155_vm2, %v1482_v55  ;;  %v1696_v55 = vld [vmem:[%s3059_s18 + $0x8] sm:$0xff] }
 0x8f8   : > { %1686 = vmatpush.msrb.mxu3 %v1666_v21 }
 0x8fe   : > { %v2140_v57 = vpop.permute.xlu0 %2139 }
 0x8ff   : > { %v2141_v58 = vunpack.i.l.bf16 %v2140_v57  ;;  %v2142_v59 = vunpack.i.h.bf16 %v2140_v57  ;;  %v2152_v57 = vld [vmem:[#allocation12] ss:$0 sm:$0xff] }
 0x901   : > { %1578 = vmatpush.msra.mxu2 %v2141_v58 }
 0x903   : > { %1579 = vmatpush.msra.mxu2 %v2142_v59 }
 0x90f   : > { %1585 = vrot.lane.b32.xlu1 %v1437_v38, %s3101_s25 }
 0x969   : > { %v1552_v60 = vpop.xlane.xlu1 %1551 }
 0x96a   : > { %2190 = vrcp.f32 %v1552_v60 }
 0x970   : > { %v2191_v61 = vpop.eup %2190 }
 0x971   : > { %v1554_v62 = vmul.f32 %v2191_v61, %v2189_v53  ;;  %v2153_v61 = vld [vmem:[#allocation13] ss:$0 sm:$0xff] }
 0x973   : > { %1993 = vmatmul.msk.f32.vlgmr.msra.gmra.mxu2 %vm1155_vm2, %v1554_v62 }
 0x97a   : > { %v1509_v63 = vpop.f32.mrf.mxu3 }
 0x97b   : > { %1589 = vrot.lane.b32.xlu0 %v1509_v63, %s3102_s30 }
 0x981   : > { %v1586_v6 = vpop.permute.xlu1 %1585 }
 0x982   : > { %v1596_v8 = vsel %vm884_vm1, %v1365_v33, %v1586_v6  ;;  %v1705_v33 = vld [vmem:[%s3059_s18 + $0x50] sm:$0xff] }
 0x983   : > { %1720 = vmatpush.msra.mxu0 %v1705_v33 }
 0x985   : > { %1721 = vmatpush.msra.mxu0 %v1704_v34 }
 0x987   : > { %1722 = vmatpush.msra.mxu0 %v1703_v35 }
 0x989   : > { %1723 = vmatpush.msra.mxu0 %v1702_v37 }
 0x98b   : > { %1724 = vmatpush.msra.mxu0 %v1701_v39 }
 0x98d   : > { %1725 = vmatpush.msra.mxu0 %v1700_v41 }
 0x98f   : > { %1726 = vmatpush.msra.mxu0 %v1699_v43 }
 0x991   : > { %1727 = vmatpush.msra.mxu0 %v1698_v45 }
 0x993   : > { %1728 = vmatpush.msra.mxu0 %v1697_v54 }
 0x995   : > { %1729 = vmatpush.msra.mxu0 %v1696_v55 }
 0x997   : > { %1730 = vmatpush.msra.mxu0 %v1695_v56 }
 0x9ed   : > { %v1590_v7 = vpop.permute.xlu0 %1589 }
 0x9ee   : > { %v1597_v9 = vsel %vm1155_vm2, %v1596_v8, %v1590_v7 }
 0x9f6   : > { %v1581_v3 = vpop.f32.mrf.mxu2 }
 0x9f7   : > { %1593 = vrot.lane.b32.xlu2 %v1581_v3, %s3103_s13 }
 0xa51   : > { %v1594_v10 = vpop.permute.xlu2 %1593 }
 0xa52   : > { %v1598_v11 = vsel %vm1157_vm3, %v1597_v9, %v1594_v10 }
 0xa53   : > { %1994 = vmatmul.msk.f32.vlgmr.msra.gmra.mxu1 %vm856_vm0, %v1598_v11 }
 0xad0   : > { %v1627_v13 = vpop.f32.mrf.mxu1 }
 0xad1   : > { %v1628_v14 = vadd.f32 %v2149_v12, %v1627_v13 }
 0xad3   : > { %v1632_v15 = vadd.f32 %v1628_v14, %v2896_v51  ;;  %v1665_v51 = vld [vmem:[%s3057_s16 + $0x10] sm:$0xff] }
 0xad4   : > { %1687 = vmatpush.msrb.mxu3 %v1665_v51 }
 0xad5   : > { %v1633_v16 = vsel %vm856_vm0, %v1632_v15, 0.0 }
 0xad6   : > { %1634 = vadd.xlane.f32.xlu1 %v1633_v16  ;;  %1688 = vmatpush.msrb.mxu3 %v1664_v22 }
 0xad8   : > { %1689 = vmatpush.msrb.mxu3 %v1663_v23 }
 0xb49   : > { %v1635_v17 = vpop.xlane.xlu1 %1634 }
 0xb4a   : > { %v1636_v18 = vmul.f32 %v1635_v17, %v2867_v24  ;;  %v2154_v17 = vld [vmem:[#allocation15] ss:$0 sm:$0xff] }
 0xb4c   : > { %v1637_v19 = vsub.f32 %v1632_v15, %v1636_v18 }
 0xb4e   : > { %v1638_v4 = vmul.f32 %v1637_v19, %v1637_v19 }
 0xb50   : > { %v1639_v20 = vsel %vm856_vm0, %v1638_v4, 0.0 }
 0xb51   : > { %1640 = vadd.xlane.f32.xlu0 %v1639_v20 }
 0xbc4   : > { %v1641_v28 = vpop.xlane.xlu0 %1640 }
 0xbc5   : > { %v1642_v29 = vmul.f32 %v1641_v28, %v2867_v24 }
 0xbc7   : > { %v1643_v31 = vadd.f32 1e-05, %v1642_v29 }
 0xbc9   : > { %2192 = vrsqrt.f32 %v1643_v31  ;;  %vm1650_vm9 = vweird.f32 %v1643_v31 }
 0xbcf   : > { %v2193_v36 = vpop.eup %2192 }
 0xbd0   : > { %v1645_v38 = vmul.f32 %v2193_v36, %v1643_v31  ;;  %vm1651_vm8 = vweird.f32 %v2193_v36 }
 0xbd1   : > { %vm1652_vm10 = vmor %vm1650_vm9, %vm1651_vm8 }
 0xbd2   : > { %v1646_v40 = vmul.f32 %v2193_v36, %v1645_v38 }
 0xbd4   : > { %v1647_v42 = vmul.f32 0.5, %v1646_v40 }
 0xbd6   : > { %v1648_v44 = vsub.f32 1.5, %v1647_v42 }
 0xbd8   : > { %v1649_v46 = vmul.f32 %v2193_v36, %v1648_v44 }
 0xbda   : > { %v1653_v48 = vsel %vm1652_vm10, %v2193_v36, %v1649_v46 }
 0xbdb   : > { %v1654_v49 = vmul.f32 %v1653_v48, %v1637_v19  ;;  %v2155_v19 = vld [vmem:[#allocation16] ss:$0 sm:$0xff] }
 0xbdd   : > { %v1658_v52 = vmul.f32 %v2150_v47, %v1654_v49 }
 0xbdf   : > { %v1662_v53 = vadd.f32 %v2151_v50, %v1658_v52 }
 0xbe1   : > { %1995 = vmatmul.msk.f32.vlgmr.msrb.gmra.mxu3 %vm856_vm0, %v1662_v53 }
 0xc64   : > { %v1691_v58 = vpop.f32.mrf.mxu3 }
 0xc65   : > { %v1692_v59 = vadd.f32 %v2152_v57, %v1691_v58 }
 0xc67   : > { %v1694_v60 = vmax.f32 %v1692_v59, 0.0 }
 0xc69   : > { %1731 = vmatmul.f32.vlgmr.msra.gmra.mxu0 %v1694_v60 }
 0xce6   : > { %v1732_v62 = vpop.f32.mrf.mxu0 }
 0xce7   : > { %v1733_v63 = vadd.f32 %v2153_v61, %v1732_v62 }
 0xce9   : > { %v1737_v0 = vadd.f32 %v1733_v63, %v1662_v53 }
 0xceb   : > { %v1738_v1 = vsel %vm856_vm0, %v1737_v0, 0.0 }
 0xcec   : > { %1739 = vadd.xlane.f32.xlu2 %v1738_v1 }
 0xd5f   : > { %v1740_v2 = vpop.xlane.xlu2 %1739 }
 0xd60   : > { %v1741_v3 = vmul.f32 %v1740_v2, %v2867_v24 }
 0xd62   : > { %v1742_v5 = vsub.f32 %v1737_v0, %v1741_v3 }
 0xd64   : > { %v1743_v6 = vmul.f32 %v1742_v5, %v1742_v5 }
 0xd66   : > { %v1744_v7 = vsel %vm856_vm0, %v1743_v6, 0.0 }
 0xd67   : > { %1745 = vadd.xlane.f32.xlu1 %v1744_v7 }
 0xdda   : > { %v1746_v8 = vpop.xlane.xlu1 %1745 }
 0xddb   : > { %v1747_v9 = vmul.f32 %v1746_v8, %v2867_v24 }
 0xddd   : > { %v1748_v10 = vadd.f32 1e-05, %v1747_v9 }
 0xddf   : > { %2194 = vrsqrt.f32 %v1748_v10  ;;  %vm1755_vm12 = vweird.f32 %v1748_v10 }
 0xde5   : > { %v2195_v11 = vpop.eup %2194 }
 0xde6   : > { %v1750_v12 = vmul.f32 %v2195_v11, %v1748_v10  ;;  %vm1756_vm11 = vweird.f32 %v2195_v11 }
 0xde7   : > { %vm1757_vm13 = vmor %vm1755_vm12, %vm1756_vm11 }
 0xde8   : > { %v1751_v13 = vmul.f32 %v2195_v11, %v1750_v12 }
 0xdea   : > { %v1752_v14 = vmul.f32 0.5, %v1751_v13 }
 0xdec   : > { %v1753_v15 = vsub.f32 1.5, %v1752_v14 }
 0xdee   : > { %v1754_v16 = vmul.f32 %v2195_v11, %v1753_v15 }
 0xdf0   : > { %v1758_v18 = vsel %vm1757_vm13, %v2195_v11, %v1754_v16 }
 0xdf1   : > { %v1759_v4 = vmul.f32 %v1758_v18, %v1742_v5 }
 0xdf3   : > { %v1763_v20 = vmul.f32 %v2154_v17, %v1759_v4 }
 0xdf5   : > { %v1767_v24 = vadd.f32 %v2155_v19, %v1763_v20 }
 0xdf7   : > { %1768 = vst.msk [vmem:[%s844_s24] sm:$0xff] %vm856_vm0, %v1767_v24 }
 0xdf8 PF: > { %s38_s3 = sadd.s32 1, %s2526_s3  }
 0xdf9   : > { %p35_p7 = scmp.ge.s32.totalorder %s38_s3, 4  }
 0xdfb   :  { %37 = sbr.rel (!%p35_p7) target bundleno = 17 (0x11), region = 182 }
 0xe00   :  { %1788 = vsyncpa [#allocation3], 1 }
 0xe01   :  { %1790 = vsyncpa [#allocation3 + $0x1], 1 }
 0xe02   :  { %1791 = vsyncpa [#allocation5], 1 }
 0xe03   :  { %1792 = vsyncpa [#allocation8], 1 }
 0xe04   :  { %1793 = vsyncpa [#allocation11], 1 }
 0xe05   :  { %1794 = vsyncpa [#allocation14], 1 }
 0xe06   :  { %1795 = vsyncpa [#allocation17], 1 }

// kernel: detr_forward.7
= control target key start
LH: loop header
LB: loop body
LE: loop exit
PB: predicated region body
PF: predicated region fallthrough
CT: control target
= control target key end

     0   :  { %s3711_s25 = smov 0   ;;  %s4839_s0 = inlined_call_operand.vmem [shape: f32[16,2,32], index: 0, kind: input, shape index: {}]   ;;  %s4840_s1 = inlined_call_operand.vmem [shape: f32[32,96], index: 1, kind: input, shape index: {}]   ;;  %s4841_s2 = inlined_call_operand.vmem [shape: f32[1,96], index: 2, kind: input, shape index: {}]   ;;  %s4842_s3 = inlined_call_operand.vmem [shape: f32[32,32], index: 3, kind: input, shape index: {}]   ;;  %s4843_s4 = inlined_call_operand.vmem [shape: f32[1,32], index: 4, kind: input, shape index: {}]   ;;  %s4844_s5 = inlined_call_operand.vmem [shape: f32[1,32], index: 5, kind: input, shape index: {}]   ;;  %s4845_s6 = inlined_call_operand.vmem [shape: f32[1,32], index: 6, kind: input, shape index: {}]   ;;  %s4846_s7 = inlined_call_operand.vmem [shape: f32[32,128], index: 7, kind: input, shape index: {}]   ;;  %s4847_s8 = inlined_call_operand.vmem [shape: f32[1,128], index: 8, kind: input, shape index: {}]   ;;  %s4848_s9 = inlined_call_operand.vmem [shape: f32[128,32], index: 9, kind: input, shape index: {}]   ;;  %s4849_s10 = inlined_call_operand.vmem [shape: f32[1,32], index: 10, kind: input, shape index: {}]   ;;  %s4850_s11 = inlined_call_operand.vmem [shape: f32[1,32], index: 11, kind: input, shape index: {}]   ;;  %s4851_s12 = inlined_call_operand.vmem [shape: f32[1,32], index: 12, kind: input, shape index: {}]   ;;  %s4852_s13 = inlined_call_operand.vmem [shape: f32[16,2,32], index: 13, kind: output, shape index: {}]  }
   0x1 LB: > { %s3304_s26 = sadd.s32 4294967295, %s3624_s25   ;;  %p3308_p0 = scmp.ge.s32.totalorder %s3624_s25, 1  ;;  %s3624_s25 = sphi %s3711_s25, %s23_s25  }
   0x2   : > { %p388_p1 = scmp.lt.s32.totalorder %s3624_s25, 3 }
   0x4   : > { %p389_p2 = pnand %p3308_p0, %p388_p1 }
   0x6   : > { %392 = sbr.rel (%p389_p2) target bundleno = 3311 (0xcef), region = 72 }
   0xb   : > { %v455_v0 = vld [vmem:[%s4840_s1 + $0x18] sm:$0xff]  ;;  %v454_v1 = vld [vmem:[%s4840_s1 + $0x10] sm:$0xff]  ;;  %s3309_s14 = sshll.u32 %s3304_s26, 3  ;;  %v453_v2 = vld [vmem:[%s4840_s1 + $0x8] sm:$0xff]  ;;  %vm485_vm0 = vcmask 261120   ;;  %s3626_s26 = smov 96  }
   0xc   : > { %502 = vmatpush.msra.mxu0 %v455_v0  ;;  %p433_p3 = scmp.lt.s32.totalorder %s3309_s14, 15  ;;  %v452_v3 = vld [vmem:[%s4840_s1] sm:$0xff]  ;;  %s3627_s27 = smov 64   ;;  %vm539_vm1 = vcmask 64512   ;;  %vm865_vm2 = vcmask 1041408   ;;  %vm768_vm3 = vcmask 9216  }
   0xd   : > { %v3472_v14 = vld [vmem:[%s4841_s2] ss:$0 sm:$0xff]  ;;  %s3628_s28 = smov 120   ;;  %s3629_s29 = smov 88   ;;  %vm861_vm4 = vcmask 15360   ;;  %vm2923_vm5 = vcmask 130048  }
   0xe   : > { %503 = vmatpush.msra.mxu0 %v454_v1  ;;  %s4904_s14 = smov (!%p433_p3, %s3309_s14), 15  ;;  %s3630_s30 = smov 56   ;;  %vm2932_vm6 = vcmask 195584  }
   0xf   : > { %s3310_s19 = sshll.u32 %s4904_s14, 1  ;;  %s3631_s15 = smov 112  }
  0x10   : > { %504 = vmatpush.msra.mxu0 %v453_v2  ;;  %s436_s22 = scalar_lea.vmem %s4839_s0, %s3310_s19  ;;  %s3632_s16 = smov 80  }
  0x11   : > { %v3739_v4 = vld [vmem:[%s436_s22] sm:$0x3]  ;;  %v3741_v5 = vld [vmem:[%s436_s22 + $0x2] sm:$0x3]  ;;  %v3743_v6 = vld [vmem:[%s436_s22 + $0x4] sm:$0x3] }
  0x12   : > { %505 = vmatpush.msra.mxu0 %v452_v3  ;;  %4861 = vst [vmem:[#allocation2_spill] sm:$0xff] %v3739_v4  ;;  %v3745_v7 = vld [vmem:[%s436_s22 + $0x6] sm:$0x3]  ;;  %v3749_v8 = vld [vmem:[%s436_s22 + $0x8] sm:$0x3]  ;;  %s3633_s17 = smov 48  }
  0x13   : > { %4862 = vst [vmem:[#allocation3_spill] sm:$0xff] %v3741_v5  ;;  %v3752_v9 = vld [vmem:[%s436_s22 + $0xa] sm:$0x3]  ;;  %v3755_v10 = vld [vmem:[%s436_s22 + $0xc] sm:$0x3]  ;;  %s3634_s18 = smov 104  }
  0x14   : > { %4863 = vst [vmem:[#allocation4_spill] sm:$0xff] %v3743_v6  ;;  %v3757_v11 = vld [vmem:[%s436_s22 + $0xe] sm:$0x3]  ;;  %s3635_s20 = smov 72   ;;  %s3636_s21 = smov 40  }
  0x15   : > { %4864 = vst [vmem:[#allocation5_spill] sm:$0xff] %v3745_v7  ;;  %s3637_s22 = smov 8   ;;  %s3638_s23 = smov 16  }
  0x16   : > { %468 = vst [vmem:[#allocation1] ss:$4 sm:$0xff] %v3739_v4  ;;  %s3639_s24 = smov 24  }
  0x17   : > { %470 = vst [vmem:[#allocation1 + $0x1] ss:$4 sm:$0xff] %v3741_v5 }
  0x18   : > { %4865 = vst [vmem:[#allocation6_spill] sm:$0xff] %v3749_v8 }
  0x19   : > { %472 = vst [vmem:[#allocation1 + $0x2] ss:$4 sm:$0xff] %v3743_v6 }
  0x1a   : > { %4866 = vst [vmem:[#allocation7_spill] sm:$0xff] %v3752_v9 }
  0x1b   : > { %474 = vst [vmem:[#allocation1 + $0x3] ss:$4 sm:$0xff] %v3745_v7 }
  0x1c   : > { %4867 = vst [vmem:[#allocation8_spill] sm:$0xff] %v3755_v10 }
  0x1d   : > { %4868 = vst [vmem:[#allocation9_spill] sm:$0xff] %v3757_v11 }
  0x1e   : > { %476 = vst [vmem:[#allocation1 + $0x20] ss:$4 sm:$0xff] %v3749_v8 }
  0x1f   : > { %478 = vst [vmem:[#allocation1 + $0x21] ss:$4 sm:$0xff] %v3752_v9 }
  0x20   : > { %480 = vst [vmem:[#allocation1 + $0x22] ss:$4 sm:$0xff] %v3755_v10 }
  0x21   : > { %482 = vst [vmem:[#allocation1 + $0x23] ss:$4 sm:$0xff] %v3757_v11 }
  0x22   : > { %v483_v12 = vld.sshfl [vmem:[#allocation1] sm:$0xff pattern:$0x73625140] }
  0x23   : > { %3313 = vmatmul.msk.f32.vlgmr.msra.gmra.mxu0 %vm485_vm0, %v483_v12 }
  0x28   : > { %v484_v13 = vld.sshfl [vmem:[#allocation1 + $0x20] sm:$0xff pattern:$0x73625140] }
  0x2b   : > { %3314 = vmatmul.msk.f32.gmra.mxu0 %vm485_vm0, %v484_v13 }
  0xa0   : > { %v507_v15 = vpop.f32.mrf.mxu0 }
  0xa1   : > { %v3768_v16 = vadd.f32 %v3472_v14, %v507_v15 }
  0xa3   : > { %535 = vst [vmem:[#allocation1] ss:$4 sm:$0xff] %v3768_v16  ;;  %v3772_v17 = vrot.slane %v3768_v16, 2  ;;  %v3777_v19 = vrot.slane %v3768_v16, 4  ;;  %v3782_v21 = vrot.slane %v3768_v16, 6 }
  0xa4   : > { %v3824_v41 = vmul.f32 0.35355338, %v3768_v16 }
  0xa5   : > { %v3832_v44 = vmul.f32 0.35355338, %v3772_v17  ;;  %v3842_v48 = vmul.f32 0.35355338, %v3782_v21  ;;  %v3857_v53 = vmul.f32 0.35355338, %v3777_v19 }
  0xa8   : > { %v510_v23 = vpop.f32.mrf.mxu0 }
  0xa9   : > { %v3785_v24 = vadd.f32 %v3472_v14, %v510_v23 }
  0xaa   : > { %v536_v18 = vld.sshfl [vmem:[#allocation1] sm:$0xff pattern:$0x73625140] }
  0xab   : > { %565 = vst [vmem:[#allocation1] ss:$4 sm:$0xff] %v3772_v17  ;;  %537 = vrot.lane.b32.xlu0 %v536_v18, %s3626_s26  ;;  %v3790_v26 = vrot.slane %v3785_v24, 2  ;;  %v3795_v28 = vrot.slane %v3785_v24, 4  ;;  %v3800_v30 = vrot.slane %v3785_v24, 6 }
  0xac   : > { %v3852_v52 = vmul.f32 0.35355338, %v3785_v24 }
  0xad   : > { %v3865_v57 = vmul.f32 0.35355338, %v3800_v30  ;;  %v3876_v60 = vmul.f32 0.35355338, %v3790_v26  ;;  %v3884_v62 = vmul.f32 0.35355338, %v3795_v28 }
  0xb2   : > { %v566_v20 = vld.sshfl [vmem:[#allocation1] sm:$0xff pattern:$0x73625140] }
  0xb3   : > { %594 = vst [vmem:[#allocation1] ss:$4 sm:$0xff] %v3777_v19  ;;  %567 = vrot.lane.b32.xlu0 %v566_v20, %s3626_s26 }
  0xba   : > { %v595_v22 = vld.sshfl [vmem:[#allocation1] sm:$0xff pattern:$0x73625140] }
  0xbb   : > { %623 = vst [vmem:[#allocation1] ss:$4 sm:$0xff] %v3782_v21 }
  0xc2   : > { %v624_v25 = vld.sshfl [vmem:[#allocation1] sm:$0xff pattern:$0x73625140] }
  0xc3   : > { %652 = vst [vmem:[#allocation1] ss:$4 sm:$0xff] %v3785_v24  ;;  %625 = vrot.lane.b32.xlu1 %v624_v25, %s3626_s26 }
  0xca   : > { %v653_v27 = vld.sshfl [vmem:[#allocation1] sm:$0xff pattern:$0x73625140] }
  0xcb   : > { %681 = vst [vmem:[#allocation1] ss:$4 sm:$0xff] %v3790_v26  ;;  %654 = vrot.lane.b32.xlu1 %v653_v27, %s3626_s26 }
  0xd2   : > { %v682_v29 = vld.sshfl [vmem:[#allocation1] sm:$0xff pattern:$0x73625140] }
  0xd3   : > { %710 = vst [vmem:[#allocation1] ss:$4 sm:$0xff] %v3795_v28  ;;  %683 = vrot.lane.b32.xlu0 %v682_v29, %s3626_s26 }
  0xda   : > { %v711_v31 = vld.sshfl [vmem:[#allocation1] sm:$0xff pattern:$0x73625140] }
  0xdb   : > { %739 = vst [vmem:[#allocation1] ss:$4 sm:$0xff] %v3800_v30  ;;  %712 = vrot.lane.b32.xlu1 %v711_v31, %s3626_s26 }
  0xe2   : > { %v740_v32 = vld.sshfl [vmem:[#allocation1] sm:$0xff pattern:$0x73625140] }
  0xe3   : > { %857 = vst [vmem:[#allocation1] ss:$4 sm:$0xff] %v3768_v16  ;;  %741 = vrot.lane.b32.xlu2 %v740_v32, %s3626_s26 }
  0xea   : > { %v858_v33 = vld.sshfl [vmem:[#allocation1] sm:$0xff pattern:$0x73625140] }
  0xeb   : > { %888 = vst [vmem:[#allocation1] ss:$4 sm:$0xff] %v3772_v17  ;;  %596 = vrot.lane.b32.xlu2 %v595_v22, %s3626_s26  ;;  %859 = vrot.lane.b32.xlu1 %v858_v33, %s3627_s27 }
  0xf2   : > { %v889_v34 = vld.sshfl [vmem:[#allocation1] sm:$0xff pattern:$0x73625140] }
  0xf3   : > { %917 = vst [vmem:[#allocation1] ss:$4 sm:$0xff] %v3777_v19  ;;  %890 = vrot.lane.b32.xlu0 %v889_v34, %s3627_s27 }
  0xfa   : > { %v918_v35 = vld.sshfl [vmem:[#allocation1] sm:$0xff pattern:$0x73625140] }
  0xfb   : > { %946 = vst [vmem:[#allocation1] ss:$4 sm:$0xff] %v3782_v21  ;;  %919 = vrot.lane.b32.xlu1 %v918_v35, %s3627_s27 }
 0x102   : > { %v947_v36 = vld.sshfl [vmem:[#allocation1] sm:$0xff pattern:$0x73625140] }
 0x103   : > { %975 = vst [vmem:[#allocation1] ss:$4 sm:$0xff] %v3785_v24  ;;  %948 = vrot.lane.b32.xlu2 %v947_v36, %s3627_s27 }
 0x10a   : > { %v976_v37 = vld.sshfl [vmem:[#allocation1] sm:$0xff pattern:$0x73625140] }
 0x10b   : > { %1004 = vst [vmem:[#allocation1] ss:$4 sm:$0xff] %v3790_v26  ;;  %977 = vrot.lane.b32.xlu0 %v976_v37, %s3627_s27 }
 0x112   : > { %v1005_v38 = vld.sshfl [vmem:[#allocation1] sm:$0xff pattern:$0x73625140] }
 0x113   : > { %1033 = vst [vmem:[#allocation1] ss:$4 sm:$0xff] %v3795_v28  ;;  %1006 = vrot.lane.b32.xlu1 %v1005_v38, %s3627_s27 }
 0x11a   : > { %v3819_v39 = vld.sshfl [vmem:[#allocation1] sm:$0xff pattern:$0x73625140] }
 0x11b   : > { %1062 = vst [vmem:[#allocation1] ss:$4 sm:$0xff] %v3800_v30 }
 0x11d   : > { %v538_v40 = vpop.permute.xlu0 %537 }
 0x11e   : > { %3315 = vmatpush.xpose.msk.msra.mxu2 %vm539_vm1, %v538_v40 }
 0x121   : > { %3316 = vmatmul.msk.f32.vlgmr.msra.gmra.mxu2 %vm539_vm1, %v3824_v41 }
 0x122   : > { %v1063_v42 = vld.sshfl [vmem:[#allocation1] sm:$0xff pattern:$0x73625140] }
 0x123   : > { %1091 = vst [vmem:[#allocation1] ss:$4 sm:$0xff] %v3824_v41  ;;  %1064 = vrot.lane.b32.xlu1 %v1063_v42, %s3627_s27 }
 0x125   : > { %v568_v43 = vpop.permute.xlu0 %567 }
 0x126   : > { %3317 = vmatpush.xpose.msk.msrb.mxu2 %vm539_vm1, %v568_v43 }
 0x129   : > { %3318 = vmatmul.msk.f32.vlgmr.msrb.gmra.mxu2 %vm539_vm1, %v3832_v44 }
 0x12a   : > { %v1092_v45 = vld.sshfl [vmem:[#allocation1] sm:$0xff pattern:$0x73625140] }
 0x12b   : > { %1095 = vst [vmem:[#allocation1] ss:$4 sm:$0xff] %v3768_v16  ;;  %1093 = vrot.lane.b32.xlu2 %v1092_v45, %s3628_s28 }
 0x132   : > { %v1096_v46 = vld.sshfl [vmem:[#allocation1] sm:$0xff pattern:$0x73625140] }
 0x133   : > { %1123 = vst [vmem:[#allocation1] ss:$4 sm:$0xff] %v3832_v44  ;;  %1097 = vrot.lane.b32.xlu0 %v1096_v46, %s3629_s29 }
 0x135   : > { %v626_v47 = vpop.permute.xlu1 %625 }
 0x136   : > { %3321 = vmatpush.xpose.msk.msra.mxu2 %vm539_vm1, %v626_v47 }
 0x139   : > { %3322 = vmatmul.msk.f32.vlgmr.msra.gmra.mxu2 %vm539_vm1, %v3842_v48 }
 0x13a   : > { %v3846_v49 = vld.sshfl [vmem:[#allocation1] sm:$0xff pattern:$0x73625140] }
 0x13b   : > { %1127 = vst [vmem:[#allocation1] ss:$4 sm:$0xff] %v3772_v17 }
 0x13d   : > { %v655_v50 = vpop.permute.xlu1 %654  ;;  %v742_v51 = vpop.permute.xlu2 %741 }
 0x13e   : > { %3323 = vmatpush.xpose.msk.msrb.mxu2 %vm539_vm1, %v655_v50 }
 0x141   : > { %3324 = vmatmul.msk.f32.vlgmr.msrb.gmra.mxu2 %vm539_vm1, %v3852_v52 }
 0x142   : > { %3329 = vmatpush.xpose.msk.msra.mxu2 %vm539_vm1, %v742_v51  ;;  %v3859_v54 = vld.sshfl [vmem:[#allocation1] sm:$0xff pattern:$0x73625140] }
 0x143   : > { %1155 = vst [vmem:[#allocation1] ss:$4 sm:$0xff] %v3857_v53 }
 0x145   : > { %v684_v55 = vpop.permute.xlu0 %683  ;;  %v597_v56 = vpop.permute.xlu2 %596 }
 0x146   : > { %3319 = vmatpush.xpose.msk.msra.mxu3 %vm539_vm1, %v597_v56 }
 0x149   : > { %3320 = vmatmul.msk.f32.vlgmr.msra.gmra.mxu3 %vm539_vm1, %v3857_v53  ;;  %3330 = vmatmul.msk.f32.vlgmr.msra.gmra.mxu2 %vm539_vm1, %v3865_v57 }
 0x14a   : > { %3325 = vmatpush.xpose.msk.msrb.mxu3 %vm539_vm1, %v684_v55  ;;  %v3871_v58 = vld.sshfl [vmem:[#allocation1] sm:$0xff pattern:$0x73625140] }
 0x14b   : > { %1159 = vst [vmem:[#allocation1] ss:$4 sm:$0xff] %v3777_v19 }
 0x14d   : > { %v713_v59 = vpop.permute.xlu1 %712 }
 0x14e   : > { %3327 = vmatpush.xpose.msk.msra.mxu3 %vm539_vm1, %v713_v59 }
 0x151   : > { %3326 = vmatmul.msk.f32.vlgmr.msrb.gmra.mxu3 %vm539_vm1, %v3876_v60 }
 0x152   : > { %v3880_v61 = vld.sshfl [vmem:[#allocation1] sm:$0xff pattern:$0x73625140] }
 0x153   : > { %1187 = vst [vmem:[#allocation1] ss:$4 sm:$0xff] %v3842_v48 }
 0x159   : > { %3328 = vmatmul.msk.f32.vlgmr.msra.gmra.mxu3 %vm539_vm1, %v3884_v62 }
 0x15a   : > { %v1188_v63 = vld.sshfl [vmem:[#allocation1] sm:$0xff pattern:$0x73625140] }
 0x15b   : > { %1191 = vst [vmem:[#allocation1] ss:$4 sm:$0xff] %v3782_v21  ;;  %1189 = vrot.lane.b32.xlu2 %v1188_v63, %s3628_s28 }
 0x15d   : > { %v860_v0 = vpop.permute.xlu1 %859  ;;  %v949_v1 = vpop.permute.xlu2 %948 }
 0x15e   : > { %3331 = vmatpush.msk.msrb.mxu3 %vm865_vm2, %v860_v0  ;;  %3337 = vmatpush.msk.msrb.mxu2 %vm865_vm2, %v949_v1 }
 0x162   : > { %v1192_v2 = vld.sshfl [vmem:[#allocation1] sm:$0xff pattern:$0x73625140] }
 0x163   : > { %1219 = vst [vmem:[#allocation1] ss:$4 sm:$0xff] %v3852_v52  ;;  %1193 = vrot.lane.b32.xlu2 %v1192_v2, %s3629_s29 }
 0x165   : > { %v891_v3 = vpop.permute.xlu0 %890 }
 0x166   : > { %3333 = vmatpush.msk.msrb.mxu0 %vm865_vm2, %v891_v3 }
 0x16a   : > { %v1220_v12 = vld.sshfl [vmem:[#allocation1] sm:$0xff pattern:$0x73625140] }
 0x16b   : > { %1223 = vst [vmem:[#allocation1] ss:$4 sm:$0xff] %v3785_v24  ;;  %1221 = vrot.lane.b32.xlu0 %v1220_v12, %s3628_s28 }
 0x16d   : > { %v920_v13 = vpop.permute.xlu1 %919 }
 0x16e   : > { %3335 = vmatpush.msk.msra.mxu1 %vm865_vm2, %v920_v13 }
 0x172   : > { %v1224_v14 = vld.sshfl [vmem:[#allocation1] sm:$0xff pattern:$0x73625140] }
 0x173   : > { %1251 = vst [vmem:[#allocation1] ss:$4 sm:$0xff] %v3876_v60  ;;  %1225 = vrot.lane.b32.xlu2 %v1224_v14, %s3629_s29 }
 0x17a   : > { %v3900_v15 = vld.sshfl [vmem:[#allocation1] sm:$0xff pattern:$0x73625140] }
 0x17b   : > { %1255 = vst [vmem:[#allocation1] ss:$4 sm:$0xff] %v3790_v26 }
 0x17d   : > { %v978_v18 = vpop.permute.xlu0 %977 }
 0x17e   : > { %3339 = vmatpush.msk.msra.mxu3 %vm865_vm2, %v978_v18 }
 0x182   : > { %v3904_v20 = vld.sshfl [vmem:[#allocation1] sm:$0xff pattern:$0x73625140] }
 0x183   : > { %1283 = vst [vmem:[#allocation1] ss:$4 sm:$0xff] %v3884_v62 }
 0x185   : > { %v1007_v22 = vpop.permute.xlu1 %1006 }
 0x186   : > { %3341 = vmatpush.msk.msra.mxu0 %vm865_vm2, %v1007_v22 }
 0x18a   : > { %v3908_v23 = vld.sshfl [vmem:[#allocation1] sm:$0xff pattern:$0x73625140] }
 0x18b   : > { %1287 = vst [vmem:[#allocation1] ss:$4 sm:$0xff] %v3795_v28 }
 0x192   : > { %v3911_v25 = vld.sshfl [vmem:[#allocation1] sm:$0xff pattern:$0x73625140] }
 0x193   : > { %1315 = vst [vmem:[#allocation1] ss:$4 sm:$0xff] %v3865_v57 }
 0x195   : > { %v1065_v27 = vpop.permute.xlu1 %1064 }
 0x196   : > { %3345 = vmatpush.msk.msra.mxu2 %vm865_vm2, %v1065_v27 }
 0x19a   : > { %v1316_v29 = vld.sshfl [vmem:[#allocation1] sm:$0xff pattern:$0x73625140] }
 0x19b   : > { %1319 = vst [vmem:[#allocation1] ss:$4 sm:$0xff] %v3800_v30  ;;  %1317 = vrot.lane.b32.xlu0 %v1316_v29, %s3628_s28 }
 0x1a2   : > { %v1320_v31 = vld.sshfl [vmem:[#allocation1] sm:$0xff pattern:$0x73625140] }
 0x1a3   : > { %1321 = vrot.lane.b32.xlu2 %v1320_v31, %s3629_s29  ;;  %1435 = vst [vmem:[#allocation1] ss:$4 sm:$0xff] %v3768_v16  ;;  %v3990_v31 = vpop.permute.xlu2 %1093 }
 0x1a4   : > { %v3921_v33 = vpop.f32.mrf.mxu2 }
 0x1a5   : > { %v769_v45 = vsel %vm768_vm3, %v3921_v33, -inf }
 0x1aa   : > { %v3919_v32 = vld.sshfl [vmem:[#allocation1] sm:$0xff pattern:$0x73625140] }
 0x1ab   : > { %1464 = vst [vmem:[#allocation1] ss:$4 sm:$0xff] %v3772_v17 }
 0x1ac   : > { %v3927_v35 = vpop.f32.mrf.mxu2 }
 0x1ad   : > { %v772_v51 = vsel %vm768_vm3, %v3927_v35, -inf }
 0x1b2   : > { %v3924_v34 = vld.sshfl [vmem:[#allocation1] sm:$0xff pattern:$0x73625140] }
 0x1b3   : > { %1493 = vst [vmem:[#allocation1] ss:$4 sm:$0xff] %v3777_v19 }
 0x1ba   : > { %v3929_v36 = vld.sshfl [vmem:[#allocation1] sm:$0xff pattern:$0x73625140] }
 0x1bb   : > { %1522 = vst [vmem:[#allocation1] ss:$4 sm:$0xff] %v3782_v21 }
 0x1bc   : > { %v3932_v37 = vpop.f32.mrf.mxu2 }
 0x1bd   : > { %v778_v56 = vsel %vm768_vm3, %v3932_v37, -inf }
 0x1c2   : > { %v3934_v38 = vld.sshfl [vmem:[#allocation1] sm:$0xff pattern:$0x73625140] }
 0x1c3   : > { %1551 = vst [vmem:[#allocation1] ss:$4 sm:$0xff] %v3785_v24 }
 0x1c4   : > { %v678_v40 = vpop.f32.mrf.mxu2 }
 0x1c5   : > { %v781_v42 = vsel %vm768_vm3, %v678_v40, -inf }
 0x1c6   : > { %782 = vmax.xlane.f32.xlu1 %v781_v42 }
 0x1ca   : > { %v3938_v43 = vld.sshfl [vmem:[#allocation1] sm:$0xff pattern:$0x73625140] }
 0x1cb   : > { %1580 = vst [vmem:[#allocation1] ss:$4 sm:$0xff] %v3790_v26 }
 0x1cc   : > { %v3943_v46 = vpop.f32.mrf.mxu3  ;;  %770 = vmax.xlane.f32.xlu2 %v769_v45  ;;  %v3965_v2 = vpop.f32.mrf.mxu2 }
 0x1cd   : > { %v775_v47 = vsel %vm768_vm3, %v3943_v46, -inf  ;;  %v790_v12 = vsel %vm768_vm3, %v3965_v2, -inf  ;;  %v3995_v45 = vpop.permute.xlu2 %1189 }
 0x1ce   : > { %776 = vmax.xlane.f32.xlu0 %v775_v47 }
 0x1d2   : > { %v3947_v50 = vld.sshfl [vmem:[#allocation1] sm:$0xff pattern:$0x73625140] }
 0x1d3   : > { %1609 = vst [vmem:[#allocation1] ss:$4 sm:$0xff] %v3795_v28 }
 0x1d4   : > { %v3952_v55 = vpop.f32.mrf.mxu3  ;;  %773 = vmax.xlane.f32.xlu2 %v772_v51 }
 0x1d5   : > { %v784_v59 = vsel %vm768_vm3, %v3952_v55, -inf  ;;  %v4000_v51 = vpop.permute.xlu2 %1193 }
 0x1d6   : > { %779 = vmax.xlane.f32.xlu0 %v778_v56  ;;  %785 = vmax.xlane.f32.xlu1 %v784_v59  ;;  %v4002_v56 = vpop.permute.xlu0 %1097 }
 0x1da   : > { %v3958_v63 = vld.sshfl [vmem:[#allocation1] sm:$0xff pattern:$0x73625140] }
 0x1db   : > { %4869 = vst [vmem:[#allocation10_spill] sm:$0xff] %v3958_v63 }
 0x1dc   : > { %1638 = vst [vmem:[#allocation1] ss:$4 sm:$0xff] %v3800_v30  ;;  %v3961_v0 = vpop.f32.mrf.mxu3 }
 0x1dd   : > { %v787_v1 = vsel %vm768_vm3, %v3961_v0, -inf }
 0x1de   : > { %788 = vmax.xlane.f32.xlu2 %v787_v1  ;;  %v4007_v1 = vpop.permute.xlu2 %1225 }
 0x1e3   : > { %v3967_v3 = vld.sshfl [vmem:[#allocation1] sm:$0xff pattern:$0x73625140] }
 0x1e4   : > { %1667 = vst [vmem:[#allocation1] ss:$4 sm:$0xff] %v3824_v41 }
 0x1e6   : > { %791 = vmax.xlane.f32.xlu2 %v790_v12  ;;  %v4009_v12 = vpop.permute.xlu0 %1221 }
 0x1eb   : > { %v3972_v13 = vld.sshfl [vmem:[#allocation1] sm:$0xff pattern:$0x73625140] }
 0x1ec   : > { %1671 = vst [vmem:[#allocation1] ss:$4 sm:$0xff] %v3768_v16 }
 0x1f3   : > { %v3975_v14 = vld.sshfl [vmem:[#allocation1] sm:$0xff pattern:$0x73625140] }
 0x1f4   : > { %1699 = vst [vmem:[#allocation1] ss:$4 sm:$0xff] %v3832_v44 }
 0x1fb   : > { %v3978_v18 = vld.sshfl [vmem:[#allocation1] sm:$0xff pattern:$0x73625140] }
 0x1fc   : > { %4870 = vst [vmem:[#allocation11_spill] sm:$0xff] %v3978_v18 }
 0x1fd   : > { %1703 = vst [vmem:[#allocation1] ss:$4 sm:$0xff] %v3772_v17  ;;  %v4014_v10 = vpop.permute.xlu2 %1321 }
 0x204   : > { %v3981_v22 = vld.sshfl [vmem:[#allocation1] sm:$0xff pattern:$0x73625140] }
 0x205   : > { %4871 = vst [vmem:[#allocation12_spill] sm:$0xff] %v3981_v22 }
 0x206   : > { %1731 = vst [vmem:[#allocation1] ss:$4 sm:$0xff] %v3857_v53 }
 0x20d   : > { %v3984_v27 = vld.sshfl [vmem:[#allocation1] sm:$0xff pattern:$0x73625140]  ;;  %v4016_v9 = vpop.permute.xlu0 %1317 }
 0x20e   : > { %4872 = vst [vmem:[#allocation13_spill] sm:$0xff] %v3984_v27 }
 0x20f   : > { %1735 = vst [vmem:[#allocation1] ss:$4 sm:$0xff] %v3777_v19 }
 0x210   : > { %4874 = vst [vmem:[#allocation15_spill] sm:$0xff] %v4016_v9 }
 0x216   : > { %v3987_v29 = vld.sshfl [vmem:[#allocation1] sm:$0xff pattern:$0x73625140] }
 0x217   : > { %4873 = vst [vmem:[#allocation14_spill] sm:$0xff] %v3987_v29 }
 0x218   : > { %1763 = vst [vmem:[#allocation1] ss:$4 sm:$0xff] %v3842_v48 }
 0x21f   : > { %v3992_v42 = vld.sshfl [vmem:[#allocation1] sm:$0xff pattern:$0x73625140] }
 0x220   : > { %1767 = vst [vmem:[#allocation1] ss:$4 sm:$0xff] %v3782_v21 }
 0x227   : > { %v3997_v47 = vld.sshfl [vmem:[#allocation1] sm:$0xff pattern:$0x73625140] }
 0x228   : > { %1795 = vst [vmem:[#allocation1] ss:$4 sm:$0xff] %v3852_v52 }
 0x22f   : > { %v4004_v59 = vld.sshfl [vmem:[#allocation1] sm:$0xff pattern:$0x73625140] }
 0x230   : > { %1799 = vst [vmem:[#allocation1] ss:$4 sm:$0xff] %v3785_v24 }
 0x237   : > { %v4011_v11 = vld.sshfl [vmem:[#allocation1] sm:$0xff pattern:$0x73625140] }
 0x238   : > { %1827 = vst [vmem:[#allocation1] ss:$4 sm:$0xff] %v3876_v60 }
 0x239   : > { %v783_v8 = vpop.xlane.xlu1 %782 }
 0x23a   : > { %v797_v7 = vsub.f32 %v678_v40, %v783_v8 }
 0x23c   : > { %v809_v5 = vmul.f32 1.442695, %v797_v7 }
 0x23e   : > { %3480 = vpow2.f32 %v809_v5 }
 0x23f   : > { %v4018_v6 = vld.sshfl [vmem:[#allocation1] sm:$0xff pattern:$0x73625140]  ;;  %v771_v4 = vpop.xlane.xlu2 %770 }
 0x240   : > { %1831 = vst [vmem:[#allocation1] ss:$4 sm:$0xff] %v3790_v26  ;;  %v793_v18 = vsub.f32 %v3921_v33, %v771_v4 }
 0x241   : > { %v777_v27 = vpop.xlane.xlu0 %776 }
 0x242   : > { %v801_v63 = vmul.f32 1.442695, %v793_v18  ;;  %v795_v22 = vsub.f32 %v3943_v46, %v777_v27 }
 0x244   : > { %v4026_v9 = vpop.eup %3480  ;;  %3482 = vpow2.f32 %v801_v63  ;;  %v805_v40 = vmul.f32 1.442695, %v795_v22 }
 0x245   : > { %v829_v8 = vsel %vm768_vm3, %v4026_v9, 0.0 }
 0x246   : > { %830 = vadd.xlane.f32.xlu2 %v829_v8  ;;  %3484 = vpow2.f32 %v805_v40 }
 0x247   : > { %v4023_v29 = vld.sshfl [vmem:[#allocation1] sm:$0xff pattern:$0x73625140]  ;;  %v774_v5 = vpop.xlane.xlu2 %773 }
 0x248   : > { %1859 = vst [vmem:[#allocation1] ss:$4 sm:$0xff] %v3884_v62  ;;  %v794_v7 = vsub.f32 %v3927_v35, %v774_v5 }
 0x249   : > { %v780_v4 = vpop.xlane.xlu0 %779 }
 0x24a   : > { %v4031_v33 = vpop.eup %3482  ;;  %v803_v46 = vmul.f32 1.442695, %v794_v7  ;;  %v796_v18 = vsub.f32 %v3932_v37, %v780_v4 }
 0x24b   : > { %v817_v63 = vsel %vm768_vm3, %v4031_v33, 0.0 }
 0x24c   : > { %3486 = vpow2.f32 %v803_v46  ;;  %818 = vadd.xlane.f32.xlu0 %v817_v63  ;;  %v807_v22 = vmul.f32 1.442695, %v796_v18  ;;  %v4039_v8 = vpop.eup %3484 }
 0x24d   : > { %v823_v37 = vsel %vm768_vm3, %v4039_v8, 0.0 }
 0x24e   : > { %3488 = vpow2.f32 %v807_v22  ;;  %v786_v22 = vpop.xlane.xlu1 %785 }
 0x24f   : > { %v4034_v27 = vld.sshfl [vmem:[#allocation1] sm:$0xff pattern:$0x73625140] }
 0x250   : > { %1863 = vst [vmem:[#allocation1] ss:$4 sm:$0xff] %v3795_v28 }
 0x252   : > { %v4041_v35 = vpop.eup %3486 }
 0x253   : > { %v820_v40 = vsel %vm768_vm3, %v4041_v35, 0.0 }
 0x254   : > { %824 = vadd.xlane.f32.xlu0 %v823_v37  ;;  %821 = vadd.xlane.f32.xlu1 %v820_v40  ;;  %v4050_v7 = vpop.eup %3488 }
 0x255   : > { %v826_v46 = vsel %vm768_vm3, %v4050_v7, 0.0 }
 0x257   : > { %v4043_v5 = vld.sshfl [vmem:[#allocation1] sm:$0xff pattern:$0x73625140] }
 0x258   : > { %1891 = vst [vmem:[#allocation1] ss:$4 sm:$0xff] %v3865_v57 }
 0x25c   : > { %827 = vadd.xlane.f32.xlu1 %v826_v46 }
 0x25e   : > { %1035 = vrot.lane.b32.xlu2 %v3819_v39, %s3627_s27  ;;  %v798_v39 = vsub.f32 %v3952_v55, %v786_v22 }
 0x25f   : > { %v4052_v4 = vld.sshfl [vmem:[#allocation1] sm:$0xff pattern:$0x73625140] }
 0x260   : > { %1895 = vst [vmem:[#allocation1] ss:$4 sm:$0xff] %v3800_v30 }
 0x267   : > { %v4059_v18 = vld.sshfl [vmem:[#allocation1] sm:$0xff pattern:$0x73625140] }
 0x268   : > { %2011 = vst [vmem:[#allocation1] ss:$4 sm:$0xff] %v3768_v16  ;;  %1129 = vrot.lane.b32.xlu0 %v3859_v54, %s3629_s29  ;;  %v811_v54 = vmul.f32 1.442695, %v798_v39 }
 0x26a   : > { %3490 = vpow2.f32 %v811_v54 }
 0x26f   : > { %v4064_v63 = vld.sshfl [vmem:[#allocation1] sm:$0xff pattern:$0x73625140] }
 0x270   : > { %2040 = vst [vmem:[#allocation1] ss:$4 sm:$0xff] %v3772_v17  ;;  %1125 = vrot.lane.b32.xlu0 %v3846_v49, %s3628_s28  ;;  %v4086_v55 = vpop.eup %3490 }
 0x275   : > { %1161 = vrot.lane.b32.xlu1 %v3880_v61, %s3629_s29  ;;  %v832_v61 = vsel %vm768_vm3, %v4086_v55, 0.0 }
 0x277   : > { %v4069_v37 = vld.sshfl [vmem:[#allocation1] sm:$0xff pattern:$0x73625140] }
 0x278   : > { %2069 = vst [vmem:[#allocation1] ss:$4 sm:$0xff] %v3777_v19  ;;  %1257 = vrot.lane.b32.xlu0 %v3904_v20, %s3629_s29 }
 0x27d   : > { %1157 = vrot.lane.b32.xlu1 %v3871_v58, %s3628_s28  ;;  %v789_v58 = vpop.xlane.xlu2 %788 }
 0x27e   : > { %v799_v46 = vsub.f32 %v3961_v0, %v789_v58 }
 0x27f   : > { %v4077_v40 = vld.sshfl [vmem:[#allocation1] sm:$0xff pattern:$0x73625140] }
 0x280   : > { %2098 = vst [vmem:[#allocation1] ss:$4 sm:$0xff] %v3782_v21  ;;  %1285 = vrot.lane.b32.xlu0 %v3908_v23, %s3628_s28 }
 0x285   : > { %v792_v54 = vpop.xlane.xlu2 %791 }
 0x287   : > { %v4084_v49 = vld.sshfl [vmem:[#allocation1] sm:$0xff pattern:$0x73625140]  ;;  %833 = vadd.xlane.f32.xlu2 %v832_v61 }
 0x288   : > { %2127 = vst [vmem:[#allocation1] ss:$4 sm:$0xff] %v3785_v24  ;;  %1553 = vrot.lane.b32.xlu0 %v3938_v43, %s3630_s30  ;;  %v813_v43 = vmul.f32 1.442695, %v799_v46 }
 0x28a   : > { %3492 = vpow2.f32 %v813_v43 }
 0x28f   : > { %v4093_v20 = vld.sshfl [vmem:[#allocation1] sm:$0xff pattern:$0x73625140] }
 0x290   : > { %2156 = vst [vmem:[#allocation1] ss:$4 sm:$0xff] %v3790_v26  ;;  %1765 = vrot.lane.b32.xlu0 %v3992_v42, %s3631_s15  ;;  %v4111_v39 = vpop.eup %3492 }
 0x291   : > { %v835_v0 = vsel %vm768_vm3, %v4111_v39, 0.0 }
 0x297   : > { %v4098_v23 = vld.sshfl [vmem:[#allocation1] sm:$0xff pattern:$0x73625140] }
 0x298   : > { %2185 = vst [vmem:[#allocation1] ss:$4 sm:$0xff] %v3795_v28  ;;  %1801 = vrot.lane.b32.xlu0 %v4011_v11, %s3632_s16 }
 0x29f   : > { %v4104_v22 = vld.sshfl [vmem:[#allocation1] sm:$0xff pattern:$0x73625140]  ;;  %1253 = vrot.lane.b32.xlu2 %v3900_v15, %s3628_s28  ;;  %v800_v15 = vsub.f32 %v3965_v2, %v792_v54 }
 0x2a0   : > { %2214 = vst [vmem:[#allocation1] ss:$4 sm:$0xff] %v3800_v30 }
 0x2a7   : > { %v4109_v42 = vld.sshfl [vmem:[#allocation1] sm:$0xff pattern:$0x73625140]  ;;  %836 = vadd.xlane.f32.xlu1 %v835_v0  ;;  %1524 = vrot.lane.b32.xlu2 %v3934_v38, %s3630_s30 }
 0x2a8   : > { %2243 = vst [vmem:[#allocation1] ss:$4 sm:$0xff] %v3824_v41  ;;  %v815_v41 = vmul.f32 1.442695, %v800_v15 }
 0x2aa   : > { %3494 = vpow2.f32 %v815_v41 }
 0x2af   : > { %v4118_v11 = vld.sshfl [vmem:[#allocation1] sm:$0xff pattern:$0x73625140]  ;;  %1669 = vrot.lane.b32.xlu2 %v3972_v13, %s3631_s15 }
 0x2b0   : > { %2247 = vst [vmem:[#allocation1] ss:$4 sm:$0xff] %v3768_v16  ;;  %v4132_v46 = vpop.eup %3494 }
 0x2b7   : > { %v4124_v61 = vld.sshfl [vmem:[#allocation1] sm:$0xff pattern:$0x73625140]  ;;  %1495 = vrot.lane.b32.xlu2 %v3929_v36, %s3630_s30  ;;  %v838_v36 = vsel %vm768_vm3, %v4132_v46, 0.0 }
 0x2b8   : > { %2275 = vst [vmem:[#allocation1] ss:$4 sm:$0xff] %v3832_v44 }
 0x2b9   : > { %v831_v38 = vpop.xlane.xlu2 %830 }
 0x2bf   : > { %v4129_v58 = vld.sshfl [vmem:[#allocation1] sm:$0xff pattern:$0x73625140]  ;;  %v819_v43 = vpop.xlane.xlu0 %818  ;;  %1893 = vrot.lane.b32.xlu2 %v4052_v4, %s3631_s15 }
 0x2c0   : > { %2279 = vst [vmem:[#allocation1] ss:$4 sm:$0xff] %v3772_v17  ;;  %3496 = vrcp.f32 %v819_v43  ;;  %1289 = vrot.lane.b32.xlu1 %v3911_v25, %s3629_s29 }
 0x2c1   : > { %v1036_v44 = vpop.permute.xlu2 %1035  ;;  %3498 = vrcp.f32 %v831_v38 }
 0x2c2   : > { %839 = vadd.xlane.f32.xlu0 %v838_v36  ;;  %3343 = vmatpush.msk.msrb.mxu1 %vm865_vm2, %v1036_v44 }
 0x2c6   : > { %v3497_v13 = vpop.eup %3496 }
 0x2c7   : > { %v4141_v2 = vld.sshfl [vmem:[#allocation1] sm:$0xff pattern:$0x73625140]  ;;  %v849_v4 = vmul.f32 %v3497_v13, %v4031_v33  ;;  %v825_v0 = vpop.xlane.xlu0 %824  ;;  %v822_v54 = vpop.xlane.xlu1 %821  ;;  %1897 = vrot.lane.b32.xlu2 %v4059_v18, %s3632_s16 }
 0x2c8   : > { %2307 = vst [vmem:[#allocation1] ss:$4 sm:$0xff] %v3857_v53  ;;  %3500 = vrcp.f32 %v825_v0  ;;  %1437 = vrot.lane.b32.xlu1 %v3919_v32, %s3630_s30  ;;  %v3499_v25 = vpop.eup %3498 }
 0x2c9   : > { %3502 = vrcp.f32 %v822_v54  ;;  %3332 = vmatmul.msk.f32.vlgmr.msrb.gmra.mxu3 %vm861_vm4, %v849_v4  ;;  %v853_v41 = vmul.f32 %v3499_v25, %v4026_v9 }
 0x2ca   : > { %3347 = vmatpush.xpose.msk.msrb.mxu3 %vm539_vm1, %v4002_v56 }
 0x2ce   : > { %v3501_v33 = vpop.eup %3500 }
 0x2cf   : > { %v4152_v53 = vld.sshfl [vmem:[#allocation1] sm:$0xff pattern:$0x73625140]  ;;  %v3503_v15 = vpop.eup %3502  ;;  %v828_v18 = vpop.xlane.xlu1 %827  ;;  %v851_v38 = vmul.f32 %v3501_v33, %v4039_v8 }
 0x2d0   : > { %2311 = vst [vmem:[#allocation1] ss:$4 sm:$0xff] %v3777_v19  ;;  %3504 = vrcp.f32 %v828_v18  ;;  %1640 = vrot.lane.b32.xlu1 %v3967_v3, %s3630_s30  ;;  %v850_v32 = vmul.f32 %v3503_v15, %v4041_v35 }
 0x2d1   : > { %3336 = vmatmul.msk.f32.vlgmr.msra.gmra.mxu1 %vm861_vm4, %v851_v38  ;;  %3340 = vmatmul.msk.f32.vlgmr.msra.gmra.mxu3 %vm861_vm4, %v853_v41 }
 0x2d2   : > { %3334 = vmatmul.msk.f32.vlgmr.msrb.gmra.mxu0 %vm861_vm4, %v850_v32  ;;  %3355 = vmatpush.xpose.msk.msra.mxu3 %vm539_vm1, %v4007_v1 }
 0x2d6   : > { %v3505_v9 = vpop.eup %3504  ;;  %1797 = vrot.lane.b32.xlu0 %v4004_v59, %s3631_s15 }
 0x2d7   : > { %v4165_v56 = vld.sshfl [vmem:[#allocation1] sm:$0xff pattern:$0x73625140]  ;;  %v852_v3 = vmul.f32 %v3505_v9, %v4050_v7 }
 0x2d8   : > { %2339 = vst [vmem:[#allocation1] ss:$4 sm:$0xff] %v3842_v48  ;;  %1673 = vrot.lane.b32.xlu1 %v3975_v14, %s3632_s16 }
 0x2d9   : > { %3338 = vmatmul.msk.f32.vlgmr.msrb.gmra.mxu2 %vm861_vm4, %v852_v3  ;;  %3348 = vmatmul.msk.f32.vlgmr.msrb.gmra.mxu3 %vm539_vm1, %v3990_v31 }
 0x2da   : > { %3353 = vmatpush.xpose.msk.msrb.mxu2 %vm539_vm1, %v4000_v51  ;;  %v1130_v1 = vpop.permute.xlu0 %1129 }
 0x2db   : > { %3349 = vmatpush.xpose.msk.msrb.mxu0 %vm539_vm1, %v1130_v1 }
 0x2de   : > { %1582 = vrot.lane.b32.xlu0 %v3947_v50, %s3630_s30 }
 0x2df   : > { %v4178_v8 = vld.sshfl [vmem:[#allocation1] sm:$0xff pattern:$0x73625140] }
 0x2e0   : > { %2343 = vst [vmem:[#allocation1] ss:$4 sm:$0xff] %v3782_v21  ;;  %1769 = vrot.lane.b32.xlu1 %v3997_v47, %s3632_s16 }
 0x2e1   : > { %3356 = vmatmul.msk.f32.vlgmr.msra.gmra.mxu3 %vm539_vm1, %v4009_v12 }
 0x2e2   : > { %v1126_v47 = vpop.permute.xlu0 %1125 }
 0x2e7   : > { %v4188_v48 = vld.sshfl [vmem:[#allocation1] sm:$0xff pattern:$0x73625140]  ;;  %v1162_v14 = vpop.permute.xlu1 %1161 }
 0x2e8   : > { %2371 = vst [vmem:[#allocation1] ss:$4 sm:$0xff] %v3852_v52  ;;  %1466 = vrot.lane.b32.xlu1 %v3924_v34, %s3630_s30  ;;  %3351 = vmatpush.xpose.msk.msra.mxu1 %vm539_vm1, %v1162_v14 }
 0x2ea   : > { %v1258_v35 = vpop.permute.xlu0 %1257 }
 0x2ef   : > { %v4194_v31 = vld.sshfl [vmem:[#allocation1] sm:$0xff pattern:$0x73625140]  ;;  %v1158_v43 = vpop.permute.xlu1 %1157 }
 0x2f0   : > { %2375 = vst [vmem:[#allocation1] ss:$4 sm:$0xff] %v3785_v24 }
 0x2f2   : > { %v1286_v7 = vpop.permute.xlu0 %1285 }
 0x2f7   : > { %v4197_v50 = vld.sshfl [vmem:[#allocation1] sm:$0xff pattern:$0x73625140] }
 0x2f8   : > { %2403 = vst [vmem:[#allocation1] ss:$4 sm:$0xff] %v3876_v60 }
 0x2fa   : > { %v834_v51 = vpop.xlane.xlu2 %833 }
 0x2fb   : > { %3506 = vrcp.f32 %v834_v51 }
 0x2ff   : > { %v4200_v59 = vld.sshfl [vmem:[#allocation1] sm:$0xff pattern:$0x73625140] }
 0x300   : > { %2407 = vst [vmem:[#allocation1] ss:$4 sm:$0xff] %v3790_v26 }
 0x301   : > { %v3507_v52 = vpop.eup %3506 }
 0x302   : > { %v854_v34 = vmul.f32 %v3507_v52, %v4086_v55  ;;  %v1254_v55 = vpop.permute.xlu2 %1253 }
 0x304   : > { %3342 = vmatmul.msk.f32.vlgmr.msra.gmra.mxu0 %vm861_vm4, %v854_v34 }
 0x305   : > { %3357 = vmatpush.xpose.msk.msra.mxu0 %vm539_vm1, %v1258_v35 }
 0x307   : > { %v4204_v12 = vld.sshfl [vmem:[#allocation1] sm:$0xff pattern:$0x73625140] }
 0x308   : > { %2435 = vst [vmem:[#allocation1] ss:$4 sm:$0xff] %v3884_v62  ;;  %v1554_v62 = vpop.permute.xlu0 %1553 }
 0x30a   : > { %v1525_v4 = vpop.permute.xlu2 %1524 }
 0x30c   : > { %3350 = vmatmul.msk.f32.vlgmr.msrb.gmra.mxu0 %vm539_vm1, %v1126_v47  ;;  %v4876_v47 = vld [vmem:[#allocation15_spill] sm:$0xff] }
 0x30f   : > { %v4209_v60 = vld.sshfl [vmem:[#allocation1] sm:$0xff pattern:$0x73625140] }
 0x310   : > { %2439 = vst [vmem:[#allocation1] ss:$4 sm:$0xff] %v3795_v28  ;;  %v4223_v33 = vpop.permute.xlu0 %1765 }
 0x314   : > { %3358 = vmatmul.msk.f32.vlgmr.msra.gmra.mxu0 %vm539_vm1, %v1254_v55 }
 0x317   : > { %v4213_v44 = vld.sshfl [vmem:[#allocation1] sm:$0xff pattern:$0x73625140] }
 0x318   : > { %2467 = vst [vmem:[#allocation1] ss:$4 sm:$0xff] %v3865_v57  ;;  %v4227_v57 = vpop.permute.xlu2 %1669  ;;  %v4233_v41 = vpop.permute.xlu0 %1801 }
 0x31a   : > { %v837_v36 = vpop.xlane.xlu1 %836 }
 0x31b   : > { %3508 = vrcp.f32 %v837_v36 }
 0x31f   : > { %v4217_v13 = vld.sshfl [vmem:[#allocation1] sm:$0xff pattern:$0x73625140] }
 0x320   : > { %2471 = vst [vmem:[#allocation1] ss:$4 sm:$0xff] %v3800_v30  ;;  %v1496_v38 = vpop.permute.xlu2 %1495 }
 0x321   : > { %v3509_v0 = vpop.eup %3508 }
 0x322   : > { %v855_v54 = vmul.f32 %v3509_v0, %v4111_v39 }
 0x324   : > { %3344 = vmatmul.msk.f32.vlgmr.msrb.gmra.mxu1 %vm861_vm4, %v855_v54 }
 0x327   : > { %v4221_v25 = vld.sshfl [vmem:[#allocation1] sm:$0xff pattern:$0x73625140] }
 0x328   : > { %2587 = vst [vmem:[#allocation1] ss:$4 sm:$0xff] %v3768_v16 }
 0x32c   : > { %3352 = vmatmul.msk.f32.vlgmr.msra.gmra.mxu1 %vm539_vm1, %v1158_v43 }
 0x32f   : > { %v4229_v15 = vld.sshfl [vmem:[#allocation1] sm:$0xff pattern:$0x73625140] }
 0x330   : > { %2616 = vst [vmem:[#allocation1] ss:$4 sm:$0xff] %v3772_v17 }
 0x332   : > { %v1290_v18 = vpop.permute.xlu1 %1289 }
 0x333   : > { %3359 = vmatpush.xpose.msk.msrb.mxu1 %vm539_vm1, %v1290_v18 }
 0x335   : > { %v840_v16 = vpop.xlane.xlu0 %839 }
 0x336   : > { %3510 = vrcp.f32 %v840_v16  ;;  %3360 = vmatmul.msk.f32.vlgmr.msrb.gmra.mxu1 %vm539_vm1, %v1286_v7 }
 0x337   : > { %v4235_v39 = vld.sshfl [vmem:[#allocation1] sm:$0xff pattern:$0x73625140]  ;;  %3367 = vmatpush.msk.msra.mxu1 %vm865_vm2, %v1496_v38 }
 0x338   : > { %2645 = vst [vmem:[#allocation1] ss:$4 sm:$0xff] %v3777_v19 }
 0x33a   : > { %v1438_v32 = vpop.permute.xlu1 %1437 }
 0x33b   : > { %3363 = vmatpush.msk.msrb.mxu3 %vm865_vm2, %v1438_v32 }
 0x33c   : > { %v3511_v9 = vpop.eup %3510 }
 0x33d   : > { %3371 = vmatpush.msk.msra.mxu3 %vm865_vm2, %v1554_v62  ;;  %v856_v3 = vmul.f32 %v3511_v9, %v4132_v46 }
 0x33f   : > { %v4241_v17 = vld.sshfl [vmem:[#allocation1] sm:$0xff pattern:$0x73625140]  ;;  %3346 = vmatmul.msk.f32.vlgmr.msra.gmra.mxu2 %vm861_vm4, %v856_v3 }
 0x340   : > { %2674 = vst [vmem:[#allocation1] ss:$4 sm:$0xff] %v3782_v21  ;;  %3361 = vmatpush.xpose.msk.msra.mxu2 %vm539_vm1, %v4014_v10 }
 0x342   : > { %v1641_v19 = vpop.permute.xlu1 %1640 }
 0x347   : > { %v4250_v1 = vld.sshfl [vmem:[#allocation1] sm:$0xff pattern:$0x73625140]  ;;  %3354 = vmatmul.msk.f32.vlgmr.msrb.gmra.mxu2 %vm539_vm1, %v3995_v45 }
 0x348   : > { %2703 = vst [vmem:[#allocation1] ss:$4 sm:$0xff] %v3785_v24  ;;  %3369 = vmatpush.msk.msrb.mxu2 %vm865_vm2, %v1525_v4  ;;  %v4266_v10 = vpop.permute.xlu0 %1797 }
 0x34a   : > { %v4256_v21 = vpop.permute.xlu1 %1673 }
 0x34c   : > { %v4261_v46 = vpop.f32.mrf.mxu3 }
 0x34d   : > { %4875 = vst [vmem:[#allocation16_spill] sm:$0xff] %v4261_v46 }
 0x34e   : > { %v4288_v54 = vpop.f32.mrf.mxu1 }
 0x34f   : > { %v4258_v14 = vld.sshfl [vmem:[#allocation1] sm:$0xff pattern:$0x73625140]  ;;  %3362 = vmatmul.msk.f32.vlgmr.msra.gmra.mxu2 %vm539_vm1, %v4876_v47 }
 0x350   : > { %2732 = vst [vmem:[#allocation1] ss:$4 sm:$0xff] %v3790_v26  ;;  %3377 = vmatpush.msk.msra.mxu2 %vm865_vm2, %v1641_v19  ;;  %v1583_v26 = vpop.permute.xlu0 %1582  ;;  %v4882_v19 = vld [vmem:[#allocation14_spill] sm:$0xff] }
 0x352   : > { %v4268_v24 = vpop.permute.xlu1 %1769 }
 0x354   : > { %v4273_v51 = vpop.f32.mrf.mxu3 }
 0x355   : > { %4877 = vst [vmem:[#allocation15_spill] sm:$0xff] %v4273_v51 }
 0x357   : > { %v4270_v45 = vld.sshfl [vmem:[#allocation1] sm:$0xff pattern:$0x73625140] }
 0x358   : > { %2761 = vst [vmem:[#allocation1] ss:$4 sm:$0xff] %v3795_v28  ;;  %v4282_v28 = vpop.f32.mrf.mxu0 }
 0x359   : > { %4878 = vst [vmem:[#allocation17_spill] sm:$0xff] %v4282_v28 }
 0x35a   : > { %v1467_v52 = vpop.permute.xlu1 %1466 }
 0x35b   : > { %3365 = vmatpush.msk.msrb.mxu0 %vm865_vm2, %v1467_v52 }
 0x35c   : > { %v1120_v35 = vpop.f32.mrf.mxu3  ;;  %v4294_v3 = vpop.f32.mrf.mxu2 }
 0x35d   : > { %3373 = vmatpush.msk.msra.mxu0 %vm865_vm2, %v1583_v26  ;;  %v1347_v7 = vsel %vm768_vm3, %v1120_v35, -inf  ;;  %4881 = vst [vmem:[#allocation20_spill] sm:$0xff] %v4294_v3 }
 0x35e   : > { %1348 = vmax.xlane.f32.xlu1 %v1347_v7 }
 0x35f   : > { %v4275_v34 = vld.sshfl [vmem:[#allocation1] sm:$0xff pattern:$0x73625140] }
 0x360   : > { %2790 = vst [vmem:[#allocation1] ss:$4 sm:$0xff] %v3800_v30 }
 0x364   : > { %v1248_v43 = vpop.f32.mrf.mxu3 }
 0x365   : > { %v1359_v55 = vsel %vm768_vm3, %v1248_v43, -inf }
 0x366   : > { %1360 = vmax.xlane.f32.xlu0 %v1359_v55 }
 0x381   : > { %v4284_v62 = vpop.f32.mrf.mxu0 }
 0x382   : > { %4879 = vst [vmem:[#allocation18_spill] sm:$0xff] %v4284_v62  ;;  %v4885_v62 = vld [vmem:[#allocation10_spill] sm:$0xff] }
 0x389   : > { %v1152_v36 = vpop.f32.mrf.mxu0 }
 0x38a   : > { %v1350_v4 = vsel %vm768_vm3, %v1152_v36, -inf }
 0x38b   : > { %1351 = vmax.xlane.f32.xlu2 %v1350_v4 }
 0x391   : > { %v1280_v0 = vpop.f32.mrf.mxu0 }
 0x392   : > { %v1362_v30 = vsel %vm768_vm3, %v1280_v0, -inf }
 0x393   : > { %1363 = vmax.xlane.f32.xlu1 %v1362_v30 }
 0x3a1   : > { %v4290_v18 = vpop.f32.mrf.mxu1 }
 0x3a2   : > { %4880 = vst [vmem:[#allocation19_spill] sm:$0xff] %v4290_v18 }
 0x3a9   : > { %v1184_v38 = vpop.f32.mrf.mxu1 }
 0x3aa   : > { %v1353_v16 = vsel %vm768_vm3, %v1184_v38, -inf }
 0x3ab   : > { %1354 = vmax.xlane.f32.xlu0 %v1353_v16 }
 0x3b3   : > { %v1312_v32 = vpop.f32.mrf.mxu1 }
 0x3b4   : > { %v1365_v9 = vsel %vm768_vm3, %v1312_v32, -inf }
 0x3b5   : > { %1366 = vmax.xlane.f32.xlu2 %v1365_v9  ;;  %v4884_v9 = vld [vmem:[#allocation12_spill] sm:$0xff] }
 0x3bf   : > { %1737 = vrot.lane.b32.xlu0 %v4882_v19, %s3632_s16 }
 0x3c2   : > { %v4298_v47 = vpop.f32.mrf.mxu2 }
 0x3c3   : > { %4883 = vst [vmem:[#allocation14_spill] sm:$0xff] %v4298_v47 }
 0x3ca   : > { %v1216_v52 = vpop.f32.mrf.mxu2 }
 0x3cb   : > { %v1356_v26 = vsel %vm768_vm3, %v1216_v52, -inf }
 0x3cc   : > { %1357 = vmax.xlane.f32.xlu2 %v1356_v26  ;;  %v4311_v26 = vpop.permute.xlu2 %1893 }
 0x3d1   : > { %v1349_v4 = vpop.xlane.xlu1 %1348 }
 0x3d2   : > { %v4301_v7 = vpop.f32.mrf.mxu2  ;;  %v1371_v30 = vsub.f32 %v1120_v35, %v1349_v4 }
 0x3d3   : > { %v1368_v55 = vsel %vm768_vm3, %v4301_v7, -inf }
 0x3d4   : > { %1369 = vmax.xlane.f32.xlu1 %v1368_v55  ;;  %v1379_v16 = vmul.f32 1.442695, %v1371_v30  ;;  %v4315_v46 = vpop.permute.xlu2 %1897 }
 0x3d6   : > { %3512 = vpow2.f32 %v1379_v16 }
 0x3d9   : > { %v1361_v55 = vpop.xlane.xlu0 %1360 }
 0x3da   : > { %v1375_v35 = vsub.f32 %v1248_v43, %v1361_v55 }
 0x3dc   : > { %v4307_v19 = vpop.eup %3512  ;;  %v1387_v4 = vmul.f32 1.442695, %v1375_v35 }
 0x3dd   : > { %v1395_v51 = vsel %vm768_vm3, %v4307_v19, 0.0 }
 0x3de   : > { %3514 = vpow2.f32 %v1387_v4 }
 0x3e4   : > { %1705 = vrot.lane.b32.xlu2 %v4884_v9, %s3632_s16  ;;  %v4317_v3 = vpop.eup %3514 }
 0x3e5   : > { %v1407_v43 = vsel %vm768_vm3, %v4317_v3, 0.0 }
 0x3e9   : > { %1396 = vadd.xlane.f32.xlu0 %v1395_v51 }
 0x3ed   : > { %1611 = vrot.lane.b32.xlu1 %v4885_v62, %s3630_s30 }
 0x3fe   : > { %v1352_v30 = vpop.xlane.xlu2 %1351 }
 0x3ff   : > { %v1372_v16 = vsub.f32 %v1152_v36, %v1352_v30 }
 0x401   : > { %v1381_v28 = vmul.f32 1.442695, %v1372_v16 }
 0x403   : > { %3516 = vpow2.f32 %v1381_v28 }
 0x406   : > { %v1364_v9 = vpop.xlane.xlu1 %1363 }
 0x407   : > { %v1376_v47 = vsub.f32 %v1280_v0, %v1364_v9 }
 0x409   : > { %v4319_v51 = vpop.eup %3516  ;;  %v1389_v18 = vmul.f32 1.442695, %v1376_v47 }
 0x40a   : > { %v1398_v62 = vsel %vm768_vm3, %v4319_v51, 0.0 }
 0x40b   : > { %1399 = vadd.xlane.f32.xlu0 %v1398_v62  ;;  %3518 = vpow2.f32 %v1389_v18 }
 0x40d   : > { %1408 = vadd.xlane.f32.xlu2 %v1407_v43 }
 0x411   : > { %v4325_v36 = vpop.eup %3518 }
 0x412   : > { %v1410_v28 = vsel %vm768_vm3, %v4325_v36, 0.0 }
 0x417   : > { %1411 = vadd.xlane.f32.xlu1 %v1410_v28 }
 0x41e   : > { %v1355_v0 = vpop.xlane.xlu0 %1354 }
 0x41f   : > { %v1373_v55 = vsub.f32 %v1184_v38, %v1355_v0  ;;  %v4886_v0 = vld [vmem:[#allocation13_spill] sm:$0xff] }
 0x421   : > { %v1383_v35 = vmul.f32 1.442695, %v1373_v55 }
 0x423   : > { %3520 = vpow2.f32 %v1383_v35 }
 0x428   : > { %v1367_v47 = vpop.xlane.xlu2 %1366 }
 0x429   : > { %v4329_v4 = vpop.eup %3520  ;;  %v1377_v30 = vsub.f32 %v1312_v32, %v1367_v47  ;;  %v4887_v47 = vld [vmem:[#allocation11_spill] sm:$0xff] }
 0x42a   : > { %v1401_v16 = vsel %vm768_vm3, %v4329_v4, 0.0 }
 0x42b   : > { %v1391_v9 = vmul.f32 1.442695, %v1377_v30  ;;  %1402 = vadd.xlane.f32.xlu2 %v1401_v16 }
 0x42d   : > { %3522 = vpow2.f32 %v1391_v9 }
 0x433   : > { %v4333_v18 = vpop.eup %3522 }
 0x434   : > { %v1413_v62 = vsel %vm768_vm3, %v4333_v18, 0.0 }
 0x435   : > { %1414 = vadd.xlane.f32.xlu0 %v1413_v62 }
 0x43f   : > { %v1358_v43 = vpop.xlane.xlu2 %1357 }
 0x440   : > { %v1374_v38 = vsub.f32 %v1216_v52, %v1358_v43  ;;  %v1738_v52 = vpop.permute.xlu0 %1737 }
 0x442   : > { %v1385_v28 = vmul.f32 1.442695, %v1374_v38 }
 0x443   : > { %1733 = vrot.lane.b32.xlu2 %v4886_v0, %s3631_s15 }
 0x444   : > { %3524 = vpow2.f32 %v1385_v28 }
 0x447   : > { %v1370_v35 = vpop.xlane.xlu1 %1369 }
 0x449   : > { %1833 = vrot.lane.b32.xlu0 %v4023_v29, %s3632_s16 }
 0x44a   : > { %v4341_v32 = vpop.eup %3524 }
 0x44b   : > { %1829 = vrot.lane.b32.xlu2 %v4018_v6, %s3631_s15  ;;  %v1404_v55 = vsel %vm768_vm3, %v4341_v32, 0.0 }
 0x44c   : > { %1405 = vadd.xlane.f32.xlu1 %v1404_v55 }
 0x451   : > { %1861 = vrot.lane.b32.xlu0 %v4034_v27, %s3631_s15 }
 0x453   : > { %2013 = vrot.lane.b32.xlu2 %v4064_v63, %s3633_s17 }
 0x459   : > { %2129 = vrot.lane.b32.xlu0 %v4093_v20, %s3633_s17 }
 0x45b   : > { %2216 = vrot.lane.b32.xlu2 %v4109_v42, %s3633_s17  ;;  %v1378_v42 = vsub.f32 %v4301_v7, %v1370_v35 }
 0x45c   : > { %v1397_v6 = vpop.xlane.xlu0 %1396 }
 0x45d   : > { %3526 = vrcp.f32 %v1397_v6 }
 0x45f   : > { %v1612_v29 = vpop.permute.xlu1 %1611 }
 0x460   : > { %3375 = vmatpush.msk.msrb.mxu1 %vm865_vm2, %v1612_v29 }
 0x461   : > { %2042 = vrot.lane.b32.xlu0 %v4069_v37, %s3633_s17  ;;  %v1706_v37 = vpop.permute.xlu2 %1705 }
 0x463   : > { %v3527_v27 = vpop.eup %3526  ;;  %2158 = vrot.lane.b32.xlu2 %v4098_v23, %s3633_s17 }
 0x464   : > { %v1427_v63 = vmul.f32 %v3527_v27, %v4307_v19  ;;  %v1393_v19 = vmul.f32 1.442695, %v1378_v42 }
 0x465   : > { %1701 = vrot.lane.b32.xlu1 %v4887_v47, %s3631_s15 }
 0x466   : > { %3364 = vmatmul.msk.f32.vlgmr.msrb.gmra.mxu3 %vm861_vm4, %v1427_v63 }
 0x467   : > { %3379 = vmatpush.xpose.msk.msrb.mxu3 %vm539_vm1, %v4256_v21 }
 0x469   : > { %2071 = vrot.lane.b32.xlu0 %v4077_v40, %s3633_s17 }
 0x46d   : > { %1865 = vrot.lane.b32.xlu1 %v4043_v5, %s3632_s16 }
 0x475   : > { %2100 = vrot.lane.b32.xlu1 %v4084_v49, %s3633_s17 }
 0x47d   : > { %2245 = vrot.lane.b32.xlu1 %v4118_v11, %s3634_s18 }
 0x47e   : > { %v1400_v20 = vpop.xlane.xlu0 %1399 }
 0x47f   : > { %3528 = vrcp.f32 %v1400_v20 }
 0x480   : > { %v1409_v23 = vpop.xlane.xlu2 %1408 }
 0x481   : > { %3530 = vrcp.f32 %v1409_v23 }
 0x482   : > { %3532 = vpow2.f32 %v1393_v19 }
 0x485   : > { %v3529_v21 = vpop.eup %3528  ;;  %2473 = vrot.lane.b32.xlu1 %v4221_v25, %s3635_s20 }
 0x486   : > { %v1428_v5 = vmul.f32 %v3529_v21, %v4319_v51 }
 0x487   : > { %v3531_v40 = vpop.eup %3530 }
 0x488   : > { %v1431_v49 = vmul.f32 %v3531_v40, %v4317_v3  ;;  %3366 = vmatmul.msk.f32.vlgmr.msrb.gmra.mxu0 %vm861_vm4, %v1428_v5  ;;  %v3533_v7 = vpop.eup %3532 }
 0x489   : > { %3381 = vmatpush.xpose.msk.msrb.mxu0 %vm539_vm1, %v1706_v37  ;;  %v1416_v3 = vsel %vm768_vm3, %v3533_v7, 0.0 }
 0x48a   : > { %v1412_v11 = vpop.xlane.xlu1 %1411  ;;  %3372 = vmatmul.msk.f32.vlgmr.msra.gmra.mxu3 %vm861_vm4, %v1431_v49 }
 0x48b   : > { %3534 = vrcp.f32 %v1412_v11  ;;  %3387 = vmatpush.xpose.msk.msra.mxu3 %vm539_vm1, %v4233_v41 }
 0x491   : > { %v3535_v30 = vpop.eup %3534 }
 0x492   : > { %v1432_v25 = vmul.f32 %v3535_v30, %v4325_v36  ;;  %3380 = vmatmul.msk.f32.vlgmr.msrb.gmra.mxu3 %vm539_vm1, %v4227_v57 }
 0x493   : > { %1417 = vadd.xlane.f32.xlu0 %v1416_v3 }
 0x494   : > { %3374 = vmatmul.msk.f32.vlgmr.msra.gmra.mxu0 %vm861_vm4, %v1432_v25 }
 0x49a   : > { %3388 = vmatmul.msk.f32.vlgmr.msra.gmra.mxu3 %vm539_vm1, %v4266_v10 }
 0x49e   : > { %v1403_v51 = vpop.xlane.xlu2 %1402 }
 0x49f   : > { %3536 = vrcp.f32 %v1403_v51 }
 0x4a5   : > { %v3537_v16 = vpop.eup %3536 }
 0x4a6   : > { %v1429_v41 = vmul.f32 %v3537_v16, %v4329_v4  ;;  %v1734_v9 = vpop.permute.xlu2 %1733 }
 0x4a7   : > { %2249 = vrot.lane.b32.xlu0 %v4124_v61, %s3635_s20 }
 0x4a8   : > { %v1415_v36 = vpop.xlane.xlu0 %1414  ;;  %3368 = vmatmul.msk.f32.vlgmr.msra.gmra.mxu1 %vm861_vm4, %v1429_v41 }
 0x4a9   : > { %3538 = vrcp.f32 %v1415_v36  ;;  %3383 = vmatpush.xpose.msk.msra.mxu1 %vm539_vm1, %v1738_v52 }
 0x4ae   : > { %v1830_v57 = vpop.permute.xlu2 %1829 }
 0x4af   : > { %v3539_v62 = vpop.eup %3538  ;;  %2345 = vrot.lane.b32.xlu0 %v4188_v48, %s3635_s20 }
 0x4b0   : > { %v1433_v10 = vmul.f32 %v3539_v62, %v4333_v18 }
 0x4b2   : > { %3376 = vmatmul.msk.f32.vlgmr.msrb.gmra.mxu1 %vm861_vm4, %v1433_v10 }
 0x4b6   : > { %v2014_v4 = vpop.permute.xlu2 %2013 }
 0x4b7   : > { %2341 = vrot.lane.b32.xlu0 %v4178_v8, %s3634_s18  ;;  %3395 = vmatpush.msk.msrb.mxu3 %vm865_vm2, %v2014_v4 }
 0x4ba   : > { %3384 = vmatmul.msk.f32.vlgmr.msra.gmra.mxu1 %vm539_vm1, %v1734_v9 }
 0x4bb   : > { %v1834_v61 = vpop.permute.xlu0 %1833 }
 0x4bc   : > { %3389 = vmatpush.xpose.msk.msra.mxu0 %vm539_vm1, %v1834_v61 }
 0x4bf   : > { %2187 = vrot.lane.b32.xlu0 %v4104_v22, %s3633_s17  ;;  %v1406_v43 = vpop.xlane.xlu1 %1405  ;;  %v2217_v22 = vpop.permute.xlu2 %2216 }
 0x4c0   : > { %3540 = vrcp.f32 %v1406_v43 }
 0x4c3   : > { %v1862_v48 = vpop.permute.xlu0 %1861 }
 0x4c6   : > { %v3541_v18 = vpop.eup %3540 }
 0x4c7   : > { %v1430_v38 = vmul.f32 %v3541_v18, %v4341_v32  ;;  %2377 = vrot.lane.b32.xlu0 %v4197_v50, %s3635_s20  ;;  %v2159_v50 = vpop.permute.xlu2 %2158 }
 0x4c9   : > { %3370 = vmatmul.msk.f32.vlgmr.msrb.gmra.mxu2 %vm861_vm4, %v1430_v38 }
 0x4ca   : > { %3385 = vmatpush.xpose.msk.msrb.mxu2 %vm539_vm1, %v4268_v24 }
 0x4cb   : > { %v2130_v8 = vpop.permute.xlu0 %2129 }
 0x4cc   : > { %3403 = vmatpush.msk.msra.mxu3 %vm865_vm2, %v2130_v8 }
 0x4cf   : > { %2373 = vrot.lane.b32.xlu0 %v4194_v31, %s3634_s18 }
 0x4d3   : > { %v2043_v28 = vpop.permute.xlu0 %2042 }
 0x4d7   : > { %v1702_v0 = vpop.permute.xlu1 %1701 }
 0x4d8   : > { %3382 = vmatmul.msk.f32.vlgmr.msrb.gmra.mxu0 %vm539_vm1, %v1702_v0 }
 0x4d9   : > { %3397 = vmatpush.msk.msrb.mxu0 %vm865_vm2, %v2043_v28 }
 0x4db   : > { %v2072_v55 = vpop.permute.xlu0 %2071 }
 0x4df   : > { %v1866_v32 = vpop.permute.xlu1 %1865 }
 0x4e0   : > { %3390 = vmatmul.msk.f32.vlgmr.msra.gmra.mxu0 %vm539_vm1, %v1830_v57  ;;  %3391 = vmatpush.xpose.msk.msrb.mxu1 %vm539_vm1, %v1866_v32 }
 0x4e1   : > { %3405 = vmatpush.msk.msra.mxu0 %vm865_vm2, %v2159_v50 }
 0x4e3   : > { %3392 = vmatmul.msk.f32.vlgmr.msrb.gmra.mxu1 %vm539_vm1, %v1862_v48 }
 0x4e4   : > { %3399 = vmatpush.msk.msra.mxu1 %vm865_vm2, %v2072_v55 }
 0x4e7   : > { %v2101_v35 = vpop.permute.xlu1 %2100 }
 0x4e9   : > { %v4433_v29 = vpop.f32.mrf.mxu3 }
 0x4ef   : > { %v4469_v62 = vpop.permute.xlu1 %2245 }
 0x4f7   : > { %v4475_v10 = vpop.permute.xlu1 %2473 }
 0x505   : > { %v4449_v19 = vpop.f32.mrf.mxu0 }
 0x506   : > { %v1418_v31 = vpop.xlane.xlu0 %1417 }
 0x507   : > { %3542 = vrcp.f32 %v1418_v31 }
 0x50d   : > { %v3543_v24 = vpop.eup %3542 }
 0x50e   : > { %v1434_v52 = vmul.f32 %v3543_v24, %v3533_v7 }
 0x510   : > { %3378 = vmatmul.msk.f32.vlgmr.msra.gmra.mxu2 %vm861_vm4, %v1434_v52 }
 0x511   : > { %3393 = vmatpush.xpose.msk.msra.mxu2 %vm539_vm1, %v4315_v46  ;;  %v4440_v46 = vpop.f32.mrf.mxu3  ;;  %v4451_v5 = vpop.f32.mrf.mxu0 }
 0x518   : > { %3386 = vmatmul.msk.f32.vlgmr.msrb.gmra.mxu2 %vm539_vm1, %v4223_v33 }
 0x519   : > { %3401 = vmatpush.msk.msrb.mxu2 %vm865_vm2, %v2101_v35  ;;  %v4429_v6 = vpop.permute.xlu0 %2249  ;;  %v1696_v20 = vpop.f32.mrf.mxu3 }
 0x51a   : > { %v1923_v7 = vsel %vm768_vm3, %v1696_v20, -inf }
 0x520   : > { %3394 = vmatmul.msk.f32.vlgmr.msra.gmra.mxu2 %vm539_vm1, %v4311_v26 }
 0x521   : > { %3409 = vmatpush.msk.msra.mxu2 %vm865_vm2, %v2217_v22  ;;  %v4436_v27 = vpop.permute.xlu0 %2345  ;;  %v1824_v42 = vpop.f32.mrf.mxu3 }
 0x522   : > { %v1935_v21 = vsel %vm768_vm3, %v1824_v42, -inf }
 0x525   : > { %v4438_v63 = vpop.f32.mrf.mxu1 }
 0x529   : > { %v4442_v47 = vpop.permute.xlu0 %2341 }
 0x52f   : > { %v4444_v33 = vpop.f32.mrf.mxu1 }
 0x531   : > { %v2188_v37 = vpop.permute.xlu0 %2187 }
 0x532   : > { %3407 = vmatpush.msk.msrb.mxu1 %vm865_vm2, %v2188_v37 }
 0x537   : > { %v1760_v23 = vpop.f32.mrf.mxu1 }
 0x538   : > { %v1929_v26 = vsel %vm768_vm3, %v1760_v23, -inf }
 0x539   : > { %1930 = vmax.xlane.f32.xlu0 %v1929_v26  ;;  %v4467_v57 = vpop.permute.xlu0 %2377 }
 0x541   : > { %1936 = vmax.xlane.f32.xlu0 %v1935_v21 }
 0x54c   : > { %v4461_v51 = vpop.f32.mrf.mxu2 }
 0x555   : > { %v1728_v40 = vpop.f32.mrf.mxu0  ;;  %2313 = vrot.lane.b32.xlu0 %v4165_v56, %s3635_s20 }
 0x556   : > { %v1926_v49 = vsel %vm768_vm3, %v1728_v40, -inf }
 0x557   : > { %1927 = vmax.xlane.f32.xlu1 %v1926_v49 }
 0x55d   : > { %v1856_v11 = vpop.f32.mrf.mxu0 }
 0x55e   : > { %v1938_v30 = vsel %vm768_vm3, %v1856_v11, -inf }
 0x55f   : > { %1924 = vmax.xlane.f32.xlu1 %v1923_v7  ;;  %1939 = vmax.xlane.f32.xlu2 %v1938_v30 }
 0x560   : > { %v1888_v25 = vpop.f32.mrf.mxu1 }
 0x561   : > { %v1941_v3 = vsel %vm768_vm3, %v1888_v25, -inf }
 0x567   : > { %1942 = vmax.xlane.f32.xlu1 %v1941_v3 }
 0x580   : > { %2281 = vrot.lane.b32.xlu1 %v4141_v2, %s3635_s20  ;;  %v4473_v2 = vpop.permute.xlu0 %2373 }
 0x593   : > { %v4463_v56 = vpop.f32.mrf.mxu2 }
 0x59b   : > { %v1792_v16 = vpop.f32.mrf.mxu2 }
 0x59c   : > { %v1932_v41 = vsel %vm768_vm3, %v1792_v16, -inf }
 0x59d   : > { %1933 = vmax.xlane.f32.xlu2 %v1932_v41 }
 0x5a3   : > { %v1920_v9 = vpop.f32.mrf.mxu2 }
 0x5a4   : > { %v1944_v36 = vsel %vm768_vm3, %v1920_v9, -inf }
 0x5a5   : > { %1945 = vmax.xlane.f32.xlu2 %v1944_v36 }
 0x5ac   : > { %v1931_v4 = vpop.xlane.xlu0 %1930 }
 0x5ad   : > { %v1949_v32 = vsub.f32 %v1760_v23, %v1931_v4 }
 0x5af   : > { %v1959_v24 = vmul.f32 1.442695, %v1949_v32 }
 0x5b4   : > { %v1937_v8 = vpop.xlane.xlu0 %1936 }
 0x5b5   : > { %v1951_v31 = vsub.f32 %v1824_v42, %v1937_v8 }
 0x5b7   : > { %v1963_v52 = vmul.f32 1.442695, %v1951_v31 }
 0x5bd   : > { %2469 = vrot.lane.b32.xlu2 %v4217_v13, %s3634_s18 }
 0x5ca   : > { %v1928_v61 = vpop.xlane.xlu1 %1927 }
 0x5cb   : > { %v1948_v43 = vsub.f32 %v1728_v40, %v1928_v61 }
 0x5cd   : > { %v1957_v48 = vmul.f32 1.442695, %v1948_v43 }
 0x5cf   : > { %3544 = vpow2.f32 %v1957_v48 }
 0x5d2   : > { %v1925_v18 = vpop.xlane.xlu1 %1924  ;;  %v1940_v38 = vpop.xlane.xlu2 %1939 }
 0x5d3   : > { %v1947_v22 = vsub.f32 %v1696_v20, %v1925_v18  ;;  %v1952_v28 = vsub.f32 %v1856_v11, %v1940_v38 }
 0x5d5   : > { %v3545_v0 = vpop.eup %3544  ;;  %v1955_v50 = vmul.f32 1.442695, %v1947_v22  ;;  %v1965_v55 = vmul.f32 1.442695, %v1952_v28 }
 0x5d6   : > { %v1974_v13 = vsel %vm768_vm3, %v3545_v0, 0.0 }
 0x5d7   : > { %3546 = vpow2.f32 %v1955_v50  ;;  %1975 = vadd.xlane.f32.xlu0 %v1974_v13 }
 0x5d8   : > { %3548 = vpow2.f32 %v1965_v55 }
 0x5d9   : > { %3550 = vpow2.f32 %v1959_v24 }
 0x5da   : > { %v1943_v35 = vpop.xlane.xlu1 %1942  ;;  %3552 = vpow2.f32 %v1963_v52 }
 0x5db   : > { %v1953_v37 = vsub.f32 %v1888_v25, %v1943_v35 }
 0x5dd   : > { %v3547_v26 = vpop.eup %3546  ;;  %v1967_v21 = vmul.f32 1.442695, %v1953_v37 }
 0x5de   : > { %v3549_v40 = vpop.eup %3548  ;;  %v1971_v20 = vsel %vm768_vm3, %v3547_v26, 0.0 }
 0x5df   : > { %3554 = vpow2.f32 %v1967_v21  ;;  %1972 = vadd.xlane.f32.xlu0 %v1971_v20  ;;  %v1986_v23 = vsel %vm768_vm3, %v3549_v40, 0.0  ;;  %v3551_v42 = vpop.eup %3550 }
 0x5e0   : > { %1987 = vadd.xlane.f32.xlu1 %v1986_v23  ;;  %v3553_v49 = vpop.eup %3552  ;;  %v1977_v7 = vsel %vm768_vm3, %v3551_v42, 0.0 }
 0x5e1   : > { %v1983_v25 = vsel %vm768_vm3, %v3553_v49, 0.0 }
 0x5e5   : > { %v3555_v11 = vpop.eup %3554 }
 0x5e6   : > { %v1989_v30 = vsel %vm768_vm3, %v3555_v11, 0.0 }
 0x5e7   : > { %1978 = vadd.xlane.f32.xlu0 %v1977_v7  ;;  %1990 = vadd.xlane.f32.xlu2 %v1989_v30 }
 0x5e8   : > { %1984 = vadd.xlane.f32.xlu1 %v1983_v25 }
 0x5fb   : > { %2409 = vrot.lane.b32.xlu0 %v4204_v12, %s3635_s20 }
 0x601   : > { %2309 = vrot.lane.b32.xlu1 %v4152_v53, %s3634_s18  ;;  %v2314_v53 = vpop.permute.xlu0 %2313 }
 0x609   : > { %2405 = vrot.lane.b32.xlu1 %v4200_v59, %s3634_s18 }
 0x610   : > { %v1934_v3 = vpop.xlane.xlu2 %1933 }
 0x611   : > { %v1950_v41 = vsub.f32 %v1792_v16, %v1934_v3  ;;  %v2282_v16 = vpop.permute.xlu1 %2281 }
 0x613   : > { %v1961_v36 = vmul.f32 1.442695, %v1950_v41 }
 0x615   : > { %3556 = vpow2.f32 %v1961_v36 }
 0x618   : > { %v1946_v4 = vpop.xlane.xlu2 %1945 }
 0x619   : > { %v1954_v61 = vsub.f32 %v1920_v9, %v1946_v4 }
 0x61b   : > { %v3557_v43 = vpop.eup %3556  ;;  %v1969_v48 = vmul.f32 1.442695, %v1954_v61 }
 0x61c   : > { %v1980_v18 = vsel %vm768_vm3, %v3557_v43, 0.0 }
 0x61d   : > { %3558 = vpow2.f32 %v1969_v48  ;;  %1981 = vadd.xlane.f32.xlu2 %v1980_v18 }
 0x623   : > { %v3559_v38 = vpop.eup %3558 }
 0x624   : > { %v1992_v12 = vsel %vm768_vm3, %v3559_v38, 0.0 }
 0x625   : > { %1993 = vadd.xlane.f32.xlu0 %v1992_v12 }
 0x635   : > { %2277 = vrot.lane.b32.xlu2 %v4129_v58, %s3634_s18  ;;  %v2470_v58 = vpop.permute.xlu2 %2469 }
 0x639   : > { %2437 = vrot.lane.b32.xlu0 %v4209_v60, %s3634_s18  ;;  %s442_s18 = scalar_lea.vmem %s4852_s13, %s3310_s19 }
 0x63d   : > { %2441 = vrot.lane.b32.xlu2 %v4213_v44, %s3635_s20 }
 0x64a   : > { %v1976_v59 = vpop.xlane.xlu0 %1975 }
 0x64b   : > { %3560 = vrcp.f32 %v1976_v59 }
 0x651   : > { %v3561_v9 = vpop.eup %3560 }
 0x652   : > { %v2004_v8 = vmul.f32 %v3561_v9, %v3545_v0  ;;  %v1973_v22 = vpop.xlane.xlu0 %1972 }
 0x653   : > { %3562 = vrcp.f32 %v1973_v22  ;;  %v1988_v28 = vpop.xlane.xlu1 %1987 }
 0x654   : > { %3564 = vrcp.f32 %v1988_v28  ;;  %3398 = vmatmul.msk.f32.vlgmr.msrb.gmra.mxu0 %vm861_vm4, %v2004_v8 }
 0x655   : > { %3413 = vmatpush.xpose.msk.msrb.mxu0 %vm539_vm1, %v2282_v16 }
 0x659   : > { %v3563_v32 = vpop.eup %3562 }
 0x65a   : > { %v3565_v60 = vpop.eup %3564  ;;  %v2003_v50 = vmul.f32 %v3563_v32, %v3547_v26  ;;  %v1979_v55 = vpop.xlane.xlu0 %1978 }
 0x65b   : > { %v2008_v44 = vmul.f32 %v3565_v60, %v3549_v40  ;;  %3566 = vrcp.f32 %v1979_v55  ;;  %v1985_v31 = vpop.xlane.xlu1 %1984  ;;  %v1991_v0 = vpop.xlane.xlu2 %1990 }
 0x65c   : > { %3568 = vrcp.f32 %v1985_v31  ;;  %3396 = vmatmul.msk.f32.vlgmr.msrb.gmra.mxu3 %vm861_vm4, %v2003_v50 }
 0x65d   : > { %3406 = vmatmul.msk.f32.vlgmr.msra.gmra.mxu0 %vm861_vm4, %v2008_v44  ;;  %3411 = vmatpush.xpose.msk.msrb.mxu3 %vm539_vm1, %v4429_v6  ;;  %3570 = vrcp.f32 %v1991_v0 }
 0x661   : > { %v3567_v13 = vpop.eup %3566 }
 0x662   : > { %v3569_v24 = vpop.eup %3568  ;;  %v2005_v52 = vmul.f32 %v3567_v13, %v3551_v42 }
 0x663   : > { %v2007_v35 = vmul.f32 %v3569_v24, %v3553_v49  ;;  %v3571_v37 = vpop.eup %3570 }
 0x664   : > { %3400 = vmatmul.msk.f32.vlgmr.msra.gmra.mxu1 %vm861_vm4, %v2005_v52  ;;  %v2009_v26 = vmul.f32 %v3571_v37, %v3555_v11 }
 0x665   : > { %3404 = vmatmul.msk.f32.vlgmr.msra.gmra.mxu3 %vm861_vm4, %v2007_v35  ;;  %3415 = vmatpush.xpose.msk.msra.mxu1 %vm539_vm1, %v2314_v53 }
 0x666   : > { %3419 = vmatpush.xpose.msk.msra.mxu3 %vm539_vm1, %v4467_v57 }
 0x66c   : > { %3408 = vmatmul.msk.f32.vlgmr.msrb.gmra.mxu1 %vm861_vm4, %v2009_v26 }
 0x66d   : > { %3412 = vmatmul.msk.f32.vlgmr.msrb.gmra.mxu3 %vm539_vm1, %v4469_v62  ;;  %v2410_v6 = vpop.permute.xlu0 %2409 }
 0x66e   : > { %3421 = vmatpush.xpose.msk.msra.mxu0 %vm539_vm1, %v2410_v6 }
 0x673   : > { %v2310_v21 = vpop.permute.xlu1 %2309 }
 0x674   : > { %3416 = vmatmul.msk.f32.vlgmr.msra.gmra.mxu1 %vm539_vm1, %v2310_v21 }
 0x675   : > { %3420 = vmatmul.msk.f32.vlgmr.msra.gmra.mxu3 %vm539_vm1, %v4473_v2 }
 0x67b   : > { %v2406_v49 = vpop.permute.xlu1 %2405 }
 0x690   : > { %v1982_v40 = vpop.xlane.xlu2 %1981 }
 0x691   : > { %3572 = vrcp.f32 %v1982_v40 }
 0x697   : > { %v3573_v20 = vpop.eup %3572 }
 0x698   : > { %v2006_v57 = vmul.f32 %v3573_v20, %v3557_v43  ;;  %v1994_v23 = vpop.xlane.xlu0 %1993  ;;  %v2278_v42 = vpop.permute.xlu2 %2277 }
 0x699   : > { %3574 = vrcp.f32 %v1994_v23  ;;  %3414 = vmatmul.msk.f32.vlgmr.msrb.gmra.mxu0 %vm539_vm1, %v2278_v42 }
 0x69a   : > { %3402 = vmatmul.msk.f32.vlgmr.msrb.gmra.mxu2 %vm861_vm4, %v2006_v57 }
 0x69b   : > { %3417 = vmatpush.xpose.msk.msrb.mxu2 %vm539_vm1, %v4436_v27 }
 0x69f   : > { %v3575_v62 = vpop.eup %3574 }
 0x6a0   : > { %v2010_v11 = vmul.f32 %v3575_v62, %v3559_v38  ;;  %v2442_v7 = vpop.permute.xlu2 %2441 }
 0x6a1   : > { %3422 = vmatmul.msk.f32.vlgmr.msra.gmra.mxu0 %vm539_vm1, %v2406_v49  ;;  %3423 = vmatpush.xpose.msk.msrb.mxu1 %vm539_vm1, %v2442_v7 }
 0x6a2   : > { %3410 = vmatmul.msk.f32.vlgmr.msra.gmra.mxu2 %vm861_vm4, %v2010_v11 }
 0x6a3   : > { %3425 = vmatpush.xpose.msk.msra.mxu2 %vm539_vm1, %v4475_v10 }
 0x6aa   : > { %3418 = vmatmul.msk.f32.vlgmr.msrb.gmra.mxu2 %vm539_vm1, %v4442_v47 }
 0x6ab   : > { %v2438_v2 = vpop.permute.xlu0 %2437 }
 0x6ac   : > { %3424 = vmatmul.msk.f32.vlgmr.msrb.gmra.mxu1 %vm539_vm1, %v2438_v2 }
 0x6b2   : > { %3426 = vmatmul.msk.f32.vlgmr.msra.gmra.mxu2 %vm539_vm1, %v2470_v58 }
 0x6d1   : > { %v4538_v4 = vpop.f32.mrf.mxu0 }
 0x6da   : > { %v4540_v61 = vpop.f32.mrf.mxu0 }
 0x6df   : > { %v4530_v30 = vpop.f32.mrf.mxu3 }
 0x6e1   : > { %v4528_v27 = vpop.f32.mrf.mxu1 }
 0x6e8   : > { %v4534_v3 = vpop.f32.mrf.mxu3 }
 0x6e9   : > { %v4532_v25 = vpop.f32.mrf.mxu1 }
 0x6f0   : > { %v2272_v10 = vpop.f32.mrf.mxu3 }
 0x6f1   : > { %v2336_v41 = vpop.f32.mrf.mxu1  ;;  %v2499_v47 = vsel %vm768_vm3, %v2272_v10, -inf }
 0x6f2   : > { %v2505_v36 = vsel %vm768_vm3, %v2336_v41, -inf }
 0x6f3   : > { %2506 = vmax.xlane.f32.xlu2 %v2505_v36 }
 0x6f8   : > { %v2400_v8 = vpop.f32.mrf.mxu3 }
 0x6f9   : > { %v2511_v22 = vsel %vm768_vm3, %v2400_v8, -inf }
 0x6fb   : > { %2500 = vmax.xlane.f32.xlu2 %v2499_v47 }
 0x716   : > { %v2304_v43 = vpop.f32.mrf.mxu0 }
 0x717   : > { %v2502_v48 = vsel %vm768_vm3, %v2304_v43, -inf }
 0x718   : > { %2503 = vmax.xlane.f32.xlu0 %v2502_v48 }
 0x71d   : > { %v4543_v18 = vpop.f32.mrf.mxu2 }
 0x71e   : > { %v2432_v38 = vpop.f32.mrf.mxu0 }
 0x71f   : > { %v2514_v12 = vsel %vm768_vm3, %v2432_v38, -inf }
 0x720   : > { %2515 = vmax.xlane.f32.xlu0 %v2514_v12 }
 0x725   : > { %v4546_v53 = vpop.f32.mrf.mxu2 }
 0x729   : > { %v2464_v59 = vpop.f32.mrf.mxu1 }
 0x72a   : > { %v2517_v16 = vsel %vm768_vm3, %v2464_v59, -inf }
 0x72b   : > { %2518 = vmax.xlane.f32.xlu1 %v2517_v16 }
 0x72d   : > { %v4549_v9 = vpop.f32.mrf.mxu2 }
 0x72e   : > { %v2508_v32 = vsel %vm768_vm3, %v4549_v9, -inf }
 0x733   : > { %2512 = vmax.xlane.f32.xlu1 %v2511_v22  ;;  %v2791_v22 = vld.sshfl [vmem:[#allocation1] sm:$0xff pattern:$0x73625140] }
 0x734   : > { %2676 = vrot.lane.b32.xlu0 %v4250_v1, %s3636_s21 }
 0x735   : > { %v2496_v28 = vpop.f32.mrf.mxu2 }
 0x736   : > { %v2520_v58 = vsel %vm768_vm3, %v2496_v28, -inf }
 0x737   : > { %2521 = vmax.xlane.f32.xlu2 %v2520_v58 }
 0x73b   : > { %2509 = vmax.xlane.f32.xlu1 %v2508_v32 }
 0x73c   : > { %2618 = vrot.lane.b32.xlu0 %v4235_v39, %s3636_s21 }
 0x74f   : > { %2589 = vrot.lane.b32.xlu2 %v4229_v15, %s3636_s21 }
 0x766   : > { %v2507_v60 = vpop.xlane.xlu2 %2506 }
 0x767   : > { %v2525_v50 = vsub.f32 %v2336_v41, %v2507_v60 }
 0x769   : > { %v2535_v55 = vmul.f32 1.442695, %v2525_v50 }
 0x76b   : > { %3576 = vpow2.f32 %v2535_v55 }
 0x76e   : > { %v2501_v44 = vpop.xlane.xlu2 %2500 }
 0x76f   : > { %v2523_v1 = vsub.f32 %v2272_v10, %v2501_v44 }
 0x771   : > { %v2531_v31 = vmul.f32 1.442695, %v2523_v1  ;;  %v4561_v0 = vpop.eup %3576 }
 0x772   : > { %v2553_v13 = vsel %vm768_vm3, %v4561_v0, 0.0 }
 0x773   : > { %3578 = vpow2.f32 %v2531_v31 }
 0x778   : > { %2554 = vadd.xlane.f32.xlu2 %v2553_v13 }
 0x779   : > { %v4565_v24 = vpop.eup %3578 }
 0x77a   : > { %v2547_v39 = vsel %vm768_vm3, %v4565_v24, 0.0 }
 0x780   : > { %2548 = vadd.xlane.f32.xlu2 %v2547_v39 }
 0x78b   : > { %v2504_v15 = vpop.xlane.xlu0 %2503 }
 0x78c   : > { %v2524_v52 = vsub.f32 %v2304_v43, %v2504_v15 }
 0x78e   : > { %v2533_v35 = vmul.f32 1.442695, %v2524_v52 }
 0x790   : > { %3580 = vpow2.f32 %v2533_v35 }
 0x793   : > { %v2516_v37 = vpop.xlane.xlu0 %2515 }
 0x794   : > { %v2528_v26 = vsub.f32 %v2432_v38, %v2516_v37 }
 0x796   : > { %v4569_v6 = vpop.eup %3580  ;;  %v2541_v21 = vmul.f32 1.442695, %v2528_v26 }
 0x797   : > { %v2550_v40 = vsel %vm768_vm3, %v4569_v6, 0.0 }
 0x798   : > { %3582 = vpow2.f32 %v2541_v21  ;;  %2551 = vadd.xlane.f32.xlu1 %v2550_v40  ;;  %2705 = vrot.lane.b32.xlu2 %v4258_v14, %s3636_s21 }
 0x79e   : > { %v4575_v20 = vpop.eup %3582  ;;  %v2519_v57 = vpop.xlane.xlu1 %2518 }
 0x79f   : > { %v2529_v23 = vsub.f32 %v2464_v59, %v2519_v57  ;;  %v2562_v42 = vsel %vm768_vm3, %v4575_v20, 0.0 }
 0x7a0   : > { %2563 = vadd.xlane.f32.xlu1 %v2562_v42  ;;  %2734 = vrot.lane.b32.xlu2 %v4270_v45, %s3636_s21 }
 0x7a1   : > { %v2543_v62 = vmul.f32 1.442695, %v2529_v23 }
 0x7a3   : > { %3584 = vpow2.f32 %v2543_v62 }
 0x7a6   : > { %v2677_v49 = vpop.permute.xlu0 %2676  ;;  %v2513_v11 = vpop.xlane.xlu1 %2512 }
 0x7a7   : > { %v2527_v7 = vsub.f32 %v2400_v8, %v2513_v11  ;;  %3433 = vmatpush.msk.msrb.mxu2 %vm865_vm2, %v2677_v49  ;;  %v4888_v49 = vld [vmem:[#allocation19_spill] sm:$0xff] }
 0x7a8   : > { %2827 = vrot.lane.b32.xlu2 %v4433_v29, %s3637_s22 }
 0x7a9   : > { %v4584_v14 = vpop.eup %3584  ;;  %v2539_v2 = vmul.f32 1.442695, %v2527_v7 }
 0x7aa   : > { %v2522_v41 = vpop.xlane.xlu2 %2521  ;;  %v2565_v36 = vsel %vm768_vm3, %v4584_v14, 0.0 }
 0x7ab   : > { %3586 = vpow2.f32 %v2539_v2  ;;  %v2530_v45 = vsub.f32 %v2496_v28, %v2522_v41  ;;  %2566 = vadd.xlane.f32.xlu1 %v2565_v36 }
 0x7ad   : > { %v2545_v10 = vmul.f32 1.442695, %v2530_v45 }
 0x7ae   : > { %v2619_v47 = vpop.permute.xlu0 %2618  ;;  %v2510_v43 = vpop.xlane.xlu1 %2509 }
 0x7af   : > { %3588 = vpow2.f32 %v2545_v10  ;;  %v2526_v48 = vsub.f32 %v4549_v9, %v2510_v43  ;;  %3429 = vmatpush.msk.msrb.mxu0 %vm865_vm2, %v2619_v47  ;;  %v4890_v10 = vld [vmem:[#allocation14_spill] sm:$0xff] }
 0x7b0   : > { %2833 = vrot.lane.b32.xlu2 %v4461_v51, %s3637_s22 }
 0x7b1   : > { %v3587_v29 = vpop.eup %3586  ;;  %v2537_v38 = vmul.f32 1.442695, %v2526_v48 }
 0x7b2   : > { %v2590_v12 = vpop.permute.xlu2 %2589  ;;  %v2559_v59 = vsel %vm768_vm3, %v3587_v29, 0.0 }
 0x7b3   : > { %3590 = vpow2.f32 %v2537_v38  ;;  %2560 = vadd.xlane.f32.xlu0 %v2559_v59  ;;  %3427 = vmatpush.msk.msrb.mxu3 %vm865_vm2, %v2590_v12 }
 0x7b5   : > { %v4594_v16 = vpop.eup %3588 }
 0x7b6   : > { %v2568_v8 = vsel %vm768_vm3, %v4594_v16, 0.0 }
 0x7b7   : > { %2569 = vadd.xlane.f32.xlu1 %v2568_v8 }
 0x7b8   : > { %2863 = vrot.lane.b32.xlu2 %v4528_v27, %s3638_s23 }
 0x7b9   : > { %v3591_v51 = vpop.eup %3590 }
 0x7ba   : > { %v2556_v9 = vsel %vm768_vm3, %v3591_v51, 0.0 }
 0x7bb   : > { %2557 = vadd.xlane.f32.xlu0 %v2556_v9 }
 0x7c0   : > { %2835 = vrot.lane.b32.xlu2 %v4440_v46, %s3637_s22 }
 0x7c8   : > { %2841 = vrot.lane.b32.xlu2 %v4463_v56, %s3637_s22 }
 0x7cf   : > { %2792 = vrot.lane.b32.xlu0 %v2791_v22, %s3636_s21  ;;  %v4891_v22 = vld [vmem:[#allocation17_spill] sm:$0xff] }
 0x7d0   : > { %2871 = vrot.lane.b32.xlu2 %v4532_v25, %s3638_s23  ;;  %2647 = vrot.lane.b32.xlu1 %v4241_v17, %s3636_s21 }
 0x7d7   : > { %2763 = vrot.lane.b32.xlu0 %v4275_v34, %s3636_s21 }
 0x7d8   : > { %2831 = vrot.lane.b32.xlu1 %v4438_v63, %s3637_s22 }
 0x7df   : > { %2829 = vrot.lane.b32.xlu0 %v4449_v19, %s3637_s22 }
 0x7e0   : > { %2861 = vrot.lane.b32.xlu1 %v4538_v4, %s3638_s23 }
 0x7e7   : > { %2859 = vrot.lane.b32.xlu0 %v4530_v30, %s3638_s23 }
 0x7e8   : > { %2839 = vrot.lane.b32.xlu1 %v4444_v33, %s3637_s22 }
 0x7eb   : > { %v2555_v46 = vpop.xlane.xlu2 %2554 }
 0x7ef   : > { %2865 = vrot.lane.b32.xlu0 %v4543_v18, %s3638_s23 }
 0x7f0   : > { %2869 = vrot.lane.b32.xlu1 %v4540_v61, %s3638_s23 }
 0x7f3   : > { %v2549_v17 = vpop.xlane.xlu2 %2548 }
 0x7f4   : > { %3592 = vrcp.f32 %v2549_v17 }
 0x7f7   : > { %2837 = vrot.lane.b32.xlu0 %v4451_v5, %s3637_s22 }
 0x7fa   : > { %v3593_v34 = vpop.eup %3592 }
 0x7fb   : > { %v2579_v63 = vmul.f32 %v3593_v34, %v4565_v24  ;;  %v2706_v19 = vpop.permute.xlu2 %2705 }
 0x7fc   : > { %3435 = vmatpush.msk.msra.mxu3 %vm865_vm2, %v2706_v19 }
 0x7fd   : > { %3428 = vmatmul.msk.f32.vlgmr.msrb.gmra.mxu3 %vm861_vm4, %v2579_v63 }
 0x7ff   : > { %2867 = vrot.lane.b32.xlu0 %v4534_v3, %s3638_s23 }
 0x803   : > { %v2735_v33 = vpop.permute.xlu2 %2734 }
 0x804   : > { %3437 = vmatpush.msk.msra.mxu0 %vm865_vm2, %v2735_v33  ;;  %v4892_v33 = vld [vmem:[#allocation16_spill] sm:$0xff] }
 0x807   : > { %2873 = vrot.lane.b32.xlu0 %v4546_v53, %s3638_s23 }
 0x80b   : > { %v2552_v56 = vpop.xlane.xlu1 %2551  ;;  %v4640_v61 = vpop.permute.xlu2 %2827 }
 0x80c   : > { %3594 = vrcp.f32 %v2552_v56  ;;  %v2915_v56 = vsel %vm539_vm1, %v4892_v33, %v4640_v61  ;;  %v2943_v61 = vld [vmem:[%s4842_s3 + $0x10] sm:$0xff] }
 0x812   : > { %v3595_v5 = vpop.eup %3594 }
 0x813   : > { %v2580_v27 = vmul.f32 %v3595_v5, %v4569_v6  ;;  %v2564_v30 = vpop.xlane.xlu1 %2563  ;;  %v2834_v32 = vpop.permute.xlu2 %2833  ;;  %v4893_v5 = vld [vmem:[#allocation18_spill] sm:$0xff] }
 0x814   : > { %3596 = vrcp.f32 %v2564_v30 }
 0x815   : > { %3430 = vmatmul.msk.f32.vlgmr.msrb.gmra.mxu0 %vm861_vm4, %v2580_v27 }
 0x81a   : > { %v3597_v25 = vpop.eup %3596 }
 0x81b   : > { %v2584_v4 = vmul.f32 %v3597_v25, %v4575_v20  ;;  %v2864_v44 = vpop.permute.xlu2 %2863 }
 0x81d   : > { %3438 = vmatmul.msk.f32.vlgmr.msra.gmra.mxu0 %vm861_vm4, %v2584_v4 }
 0x81e   : > { %v2567_v53 = vpop.xlane.xlu1 %2566 }
 0x823   : > { %v4650_v35 = vpop.permute.xlu2 %2835 }
 0x826   : > { %v2561_v3 = vpop.xlane.xlu0 %2560 }
 0x827   : > { %3598 = vrcp.f32 %v2561_v3 }
 0x82a   : > { %v2570_v50 = vpop.xlane.xlu1 %2569 }
 0x82b   : > { %v2842_v40 = vpop.permute.xlu2 %2841 }
 0x82c   : > { %v2922_v47 = vsel %vm539_vm1, %v4890_v10, %v2842_v40  ;;  %v4897_v40 = vld [vmem:[#allocation4_spill] sm:$0xff] }
 0x82d   : > { %v3599_v18 = vpop.eup %3598 }
 0x82e   : > { %v2583_v28 = vmul.f32 %v3599_v18, %v3587_v29  ;;  %v2558_v58 = vpop.xlane.xlu0 %2557 }
 0x82f   : > { %3600 = vrcp.f32 %v2558_v58  ;;  %v2942_v58 = vld [vmem:[%s4842_s3 + $0x8] sm:$0xff] }
 0x830   : > { %3436 = vmatmul.msk.f32.vlgmr.msra.gmra.mxu3 %vm861_vm4, %v2583_v28  ;;  %3602 = vrcp.f32 %v2570_v50  ;;  %v2944_v28 = vld [vmem:[%s4842_s3 + $0x18] sm:$0xff] }
 0x831   : > { %3604 = vrcp.f32 %v2555_v46  ;;  %2990 = vmatpush.msrb.mxu3 %v2944_v28  ;;  %v3137_v28 = vld [vmem:[%s4848_s9 + $0x68] sm:$0xff] }
 0x832   : > { %3606 = vrcp.f32 %v2567_v53 }
 0x833   : > { %v2872_v62 = vpop.permute.xlu2 %2871  ;;  %2991 = vmatpush.msrb.mxu3 %v2943_v61 }
 0x835   : > { %v3601_v60 = vpop.eup %3600  ;;  %2992 = vmatpush.msrb.mxu3 %v2942_v58 }
 0x836   : > { %v2582_v55 = vmul.f32 %v3601_v60, %v3591_v51  ;;  %v3603_v1 = vpop.eup %3602  ;;  %v4894_v60 = vld [vmem:[#allocation15_spill] sm:$0xff] }
 0x837   : > { %v3605_v31 = vpop.eup %3604  ;;  %v2586_v13 = vmul.f32 %v3603_v1, %v4594_v16  ;;  %v2919_v50 = vsel %vm539_vm1, %v4894_v60, %v4650_v35 }
 0x838   : > { %3434 = vmatmul.msk.f32.vlgmr.msrb.gmra.mxu2 %vm861_vm4, %v2582_v55  ;;  %v2581_v39 = vmul.f32 %v3605_v31, %v4561_v0  ;;  %v3607_v52 = vpop.eup %3606 }
 0x839   : > { %v2585_v26 = vmul.f32 %v3607_v52, %v4584_v14  ;;  %v4889_v14 = vld [vmem:[#allocation20_spill] sm:$0xff] }
 0x841   : > { %v2793_v24 = vpop.permute.xlu0 %2792 }
 0x842   : > { %3441 = vmatpush.msk.msra.mxu2 %vm865_vm2, %v2793_v24  ;;  %v2648_v15 = vpop.permute.xlu1 %2647 }
 0x843   : > { %3431 = vmatpush.msk.msra.mxu1 %vm865_vm2, %v2648_v15  ;;  %3442 = vmatmul.msk.f32.vlgmr.msra.gmra.mxu2 %vm861_vm4, %v2586_v13 }
 0x844   : > { %3432 = vmatmul.msk.f32.vlgmr.msra.gmra.mxu1 %vm861_vm4, %v2581_v39 }
 0x849   : > { %v2764_v37 = vpop.permute.xlu0 %2763 }
 0x84a   : > { %3439 = vmatpush.msk.msrb.mxu1 %vm865_vm2, %v2764_v37  ;;  %v2832_v6 = vpop.permute.xlu1 %2831 }
 0x84b   : > { %v2917_v0 = vsel %vm539_vm1, %v4288_v54, %v2832_v6  ;;  %v2918_v54 = vsel %vm539_vm1, %v4889_v14, %v2834_v32  ;;  %v2941_v32 = vld [vmem:[%s4842_s3] sm:$0xff]  ;;  %v4895_v6 = vld [vmem:[#allocation2_spill] sm:$0xff] }
 0x84c   : > { %3440 = vmatmul.msk.f32.vlgmr.msrb.gmra.mxu1 %vm861_vm4, %v2585_v26  ;;  %v4658_v21 = vsel %vm2923_vm5, %v2917_v0, %v2864_v44  ;;  %2993 = vmatpush.msrb.mxu3 %v2941_v32  ;;  %v4896_v0 = vld [vmem:[#allocation3_spill] sm:$0xff]  ;;  %v3136_v32 = vld [vmem:[%s4848_s9 + $0x60] sm:$0xff] }
 0x851   : > { %v2830_v20 = vpop.permute.xlu0 %2829 }
 0x852   : > { %v2862_v57 = vpop.permute.xlu1 %2861  ;;  %v2916_v46 = vsel %vm539_vm1, %v4891_v22, %v2830_v20 }
 0x853   : > { %v2925_v34 = vsel %vm2923_vm5, %v2916_v46, %v2862_v57  ;;  %v4899_v57 = vld [vmem:[#allocation6_spill] sm:$0xff] }
 0x859   : > { %v2860_v23 = vpop.permute.xlu0 %2859 }
 0x85a   : > { %v2840_v42 = vpop.permute.xlu1 %2839  ;;  %v2924_v30 = vsel %vm2923_vm5, %v2915_v56, %v2860_v23  ;;  %v4900_v23 = vld [vmem:[#allocation7_spill] sm:$0xff]  ;;  %v3088_v56 = vld [vmem:[%s4846_s7 + $0x18] sm:$0xff] }
 0x85b   : > { %v2921_v11 = vsel %vm539_vm1, %v4888_v49, %v2840_v42  ;;  %v4901_v42 = vld [vmem:[#allocation8_spill] sm:$0xff]  ;;  %v3473_v49 = vld [vmem:[%s4843_s4] ss:$0 sm:$0xff]  ;;  %3111 = vmatpush.msrb.mxu0 %v3088_v56 }
 0x85c   : > { %v4663_v7 = vsel %vm2923_vm5, %v2921_v11, %v2872_v62  ;;  %v4902_v62 = vld [vmem:[#allocation9_spill] sm:$0xff] }
 0x861   : > { %v2866_v2 = vpop.permute.xlu0 %2865 }
 0x862   : > { %v2927_v41 = vsel %vm2923_vm5, %v2918_v54, %v2866_v2  ;;  %v2870_v17 = vpop.permute.xlu1 %2869 }
 0x869   : > { %v2838_v36 = vpop.permute.xlu0 %2837 }
 0x86a   : > { %v2920_v27 = vsel %vm539_vm1, %v4893_v5, %v2838_v36  ;;  %v3087_v5 = vld [vmem:[%s4846_s7 + $0x10] sm:$0xff]  ;;  %vm3239_vm1 = vcmask 254976  }
 0x86b   : > { %v2929_v3 = vsel %vm2923_vm5, %v2920_v27, %v2870_v17  ;;  %3112 = vmatpush.msrb.mxu0 %v3087_v5  ;;  %v3086_v27 = vld [vmem:[%s4846_s7 + $0x8] sm:$0xff] }
 0x86d   : > { %3113 = vmatpush.msrb.mxu0 %v3086_v27 }
 0x871   : > { %v2868_v45 = vpop.permute.xlu0 %2867 }
 0x872   : > { %v2928_v55 = vsel %vm2923_vm5, %v2919_v50, %v2868_v45 }
 0x879   : > { %v2874_v43 = vpop.permute.xlu0 %2873 }
 0x87a   : > { %v2931_v48 = vsel %vm2923_vm5, %v2922_v47, %v2874_v43  ;;  %v3640_v43 = vmov 32.0  }
 0x87b   : > { %3608 = vrcp.f32 %v3640_v43  ;;  %v3124_v43 = vld [vmem:[%s4848_s9] sm:$0xff] }
 0x880   : > { %v2613_v29 = vpop.f32.mrf.mxu3 }
 0x881   : > { %2891 = vrot.lane.b32.xlu1 %v2613_v29, %s3639_s24 }
 0x892   : > { %v2642_v38 = vpop.f32.mrf.mxu0 }
 0x893   : > { %2893 = vrot.lane.b32.xlu2 %v2642_v38, %s3639_s24 }
 0x89a   : > { %v2758_v12 = vpop.f32.mrf.mxu0 }
 0x89b   : > { %2901 = vrot.lane.b32.xlu2 %v2758_v12, %s3639_s24 }
 0x8b3   : > { %v2729_v59 = vpop.f32.mrf.mxu3 }
 0x8b4   : > { %2899 = vrot.lane.b32.xlu1 %v2729_v59, %s3639_s24 }
 0x8bb   : > { %v2700_v16 = vpop.f32.mrf.mxu2 }
 0x8bc   : > { %2897 = vrot.lane.b32.xlu1 %v2700_v16, %s3639_s24 }
 0x8c1   : > { %v2671_v8 = vpop.f32.mrf.mxu1 }
 0x8c2   : > { %2895 = vrot.lane.b32.xlu0 %v2671_v8, %s3639_s24 }
 0x8c6   : > { %v2816_v51 = vpop.f32.mrf.mxu2 }
 0x8c7   : > { %2905 = vrot.lane.b32.xlu1 %v2816_v51, %s3639_s24 }
 0x8c9   : > { %v2787_v9 = vpop.f32.mrf.mxu1 }
 0x8ca   : > { %2903 = vrot.lane.b32.xlu0 %v2787_v9, %s3639_s24 }
 0x8ed   : > { %v2894_v63 = vpop.permute.xlu2 %2893 }
 0x8ee   : > { %v2934_v19 = vsel %vm2932_vm6, %v2925_v34, %v2894_v63 }
 0x8ef   : > { %2959 = vst [vmem:[#allocation1 + $0x1] ss:$4 sm:$0xff] %v2934_v19 }
 0x8f3   : > { %v2892_v25 = vpop.permute.xlu1 %2891 }
 0x8f4   : > { %v2933_v4 = vsel %vm2932_vm6, %v2924_v30, %v2892_v25  ;;  %v3085_v30 = vld [vmem:[%s4846_s7] sm:$0xff] }
 0x8f5   : > { %2957 = vst [vmem:[#allocation1] ss:$4 sm:$0xff] %v2933_v4  ;;  %v2902_v18 = vpop.permute.xlu2 %2901  ;;  %3114 = vmatpush.msrb.mxu0 %v3085_v30 }
 0x8f6   : > { %v2938_v53 = vsel %vm2932_vm6, %v2929_v3, %v2902_v18  ;;  %v3139_v18 = vld [vmem:[%s4848_s9 + $0x78] sm:$0xff] }
 0x8f7   : > { %2967 = vst [vmem:[#allocation1 + $0x21] ss:$4 sm:$0xff] %v2938_v53  ;;  %v3138_v53 = vld [vmem:[%s4848_s9 + $0x70] sm:$0xff]  ;;  %3144 = vmatpush.msra.mxu1 %v3139_v18 }
 0x8f9   : > { %3145 = vmatpush.msra.mxu1 %v3138_v53 }
 0x8fb   : > { %3146 = vmatpush.msra.mxu1 %v3137_v28 }
 0x8fd   : > { %3147 = vmatpush.msra.mxu1 %v3136_v32 }
 0x926   : > { %v2900_v44 = vpop.permute.xlu1 %2899 }
 0x927   : > { %v2937_v1 = vsel %vm2932_vm6, %v2928_v55, %v2900_v44  ;;  %v3135_v55 = vld [vmem:[%s4848_s9 + $0x58] sm:$0xff] }
 0x928   : > { %2965 = vst [vmem:[#allocation1 + $0x20] ss:$4 sm:$0xff] %v2937_v1  ;;  %v3134_v1 = vld [vmem:[%s4848_s9 + $0x50] sm:$0xff]  ;;  %3148 = vmatpush.msra.mxu1 %v3135_v55 }
 0x92a   : > { %3149 = vmatpush.msra.mxu1 %v3134_v1 }
 0x92e   : > { %v2898_v31 = vpop.permute.xlu1 %2897 }
 0x92f   : > { %v2936_v13 = vsel %vm2932_vm6, %v2927_v41, %v2898_v31 }
 0x930   : > { %2963 = vst [vmem:[#allocation1 + $0x3] ss:$4 sm:$0xff] %v2936_v13  ;;  %v3133_v13 = vld [vmem:[%s4848_s9 + $0x48] sm:$0xff] }
 0x931   : > { %3150 = vmatpush.msra.mxu1 %v3133_v13 }
 0x934   : > { %v2896_v24 = vpop.permute.xlu0 %2895 }
 0x935   : > { %v2935_v39 = vsel %vm2932_vm6, %v4658_v21, %v2896_v24  ;;  %v4898_v21 = vld [vmem:[#allocation5_spill] sm:$0xff] }
 0x936   : > { %2961 = vst [vmem:[#allocation1 + $0x2] ss:$4 sm:$0xff] %v2935_v39  ;;  %v3132_v39 = vld [vmem:[%s4848_s9 + $0x40] sm:$0xff] }
 0x937   : > { %3151 = vmatpush.msra.mxu1 %v3132_v39 }
 0x939   : > { %v2906_v15 = vpop.permute.xlu1 %2905 }
 0x93a   : > { %v2940_v52 = vsel %vm2932_vm6, %v2931_v48, %v2906_v15  ;;  %v3609_v48 = vpop.eup %3608 }
 0x93b   : > { %2971 = vst [vmem:[#allocation1 + $0x23] ss:$4 sm:$0xff] %v2940_v52  ;;  %v3031_v29 = vmul.f32 32.0, %v3609_v48  ;;  %vm3035_vm7 = vweird.f32 %v3609_v48 }
 0x93c   : > { %v2904_v35 = vpop.permute.xlu0 %2903 }
 0x93d   : > { %v2939_v37 = vsel %vm2932_vm6, %v4663_v7, %v2904_v35  ;;  %v2972_v26 = vld.sshfl [vmem:[#allocation1] sm:$0xff pattern:$0x73625140]  ;;  %v3032_v38 = vsub.f32 1.0, %v3031_v29  ;;  %v3131_v35 = vld [vmem:[%s4848_s9 + $0x38] sm:$0xff] }
 0x93e   : > { %2969 = vst [vmem:[#allocation1 + $0x22] ss:$4 sm:$0xff] %v2939_v37  ;;  %3443 = vmatmul.msk.f32.vlgmr.msrb.gmra.mxu3 %vm485_vm0, %v2972_v26  ;;  %3152 = vmatpush.msra.mxu1 %v3131_v35 }
 0x93f   : > { %3003 = vst [vmem:[#allocation1] ss:$4 sm:$0xff] %v4895_v6  ;;  %v3033_v12 = vmul.f32 %v3609_v48, %v3032_v38  ;;  %v3474_v6 = vld [vmem:[%s4844_s5] ss:$0 sm:$0xff] }
 0x940   : > { %3005 = vst [vmem:[#allocation1 + $0x1] ss:$4 sm:$0xff] %v4896_v0  ;;  %v3130_v0 = vld [vmem:[%s4848_s9 + $0x30] sm:$0xff] }
 0x941   : > { %3007 = vst [vmem:[#allocation1 + $0x2] ss:$4 sm:$0xff] %v4897_v40  ;;  %v3034_v59 = vadd.f32 %v3609_v48, %v3033_v12  ;;  %3153 = vmatpush.msra.mxu1 %v3130_v0 }
 0x942   : > { %3009 = vst [vmem:[#allocation1 + $0x3] ss:$4 sm:$0xff] %v4898_v21 }
 0x943   : > { %v4722_v16 = vsel %vm3035_vm7, %v3609_v48, %v3034_v59  ;;  %v3476_v48 = vld [vmem:[%s4847_s8] ss:$0 sm:$0xff] }
 0x945   : > { %v2973_v20 = vld.sshfl [vmem:[#allocation1 + $0x20] sm:$0xff pattern:$0x73625140] }
 0x946   : > { %3444 = vmatmul.msk.f32.gmra.mxu3 %vm485_vm0, %v2973_v20  ;;  %3011 = vst [vmem:[#allocation1 + $0x20] ss:$4 sm:$0xff] %v4899_v57  ;;  %v3475_v57 = vld [vmem:[%s4845_s6] ss:$0 sm:$0xff] }
 0x947   : > { %3013 = vst [vmem:[#allocation1 + $0x21] ss:$4 sm:$0xff] %v4900_v23  ;;  %v3129_v23 = vld [vmem:[%s4848_s9 + $0x28] sm:$0xff] }
 0x948   : > { %3015 = vst [vmem:[#allocation1 + $0x22] ss:$4 sm:$0xff] %v4901_v42  ;;  %3154 = vmatpush.msra.mxu1 %v3129_v23 }
 0x949   : > { %3017 = vst [vmem:[#allocation1 + $0x23] ss:$4 sm:$0xff] %v4902_v62  ;;  %v3018_v7 = vld.sshfl [vmem:[#allocation1] sm:$0xff pattern:$0x73625140] }
 0x950   : > { %v3019_v36 = vld.sshfl [vmem:[#allocation1 + $0x20] sm:$0xff pattern:$0x73625140] }
 0x9c1   : > { %v2995_v11 = vpop.f32.mrf.mxu3 }
 0x9c2   : > { %v2996_v14 = vadd.f32 %v3473_v49, %v2995_v11 }
 0x9c4   : > { %v3022_v54 = vadd.f32 %v3018_v7, %v2996_v14  ;;  %v3127_v14 = vld [vmem:[%s4848_s9 + $0x18] sm:$0xff] }
 0x9c6   : > { %v3024_v2 = vsel %vm485_vm0, %v3022_v54, 0.0 }
 0x9c7   : > { %3025 = vadd.xlane.f32.xlu2 %v3024_v2 }
 0x9c9   : > { %v2998_v41 = vpop.f32.mrf.mxu3 }
 0x9ca   : > { %v2999_v45 = vadd.f32 %v3473_v49, %v2998_v41  ;;  %v3128_v49 = vld [vmem:[%s4848_s9 + $0x20] sm:$0xff] }
 0x9cb   : > { %3155 = vmatpush.msra.mxu1 %v3128_v49 }
 0x9cc   : > { %v3023_v10 = vadd.f32 %v3019_v36, %v2999_v45 }
 0x9cd   : > { %3156 = vmatpush.msra.mxu1 %v3127_v14 }
 0x9ce   : > { %v3027_v47 = vsel %vm485_vm0, %v3023_v10, 0.0 }
 0x9cf   : > { %3028 = vadd.xlane.f32.xlu0 %v3027_v47  ;;  %v3125_v47 = vld [vmem:[%s4848_s9 + $0x8] sm:$0xff] }
 0xa3a   : > { %v3026_v8 = vpop.xlane.xlu2 %3025 }
 0xa3b   : > { %v3037_v51 = vmul.f32 %v4722_v16, %v3026_v8 }
 0xa3d   : > { %v3039_v9 = vsub.f32 %v3022_v54, %v3037_v51 }
 0xa3f   : > { %v3041_v22 = vmul.f32 %v3039_v9, %v3039_v9 }
 0xa41   : > { %v3043_v46 = vsel %vm485_vm0, %v3041_v22, 0.0 }
 0xa42   : > { %v3029_v17 = vpop.xlane.xlu0 %3028  ;;  %3044 = vadd.xlane.f32.xlu1 %v3043_v46 }
 0xa43   : > { %v3038_v34 = vmul.f32 %v4722_v16, %v3029_v17 }
 0xa45   : > { %v4727_v63 = vsub.f32 %v3023_v10, %v3038_v34  ;;  %v3126_v10 = vld [vmem:[%s4848_s9 + $0x10] sm:$0xff] }
 0xa46   : > { %3157 = vmatpush.msra.mxu1 %v3126_v10 }
 0xa47   : > { %v3042_v19 = vmul.f32 %v4727_v63, %v4727_v63 }
 0xa48   : > { %3158 = vmatpush.msra.mxu1 %v3125_v47 }
 0xa49   : > { %v3046_v33 = vsel %vm485_vm0, %v3042_v19, 0.0 }
 0xa4a   : > { %3047 = vadd.xlane.f32.xlu2 %v3046_v33  ;;  %3159 = vmatpush.msra.mxu1 %v3124_v43 }
 0xab5   : > { %v3045_v25 = vpop.xlane.xlu1 %3044 }
 0xab6   : > { %v3049_v4 = vmul.f32 %v3045_v25, %v4722_v16 }
 0xab8   : > { %v3051_v3 = vadd.f32 1e-05, %v3049_v4 }
 0xaba   : > { %3610 = vrsqrt.f32 %v3051_v3  ;;  %vm3059_vm9 = vweird.f32 %v3051_v3 }
 0xabd   : > { %v3048_v61 = vpop.xlane.xlu2 %3047 }
 0xabe   : > { %v3050_v58 = vmul.f32 %v3048_v61, %v4722_v16 }
 0xac0   : > { %v3611_v60 = vpop.eup %3610  ;;  %v3052_v50 = vadd.f32 1e-05, %v3050_v58 }
 0xac1   : > { %v3054_v44 = vmul.f32 %v3611_v60, %v3051_v3  ;;  %vm3060_vm8 = vweird.f32 %v3611_v60 }
 0xac2   : > { %3612 = vrsqrt.f32 %v3052_v50  ;;  %vm3061_vm10 = vmor %vm3059_vm9, %vm3060_vm8  ;;  %vm3069_vm12 = vweird.f32 %v3052_v50 }
 0xac3   : > { %v3055_v31 = vmul.f32 %v3611_v60, %v3054_v44 }
 0xac5   : > { %v3056_v24 = vmul.f32 0.5, %v3055_v31 }
 0xac7   : > { %v3057_v15 = vsub.f32 1.5, %v3056_v24 }
 0xac8   : > { %v3613_v52 = vpop.eup %3612 }
 0xac9   : > { %v3058_v37 = vmul.f32 %v3611_v60, %v3057_v15  ;;  %v3064_v26 = vmul.f32 %v3613_v52, %v3052_v50  ;;  %vm3070_vm11 = vweird.f32 %v3613_v52 }
 0xaca   : > { %vm3071_vm13 = vmor %vm3069_vm12, %vm3070_vm11 }
 0xacb   : > { %v3062_v40 = vsel %vm3061_vm10, %v3611_v60, %v3058_v37  ;;  %v3065_v21 = vmul.f32 %v3613_v52, %v3064_v26  ;;  %v3478_v37 = vld [vmem:[%s4850_s11] ss:$0 sm:$0xff] }
 0xacc   : > { %v3073_v20 = vmul.f32 %v3062_v40, %v3039_v9  ;;  %v3477_v9 = vld [vmem:[%s4849_s10] ss:$0 sm:$0xff] }
 0xacd   : > { %v3066_v42 = vmul.f32 0.5, %v3065_v21 }
 0xace   : > { %v3078_v62 = vmul.f32 %v3474_v6, %v3073_v20 }
 0xacf   : > { %v3067_v11 = vsub.f32 1.5, %v3066_v42 }
 0xad0   : > { %v3083_v7 = vadd.f32 %v3475_v57, %v3078_v62 }
 0xad1   : > { %v3068_v54 = vmul.f32 %v3613_v52, %v3067_v11 }
 0xad2   : > { %3445 = vmatmul.msk.f32.vlgmr.msrb.gmra.mxu0 %vm485_vm0, %v3083_v7 }
 0xad3   : > { %v3072_v2 = vsel %vm3071_vm13, %v3613_v52, %v3068_v54 }
 0xad4   : > { %v3074_v41 = vmul.f32 %v3072_v2, %v4727_v63 }
 0xad6   : > { %v3079_v36 = vmul.f32 %v3474_v6, %v3074_v41  ;;  %v3479_v6 = vld [vmem:[%s4851_s12] ss:$0 sm:$0xff] }
 0xad8   : > { %v3084_v45 = vadd.f32 %v3475_v57, %v3079_v36 }
 0xada   : > { %3446 = vmatmul.msk.f32.gmra.mxu0 %vm485_vm0, %v3084_v45 }
 0xb4f   : > { %v3116_v29 = vpop.f32.mrf.mxu0 }
 0xb50   : > { %v3117_v38 = vadd.f32 %v3476_v48, %v3116_v29 }
 0xb52   : > { %v3122_v12 = vmax.f32 %v3117_v38, 0.0 }
 0xb54   : > { %3160 = vmatmul.f32.vlgmr.msra.gmra.mxu1 %v3122_v12 }
 0xb57   : > { %v3119_v59 = vpop.f32.mrf.mxu0 }
 0xb58   : > { %v3120_v8 = vadd.f32 %v3476_v48, %v3119_v59 }
 0xb5a   : > { %v3123_v51 = vmax.f32 %v3120_v8, 0.0 }
 0xb5c   : > { %3163 = vmatmul.f32.gmra.mxu1 %v3123_v51 }
 0xbd1   : > { %v3161_v22 = vpop.f32.mrf.mxu1 }
 0xbd2   : > { %v3162_v46 = vadd.f32 %v3477_v9, %v3161_v22 }
 0xbd4   : > { %v3169_v17 = vadd.f32 %v3162_v46, %v3083_v7 }
 0xbd6   : > { %v3171_v34 = vsel %vm485_vm0, %v3169_v17, 0.0 }
 0xbd7   : > { %3172 = vadd.xlane.f32.xlu0 %v3171_v34 }
 0xbd9   : > { %v3164_v63 = vpop.f32.mrf.mxu1 }
 0xbda   : > { %v3165_v19 = vadd.f32 %v3477_v9, %v3164_v63 }
 0xbdc   : > { %v3170_v33 = vadd.f32 %v3165_v19, %v3084_v45 }
 0xbde   : > { %v3174_v56 = vsel %vm485_vm0, %v3170_v33, 0.0 }
 0xbdf   : > { %3175 = vadd.xlane.f32.xlu1 %v3174_v56 }
 0xc4a   : > { %v3173_v5 = vpop.xlane.xlu0 %3172 }
 0xc4b   : > { %v3177_v27 = vmul.f32 %v3173_v5, %v4722_v16 }
 0xc4d   : > { %v3179_v30 = vsub.f32 %v3169_v17, %v3177_v27 }
 0xc4f   : > { %v3181_v25 = vmul.f32 %v3179_v30, %v3179_v30 }
 0xc51   : > { %v3183_v4 = vsel %vm485_vm0, %v3181_v25, 0.0 }
 0xc52   : > { %3184 = vadd.xlane.f32.xlu2 %v3183_v4  ;;  %v3176_v3 = vpop.xlane.xlu1 %3175 }
 0xc53   : > { %v3178_v18 = vmul.f32 %v3176_v3, %v4722_v16 }
 0xc55   : > { %v3180_v53 = vsub.f32 %v3170_v33, %v3178_v18 }
 0xc57   : > { %v3182_v28 = vmul.f32 %v3180_v53, %v3180_v53 }
 0xc59   : > { %v3186_v61 = vsel %vm485_vm0, %v3182_v28, 0.0 }
 0xc5a   : > { %3187 = vadd.xlane.f32.xlu0 %v3186_v61 }
 0xcc5   : > { %v3185_v58 = vpop.xlane.xlu2 %3184 }
 0xcc6   : > { %v3189_v32 = vmul.f32 %v3185_v58, %v4722_v16 }
 0xcc8   : > { %v3191_v60 = vadd.f32 1e-05, %v3189_v32 }
 0xcca   : > { %3614 = vrsqrt.f32 %v3191_v60  ;;  %vm3199_vm15 = vweird.f32 %v3191_v60 }
 0xccd   : > { %v3188_v50 = vpop.xlane.xlu0 %3187 }
 0xcce   : > { %v3190_v55 = vmul.f32 %v3188_v50, %v4722_v16 }
 0xcd0   : > { %v3615_v44 = vpop.eup %3614  ;;  %v3192_v1 = vadd.f32 1e-05, %v3190_v55 }
 0xcd1   : > { %v3194_v31 = vmul.f32 %v3615_v44, %v3191_v60  ;;  %vm3200_vm14 = vweird.f32 %v3615_v44 }
 0xcd2   : > { %3616 = vrsqrt.f32 %v3192_v1  ;;  %vm3201_vm0 = vmor %vm3199_vm15, %vm3200_vm14  ;;  %vm3209_vm3 = vweird.f32 %v3192_v1 }
 0xcd3   : > { %v3195_v13 = vmul.f32 %v3615_v44, %v3194_v31 }
 0xcd5   : > { %v3196_v24 = vmul.f32 0.5, %v3195_v13 }
 0xcd7   : > { %v3197_v39 = vsub.f32 1.5, %v3196_v24 }
 0xcd8   : > { %v3617_v15 = vpop.eup %3616 }
 0xcd9   : > { %v3198_v52 = vmul.f32 %v3615_v44, %v3197_v39  ;;  %v3204_v35 = vmul.f32 %v3617_v15, %v3192_v1  ;;  %vm3210_vm2 = vweird.f32 %v3617_v15 }
 0xcda   : > { %vm3211_vm4 = vmor %vm3209_vm3, %vm3210_vm2 }
 0xcdb   : > { %v3202_v26 = vsel %vm3201_vm0, %v3615_v44, %v3198_v52  ;;  %v3205_v16 = vmul.f32 %v3617_v15, %v3204_v35 }
 0xcdc   : > { %v3213_v0 = vmul.f32 %v3202_v26, %v3179_v30 }
 0xcdd   : > { %v3206_v40 = vmul.f32 0.5, %v3205_v16 }
 0xcde   : > { %v3218_v21 = vmul.f32 %v3478_v37, %v3213_v0 }
 0xcdf   : > { %v3207_v20 = vsub.f32 1.5, %v3206_v40 }
 0xce0   : > { %v3223_v57 = vadd.f32 %v3479_v6, %v3218_v21 }
 0xce1   : > { %v3208_v23 = vmul.f32 %v3617_v15, %v3207_v20 }
 0xce2   : > { %v3227_v42 = vrot.slane %v3223_v57, 2  ;;  %v3228_v62 = vrot.slane %v3223_v57, 4  ;;  %v3229_v49 = vrot.slane %v3223_v57, 6  ;;  %3240 = vst.msk [vmem:[%s442_s18] sm:$0x3] %vm3239_vm1, %v3223_v57 }
 0xce3   : > { %v3212_v11 = vsel %vm3211_vm4, %v3617_v15, %v3208_v23 }
 0xce4   : > { %3241 = vst.msk [vmem:[%s442_s18 + $0x2] sm:$0x3] %vm3239_vm1, %v3227_v42  ;;  %v3214_v7 = vmul.f32 %v3212_v11, %v3180_v53 }
 0xce5   : > { %3242 = vst.msk [vmem:[%s442_s18 + $0x4] sm:$0x3] %vm3239_vm1, %v3228_v62 }
 0xce6   : > { %3243 = vst.msk [vmem:[%s442_s18 + $0x6] sm:$0x3] %vm3239_vm1, %v3229_v49  ;;  %v3219_v14 = vmul.f32 %v3478_v37, %v3214_v7 }
 0xce8   : > { %v3224_v54 = vadd.f32 %v3479_v6, %v3219_v14 }
 0xcea   : > { %v3230_v2 = vrot.slane %v3224_v54, 2  ;;  %v3231_v41 = vrot.slane %v3224_v54, 4  ;;  %v3232_v36 = vrot.slane %v3224_v54, 6  ;;  %3244 = vst.msk [vmem:[%s442_s18 + $0x8] sm:$0x3] %vm3239_vm1, %v3224_v54 }
 0xcec   : > { %3245 = vst.msk [vmem:[%s442_s18 + $0xa] sm:$0x3] %vm3239_vm1, %v3230_v2 }
 0xced   : > { %3246 = vst.msk [vmem:[%s442_s18 + $0xc] sm:$0x3] %vm3239_vm1, %v3231_v41 }
 0xcee   : > { %3247 = vst.msk [vmem:[%s442_s18 + $0xe] sm:$0x3] %vm3239_vm1, %v3232_v36 }
 0xcef PF: > { %s23_s25 = sadd.s32 1, %s3624_s25  }
 0xcf0   : > { %p20_p4 = scmp.ge.s32.totalorder %s23_s25, 4  }
 0xcf2   :  { %22 = sbr.rel (!%p20_p4) target bundleno = 1 (0x1), region = 123 }

// kernel: detr_forward.11
= control target key start
LH: loop header
LB: loop body
LE: loop exit
PB: predicated region body
PF: predicated region fallthrough
CT: control target
= control target key end

     0   :  { %vm26_vm0 = vcmask 261120   ;;  %vm68_vm1 = vcmask 130048   ;;  %s153_s1 = inlined_call_operand.vmem [shape: f32[32,16], index: 1, kind: input, shape index: {}]   ;;  %s154_s2 = inlined_call_operand.vmem [shape: f32[1,16], index: 2, kind: input, shape index: {}]   ;;  %s155_s0 = inlined_call_operand.vmem [shape: f32[32,32], index: 0, kind: input, shape index: {}]   ;;  %s156_s3 = inlined_call_operand.vmem [shape: f32[32,16], index: 3, kind: output, shape index: {}]  }
   0x1   :  { %v21_v0 = vld [vmem:[%s153_s1 + $0x18] sm:$0xff]  ;;  %v20_v1 = vld [vmem:[%s153_s1 + $0x10] sm:$0xff]  ;;  %v19_v2 = vld [vmem:[%s153_s1 + $0x8] sm:$0xff] }
   0x2   :  { %82 = vmatpush.msra.mxu2 %v21_v0  ;;  %83 = vmatpush.msra.mxu3 %v21_v0  ;;  %v18_v3 = vld [vmem:[%s153_s1] sm:$0xff]  ;;  %v16_v4 = vld [vmem:[%s155_s0 + $0x10] sm:$0xff]  ;;  %v17_v5 = vld [vmem:[%s155_s0 + $0x18] sm:$0xff] }
   0x3   :  { %51 = vmatpush.msra.mxu0 %v21_v0  ;;  %81 = vmatpush.msra.mxu1 %v21_v0  ;;  %v14_v6 = vld [vmem:[%s155_s0] sm:$0xff]  ;;  %v15_v7 = vld [vmem:[%s155_s0 + $0x8] sm:$0xff] }
   0x4   :  { %85 = vmatpush.msra.mxu2 %v20_v1  ;;  %86 = vmatpush.msra.mxu3 %v20_v1  ;;  %v93_v8 = vld [vmem:[%s154_s2] ss:$0 sm:$0xff] }
   0x5   :  { %52 = vmatpush.msra.mxu0 %v20_v1  ;;  %84 = vmatpush.msra.mxu1 %v20_v1 }
   0x6   :  { %88 = vmatpush.msra.mxu2 %v19_v2  ;;  %89 = vmatpush.msra.mxu3 %v19_v2 }
   0x7   :  { %53 = vmatpush.msra.mxu0 %v19_v2  ;;  %87 = vmatpush.msra.mxu1 %v19_v2 }
   0x8   :  { %91 = vmatpush.msra.mxu2 %v18_v3  ;;  %92 = vmatpush.msra.mxu3 %v18_v3 }
   0x9   :  { %79 = vmatmul.msk.f32.vlgmr.msra.gmra.mxu2 %vm26_vm0, %v16_v4  ;;  %80 = vmatmul.msk.f32.vlgmr.msra.gmra.mxu3 %vm26_vm0, %v17_v5 }
   0xa   :  { %54 = vmatpush.msra.mxu0 %v18_v3  ;;  %90 = vmatpush.msra.mxu1 %v18_v3 }
   0xb   :  { %77 = vmatmul.msk.f32.vlgmr.msra.gmra.mxu0 %vm26_vm0, %v14_v6  ;;  %78 = vmatmul.msk.f32.vlgmr.msra.gmra.mxu1 %vm26_vm0, %v15_v7 }
  0x88   :  { %v56_v9 = vpop.f32.mrf.mxu0  ;;  %v59_v10 = vpop.f32.mrf.mxu1 }
  0x89   :  { %v57_v11 = vadd.f32 %v93_v8, %v56_v9  ;;  %v60_v12 = vadd.f32 %v93_v8, %v59_v10 }
  0x8b   :  { %69 = vst.msk [vmem:[%s156_s3] sm:$0xff] %vm68_vm1, %v57_v11 }
  0x8c   :  { %70 = vst.msk [vmem:[%s156_s3 + $0x8] sm:$0xff] %vm68_vm1, %v60_v12  ;;  %v62_v13 = vpop.f32.mrf.mxu2  ;;  %v65_v14 = vpop.f32.mrf.mxu3 }
  0x8d   :  { %v63_v15 = vadd.f32 %v93_v8, %v62_v13  ;;  %v66_v16 = vadd.f32 %v93_v8, %v65_v14 }
  0x8f   :  { %71 = vst.msk [vmem:[%s156_s3 + $0x10] sm:$0xff] %vm68_vm1, %v63_v15 }
  0x90   :  { %72 = vst.msk [vmem:[%s156_s3 + $0x18] sm:$0xff] %vm68_vm1, %v66_v16 }

</bundles_post_ra>
